<compile_context>
chip_gen: v7x
topology: tpu7x:2x2x1
jax: 0.10.0
libtpu: 0.0.40
codegen_flags: <defaults>
</compile_context>

<pallas_src>
import functools

import jax
import jax.numpy as jnp
import numpy as np
from jax import lax
from jax.experimental import pallas as pl
from jax.experimental.pallas import tpu as pltpu

RGB_MAX = 1.0
C_IN = 3          # per-image channels (assert im1.size()[1] == 3)
C_CAT = 2 * C_IN  # concatenated (im1, im2) channels
C_FLOW = 2        # flow channels
KH = KW = 3       # synthetic conv kernel size
N_W = C_FLOW * C_CAT * KH * KW          # 108 conv weights
N_PARAMS = N_W + C_FLOW                 # + 2 biases
SHIFTS = (-1, 0, 1)


def _shift2d(x, s, axis, valid_mask):
    """shifted[..., i, ...] = x[..., i+s, ...] along `axis`; zero where i+s is OOB.

    Implements the zero "same" padding of the 3x3 conv with an XLU rotate plus a
    VPU select instead of a padded VMEM scratch buffer.
    """
    if s == 0:
        return x
    n = x.shape[axis]
    # np.roll convention: rolled[i] = x[(i - shift) % n]; with shift = (-s) % n
    # this gives rolled[i] = x[(i + s) % n].
    rolled = pltpu.roll(x, shift=(-s) % n, axis=axis)
    return jnp.where(valid_mask, rolled, 0.0)


def _flow_kernel(w_ref, im1_ref, im2_ref, flow_ref, conf_ref, *, H, W):
    """Per-batch kernel: rgb-mean normalize -> 3x3 conv -> flow; conf = exp(-||flow||^2)."""
    # Border-validity masks, hoisted once (shared by every channel / tap).
    row_ids = lax.broadcasted_iota(jnp.int32, (H, W), 0)
    col_ids = lax.broadcasted_iota(jnp.int32, (H, W), 1)
    row_ok = {-1: row_ids >= 1, 0: None, 1: row_ids < H - 1}
    col_ok = {-1: col_ids >= 1, 0: None, 1: col_ids < W - 1}

    acc0 = jnp.zeros((H, W), jnp.float32)
    acc1 = jnp.zeros((H, W), jnp.float32)

    for c in range(C_IN):
        # Stream one channel of each frame at a time (bf16 transport -> f32 math).
        a = im1_ref[0, c, :, :].astype(jnp.float32)    # (H, W)
        b = im2_ref[0, c, :, :].astype(jnp.float32)    # (H, W)
        # FlowNet2 preprocessing: per-channel mean over both frames and all pixels.
        mean_c = 0.5 * (jnp.mean(a, keepdims=True) + jnp.mean(b, keepdims=True))
        for frame, img in enumerate((a, b)):
            x = img - mean_c
            if RGB_MAX != 1.0:                         # rgb_max == 1.0 -> folded away
                x = x * (1.0 / RGB_MAX)
            ic = frame * C_IN + c                      # channel index in (im1, im2) stack
            # Vertical (sublane) shifted copies once, then horizontal (lane) shifts.
            xv = {sy: _shift2d(x, sy, 0, row_ok[sy]) for sy in SHIFTS}
            for sy in SHIFTS:
                for sx in SHIFTS:
                    patch = _shift2d(xv[sy], sx, 1, col_ok[sx])
                    dy, dx = sy + 1, sx + 1
                    k0 = ((0 * C_CAT + ic) * KH + dy) * KW + dx
                    k1 = ((1 * C_CAT + ic) * KH + dy) * KW + dx
                    acc0 = acc0 + w_ref[k0] * patch
                    acc1 = acc1 + w_ref[k1] * patch

    acc0 = acc0 + w_ref[N_W + 0]                       # biases
    acc1 = acc1 + w_ref[N_W + 1]
    flow_ref[0, 0, :, :] = acc0
    flow_ref[0, 1, :, :] = acc1
    # conf = exp(-norm(flow)), norm(t) = sum(t*t, dim=1, keepdim=True)
    conf_ref[0, 0, :, :] = jnp.exp(-(acc0 * acc0 + acc1 * acc1))


def _compute_flow_and_conf(im1, im2, params):
    B, C, H, W = im1.shape
    assert C == 3
    assert im1.shape == im2.shape
    # TODO(synk): bilinear resize path (old_h != old_h//64*64) of compute_flow_and_conf
    # is not implemented; require spatial dims already multiples of 64.
    assert H % 64 == 0 and W % 64 == 0

    # bf16 transport only — all in-kernel arithmetic stays f32 (v5e has no bf16 VALU).
    im1_bf = im1.astype(jnp.bfloat16)
    im2_bf = im2.astype(jnp.bfloat16)

    kernel = functools.partial(_flow_kernel, H=H, W=W)

    # TODO(synk): at large H,W (~1k+) full-image blocks exceed v7x's 64 MiB VMEM;
    # a row-tiled grid (B, H//TH) with a 1-row halo would be needed there.
    flow, conf = pl.pallas_call(
        kernel,
        out_shape=(
            jax.ShapeDtypeStruct((B, C_FLOW, H, W), jnp.float32),
            jax.ShapeDtypeStruct((B, 1, H, W), jnp.float32),
        ),
        grid_spec=pltpu.PrefetchScalarGridSpec(
            num_scalar_prefetch=0,
            grid=(B,),
            in_specs=[
                pl.BlockSpec(memory_space=pltpu.SMEM),                    # params (110,)
                pl.BlockSpec((1, C_IN, H, W), lambda b: (b, 0, 0, 0)),    # im1 (bf16)
                pl.BlockSpec((1, C_IN, H, W), lambda b: (b, 0, 0, 0)),    # im2 (bf16)
            ],
            out_specs=[
                pl.BlockSpec((1, C_FLOW, H, W), lambda b: (b, 0, 0, 0)),  # flow
                pl.BlockSpec((1, 1, H, W), lambda b: (b, 0, 0, 0)),       # conf
            ],
        ),
        compiler_params=pltpu.CompilerParams(
            dimension_semantics=("parallel",),       # v7x: shard batch over both TCs
            vmem_limit_bytes=64 * 1024 * 1024,       # above 16/32 MiB scoped defaults
        ),
    )(params, im1_bf, im2_bf)
    return flow, conf


def flownet_forward(input_A, input_B, params):
    """Mirrors FlowNet.forward for 4D/5D/6D inputs (NCHW innermost)."""
    size = input_A.shape
    assert len(size) in (4, 5, 6)
    if len(size) >= 5:
        c, h, w = size[-3], size[-2], size[-1]
        a = input_A.reshape(-1, c, h, w)
        b = input_B.reshape(-1, c, h, w)
        flow, conf = _compute_flow_and_conf(a, b, params)
        lead = size[:-3]
        return (flow.reshape(*lead, 2, h, w), conf.reshape(*lead, 1, h, w))
    return _compute_flow_and_conf(input_A, input_B, params)


def _reference_forward(a, b, w_flat):
    """Pure-JAX reference of the stand-in network (same bf16 input transport)."""
    a = a.astype(jnp.bfloat16).astype(jnp.float32)
    b = b.astype(jnp.bfloat16).astype(jnp.float32)
    w = w_flat[:N_W].reshape(C_FLOW, C_CAT, KH, KW)
    bias = w_flat[N_W:]
    mean = 0.5 * (a.mean(axis=(2, 3), keepdims=True) + b.mean(axis=(2, 3), keepdims=True))
    x = jnp.concatenate([a - mean, b - mean], axis=1) / RGB_MAX
    flow = lax.conv_general_dilated(
        x, w, window_strides=(1, 1), padding="SAME",
        dimension_numbers=("NCHW", "OIHW", "NCHW"),
        precision=lax.Precision.HIGHEST,
    ) + bias[None, :, None, None]
    conf = jnp.exp(-jnp.sum(flow * flow, axis=1, keepdims=True))
    return flow, conf


if __name__ == "__main__":
    # Deterministic parameter init (synthetic stand-in for the pretrained checkpoint).
    pkey = jax.random.PRNGKey(42)
    params = (jax.random.normal(pkey, (N_PARAMS,), dtype=jnp.float32)
              * (1.0 / np.sqrt(C_CAT * KH * KW)))

    # Small example inputs: batch=2, channels=3, spatial=64 (multiple of 64 -> no resize).
    key = jax.random.PRNGKey(0)
    kA, kB = jax.random.split(key)
    input_A = jax.random.uniform(kA, (2, 3, 64, 64), dtype=jnp.float32)
    input_B = jax.random.uniform(kB, (2, 3, 64, 64), dtype=jnp.float32)

    flow, conf = flownet_forward(input_A, input_B, params)
    jax.block_until_ready((flow, conf))

    assert flow.shape == (2, 2, 64, 64) and conf.shape == (2, 1, 64, 64)

    ref_flow, ref_conf = _reference_forward(input_A, input_B, params)
    np.testing.assert_allclose(np.asarray(flow), np.asarray(ref_flow), rtol=1e-4, atol=1e-4)
    np.testing.assert_allclose(np.asarray(conf), np.asarray(ref_conf), rtol=1e-4, atol=1e-4)

    print("KERNEL_OK")
</pallas_src>

<mosaic_0001>
module attributes {stable_mosaic.version = 11 : i64} {
  func.func @_flow_kernel(%arg0: i32, %arg1: memref<110xf32, #tpu.memory_space<smem>>, %arg2: memref<1x3x64x64xbf16, #tpu.memory_space<vmem>>, %arg3: memref<1x3x64x64xbf16, #tpu.memory_space<vmem>>, %arg4: memref<1x2x64x64xf32, #tpu.memory_space<vmem>>, %arg5: memref<1x1x64x64xf32, #tpu.memory_space<vmem>>) attributes {dimension_semantics = [#tpu.dimension_semantics<parallel>], iteration_bounds = array<i64: 2>, scalar_prefetch = 0 : i64, scratch_operands = 0 : i64, tpu.core_type = #tpu.core_type<tc>, window_params = [{transform_indices = @transform_0, window_bounds = array<i64: 110>}, {transform_indices = @transform_1, window_bounds = array<i64: 1, 3, 64, 64>}, {transform_indices = @transform_2, window_bounds = array<i64: 1, 3, 64, 64>}, {transform_indices = @transform_3, window_bounds = array<i64: 1, 2, 64, 64>}, {transform_indices = @transform_4, window_bounds = array<i64: 1, 1, 64, 64>}]} {
    %0 = tpu.iota {dimensions = array<i32: 0>} : vector<64x64xi32>
    %1 = tpu.iota {dimensions = array<i32: 1>} : vector<64x64xi32>
    %c1_i32 = arith.constant 1 : i32
    %2 = vector.broadcast %c1_i32 : i32 to vector<64x64xi32>
    %3 = arith.cmpi sge, %0, %2 : vector<64x64xi32>
    %c63_i32 = arith.constant 63 : i32
    %4 = vector.broadcast %c63_i32 : i32 to vector<64x64xi32>
    %5 = arith.cmpi slt, %0, %4 : vector<64x64xi32>
    %c1_i32_0 = arith.constant 1 : i32
    %6 = vector.broadcast %c1_i32_0 : i32 to vector<64x64xi32>
    %7 = arith.cmpi sge, %1, %6 : vector<64x64xi32>
    %c63_i32_1 = arith.constant 63 : i32
    %8 = vector.broadcast %c63_i32_1 : i32 to vector<64x64xi32>
    %9 = arith.cmpi slt, %1, %8 : vector<64x64xi32>
    %cst = arith.constant 0.000000e+00 : f32
    %10 = vector.broadcast %cst : f32 to vector<64x64xf32>
    %cst_2 = arith.constant 0.000000e+00 : f32
    %11 = vector.broadcast %cst_2 : f32 to vector<64x64xf32>
    %c0 = arith.constant 0 : index
    %c0_3 = arith.constant 0 : index
    %c0_4 = arith.constant 0 : index
    %c0_5 = arith.constant 0 : index
    %12 = vector.load %arg2[%c0, %c0_3, %c0_4, %c0_5] : memref<1x3x64x64xbf16, #tpu.memory_space<vmem>>, vector<1x1x64x64xbf16>
    %13 = vector.shape_cast %12 : vector<1x1x64x64xbf16> to vector<64x64xbf16>
    %14 = arith.extf %13 : vector<64x64xbf16> to vector<64x64xf32>
    %c0_6 = arith.constant 0 : index
    %c0_7 = arith.constant 0 : index
    %c0_8 = arith.constant 0 : index
    %c0_9 = arith.constant 0 : index
    %15 = vector.load %arg3[%c0_6, %c0_7, %c0_8, %c0_9] : memref<1x3x64x64xbf16, #tpu.memory_space<vmem>>, vector<1x1x64x64xbf16>
    %16 = vector.shape_cast %15 : vector<1x1x64x64xbf16> to vector<64x64xbf16>
    %17 = arith.extf %16 : vector<64x64xbf16> to vector<64x64xf32>
    %18 = vector.shape_cast %14 : vector<64x64xf32> to vector<1x64x64xf32>
    %cst_10 = arith.constant dense<0.000000e+00> : vector<1xf32>
    %19 = vector.multi_reduction <add>, %18, %cst_10 [1, 2] : vector<1x64x64xf32> to vector<1xf32>
    %20 = vector.shape_cast %19 : vector<1xf32> to vector<1x1x1xf32>
    %21 = vector.extract %20[0, 0, 0] : f32 from vector<1x1x1xf32>
    %22 = vector.broadcast %21 : f32 to vector<1x1xf32>
    %cst_11 = arith.constant 4.096000e+03 : f32
    %23 = vector.broadcast %cst_11 : f32 to vector<1x1xf32>
    %24 = arith.divf %22, %23 : vector<1x1xf32>
    %25 = vector.shape_cast %17 : vector<64x64xf32> to vector<1x64x64xf32>
    %cst_12 = arith.constant dense<0.000000e+00> : vector<1xf32>
    %26 = vector.multi_reduction <add>, %25, %cst_12 [1, 2] : vector<1x64x64xf32> to vector<1xf32>
    %27 = vector.shape_cast %26 : vector<1xf32> to vector<1x1x1xf32>
    %28 = vector.extract %27[0, 0, 0] : f32 from vector<1x1x1xf32>
    %29 = vector.broadcast %28 : f32 to vector<1x1xf32>
    %cst_13 = arith.constant 4.096000e+03 : f32
    %30 = vector.broadcast %cst_13 : f32 to vector<1x1xf32>
    %31 = arith.divf %29, %30 : vector<1x1xf32>
    %32 = arith.addf %24, %31 : vector<1x1xf32>
    %cst_14 = arith.constant 5.000000e-01 : f32
    %33 = vector.broadcast %cst_14 : f32 to vector<1x1xf32>
    %34 = arith.mulf %33, %32 : vector<1x1xf32>
    %35 = vector.broadcast %34 : vector<1x1xf32> to vector<64x64xf32>
    %36 = arith.subf %14, %35 : vector<64x64xf32>
    %c1_i32_15 = arith.constant 1 : i32
    %37 = tpu.dynamic_rotate %36 by %c1_i32_15 dim 0 : vector<64x64xf32>, i32 -> vector<64x64xf32>
    %cst_16 = arith.constant 0.000000e+00 : f32
    %38 = vector.broadcast %cst_16 : f32 to vector<64x64xf32>
    %39 = arith.select %3, %37, %38 : vector<64x64xi1>, vector<64x64xf32>
    %c63_i32_17 = arith.constant 63 : i32
    %40 = tpu.dynamic_rotate %36 by %c63_i32_17 dim 0 : vector<64x64xf32>, i32 -> vector<64x64xf32>
    %cst_18 = arith.constant 0.000000e+00 : f32
    %41 = vector.broadcast %cst_18 : f32 to vector<64x64xf32>
    %42 = arith.select %5, %40, %41 : vector<64x64xi1>, vector<64x64xf32>
    %c1_i32_19 = arith.constant 1 : i32
    %43 = tpu.dynamic_rotate %39 by %c1_i32_19 dim 1 : vector<64x64xf32>, i32 -> vector<64x64xf32>
    %cst_20 = arith.constant 0.000000e+00 : f32
    %44 = vector.broadcast %cst_20 : f32 to vector<64x64xf32>
    %45 = arith.select %7, %43, %44 : vector<64x64xi1>, vector<64x64xf32>
    %c0_21 = arith.constant 0 : index
    %46 = memref.load %arg1[%c0_21] : memref<110xf32, #tpu.memory_space<smem>>
    %47 = vector.broadcast %46 : f32 to vector<64x64xf32>
    %48 = arith.mulf %47, %45 : vector<64x64xf32>
    %49 = arith.addf %10, %48 : vector<64x64xf32>
    %c54 = arith.constant 54 : index
    %50 = memref.load %arg1[%c54] : memref<110xf32, #tpu.memory_space<smem>>
    %51 = vector.broadcast %50 : f32 to vector<64x64xf32>
    %52 = arith.mulf %51, %45 : vector<64x64xf32>
    %53 = arith.addf %11, %52 : vector<64x64xf32>
    %c1 = arith.constant 1 : index
    %54 = memref.load %arg1[%c1] : memref<110xf32, #tpu.memory_space<smem>>
    %55 = vector.broadcast %54 : f32 to vector<64x64xf32>
    %56 = arith.mulf %55, %39 : vector<64x64xf32>
    %57 = arith.addf %49, %56 : vector<64x64xf32>
    %c55 = arith.constant 55 : index
    %58 = memref.load %arg1[%c55] : memref<110xf32, #tpu.memory_space<smem>>
    %59 = vector.broadcast %58 : f32 to vector<64x64xf32>
    %60 = arith.mulf %59, %39 : vector<64x64xf32>
    %61 = arith.addf %53, %60 : vector<64x64xf32>
    %c63_i32_22 = arith.constant 63 : i32
    %62 = tpu.dynamic_rotate %39 by %c63_i32_22 dim 1 : vector<64x64xf32>, i32 -> vector<64x64xf32>
    %cst_23 = arith.constant 0.000000e+00 : f32
    %63 = vector.broadcast %cst_23 : f32 to vector<64x64xf32>
    %64 = arith.select %9, %62, %63 : vector<64x64xi1>, vector<64x64xf32>
    %c2 = arith.constant 2 : index
    %65 = memref.load %arg1[%c2] : memref<110xf32, #tpu.memory_space<smem>>
    %66 = vector.broadcast %65 : f32 to vector<64x64xf32>
    %67 = arith.mulf %66, %64 : vector<64x64xf32>
    %68 = arith.addf %57, %67 : vector<64x64xf32>
    %c56 = arith.constant 56 : index
    %69 = memref.load %arg1[%c56] : memref<110xf32, #tpu.memory_space<smem>>
    %70 = vector.broadcast %69 : f32 to vector<64x64xf32>
    %71 = arith.mulf %70, %64 : vector<64x64xf32>
    %72 = arith.addf %61, %71 : vector<64x64xf32>
    %c1_i32_24 = arith.constant 1 : i32
    %73 = tpu.dynamic_rotate %36 by %c1_i32_24 dim 1 : vector<64x64xf32>, i32 -> vector<64x64xf32>
    %cst_25 = arith.constant 0.000000e+00 : f32
    %74 = vector.broadcast %cst_25 : f32 to vector<64x64xf32>
    %75 = arith.select %7, %73, %74 : vector<64x64xi1>, vector<64x64xf32>
    %c3 = arith.constant 3 : index
    %76 = memref.load %arg1[%c3] : memref<110xf32, #tpu.memory_space<smem>>
    %77 = vector.broadcast %76 : f32 to vector<64x64xf32>
    %78 = arith.mulf %77, %75 : vector<64x64xf32>
    %79 = arith.addf %68, %78 : vector<64x64xf32>
    %c57 = arith.constant 57 : index
    %80 = memref.load %arg1[%c57] : memref<110xf32, #tpu.memory_space<smem>>
    %81 = vector.broadcast %80 : f32 to vector<64x64xf32>
    %82 = arith.mulf %81, %75 : vector<64x64xf32>
    %83 = arith.addf %72, %82 : vector<64x64xf32>
    %c4 = arith.constant 4 : index
    %84 = memref.load %arg1[%c4] : memref<110xf32, #tpu.memory_space<smem>>
    %85 = vector.broadcast %84 : f32 to vector<64x64xf32>
    %86 = arith.mulf %85, %36 : vector<64x64xf32>
    %87 = arith.addf %79, %86 : vector<64x64xf32>
    %c58 = arith.constant 58 : index
    %88 = memref.load %arg1[%c58] : memref<110xf32, #tpu.memory_space<smem>>
    %89 = vector.broadcast %88 : f32 to vector<64x64xf32>
    %90 = arith.mulf %89, %36 : vector<64x64xf32>
    %91 = arith.addf %83, %90 : vector<64x64xf32>
    %c63_i32_26 = arith.constant 63 : i32
    %92 = tpu.dynamic_rotate %36 by %c63_i32_26 dim 1 : vector<64x64xf32>, i32 -> vector<64x64xf32>
    %cst_27 = arith.constant 0.000000e+00 : f32
    %93 = vector.broadcast %cst_27 : f32 to vector<64x64xf32>
    %94 = arith.select %9, %92, %93 : vector<64x64xi1>, vector<64x64xf32>
    %c5 = arith.constant 5 : index
    %95 = memref.load %arg1[%c5] : memref<110xf32, #tpu.memory_space<smem>>
    %96 = vector.broadcast %95 : f32 to vector<64x64xf32>
    %97 = arith.mulf %96, %94 : vector<64x64xf32>
    %98 = arith.addf %87, %97 : vector<64x64xf32>
    %c59 = arith.constant 59 : index
    %99 = memref.load %arg1[%c59] : memref<110xf32, #tpu.memory_space<smem>>
    %100 = vector.broadcast %99 : f32 to vector<64x64xf32>
    %101 = arith.mulf %100, %94 : vector<64x64xf32>
    %102 = arith.addf %91, %101 : vector<64x64xf32>
    %c1_i32_28 = arith.constant 1 : i32
    %103 = tpu.dynamic_rotate %42 by %c1_i32_28 dim 1 : vector<64x64xf32>, i32 -> vector<64x64xf32>
    %cst_29 = arith.constant 0.000000e+00 : f32
    %104 = vector.broadcast %cst_29 : f32 to vector<64x64xf32>
    %105 = arith.select %7, %103, %104 : vector<64x64xi1>, vector<64x64xf32>
    %c6 = arith.constant 6 : index
    %106 = memref.load %arg1[%c6] : memref<110xf32, #tpu.memory_space<smem>>
    %107 = vector.broadcast %106 : f32 to vector<64x64xf32>
    %108 = arith.mulf %107, %105 : vector<64x64xf32>
    %109 = arith.addf %98, %108 : vector<64x64xf32>
    %c60 = arith.constant 60 : index
    %110 = memref.load %arg1[%c60] : memref<110xf32, #tpu.memory_space<smem>>
    %111 = vector.broadcast %110 : f32 to vector<64x64xf32>
    %112 = arith.mulf %111, %105 : vector<64x64xf32>
    %113 = arith.addf %102, %112 : vector<64x64xf32>
    %c7 = arith.constant 7 : index
    %114 = memref.load %arg1[%c7] : memref<110xf32, #tpu.memory_space<smem>>
    %115 = vector.broadcast %114 : f32 to vector<64x64xf32>
    %116 = arith.mulf %115, %42 : vector<64x64xf32>
    %117 = arith.addf %109, %116 : vector<64x64xf32>
    %c61 = arith.constant 61 : index
    %118 = memref.load %arg1[%c61] : memref<110xf32, #tpu.memory_space<smem>>
    %119 = vector.broadcast %118 : f32 to vector<64x64xf32>
    %120 = arith.mulf %119, %42 : vector<64x64xf32>
    %121 = arith.addf %113, %120 : vector<64x64xf32>
    %c63_i32_30 = arith.constant 63 : i32
    %122 = tpu.dynamic_rotate %42 by %c63_i32_30 dim 1 : vector<64x64xf32>, i32 -> vector<64x64xf32>
    %cst_31 = arith.constant 0.000000e+00 : f32
    %123 = vector.broadcast %cst_31 : f32 to vector<64x64xf32>
    %124 = arith.select %9, %122, %123 : vector<64x64xi1>, vector<64x64xf32>
    %c8 = arith.constant 8 : index
    %125 = memref.load %arg1[%c8] : memref<110xf32, #tpu.memory_space<smem>>
    %126 = vector.broadcast %125 : f32 to vector<64x64xf32>
    %127 = arith.mulf %126, %124 : vector<64x64xf32>
    %128 = arith.addf %117, %127 : vector<64x64xf32>
    %c62 = arith.constant 62 : index
    %129 = memref.load %arg1[%c62] : memref<110xf32, #tpu.memory_space<smem>>
    %130 = vector.broadcast %129 : f32 to vector<64x64xf32>
    %131 = arith.mulf %130, %124 : vector<64x64xf32>
    %132 = arith.addf %121, %131 : vector<64x64xf32>
    %133 = vector.broadcast %34 : vector<1x1xf32> to vector<64x64xf32>
    %134 = arith.subf %17, %133 : vector<64x64xf32>
    %c1_i32_32 = arith.constant 1 : i32
    %135 = tpu.dynamic_rotate %134 by %c1_i32_32 dim 0 : vector<64x64xf32>, i32 -> vector<64x64xf32>
    %cst_33 = arith.constant 0.000000e+00 : f32
    %136 = vector.broadcast %cst_33 : f32 to vector<64x64xf32>
    %137 = arith.select %3, %135, %136 : vector<64x64xi1>, vector<64x64xf32>
    %c63_i32_34 = arith.constant 63 : i32
    %138 = tpu.dynamic_rotate %134 by %c63_i32_34 dim 0 : vector<64x64xf32>, i32 -> vector<64x64xf32>
    %cst_35 = arith.constant 0.000000e+00 : f32
    %139 = vector.broadcast %cst_35 : f32 to vector<64x64xf32>
    %140 = arith.select %5, %138, %139 : vector<64x64xi1>, vector<64x64xf32>
    %c1_i32_36 = arith.constant 1 : i32
    %141 = tpu.dynamic_rotate %137 by %c1_i32_36 dim 1 : vector<64x64xf32>, i32 -> vector<64x64xf32>
    %cst_37 = arith.constant 0.000000e+00 : f32
    %142 = vector.broadcast %cst_37 : f32 to vector<64x64xf32>
    %143 = arith.select %7, %141, %142 : vector<64x64xi1>, vector<64x64xf32>
    %c27 = arith.constant 27 : index
    %144 = memref.load %arg1[%c27] : memref<110xf32, #tpu.memory_space<smem>>
    %145 = vector.broadcast %144 : f32 to vector<64x64xf32>
    %146 = arith.mulf %145, %143 : vector<64x64xf32>
    %147 = arith.addf %128, %146 : vector<64x64xf32>
    %c81 = arith.constant 81 : index
    %148 = memref.load %arg1[%c81] : memref<110xf32, #tpu.memory_space<smem>>
    %149 = vector.broadcast %148 : f32 to vector<64x64xf32>
    %150 = arith.mulf %149, %143 : vector<64x64xf32>
    %151 = arith.addf %132, %150 : vector<64x64xf32>
    %c28 = arith.constant 28 : index
    %152 = memref.load %arg1[%c28] : memref<110xf32, #tpu.memory_space<smem>>
    %153 = vector.broadcast %152 : f32 to vector<64x64xf32>
    %154 = arith.mulf %153, %137 : vector<64x64xf32>
    %155 = arith.addf %147, %154 : vector<64x64xf32>
    %c82 = arith.constant 82 : index
    %156 = memref.load %arg1[%c82] : memref<110xf32, #tpu.memory_space<smem>>
    %157 = vector.broadcast %156 : f32 to vector<64x64xf32>
    %158 = arith.mulf %157, %137 : vector<64x64xf32>
    %159 = arith.addf %151, %158 : vector<64x64xf32>
    %c63_i32_38 = arith.constant 63 : i32
    %160 = tpu.dynamic_rotate %137 by %c63_i32_38 dim 1 : vector<64x64xf32>, i32 -> vector<64x64xf32>
    %cst_39 = arith.constant 0.000000e+00 : f32
    %161 = vector.broadcast %cst_39 : f32 to vector<64x64xf32>
    %162 = arith.select %9, %160, %161 : vector<64x64xi1>, vector<64x64xf32>
    %c29 = arith.constant 29 : index
    %163 = memref.load %arg1[%c29] : memref<110xf32, #tpu.memory_space<smem>>
    %164 = vector.broadcast %163 : f32 to vector<64x64xf32>
    %165 = arith.mulf %164, %162 : vector<64x64xf32>
    %166 = arith.addf %155, %165 : vector<64x64xf32>
    %c83 = arith.constant 83 : index
    %167 = memref.load %arg1[%c83] : memref<110xf32, #tpu.memory_space<smem>>
    %168 = vector.broadcast %167 : f32 to vector<64x64xf32>
    %169 = arith.mulf %168, %162 : vector<64x64xf32>
    %170 = arith.addf %159, %169 : vector<64x64xf32>
    %c1_i32_40 = arith.constant 1 : i32
    %171 = tpu.dynamic_rotate %134 by %c1_i32_40 dim 1 : vector<64x64xf32>, i32 -> vector<64x64xf32>
    %cst_41 = arith.constant 0.000000e+00 : f32
    %172 = vector.broadcast %cst_41 : f32 to vector<64x64xf32>
    %173 = arith.select %7, %171, %172 : vector<64x64xi1>, vector<64x64xf32>
    %c30 = arith.constant 30 : index
    %174 = memref.load %arg1[%c30] : memref<110xf32, #tpu.memory_space<smem>>
    %175 = vector.broadcast %174 : f32 to vector<64x64xf32>
    %176 = arith.mulf %175, %173 : vector<64x64xf32>
    %177 = arith.addf %166, %176 : vector<64x64xf32>
    %c84 = arith.constant 84 : index
    %178 = memref.load %arg1[%c84] : memref<110xf32, #tpu.memory_space<smem>>
    %179 = vector.broadcast %178 : f32 to vector<64x64xf32>
    %180 = arith.mulf %179, %173 : vector<64x64xf32>
    %181 = arith.addf %170, %180 : vector<64x64xf32>
    %c31 = arith.constant 31 : index
    %182 = memref.load %arg1[%c31] : memref<110xf32, #tpu.memory_space<smem>>
    %183 = vector.broadcast %182 : f32 to vector<64x64xf32>
    %184 = arith.mulf %183, %134 : vector<64x64xf32>
    %185 = arith.addf %177, %184 : vector<64x64xf32>
    %c85 = arith.constant 85 : index
    %186 = memref.load %arg1[%c85] : memref<110xf32, #tpu.memory_space<smem>>
    %187 = vector.broadcast %186 : f32 to vector<64x64xf32>
    %188 = arith.mulf %187, %134 : vector<64x64xf32>
    %189 = arith.addf %181, %188 : vector<64x64xf32>
    %c63_i32_42 = arith.constant 63 : i32
    %190 = tpu.dynamic_rotate %134 by %c63_i32_42 dim 1 : vector<64x64xf32>, i32 -> vector<64x64xf32>
    %cst_43 = arith.constant 0.000000e+00 : f32
    %191 = vector.broadcast %cst_43 : f32 to vector<64x64xf32>
    %192 = arith.select %9, %190, %191 : vector<64x64xi1>, vector<64x64xf32>
    %c32 = arith.constant 32 : index
    %193 = memref.load %arg1[%c32] : memref<110xf32, #tpu.memory_space<smem>>
    %194 = vector.broadcast %193 : f32 to vector<64x64xf32>
    %195 = arith.mulf %194, %192 : vector<64x64xf32>
    %196 = arith.addf %185, %195 : vector<64x64xf32>
    %c86 = arith.constant 86 : index
    %197 = memref.load %arg1[%c86] : memref<110xf32, #tpu.memory_space<smem>>
    %198 = vector.broadcast %197 : f32 to vector<64x64xf32>
    %199 = arith.mulf %198, %192 : vector<64x64xf32>
    %200 = arith.addf %189, %199 : vector<64x64xf32>
    %c1_i32_44 = arith.constant 1 : i32
    %201 = tpu.dynamic_rotate %140 by %c1_i32_44 dim 1 : vector<64x64xf32>, i32 -> vector<64x64xf32>
    %cst_45 = arith.constant 0.000000e+00 : f32
    %202 = vector.broadcast %cst_45 : f32 to vector<64x64xf32>
    %203 = arith.select %7, %201, %202 : vector<64x64xi1>, vector<64x64xf32>
    %c33 = arith.constant 33 : index
    %204 = memref.load %arg1[%c33] : memref<110xf32, #tpu.memory_space<smem>>
    %205 = vector.broadcast %204 : f32 to vector<64x64xf32>
    %206 = arith.mulf %205, %203 : vector<64x64xf32>
    %207 = arith.addf %196, %206 : vector<64x64xf32>
    %c87 = arith.constant 87 : index
    %208 = memref.load %arg1[%c87] : memref<110xf32, #tpu.memory_space<smem>>
    %209 = vector.broadcast %208 : f32 to vector<64x64xf32>
    %210 = arith.mulf %209, %203 : vector<64x64xf32>
    %211 = arith.addf %200, %210 : vector<64x64xf32>
    %c34 = arith.constant 34 : index
    %212 = memref.load %arg1[%c34] : memref<110xf32, #tpu.memory_space<smem>>
    %213 = vector.broadcast %212 : f32 to vector<64x64xf32>
    %214 = arith.mulf %213, %140 : vector<64x64xf32>
    %215 = arith.addf %207, %214 : vector<64x64xf32>
    %c88 = arith.constant 88 : index
    %216 = memref.load %arg1[%c88] : memref<110xf32, #tpu.memory_space<smem>>
    %217 = vector.broadcast %216 : f32 to vector<64x64xf32>
    %218 = arith.mulf %217, %140 : vector<64x64xf32>
    %219 = arith.addf %211, %218 : vector<64x64xf32>
    %c63_i32_46 = arith.constant 63 : i32
    %220 = tpu.dynamic_rotate %140 by %c63_i32_46 dim 1 : vector<64x64xf32>, i32 -> vector<64x64xf32>
    %cst_47 = arith.constant 0.000000e+00 : f32
    %221 = vector.broadcast %cst_47 : f32 to vector<64x64xf32>
    %222 = arith.select %9, %220, %221 : vector<64x64xi1>, vector<64x64xf32>
    %c35 = arith.constant 35 : index
    %223 = memref.load %arg1[%c35] : memref<110xf32, #tpu.memory_space<smem>>
    %224 = vector.broadcast %223 : f32 to vector<64x64xf32>
    %225 = arith.mulf %224, %222 : vector<64x64xf32>
    %226 = arith.addf %215, %225 : vector<64x64xf32>
    %c89 = arith.constant 89 : index
    %227 = memref.load %arg1[%c89] : memref<110xf32, #tpu.memory_space<smem>>
    %228 = vector.broadcast %227 : f32 to vector<64x64xf32>
    %229 = arith.mulf %228, %222 : vector<64x64xf32>
    %230 = arith.addf %219, %229 : vector<64x64xf32>
    %c0_48 = arith.constant 0 : index
    %c1_49 = arith.constant 1 : index
    %c0_50 = arith.constant 0 : index
    %c0_51 = arith.constant 0 : index
    %231 = vector.load %arg2[%c0_48, %c1_49, %c0_50, %c0_51] : memref<1x3x64x64xbf16, #tpu.memory_space<vmem>>, vector<1x1x64x64xbf16>
    %232 = vector.shape_cast %231 : vector<1x1x64x64xbf16> to vector<64x64xbf16>
    %233 = arith.extf %232 : vector<64x64xbf16> to vector<64x64xf32>
    %c0_52 = arith.constant 0 : index
    %c1_53 = arith.constant 1 : index
    %c0_54 = arith.constant 0 : index
    %c0_55 = arith.constant 0 : index
    %234 = vector.load %arg3[%c0_52, %c1_53, %c0_54, %c0_55] : memref<1x3x64x64xbf16, #tpu.memory_space<vmem>>, vector<1x1x64x64xbf16>
    %235 = vector.shape_cast %234 : vector<1x1x64x64xbf16> to vector<64x64xbf16>
    %236 = arith.extf %235 : vector<64x64xbf16> to vector<64x64xf32>
    %237 = vector.shape_cast %233 : vector<64x64xf32> to vector<1x64x64xf32>
    %cst_56 = arith.constant dense<0.000000e+00> : vector<1xf32>
    %238 = vector.multi_reduction <add>, %237, %cst_56 [1, 2] : vector<1x64x64xf32> to vector<1xf32>
    %239 = vector.shape_cast %238 : vector<1xf32> to vector<1x1x1xf32>
    %240 = vector.extract %239[0, 0, 0] : f32 from vector<1x1x1xf32>
    %241 = vector.broadcast %240 : f32 to vector<1x1xf32>
    %cst_57 = arith.constant 4.096000e+03 : f32
    %242 = vector.broadcast %cst_57 : f32 to vector<1x1xf32>
    %243 = arith.divf %241, %242 : vector<1x1xf32>
    %244 = vector.shape_cast %236 : vector<64x64xf32> to vector<1x64x64xf32>
    %cst_58 = arith.constant dense<0.000000e+00> : vector<1xf32>
    %245 = vector.multi_reduction <add>, %244, %cst_58 [1, 2] : vector<1x64x64xf32> to vector<1xf32>
    %246 = vector.shape_cast %245 : vector<1xf32> to vector<1x1x1xf32>
    %247 = vector.extract %246[0, 0, 0] : f32 from vector<1x1x1xf32>
    %248 = vector.broadcast %247 : f32 to vector<1x1xf32>
    %cst_59 = arith.constant 4.096000e+03 : f32
    %249 = vector.broadcast %cst_59 : f32 to vector<1x1xf32>
    %250 = arith.divf %248, %249 : vector<1x1xf32>
    %251 = arith.addf %243, %250 : vector<1x1xf32>
    %cst_60 = arith.constant 5.000000e-01 : f32
    %252 = vector.broadcast %cst_60 : f32 to vector<1x1xf32>
    %253 = arith.mulf %252, %251 : vector<1x1xf32>
    %254 = vector.broadcast %253 : vector<1x1xf32> to vector<64x64xf32>
    %255 = arith.subf %233, %254 : vector<64x64xf32>
    %c1_i32_61 = arith.constant 1 : i32
    %256 = tpu.dynamic_rotate %255 by %c1_i32_61 dim 0 : vector<64x64xf32>, i32 -> vector<64x64xf32>
    %cst_62 = arith.constant 0.000000e+00 : f32
    %257 = vector.broadcast %cst_62 : f32 to vector<64x64xf32>
    %258 = arith.select %3, %256, %257 : vector<64x64xi1>, vector<64x64xf32>
    %c63_i32_63 = arith.constant 63 : i32
    %259 = tpu.dynamic_rotate %255 by %c63_i32_63 dim 0 : vector<64x64xf32>, i32 -> vector<64x64xf32>
    %cst_64 = arith.constant 0.000000e+00 : f32
    %260 = vector.broadcast %cst_64 : f32 to vector<64x64xf32>
    %261 = arith.select %5, %259, %260 : vector<64x64xi1>, vector<64x64xf32>
    %c1_i32_65 = arith.constant 1 : i32
    %262 = tpu.dynamic_rotate %258 by %c1_i32_65 dim 1 : vector<64x64xf32>, i32 -> vector<64x64xf32>
    %cst_66 = arith.constant 0.000000e+00 : f32
    %263 = vector.broadcast %cst_66 : f32 to vector<64x64xf32>
    %264 = arith.select %7, %262, %263 : vector<64x64xi1>, vector<64x64xf32>
    %c9 = arith.constant 9 : index
    %265 = memref.load %arg1[%c9] : memref<110xf32, #tpu.memory_space<smem>>
    %266 = vector.broadcast %265 : f32 to vector<64x64xf32>
    %267 = arith.mulf %266, %264 : vector<64x64xf32>
    %268 = arith.addf %226, %267 : vector<64x64xf32>
    %c63 = arith.constant 63 : index
    %269 = memref.load %arg1[%c63] : memref<110xf32, #tpu.memory_space<smem>>
    %270 = vector.broadcast %269 : f32 to vector<64x64xf32>
    %271 = arith.mulf %270, %264 : vector<64x64xf32>
    %272 = arith.addf %230, %271 : vector<64x64xf32>
    %c10 = arith.constant 10 : index
    %273 = memref.load %arg1[%c10] : memref<110xf32, #tpu.memory_space<smem>>
    %274 = vector.broadcast %273 : f32 to vector<64x64xf32>
    %275 = arith.mulf %274, %258 : vector<64x64xf32>
    %276 = arith.addf %268, %275 : vector<64x64xf32>
    %c64 = arith.constant 64 : index
    %277 = memref.load %arg1[%c64] : memref<110xf32, #tpu.memory_space<smem>>
    %278 = vector.broadcast %277 : f32 to vector<64x64xf32>
    %279 = arith.mulf %278, %258 : vector<64x64xf32>
    %280 = arith.addf %272, %279 : vector<64x64xf32>
    %c63_i32_67 = arith.constant 63 : i32
    %281 = tpu.dynamic_rotate %258 by %c63_i32_67 dim 1 : vector<64x64xf32>, i32 -> vector<64x64xf32>
    %cst_68 = arith.constant 0.000000e+00 : f32
    %282 = vector.broadcast %cst_68 : f32 to vector<64x64xf32>
    %283 = arith.select %9, %281, %282 : vector<64x64xi1>, vector<64x64xf32>
    %c11 = arith.constant 11 : index
    %284 = memref.load %arg1[%c11] : memref<110xf32, #tpu.memory_space<smem>>
    %285 = vector.broadcast %284 : f32 to vector<64x64xf32>
    %286 = arith.mulf %285, %283 : vector<64x64xf32>
    %287 = arith.addf %276, %286 : vector<64x64xf32>
    %c65 = arith.constant 65 : index
    %288 = memref.load %arg1[%c65] : memref<110xf32, #tpu.memory_space<smem>>
    %289 = vector.broadcast %288 : f32 to vector<64x64xf32>
    %290 = arith.mulf %289, %283 : vector<64x64xf32>
    %291 = arith.addf %280, %290 : vector<64x64xf32>
    %c1_i32_69 = arith.constant 1 : i32
    %292 = tpu.dynamic_rotate %255 by %c1_i32_69 dim 1 : vector<64x64xf32>, i32 -> vector<64x64xf32>
    %cst_70 = arith.constant 0.000000e+00 : f32
    %293 = vector.broadcast %cst_70 : f32 to vector<64x64xf32>
    %294 = arith.select %7, %292, %293 : vector<64x64xi1>, vector<64x64xf32>
    %c12 = arith.constant 12 : index
    %295 = memref.load %arg1[%c12] : memref<110xf32, #tpu.memory_space<smem>>
    %296 = vector.broadcast %295 : f32 to vector<64x64xf32>
    %297 = arith.mulf %296, %294 : vector<64x64xf32>
    %298 = arith.addf %287, %297 : vector<64x64xf32>
    %c66 = arith.constant 66 : index
    %299 = memref.load %arg1[%c66] : memref<110xf32, #tpu.memory_space<smem>>
    %300 = vector.broadcast %299 : f32 to vector<64x64xf32>
    %301 = arith.mulf %300, %294 : vector<64x64xf32>
    %302 = arith.addf %291, %301 : vector<64x64xf32>
    %c13 = arith.constant 13 : index
    %303 = memref.load %arg1[%c13] : memref<110xf32, #tpu.memory_space<smem>>
    %304 = vector.broadcast %303 : f32 to vector<64x64xf32>
    %305 = arith.mulf %304, %255 : vector<64x64xf32>
    %306 = arith.addf %298, %305 : vector<64x64xf32>
    %c67 = arith.constant 67 : index
    %307 = memref.load %arg1[%c67] : memref<110xf32, #tpu.memory_space<smem>>
    %308 = vector.broadcast %307 : f32 to vector<64x64xf32>
    %309 = arith.mulf %308, %255 : vector<64x64xf32>
    %310 = arith.addf %302, %309 : vector<64x64xf32>
    %c63_i32_71 = arith.constant 63 : i32
    %311 = tpu.dynamic_rotate %255 by %c63_i32_71 dim 1 : vector<64x64xf32>, i32 -> vector<64x64xf32>
    %cst_72 = arith.constant 0.000000e+00 : f32
    %312 = vector.broadcast %cst_72 : f32 to vector<64x64xf32>
    %313 = arith.select %9, %311, %312 : vector<64x64xi1>, vector<64x64xf32>
    %c14 = arith.constant 14 : index
    %314 = memref.load %arg1[%c14] : memref<110xf32, #tpu.memory_space<smem>>
    %315 = vector.broadcast %314 : f32 to vector<64x64xf32>
    %316 = arith.mulf %315, %313 : vector<64x64xf32>
    %317 = arith.addf %306, %316 : vector<64x64xf32>
    %c68 = arith.constant 68 : index
    %318 = memref.load %arg1[%c68] : memref<110xf32, #tpu.memory_space<smem>>
    %319 = vector.broadcast %318 : f32 to vector<64x64xf32>
    %320 = arith.mulf %319, %313 : vector<64x64xf32>
    %321 = arith.addf %310, %320 : vector<64x64xf32>
    %c1_i32_73 = arith.constant 1 : i32
    %322 = tpu.dynamic_rotate %261 by %c1_i32_73 dim 1 : vector<64x64xf32>, i32 -> vector<64x64xf32>
    %cst_74 = arith.constant 0.000000e+00 : f32
    %323 = vector.broadcast %cst_74 : f32 to vector<64x64xf32>
    %324 = arith.select %7, %322, %323 : vector<64x64xi1>, vector<64x64xf32>
    %c15 = arith.constant 15 : index
    %325 = memref.load %arg1[%c15] : memref<110xf32, #tpu.memory_space<smem>>
    %326 = vector.broadcast %325 : f32 to vector<64x64xf32>
    %327 = arith.mulf %326, %324 : vector<64x64xf32>
    %328 = arith.addf %317, %327 : vector<64x64xf32>
    %c69 = arith.constant 69 : index
    %329 = memref.load %arg1[%c69] : memref<110xf32, #tpu.memory_space<smem>>
    %330 = vector.broadcast %329 : f32 to vector<64x64xf32>
    %331 = arith.mulf %330, %324 : vector<64x64xf32>
    %332 = arith.addf %321, %331 : vector<64x64xf32>
    %c16 = arith.constant 16 : index
    %333 = memref.load %arg1[%c16] : memref<110xf32, #tpu.memory_space<smem>>
    %334 = vector.broadcast %333 : f32 to vector<64x64xf32>
    %335 = arith.mulf %334, %261 : vector<64x64xf32>
    %336 = arith.addf %328, %335 : vector<64x64xf32>
    %c70 = arith.constant 70 : index
    %337 = memref.load %arg1[%c70] : memref<110xf32, #tpu.memory_space<smem>>
    %338 = vector.broadcast %337 : f32 to vector<64x64xf32>
    %339 = arith.mulf %338, %261 : vector<64x64xf32>
    %340 = arith.addf %332, %339 : vector<64x64xf32>
    %c63_i32_75 = arith.constant 63 : i32
    %341 = tpu.dynamic_rotate %261 by %c63_i32_75 dim 1 : vector<64x64xf32>, i32 -> vector<64x64xf32>
    %cst_76 = arith.constant 0.000000e+00 : f32
    %342 = vector.broadcast %cst_76 : f32 to vector<64x64xf32>
    %343 = arith.select %9, %341, %342 : vector<64x64xi1>, vector<64x64xf32>
    %c17 = arith.constant 17 : index
    %344 = memref.load %arg1[%c17] : memref<110xf32, #tpu.memory_space<smem>>
    %345 = vector.broadcast %344 : f32 to vector<64x64xf32>
    %346 = arith.mulf %345, %343 : vector<64x64xf32>
    %347 = arith.addf %336, %346 : vector<64x64xf32>
    %c71 = arith.constant 71 : index
    %348 = memref.load %arg1[%c71] : memref<110xf32, #tpu.memory_space<smem>>
    %349 = vector.broadcast %348 : f32 to vector<64x64xf32>
    %350 = arith.mulf %349, %343 : vector<64x64xf32>
    %351 = arith.addf %340, %350 : vector<64x64xf32>
    %352 = vector.broadcast %253 : vector<1x1xf32> to vector<64x64xf32>
    %353 = arith.subf %236, %352 : vector<64x64xf32>
    %c1_i32_77 = arith.constant 1 : i32
    %354 = tpu.dynamic_rotate %353 by %c1_i32_77 dim 0 : vector<64x64xf32>, i32 -> vector<64x64xf32>
    %cst_78 = arith.constant 0.000000e+00 : f32
    %355 = vector.broadcast %cst_78 : f32 to vector<64x64xf32>
    %356 = arith.select %3, %354, %355 : vector<64x64xi1>, vector<64x64xf32>
    %c63_i32_79 = arith.constant 63 : i32
    %357 = tpu.dynamic_rotate %353 by %c63_i32_79 dim 0 : vector<64x64xf32>, i32 -> vector<64x64xf32>
    %cst_80 = arith.constant 0.000000e+00 : f32
    %358 = vector.broadcast %cst_80 : f32 to vector<64x64xf32>
    %359 = arith.select %5, %357, %358 : vector<64x64xi1>, vector<64x64xf32>
    %c1_i32_81 = arith.constant 1 : i32
    %360 = tpu.dynamic_rotate %356 by %c1_i32_81 dim 1 : vector<64x64xf32>, i32 -> vector<64x64xf32>
    %cst_82 = arith.constant 0.000000e+00 : f32
    %361 = vector.broadcast %cst_82 : f32 to vector<64x64xf32>
    %362 = arith.select %7, %360, %361 : vector<64x64xi1>, vector<64x64xf32>
    %c36 = arith.constant 36 : index
    %363 = memref.load %arg1[%c36] : memref<110xf32, #tpu.memory_space<smem>>
    %364 = vector.broadcast %363 : f32 to vector<64x64xf32>
    %365 = arith.mulf %364, %362 : vector<64x64xf32>
    %366 = arith.addf %347, %365 : vector<64x64xf32>
    %c90 = arith.constant 90 : index
    %367 = memref.load %arg1[%c90] : memref<110xf32, #tpu.memory_space<smem>>
    %368 = vector.broadcast %367 : f32 to vector<64x64xf32>
    %369 = arith.mulf %368, %362 : vector<64x64xf32>
    %370 = arith.addf %351, %369 : vector<64x64xf32>
    %c37 = arith.constant 37 : index
    %371 = memref.load %arg1[%c37] : memref<110xf32, #tpu.memory_space<smem>>
    %372 = vector.broadcast %371 : f32 to vector<64x64xf32>
    %373 = arith.mulf %372, %356 : vector<64x64xf32>
    %374 = arith.addf %366, %373 : vector<64x64xf32>
    %c91 = arith.constant 91 : index
    %375 = memref.load %arg1[%c91] : memref<110xf32, #tpu.memory_space<smem>>
    %376 = vector.broadcast %375 : f32 to vector<64x64xf32>
    %377 = arith.mulf %376, %356 : vector<64x64xf32>
    %378 = arith.addf %370, %377 : vector<64x64xf32>
    %c63_i32_83 = arith.constant 63 : i32
    %379 = tpu.dynamic_rotate %356 by %c63_i32_83 dim 1 : vector<64x64xf32>, i32 -> vector<64x64xf32>
    %cst_84 = arith.constant 0.000000e+00 : f32
    %380 = vector.broadcast %cst_84 : f32 to vector<64x64xf32>
    %381 = arith.select %9, %379, %380 : vector<64x64xi1>, vector<64x64xf32>
    %c38 = arith.constant 38 : index
    %382 = memref.load %arg1[%c38] : memref<110xf32, #tpu.memory_space<smem>>
    %383 = vector.broadcast %382 : f32 to vector<64x64xf32>
    %384 = arith.mulf %383, %381 : vector<64x64xf32>
    %385 = arith.addf %374, %384 : vector<64x64xf32>
    %c92 = arith.constant 92 : index
    %386 = memref.load %arg1[%c92] : memref<110xf32, #tpu.memory_space<smem>>
    %387 = vector.broadcast %386 : f32 to vector<64x64xf32>
    %388 = arith.mulf %387, %381 : vector<64x64xf32>
    %389 = arith.addf %378, %388 : vector<64x64xf32>
    %c1_i32_85 = arith.constant 1 : i32
    %390 = tpu.dynamic_rotate %353 by %c1_i32_85 dim 1 : vector<64x64xf32>, i32 -> vector<64x64xf32>
    %cst_86 = arith.constant 0.000000e+00 : f32
    %391 = vector.broadcast %cst_86 : f32 to vector<64x64xf32>
    %392 = arith.select %7, %390, %391 : vector<64x64xi1>, vector<64x64xf32>
    %c39 = arith.constant 39 : index
    %393 = memref.load %arg1[%c39] : memref<110xf32, #tpu.memory_space<smem>>
    %394 = vector.broadcast %393 : f32 to vector<64x64xf32>
    %395 = arith.mulf %394, %392 : vector<64x64xf32>
    %396 = arith.addf %385, %395 : vector<64x64xf32>
    %c93 = arith.constant 93 : index
    %397 = memref.load %arg1[%c93] : memref<110xf32, #tpu.memory_space<smem>>
    %398 = vector.broadcast %397 : f32 to vector<64x64xf32>
    %399 = arith.mulf %398, %392 : vector<64x64xf32>
    %400 = arith.addf %389, %399 : vector<64x64xf32>
    %c40 = arith.constant 40 : index
    %401 = memref.load %arg1[%c40] : memref<110xf32, #tpu.memory_space<smem>>
    %402 = vector.broadcast %401 : f32 to vector<64x64xf32>
    %403 = arith.mulf %402, %353 : vector<64x64xf32>
    %404 = arith.addf %396, %403 : vector<64x64xf32>
    %c94 = arith.constant 94 : index
    %405 = memref.load %arg1[%c94] : memref<110xf32, #tpu.memory_space<smem>>
    %406 = vector.broadcast %405 : f32 to vector<64x64xf32>
    %407 = arith.mulf %406, %353 : vector<64x64xf32>
    %408 = arith.addf %400, %407 : vector<64x64xf32>
    %c63_i32_87 = arith.constant 63 : i32
    %409 = tpu.dynamic_rotate %353 by %c63_i32_87 dim 1 : vector<64x64xf32>, i32 -> vector<64x64xf32>
    %cst_88 = arith.constant 0.000000e+00 : f32
    %410 = vector.broadcast %cst_88 : f32 to vector<64x64xf32>
    %411 = arith.select %9, %409, %410 : vector<64x64xi1>, vector<64x64xf32>
    %c41 = arith.constant 41 : index
    %412 = memref.load %arg1[%c41] : memref<110xf32, #tpu.memory_space<smem>>
    %413 = vector.broadcast %412 : f32 to vector<64x64xf32>
    %414 = arith.mulf %413, %411 : vector<64x64xf32>
    %415 = arith.addf %404, %414 : vector<64x64xf32>
    %c95 = arith.constant 95 : index
    %416 = memref.load %arg1[%c95] : memref<110xf32, #tpu.memory_space<smem>>
    %417 = vector.broadcast %416 : f32 to vector<64x64xf32>
    %418 = arith.mulf %417, %411 : vector<64x64xf32>
    %419 = arith.addf %408, %418 : vector<64x64xf32>
    %c1_i32_89 = arith.constant 1 : i32
    %420 = tpu.dynamic_rotate %359 by %c1_i32_89 dim 1 : vector<64x64xf32>, i32 -> vector<64x64xf32>
    %cst_90 = arith.constant 0.000000e+00 : f32
    %421 = vector.broadcast %cst_90 : f32 to vector<64x64xf32>
    %422 = arith.select %7, %420, %421 : vector<64x64xi1>, vector<64x64xf32>
    %c42 = arith.constant 42 : index
    %423 = memref.load %arg1[%c42] : memref<110xf32, #tpu.memory_space<smem>>
    %424 = vector.broadcast %423 : f32 to vector<64x64xf32>
    %425 = arith.mulf %424, %422 : vector<64x64xf32>
    %426 = arith.addf %415, %425 : vector<64x64xf32>
    %c96 = arith.constant 96 : index
    %427 = memref.load %arg1[%c96] : memref<110xf32, #tpu.memory_space<smem>>
    %428 = vector.broadcast %427 : f32 to vector<64x64xf32>
    %429 = arith.mulf %428, %422 : vector<64x64xf32>
    %430 = arith.addf %419, %429 : vector<64x64xf32>
    %c43 = arith.constant 43 : index
    %431 = memref.load %arg1[%c43] : memref<110xf32, #tpu.memory_space<smem>>
    %432 = vector.broadcast %431 : f32 to vector<64x64xf32>
    %433 = arith.mulf %432, %359 : vector<64x64xf32>
    %434 = arith.addf %426, %433 : vector<64x64xf32>
    %c97 = arith.constant 97 : index
    %435 = memref.load %arg1[%c97] : memref<110xf32, #tpu.memory_space<smem>>
    %436 = vector.broadcast %435 : f32 to vector<64x64xf32>
    %437 = arith.mulf %436, %359 : vector<64x64xf32>
    %438 = arith.addf %430, %437 : vector<64x64xf32>
    %c63_i32_91 = arith.constant 63 : i32
    %439 = tpu.dynamic_rotate %359 by %c63_i32_91 dim 1 : vector<64x64xf32>, i32 -> vector<64x64xf32>
    %cst_92 = arith.constant 0.000000e+00 : f32
    %440 = vector.broadcast %cst_92 : f32 to vector<64x64xf32>
    %441 = arith.select %9, %439, %440 : vector<64x64xi1>, vector<64x64xf32>
    %c44 = arith.constant 44 : index
    %442 = memref.load %arg1[%c44] : memref<110xf32, #tpu.memory_space<smem>>
    %443 = vector.broadcast %442 : f32 to vector<64x64xf32>
    %444 = arith.mulf %443, %441 : vector<64x64xf32>
    %445 = arith.addf %434, %444 : vector<64x64xf32>
    %c98 = arith.constant 98 : index
    %446 = memref.load %arg1[%c98] : memref<110xf32, #tpu.memory_space<smem>>
    %447 = vector.broadcast %446 : f32 to vector<64x64xf32>
    %448 = arith.mulf %447, %441 : vector<64x64xf32>
    %449 = arith.addf %438, %448 : vector<64x64xf32>
    %c0_93 = arith.constant 0 : index
    %c2_94 = arith.constant 2 : index
    %c0_95 = arith.constant 0 : index
    %c0_96 = arith.constant 0 : index
    %450 = vector.load %arg2[%c0_93, %c2_94, %c0_95, %c0_96] : memref<1x3x64x64xbf16, #tpu.memory_space<vmem>>, vector<1x1x64x64xbf16>
    %451 = vector.shape_cast %450 : vector<1x1x64x64xbf16> to vector<64x64xbf16>
    %452 = arith.extf %451 : vector<64x64xbf16> to vector<64x64xf32>
    %c0_97 = arith.constant 0 : index
    %c2_98 = arith.constant 2 : index
    %c0_99 = arith.constant 0 : index
    %c0_100 = arith.constant 0 : index
    %453 = vector.load %arg3[%c0_97, %c2_98, %c0_99, %c0_100] : memref<1x3x64x64xbf16, #tpu.memory_space<vmem>>, vector<1x1x64x64xbf16>
    %454 = vector.shape_cast %453 : vector<1x1x64x64xbf16> to vector<64x64xbf16>
    %455 = arith.extf %454 : vector<64x64xbf16> to vector<64x64xf32>
    %456 = vector.shape_cast %452 : vector<64x64xf32> to vector<1x64x64xf32>
    %cst_101 = arith.constant dense<0.000000e+00> : vector<1xf32>
    %457 = vector.multi_reduction <add>, %456, %cst_101 [1, 2] : vector<1x64x64xf32> to vector<1xf32>
    %458 = vector.shape_cast %457 : vector<1xf32> to vector<1x1x1xf32>
    %459 = vector.extract %458[0, 0, 0] : f32 from vector<1x1x1xf32>
    %460 = vector.broadcast %459 : f32 to vector<1x1xf32>
    %cst_102 = arith.constant 4.096000e+03 : f32
    %461 = vector.broadcast %cst_102 : f32 to vector<1x1xf32>
    %462 = arith.divf %460, %461 : vector<1x1xf32>
    %463 = vector.shape_cast %455 : vector<64x64xf32> to vector<1x64x64xf32>
    %cst_103 = arith.constant dense<0.000000e+00> : vector<1xf32>
    %464 = vector.multi_reduction <add>, %463, %cst_103 [1, 2] : vector<1x64x64xf32> to vector<1xf32>
    %465 = vector.shape_cast %464 : vector<1xf32> to vector<1x1x1xf32>
    %466 = vector.extract %465[0, 0, 0] : f32 from vector<1x1x1xf32>
    %467 = vector.broadcast %466 : f32 to vector<1x1xf32>
    %cst_104 = arith.constant 4.096000e+03 : f32
    %468 = vector.broadcast %cst_104 : f32 to vector<1x1xf32>
    %469 = arith.divf %467, %468 : vector<1x1xf32>
    %470 = arith.addf %462, %469 : vector<1x1xf32>
    %cst_105 = arith.constant 5.000000e-01 : f32
    %471 = vector.broadcast %cst_105 : f32 to vector<1x1xf32>
    %472 = arith.mulf %471, %470 : vector<1x1xf32>
    %473 = vector.broadcast %472 : vector<1x1xf32> to vector<64x64xf32>
    %474 = arith.subf %452, %473 : vector<64x64xf32>
    %c1_i32_106 = arith.constant 1 : i32
    %475 = tpu.dynamic_rotate %474 by %c1_i32_106 dim 0 : vector<64x64xf32>, i32 -> vector<64x64xf32>
    %cst_107 = arith.constant 0.000000e+00 : f32
    %476 = vector.broadcast %cst_107 : f32 to vector<64x64xf32>
    %477 = arith.select %3, %475, %476 : vector<64x64xi1>, vector<64x64xf32>
    %c63_i32_108 = arith.constant 63 : i32
    %478 = tpu.dynamic_rotate %474 by %c63_i32_108 dim 0 : vector<64x64xf32>, i32 -> vector<64x64xf32>
    %cst_109 = arith.constant 0.000000e+00 : f32
    %479 = vector.broadcast %cst_109 : f32 to vector<64x64xf32>
    %480 = arith.select %5, %478, %479 : vector<64x64xi1>, vector<64x64xf32>
    %c1_i32_110 = arith.constant 1 : i32
    %481 = tpu.dynamic_rotate %477 by %c1_i32_110 dim 1 : vector<64x64xf32>, i32 -> vector<64x64xf32>
    %cst_111 = arith.constant 0.000000e+00 : f32
    %482 = vector.broadcast %cst_111 : f32 to vector<64x64xf32>
    %483 = arith.select %7, %481, %482 : vector<64x64xi1>, vector<64x64xf32>
    %c18 = arith.constant 18 : index
    %484 = memref.load %arg1[%c18] : memref<110xf32, #tpu.memory_space<smem>>
    %485 = vector.broadcast %484 : f32 to vector<64x64xf32>
    %486 = arith.mulf %485, %483 : vector<64x64xf32>
    %487 = arith.addf %445, %486 : vector<64x64xf32>
    %c72 = arith.constant 72 : index
    %488 = memref.load %arg1[%c72] : memref<110xf32, #tpu.memory_space<smem>>
    %489 = vector.broadcast %488 : f32 to vector<64x64xf32>
    %490 = arith.mulf %489, %483 : vector<64x64xf32>
    %491 = arith.addf %449, %490 : vector<64x64xf32>
    %c19 = arith.constant 19 : index
    %492 = memref.load %arg1[%c19] : memref<110xf32, #tpu.memory_space<smem>>
    %493 = vector.broadcast %492 : f32 to vector<64x64xf32>
    %494 = arith.mulf %493, %477 : vector<64x64xf32>
    %495 = arith.addf %487, %494 : vector<64x64xf32>
    %c73 = arith.constant 73 : index
    %496 = memref.load %arg1[%c73] : memref<110xf32, #tpu.memory_space<smem>>
    %497 = vector.broadcast %496 : f32 to vector<64x64xf32>
    %498 = arith.mulf %497, %477 : vector<64x64xf32>
    %499 = arith.addf %491, %498 : vector<64x64xf32>
    %c63_i32_112 = arith.constant 63 : i32
    %500 = tpu.dynamic_rotate %477 by %c63_i32_112 dim 1 : vector<64x64xf32>, i32 -> vector<64x64xf32>
    %cst_113 = arith.constant 0.000000e+00 : f32
    %501 = vector.broadcast %cst_113 : f32 to vector<64x64xf32>
    %502 = arith.select %9, %500, %501 : vector<64x64xi1>, vector<64x64xf32>
    %c20 = arith.constant 20 : index
    %503 = memref.load %arg1[%c20] : memref<110xf32, #tpu.memory_space<smem>>
    %504 = vector.broadcast %503 : f32 to vector<64x64xf32>
    %505 = arith.mulf %504, %502 : vector<64x64xf32>
    %506 = arith.addf %495, %505 : vector<64x64xf32>
    %c74 = arith.constant 74 : index
    %507 = memref.load %arg1[%c74] : memref<110xf32, #tpu.memory_space<smem>>
    %508 = vector.broadcast %507 : f32 to vector<64x64xf32>
    %509 = arith.mulf %508, %502 : vector<64x64xf32>
    %510 = arith.addf %499, %509 : vector<64x64xf32>
    %c1_i32_114 = arith.constant 1 : i32
    %511 = tpu.dynamic_rotate %474 by %c1_i32_114 dim 1 : vector<64x64xf32>, i32 -> vector<64x64xf32>
    %cst_115 = arith.constant 0.000000e+00 : f32
    %512 = vector.broadcast %cst_115 : f32 to vector<64x64xf32>
    %513 = arith.select %7, %511, %512 : vector<64x64xi1>, vector<64x64xf32>
    %c21 = arith.constant 21 : index
    %514 = memref.load %arg1[%c21] : memref<110xf32, #tpu.memory_space<smem>>
    %515 = vector.broadcast %514 : f32 to vector<64x64xf32>
    %516 = arith.mulf %515, %513 : vector<64x64xf32>
    %517 = arith.addf %506, %516 : vector<64x64xf32>
    %c75 = arith.constant 75 : index
    %518 = memref.load %arg1[%c75] : memref<110xf32, #tpu.memory_space<smem>>
    %519 = vector.broadcast %518 : f32 to vector<64x64xf32>
    %520 = arith.mulf %519, %513 : vector<64x64xf32>
    %521 = arith.addf %510, %520 : vector<64x64xf32>
    %c22 = arith.constant 22 : index
    %522 = memref.load %arg1[%c22] : memref<110xf32, #tpu.memory_space<smem>>
    %523 = vector.broadcast %522 : f32 to vector<64x64xf32>
    %524 = arith.mulf %523, %474 : vector<64x64xf32>
    %525 = arith.addf %517, %524 : vector<64x64xf32>
    %c76 = arith.constant 76 : index
    %526 = memref.load %arg1[%c76] : memref<110xf32, #tpu.memory_space<smem>>
    %527 = vector.broadcast %526 : f32 to vector<64x64xf32>
    %528 = arith.mulf %527, %474 : vector<64x64xf32>
    %529 = arith.addf %521, %528 : vector<64x64xf32>
    %c63_i32_116 = arith.constant 63 : i32
    %530 = tpu.dynamic_rotate %474 by %c63_i32_116 dim 1 : vector<64x64xf32>, i32 -> vector<64x64xf32>
    %cst_117 = arith.constant 0.000000e+00 : f32
    %531 = vector.broadcast %cst_117 : f32 to vector<64x64xf32>
    %532 = arith.select %9, %530, %531 : vector<64x64xi1>, vector<64x64xf32>
    %c23 = arith.constant 23 : index
    %533 = memref.load %arg1[%c23] : memref<110xf32, #tpu.memory_space<smem>>
    %534 = vector.broadcast %533 : f32 to vector<64x64xf32>
    %535 = arith.mulf %534, %532 : vector<64x64xf32>
    %536 = arith.addf %525, %535 : vector<64x64xf32>
    %c77 = arith.constant 77 : index
    %537 = memref.load %arg1[%c77] : memref<110xf32, #tpu.memory_space<smem>>
    %538 = vector.broadcast %537 : f32 to vector<64x64xf32>
    %539 = arith.mulf %538, %532 : vector<64x64xf32>
    %540 = arith.addf %529, %539 : vector<64x64xf32>
    %c1_i32_118 = arith.constant 1 : i32
    %541 = tpu.dynamic_rotate %480 by %c1_i32_118 dim 1 : vector<64x64xf32>, i32 -> vector<64x64xf32>
    %cst_119 = arith.constant 0.000000e+00 : f32
    %542 = vector.broadcast %cst_119 : f32 to vector<64x64xf32>
    %543 = arith.select %7, %541, %542 : vector<64x64xi1>, vector<64x64xf32>
    %c24 = arith.constant 24 : index
    %544 = memref.load %arg1[%c24] : memref<110xf32, #tpu.memory_space<smem>>
    %545 = vector.broadcast %544 : f32 to vector<64x64xf32>
    %546 = arith.mulf %545, %543 : vector<64x64xf32>
    %547 = arith.addf %536, %546 : vector<64x64xf32>
    %c78 = arith.constant 78 : index
    %548 = memref.load %arg1[%c78] : memref<110xf32, #tpu.memory_space<smem>>
    %549 = vector.broadcast %548 : f32 to vector<64x64xf32>
    %550 = arith.mulf %549, %543 : vector<64x64xf32>
    %551 = arith.addf %540, %550 : vector<64x64xf32>
    %c25 = arith.constant 25 : index
    %552 = memref.load %arg1[%c25] : memref<110xf32, #tpu.memory_space<smem>>
    %553 = vector.broadcast %552 : f32 to vector<64x64xf32>
    %554 = arith.mulf %553, %480 : vector<64x64xf32>
    %555 = arith.addf %547, %554 : vector<64x64xf32>
    %c79 = arith.constant 79 : index
    %556 = memref.load %arg1[%c79] : memref<110xf32, #tpu.memory_space<smem>>
    %557 = vector.broadcast %556 : f32 to vector<64x64xf32>
    %558 = arith.mulf %557, %480 : vector<64x64xf32>
    %559 = arith.addf %551, %558 : vector<64x64xf32>
    %c63_i32_120 = arith.constant 63 : i32
    %560 = tpu.dynamic_rotate %480 by %c63_i32_120 dim 1 : vector<64x64xf32>, i32 -> vector<64x64xf32>
    %cst_121 = arith.constant 0.000000e+00 : f32
    %561 = vector.broadcast %cst_121 : f32 to vector<64x64xf32>
    %562 = arith.select %9, %560, %561 : vector<64x64xi1>, vector<64x64xf32>
    %c26 = arith.constant 26 : index
    %563 = memref.load %arg1[%c26] : memref<110xf32, #tpu.memory_space<smem>>
    %564 = vector.broadcast %563 : f32 to vector<64x64xf32>
    %565 = arith.mulf %564, %562 : vector<64x64xf32>
    %566 = arith.addf %555, %565 : vector<64x64xf32>
    %c80 = arith.constant 80 : index
    %567 = memref.load %arg1[%c80] : memref<110xf32, #tpu.memory_space<smem>>
    %568 = vector.broadcast %567 : f32 to vector<64x64xf32>
    %569 = arith.mulf %568, %562 : vector<64x64xf32>
    %570 = arith.addf %559, %569 : vector<64x64xf32>
    %571 = vector.broadcast %472 : vector<1x1xf32> to vector<64x64xf32>
    %572 = arith.subf %455, %571 : vector<64x64xf32>
    %c1_i32_122 = arith.constant 1 : i32
    %573 = tpu.dynamic_rotate %572 by %c1_i32_122 dim 0 : vector<64x64xf32>, i32 -> vector<64x64xf32>
    %cst_123 = arith.constant 0.000000e+00 : f32
    %574 = vector.broadcast %cst_123 : f32 to vector<64x64xf32>
    %575 = arith.select %3, %573, %574 : vector<64x64xi1>, vector<64x64xf32>
    %c63_i32_124 = arith.constant 63 : i32
    %576 = tpu.dynamic_rotate %572 by %c63_i32_124 dim 0 : vector<64x64xf32>, i32 -> vector<64x64xf32>
    %cst_125 = arith.constant 0.000000e+00 : f32
    %577 = vector.broadcast %cst_125 : f32 to vector<64x64xf32>
    %578 = arith.select %5, %576, %577 : vector<64x64xi1>, vector<64x64xf32>
    %c1_i32_126 = arith.constant 1 : i32
    %579 = tpu.dynamic_rotate %575 by %c1_i32_126 dim 1 : vector<64x64xf32>, i32 -> vector<64x64xf32>
    %cst_127 = arith.constant 0.000000e+00 : f32
    %580 = vector.broadcast %cst_127 : f32 to vector<64x64xf32>
    %581 = arith.select %7, %579, %580 : vector<64x64xi1>, vector<64x64xf32>
    %c45 = arith.constant 45 : index
    %582 = memref.load %arg1[%c45] : memref<110xf32, #tpu.memory_space<smem>>
    %583 = vector.broadcast %582 : f32 to vector<64x64xf32>
    %584 = arith.mulf %583, %581 : vector<64x64xf32>
    %585 = arith.addf %566, %584 : vector<64x64xf32>
    %c99 = arith.constant 99 : index
    %586 = memref.load %arg1[%c99] : memref<110xf32, #tpu.memory_space<smem>>
    %587 = vector.broadcast %586 : f32 to vector<64x64xf32>
    %588 = arith.mulf %587, %581 : vector<64x64xf32>
    %589 = arith.addf %570, %588 : vector<64x64xf32>
    %c46 = arith.constant 46 : index
    %590 = memref.load %arg1[%c46] : memref<110xf32, #tpu.memory_space<smem>>
    %591 = vector.broadcast %590 : f32 to vector<64x64xf32>
    %592 = arith.mulf %591, %575 : vector<64x64xf32>
    %593 = arith.addf %585, %592 : vector<64x64xf32>
    %c100 = arith.constant 100 : index
    %594 = memref.load %arg1[%c100] : memref<110xf32, #tpu.memory_space<smem>>
    %595 = vector.broadcast %594 : f32 to vector<64x64xf32>
    %596 = arith.mulf %595, %575 : vector<64x64xf32>
    %597 = arith.addf %589, %596 : vector<64x64xf32>
    %c63_i32_128 = arith.constant 63 : i32
    %598 = tpu.dynamic_rotate %575 by %c63_i32_128 dim 1 : vector<64x64xf32>, i32 -> vector<64x64xf32>
    %cst_129 = arith.constant 0.000000e+00 : f32
    %599 = vector.broadcast %cst_129 : f32 to vector<64x64xf32>
    %600 = arith.select %9, %598, %599 : vector<64x64xi1>, vector<64x64xf32>
    %c47 = arith.constant 47 : index
    %601 = memref.load %arg1[%c47] : memref<110xf32, #tpu.memory_space<smem>>
    %602 = vector.broadcast %601 : f32 to vector<64x64xf32>
    %603 = arith.mulf %602, %600 : vector<64x64xf32>
    %604 = arith.addf %593, %603 : vector<64x64xf32>
    %c101 = arith.constant 101 : index
    %605 = memref.load %arg1[%c101] : memref<110xf32, #tpu.memory_space<smem>>
    %606 = vector.broadcast %605 : f32 to vector<64x64xf32>
    %607 = arith.mulf %606, %600 : vector<64x64xf32>
    %608 = arith.addf %597, %607 : vector<64x64xf32>
    %c1_i32_130 = arith.constant 1 : i32
    %609 = tpu.dynamic_rotate %572 by %c1_i32_130 dim 1 : vector<64x64xf32>, i32 -> vector<64x64xf32>
    %cst_131 = arith.constant 0.000000e+00 : f32
    %610 = vector.broadcast %cst_131 : f32 to vector<64x64xf32>
    %611 = arith.select %7, %609, %610 : vector<64x64xi1>, vector<64x64xf32>
    %c48 = arith.constant 48 : index
    %612 = memref.load %arg1[%c48] : memref<110xf32, #tpu.memory_space<smem>>
    %613 = vector.broadcast %612 : f32 to vector<64x64xf32>
    %614 = arith.mulf %613, %611 : vector<64x64xf32>
    %615 = arith.addf %604, %614 : vector<64x64xf32>
    %c102 = arith.constant 102 : index
    %616 = memref.load %arg1[%c102] : memref<110xf32, #tpu.memory_space<smem>>
    %617 = vector.broadcast %616 : f32 to vector<64x64xf32>
    %618 = arith.mulf %617, %611 : vector<64x64xf32>
    %619 = arith.addf %608, %618 : vector<64x64xf32>
    %c49 = arith.constant 49 : index
    %620 = memref.load %arg1[%c49] : memref<110xf32, #tpu.memory_space<smem>>
    %621 = vector.broadcast %620 : f32 to vector<64x64xf32>
    %622 = arith.mulf %621, %572 : vector<64x64xf32>
    %623 = arith.addf %615, %622 : vector<64x64xf32>
    %c103 = arith.constant 103 : index
    %624 = memref.load %arg1[%c103] : memref<110xf32, #tpu.memory_space<smem>>
    %625 = vector.broadcast %624 : f32 to vector<64x64xf32>
    %626 = arith.mulf %625, %572 : vector<64x64xf32>
    %627 = arith.addf %619, %626 : vector<64x64xf32>
    %c63_i32_132 = arith.constant 63 : i32
    %628 = tpu.dynamic_rotate %572 by %c63_i32_132 dim 1 : vector<64x64xf32>, i32 -> vector<64x64xf32>
    %cst_133 = arith.constant 0.000000e+00 : f32
    %629 = vector.broadcast %cst_133 : f32 to vector<64x64xf32>
    %630 = arith.select %9, %628, %629 : vector<64x64xi1>, vector<64x64xf32>
    %c50 = arith.constant 50 : index
    %631 = memref.load %arg1[%c50] : memref<110xf32, #tpu.memory_space<smem>>
    %632 = vector.broadcast %631 : f32 to vector<64x64xf32>
    %633 = arith.mulf %632, %630 : vector<64x64xf32>
    %634 = arith.addf %623, %633 : vector<64x64xf32>
    %c104 = arith.constant 104 : index
    %635 = memref.load %arg1[%c104] : memref<110xf32, #tpu.memory_space<smem>>
    %636 = vector.broadcast %635 : f32 to vector<64x64xf32>
    %637 = arith.mulf %636, %630 : vector<64x64xf32>
    %638 = arith.addf %627, %637 : vector<64x64xf32>
    %c1_i32_134 = arith.constant 1 : i32
    %639 = tpu.dynamic_rotate %578 by %c1_i32_134 dim 1 : vector<64x64xf32>, i32 -> vector<64x64xf32>
    %cst_135 = arith.constant 0.000000e+00 : f32
    %640 = vector.broadcast %cst_135 : f32 to vector<64x64xf32>
    %641 = arith.select %7, %639, %640 : vector<64x64xi1>, vector<64x64xf32>
    %c51 = arith.constant 51 : index
    %642 = memref.load %arg1[%c51] : memref<110xf32, #tpu.memory_space<smem>>
    %643 = vector.broadcast %642 : f32 to vector<64x64xf32>
    %644 = arith.mulf %643, %641 : vector<64x64xf32>
    %645 = arith.addf %634, %644 : vector<64x64xf32>
    %c105 = arith.constant 105 : index
    %646 = memref.load %arg1[%c105] : memref<110xf32, #tpu.memory_space<smem>>
    %647 = vector.broadcast %646 : f32 to vector<64x64xf32>
    %648 = arith.mulf %647, %641 : vector<64x64xf32>
    %649 = arith.addf %638, %648 : vector<64x64xf32>
    %c52 = arith.constant 52 : index
    %650 = memref.load %arg1[%c52] : memref<110xf32, #tpu.memory_space<smem>>
    %651 = vector.broadcast %650 : f32 to vector<64x64xf32>
    %652 = arith.mulf %651, %578 : vector<64x64xf32>
    %653 = arith.addf %645, %652 : vector<64x64xf32>
    %c106 = arith.constant 106 : index
    %654 = memref.load %arg1[%c106] : memref<110xf32, #tpu.memory_space<smem>>
    %655 = vector.broadcast %654 : f32 to vector<64x64xf32>
    %656 = arith.mulf %655, %578 : vector<64x64xf32>
    %657 = arith.addf %649, %656 : vector<64x64xf32>
    %c63_i32_136 = arith.constant 63 : i32
    %658 = tpu.dynamic_rotate %578 by %c63_i32_136 dim 1 : vector<64x64xf32>, i32 -> vector<64x64xf32>
    %cst_137 = arith.constant 0.000000e+00 : f32
    %659 = vector.broadcast %cst_137 : f32 to vector<64x64xf32>
    %660 = arith.select %9, %658, %659 : vector<64x64xi1>, vector<64x64xf32>
    %c53 = arith.constant 53 : index
    %661 = memref.load %arg1[%c53] : memref<110xf32, #tpu.memory_space<smem>>
    %662 = vector.broadcast %661 : f32 to vector<64x64xf32>
    %663 = arith.mulf %662, %660 : vector<64x64xf32>
    %664 = arith.addf %653, %663 : vector<64x64xf32>
    %c107 = arith.constant 107 : index
    %665 = memref.load %arg1[%c107] : memref<110xf32, #tpu.memory_space<smem>>
    %666 = vector.broadcast %665 : f32 to vector<64x64xf32>
    %667 = arith.mulf %666, %660 : vector<64x64xf32>
    %668 = arith.addf %657, %667 : vector<64x64xf32>
    %c108 = arith.constant 108 : index
    %669 = memref.load %arg1[%c108] : memref<110xf32, #tpu.memory_space<smem>>
    %670 = vector.broadcast %669 : f32 to vector<64x64xf32>
    %671 = arith.addf %664, %670 : vector<64x64xf32>
    %c109 = arith.constant 109 : index
    %672 = memref.load %arg1[%c109] : memref<110xf32, #tpu.memory_space<smem>>
    %673 = vector.broadcast %672 : f32 to vector<64x64xf32>
    %674 = arith.addf %668, %673 : vector<64x64xf32>
    %c0_138 = arith.constant 0 : index
    %c0_139 = arith.constant 0 : index
    %c0_140 = arith.constant 0 : index
    %c0_141 = arith.constant 0 : index
    %675 = vector.load %arg4[%c0_138, %c0_139, %c0_140, %c0_141] : memref<1x2x64x64xf32, #tpu.memory_space<vmem>>, vector<1x1x64x64xf32>
    %676 = vector.shape_cast %675 : vector<1x1x64x64xf32> to vector<64x64xf32>
    %677 = vector.shape_cast %671 : vector<64x64xf32> to vector<1x1x64x64xf32>
    tpu.vector_store %arg4[%c0_138, %c0_139, %c0_140, %c0_141], %677 {strides = array<i32>} : memref<1x2x64x64xf32, #tpu.memory_space<vmem>>, vector<1x1x64x64xf32>,
    %c0_142 = arith.constant 0 : index
    %c1_143 = arith.constant 1 : index
    %c0_144 = arith.constant 0 : index
    %c0_145 = arith.constant 0 : index
    %678 = vector.load %arg4[%c0_142, %c1_143, %c0_144, %c0_145] : memref<1x2x64x64xf32, #tpu.memory_space<vmem>>, vector<1x1x64x64xf32>
    %679 = vector.shape_cast %678 : vector<1x1x64x64xf32> to vector<64x64xf32>
    %680 = vector.shape_cast %674 : vector<64x64xf32> to vector<1x1x64x64xf32>
    tpu.vector_store %arg4[%c0_142, %c1_143, %c0_144, %c0_145], %680 {strides = array<i32>} : memref<1x2x64x64xf32, #tpu.memory_space<vmem>>, vector<1x1x64x64xf32>,
    %681 = arith.mulf %671, %671 : vector<64x64xf32>
    %682 = arith.mulf %674, %674 : vector<64x64xf32>
    %683 = arith.addf %681, %682 : vector<64x64xf32>
    %cst_146 = arith.constant 0.000000e+00 : f32
    %684 = vector.broadcast %cst_146 : f32 to vector<64x64xf32>
    %685 = arith.subf %684, %683 : vector<64x64xf32>
    %686 = math.exp %685 : vector<64x64xf32>
    %c0_147 = arith.constant 0 : index
    %c0_148 = arith.constant 0 : index
    %c0_149 = arith.constant 0 : index
    %c0_150 = arith.constant 0 : index
    %687 = vector.load %arg5[%c0_147, %c0_148, %c0_149, %c0_150] : memref<1x1x64x64xf32, #tpu.memory_space<vmem>>, vector<1x1x64x64xf32>
    %688 = vector.shape_cast %687 : vector<1x1x64x64xf32> to vector<64x64xf32>
    %689 = vector.shape_cast %686 : vector<64x64xf32> to vector<1x1x64x64xf32>
    tpu.vector_store %arg5[%c0_147, %c0_148, %c0_149, %c0_150], %689 {strides = array<i32>} : memref<1x1x64x64xf32, #tpu.memory_space<vmem>>, vector<1x1x64x64xf32>,
    return
  }
  func.func @transform_0(%arg0: i32) -> i32 {
    %c0_i32 = arith.constant 0 : i32
    %c0_i32_0 = arith.constant 0 : i32
    return %c0_i32 : i32
  }
  func.func @transform_1(%arg0: i32) -> (i32, i32, i32, i32) {
    %c0_i32 = arith.constant 0 : i32
    %c0_i32_0 = arith.constant 0 : i32
    %c0_i32_1 = arith.constant 0 : i32
    %c0_i32_2 = arith.constant 0 : i32
    return %arg0, %c0_i32, %c0_i32_0, %c0_i32_1 : i32, i32, i32, i32
  }
  func.func @transform_2(%arg0: i32) -> (i32, i32, i32, i32) {
    %c0_i32 = arith.constant 0 : i32
    %c0_i32_0 = arith.constant 0 : i32
    %c0_i32_1 = arith.constant 0 : i32
    %c0_i32_2 = arith.constant 0 : i32
    return %arg0, %c0_i32, %c0_i32_0, %c0_i32_1 : i32, i32, i32, i32
  }
  func.func @transform_3(%arg0: i32) -> (i32, i32, i32, i32) {
    %c0_i32 = arith.constant 0 : i32
    %c0_i32_0 = arith.constant 0 : i32
    %c0_i32_1 = arith.constant 0 : i32
    %c0_i32_2 = arith.constant 0 : i32
    return %arg0, %c0_i32, %c0_i32_0, %c0_i32_1 : i32, i32, i32, i32
  }
  func.func @transform_4(%arg0: i32) -> (i32, i32, i32, i32) {
    %c0_i32 = arith.constant 0 : i32
    %c0_i32_0 = arith.constant 0 : i32
    %c0_i32_1 = arith.constant 0 : i32
    %c0_i32_2 = arith.constant 0 : i32
    return %arg0, %c0_i32, %c0_i32_0, %c0_i32_1 : i32, i32, i32, i32
  }
}

</mosaic_0001>

<bundles_post_ra>
// kernel: tpu_custom_call.1
= control target key start
LH: loop header
LB: loop body
LE: loop exit
PB: predicated region body
PF: predicated region fallthrough
CT: control target
= control target key end

     0   :  { %s13060_s0 = inlined_call_operand.hbm [shape: f32[110], index: 0, kind: input, shape index: {}]   ;;  %s13061_s1 = inlined_call_operand.hbm [shape: bf16[2,3,64,64], index: 1, kind: input, shape index: {}]   ;;  %s13062_s2 = inlined_call_operand.hbm [shape: bf16[2,3,64,64], index: 2, kind: input, shape index: {}]   ;;  %s13063_s3 = inlined_call_operand.hbm [shape: f32[2,2,64,64], index: 3, kind: output, shape index: {0}]   ;;  %s13064_s4 = inlined_call_operand.hbm [shape: f32[2,1,64,64], index: 4, kind: output, shape index: {1}]  }
   0x1   :  { %13420 = sst [smem:[#allocation462_spill]] %s13060_s0 }
   0x2   :  { %10 = vsyncpa [#allocation5], 0 }
   0x3   :  { %11 = vsyncpa [#allocation3], 0 }
   0x4   :  { %13 = vsyncpa [#allocation3 + $0x1], 0 }
   0x5   :  { %14 = vsyncpa [#allocation8], 0 }
   0x6   :  { %16 = vsyncpa [#allocation8 + $0x1], 0 }
   0x7   :  { %17 = vsyncpa [#allocation4], 0 }
   0x8   :  { %19 = vsyncpa [#allocation4 + $0x1], 0 }
   0x9   :  { %20 = vsyncpa [#allocation11], 0 }
   0xa   :  { %22 = vsyncpa [#allocation11 + $0x1], 0  ;;  %s5895_s15 = smov 0   ;;  %s5897_s16 = smov 0  }
   0xb   :  { %s5899_s17 = smov 0   ;;  %s5901_s18 = smov 0  }
   0xc LB: > { %s5916_s19 = sadd.s32 4294967295, %s5856_s18   ;;  %s5283_s20 = sadd.s32 4294967294, %s5856_s18   ;;  %s5856_s18 = sphi %s5901_s18, %s14847_s18   ;;  %s5852_s17 = sphi %s5899_s17, %s14846_s17   ;;  %s5848_s16 = sphi %s5897_s16, %s14845_s16   ;;  %s5844_s15 = sphi %s5895_s15, %s14844_s15  }
   0xd   : > { %s5920_s21 = sadd.s32 1, %s5856_s18   ;;  %s56_s22 = sadd.s32 1, %s5852_s17 }
   0xe   : > { %s53_s23 = ssub.s32 %s5856_s18, %s5920_s21  ;;  %p63_p0 = scmp.ne.s32.totalorder %s5852_s17, %s5848_s16 }
   0xf   : > { %p54_p1 = scmp.eq.s32.totalorder %s53_s23, 0  ;;  %p64_p2 = scmp.eq.s32.totalorder %s5856_s18, 0 }
  0x10   : > { %p69_p3 = scmp.ne.s32.totalorder %s5848_s16, %s5844_s15  ;;  %p13065_p4 = scmp.eq.s32.totalorder %s5916_s19, 0 }
  0x11   : > { %s5932_s24 = scalar_select %p54_p1, %s5852_s17, %s56_s22  }
  0x12   : > { %p5934_p5 = por %p64_p2, %p63_p0  ;;  %p5940_p6 = por %p13065_p4, %p69_p3 }
  0x13   : > { %p119_p7 = scmp.eq.s32.totalorder %s5916_s19, 1  ;;  %p125_p8 = scmp.eq.s32.totalorder %s5283_s20, 1 }
  0x14   : > { %s13422_s26 = scalar_select %p5940_p6, 1, 0 }
  0x15   : > { %p5284_p9 = scmp.ge.s32.totalorder %s5856_s18, 1  ;;  %p158_p10 = scmp.lt.s32.totalorder %s5856_s18, 3 }
  0x16   : > { %p5947_p11 = por %p119_p7, %p63_p0  ;;  %p5951_p12 = por %p125_p8, %p69_p3 }
  0x17   : > { %p5955_p13 = pnand %p5284_p9, %p158_p10  ;;  %p5618_p4 = scmp.lt.s32.totalorder %s5856_s18, 2 }
  0x18   : > { %s13423_s27 = scalar_select %p5947_p11, 1, 0 }
  0x19   : > { %s13424_s28 = scalar_select %p5951_p12, 1, 0 }
  0x1a   : > { %p5599_p2 = pneg %p5955_p13  ;;  %s5964_s30 = sand.u32 1, %s5852_s17  }
  0x1b   : > { %s5571_s5 = smul.u32 1536, %s5856_s18  ;;  %p13426_p0 = scmp.eq.s32.totalorder %s5916_s19, 0 }
  0x1c   : > { %p5971_p3 = pnand %p5618_p4, %p5934_p5  ;;  %s5570_s7 = smul.u32 96, %s5964_s30 }
  0x1d   : > { %p5600_p7 = pnand %p5599_p2, %p13426_p0  ;;  %s13428_s0 = sld [smem:[#allocation462_spill]] }
  0x1f   : > { %p5679_p9 = pneg %p5600_p7 }
  0x23   : > { %s5677_s10 = scalar_lea.hbm %s13428_s0, 16 }
  0x24   : > { %p5678_p8 = scmp.ne.s32.totalorder %s13428_s0, %s5677_s10  ;;  %p5684_p2 = scmp.lt.u32.totalorder %s5677_s10, %s13428_s0 }
  0x26   : > { %p5680_p10 = pnand %p5679_p9, %p5678_p8 }
  0x28   : > { %p5681_p1 = pneg %p5680_p10 }
  0x2a   : > { %p5686_p4 = pnand %p5684_p2, %p5681_p1 }
  0x2c   : > { %5689 = shalt.err (!%p5686_p4)
}
  0x2d   : > { %s5858_s20 = smov [#allocation2]   ;;  %s5993_s9 = scalar_lea.hbm %s13061_s1, %s5571_s5 }
  0x2e   : > { %5602 = dma.hbm_to_smem (!%p5600_p7), %s13428_s0, 16, %s5858_s20, [#allocation5]  }
  0x2f   : > { %s184_s10 = scalar_lea.vmem [#allocation6], %s5570_s7  ;;  %s181_s12 = scalar_lea.sflag [#allocation3], %s5964_s30 }
  0x30   : > { %s191_s11 = sshll.u32 %s184_s10, 4  ;;  %s5690_s13 = scalar_lea.hbm %s5993_s9, 1536  ;;  %s5997_s11 = int_to_ptr.vmem [resolvable:$true] %s191_s11 }
  0x31   : > { %p5691_p5 = scmp.ne.s32.totalorder %s5993_s9, %s5690_s13  ;;  %p5692_p1 = pneg %p5971_p3 }
  0x32   : > { %s5695_s22 = scalar_lea.hbm %s13061_s1, 3072  ;;  %p5696_p8 = scmp.lt.u32.totalorder %s5993_s9, %s13061_s1 }
  0x33   : > { %p5693_p0 = pnand %p5692_p1, %p5691_p5  ;;  %p5697_p9 = scmp.lt.u32.totalorder %s5695_s22, %s5690_s13 }
  0x34   : > { %p5699_p2 = scmp.lt.u32.totalorder %s5690_s13, %s5993_s9 }
  0x35   : > { %p5694_p7 = pneg %p5693_p0  ;;  %p5698_p10 = por %p5697_p9, %p5696_p8 }
  0x37   : > { %p5700_p4 = por %p5699_p2, %p5698_p10 }
  0x39   : > { %p5701_p12 = pnand %p5700_p4, %p5694_p7 }
  0x3b   : > { %5704 = shalt.err (!%p5701_p12)
}
  0x3c   : > { %s5705_s8 = scalar_lea.vmem %s5997_s11, 1536  ;;  %s5859_s10 = smov [#allocation6]  }
  0x3d   : > { %p5706_p5 = scmp.ne.s32.totalorder %s5997_s11, %s5705_s8  ;;  %s5710_s14 = sshll.u32 %s5859_s10, 4  ;;  %s5711_s14 = int_to_ptr.vmem [resolvable:$false] %s5710_s14 }
  0x3e   : > { %s5712_s20 = scalar_lea.vmem %s5711_s14, 3072  ;;  %p5713_p6 = scmp.lt.s32.totalorder %s5997_s11, %s5711_s14 }
  0x3f   : > { %p5708_p0 = pnand %p5706_p5, %p5692_p1  ;;  %p5714_p8 = scmp.lt.s32.totalorder %s5712_s20, %s5705_s8 }
  0x41   : > { %p5709_p11 = pneg %p5708_p0  ;;  %p5715_p9 = por %p5714_p8, %p5713_p6 }
  0x43   : > { %p5716_p10 = pnand %p5715_p9, %p5709_p11 }
  0x45   : > { %5719 = shalt.err (!%p5716_p10)
}
  0x46   : > { %s5860_s13 = smov 64   ;;  %s5861_s22 = smov 4  }
  0x47   : > { %5606 = dma.hbm_to_vmem [thread:$0]  (!%p5971_p3), %s5993_s9, 1536, %s5997_s11, %s181_s12, %s5860_s13, %s5860_s13, %s5861_s22  }
  0x48   : > { %s6035_s8 = scalar_lea.hbm %s13062_s2, %s5571_s5  ;;  %s205_s10 = scalar_lea.vmem [#allocation7], %s5570_s7 }
  0x49   : > { %s212_s14 = sshll.u32 %s205_s10, 4  ;;  %s202_s20 = scalar_lea.sflag [#allocation8], %s5964_s30  ;;  %s6039_s14 = int_to_ptr.vmem [resolvable:$true] %s212_s14 }
  0x4a   : > { %s5720_s0 = scalar_lea.hbm %s6035_s8, 1536  ;;  %s5725_s5 = scalar_lea.hbm %s13062_s2, 3072 }
  0x4b   : > { %p5721_p6 = scmp.ne.s32.totalorder %s6035_s8, %s5720_s0  ;;  %p5726_p7 = scmp.lt.u32.totalorder %s6035_s8, %s13062_s2 }
  0x4c   : > { %p5727_p2 = scmp.lt.u32.totalorder %s5725_s5, %s5720_s0  ;;  %p5729_p5 = scmp.lt.u32.totalorder %s5720_s0, %s6035_s8 }
  0x4d   : > { %p5723_p11 = pnand %p5721_p6, %p5692_p1 }
  0x4e   : > { %p5728_p4 = por %p5727_p2, %p5726_p7 }
  0x4f   : > { %p5724_p12 = pneg %p5723_p11 }
  0x50   : > { %p5730_p0 = por %p5729_p5, %p5728_p4 }
  0x52   : > { %p5731_p8 = pnand %p5730_p0, %p5724_p12 }
  0x54   : > { %5734 = shalt.err (!%p5731_p8)
}
  0x55   : > { %s5735_s7 = scalar_lea.vmem %s6039_s14, 1536  ;;  %s5862_s25 = smov [#allocation7]  }
  0x56   : > { %p5736_p9 = scmp.ne.s32.totalorder %s6039_s14, %s5735_s7  ;;  %s5740_s10 = sshll.u32 %s5862_s25, 4  ;;  %s5741_s10 = int_to_ptr.vmem [resolvable:$false] %s5740_s10 }
  0x57   : > { %s5742_s9 = scalar_lea.vmem %s5741_s10, 3072  ;;  %p5743_p11 = scmp.lt.s32.totalorder %s6039_s14, %s5741_s10 }
  0x58   : > { %p5738_p10 = pnand %p5736_p9, %p5692_p1  ;;  %p5744_p7 = scmp.lt.s32.totalorder %s5742_s9, %s5735_s7 }
  0x5a   : > { %p5739_p6 = pneg %p5738_p10  ;;  %p5745_p2 = por %p5744_p7, %p5743_p11 }
  0x5c   : > { %p5746_p4 = pnand %p5745_p2, %p5739_p6 }
  0x5e   : > { %5749 = shalt.err (!%p5746_p4)
}
  0x5f   : > { %5609 = dma.hbm_to_vmem [thread:$0]  (!%p5971_p3), %s6035_s8, 1536, %s6039_s14, %s202_s20, %s5860_s13, %s5860_s13, %s5861_s22  }
  0x60   : > { %224 = sbr.rel (%p5955_p13) target bundleno = 3806 (0xede), region = 32 }
  0x67   : > { %p13429_p1 = scmp.eq.s32.totalorder %s5916_s19, 0 }
  0x69   : > { %5823 = dma.done.wait (%p13429_p1), [#allocation5], 16   ;;  %p13430_p12 = pmov %p13429_p1 }
  0x6a   : > { %s6077_s0 = sand.u32 1, %s5848_s16   ;;  %p13431_p3 = scmp.ne.s32.totalorder %s13422_s26, 0 }
  0x6b   : > { %5825 = vsyncadd (%p13430_p12), [#allocation5], 4294967280  ;;  %s5574_s6 = smul.u32 96, %s6077_s0  ;;  %s231_s30 = scalar_lea.sflag [#allocation3], %s6077_s0 }
  0x6d   : > { %s6081_s11 = scalar_lea.vmem [#allocation6], %s5574_s6 }
  0x6e   : > { %5827 = dma.done.wait (%p13431_p3), %s231_s30, 1536  }
  0x6f   : > { %5829 = vsyncadd (%p13431_p3), %s231_s30, 4294965760  ;;  %s240_s29 = scalar_lea.sflag [#allocation8], %s6077_s0  ;;  %s6088_s13 = scalar_lea.vmem [#allocation7], %s5574_s6 }
  0x70   : > { %5831 = dma.done.wait (%p13431_p3), %s240_s29, 1536  }
  0x71   : > { %5833 = vsyncadd (%p13431_p3), %s240_s29, 4294965760 }
  0x72   : > { %248 = sfence }
  0x73   : > { %v6095_v0 = vld [vmem:[%s6081_s11] sm:$0xff]   ;;  %v6098_v1 = vld [vmem:[%s6081_s11 + $0x8] sm:$0xff]   ;;  %v6101_v2 = vld [vmem:[%s6081_s11 + $0x10] sm:$0xff]   ;;  %vm340_vm0 = vcmask 523264   ;;  %s5863_s8 = smov 64   ;;  %vm454_vm5 = vcmask 1048064  }
  0x74   : > { %v5454_v3 = vunpack.c.l.bf16 %v6095_v0  ;;  %v5455_v4 = vunpack.c.h.bf16 %v6095_v0  ;;  %v5458_v5 = vunpack.c.l.bf16 %v6098_v1  ;;  %v5459_v6 = vunpack.c.h.bf16 %v6098_v1  ;;  %v6108_v7 = vld [vmem:[%s6081_s11 + $0x18] sm:$0xff]   ;;  %v6111_v8 = vld [vmem:[%s6088_s13] sm:$0xff]   ;;  %v6114_v9 = vld [vmem:[%s6088_s13 + $0x8] sm:$0xff]   ;;  %s5864_s5 = smov 65   ;;  %s13317_s12 = smov 127  }
  0x75   : > { %v5462_v10 = vunpack.c.l.bf16 %v6101_v2  ;;  %v5463_v14 = vunpack.c.h.bf16 %v6101_v2  ;;  %v5466_v15 = vunpack.c.l.bf16 %v6108_v7  ;;  %v6129_v17 = vld [vmem:[%s6088_s13 + $0x10] sm:$0xff]   ;;  %v5470_v19 = vunpack.c.l.bf16 %v6111_v8  ;;  %v6140_v25 = vld [vmem:[%s6088_s13 + $0x18] sm:$0xff]   ;;  %v6153_v30 = vld [vmem:[%s6081_s11 + $0x20] sm:$0xff]   ;;  %s5294_s25 = sld [smem:[#allocation2 + $0x1]]  ;;  %s5295_s10 = sld [smem:[#allocation2 + $0x37]] }
  0x76   : > { %v341_v11 = vsel %vm340_vm0, %v5454_v3, 0.0  ;;  %v342_v12 = vsel %vm340_vm0, %v5455_v4, 0.0  ;;  %v344_v13 = vsel %vm340_vm0, %v5458_v5, 0.0  ;;  %v346_v18 = vsel %vm340_vm0, %v5459_v6, 0.0  ;;  %v6160_v35 = vld [vmem:[%s6081_s11 + $0x28] sm:$0xff]   ;;  %v6175_v44 = vld [vmem:[%s6081_s11 + $0x30] sm:$0xff]  }
  0x77   : > { %v343_v16 = vadd.f32 %v342_v12, %v341_v11  ;;  %v5471_v20 = vunpack.c.h.bf16 %v6111_v8  ;;  %v5474_v21 = vunpack.c.l.bf16 %v6114_v9  ;;  %v5467_v22 = vunpack.c.h.bf16 %v6108_v7  ;;  %v6190_v53 = vld [vmem:[%s6088_s13 + $0x20] sm:$0xff]   ;;  %v6204_v61 = vld [vmem:[%s6081_s11 + $0x38] sm:$0xff]   ;;  %v6207_v63 = vld [vmem:[%s6088_s13 + $0x28] sm:$0xff]   ;;  %s5300_s9 = sld [smem:[#allocation2 + $0x4]]  ;;  %s5301_s6 = sld [smem:[#allocation2 + $0x3a]] }
  0x78   : > { %v5475_v24 = vunpack.c.h.bf16 %v6114_v9  ;;  %v348_v26 = vsel %vm340_vm0, %v5462_v10, 0.0  ;;  %v5478_v27 = vunpack.c.l.bf16 %v6129_v17  ;;  %v368_v28 = vsel %vm340_vm0, %v5470_v19, 0.0  ;;  %13432 = vst [vmem:[#allocation17_spill] sm:$0xff] %v6190_v53  ;;  %13433 = vst [vmem:[#allocation18_spill] sm:$0xff] %v6207_v63  ;;  %s5306_s30 = sld [smem:[#allocation2 + $0x7]]  ;;  %s5312_s29 = sld [smem:[#allocation2 + $0x1c]] }
  0x79   : > { %v345_v23 = vadd.f32 %v344_v13, %v343_v16  ;;  %v369_v29 = vsel %vm340_vm0, %v5471_v20, 0.0  ;;  %v5479_v32 = vunpack.c.h.bf16 %v6129_v17  ;;  %v371_v34 = vsel %vm340_vm0, %v5474_v21, 0.0  ;;  %p14841_p5 = scmp.ne.s32.totalorder %s13423_s27, 0 }
  0x7a   : > { %v370_v33 = vadd.f32 %v369_v29, %v368_v28  ;;  %v350_v36 = vsel %vm340_vm0, %v5463_v14, 0.0  ;;  %v352_v37 = vsel %vm340_vm0, %v5466_v15, 0.0  ;;  %v5482_v38 = vunpack.c.l.bf16 %v6140_v25  ;;  %v6221_v29 = vld [vmem:[%s6088_s13 + $0x30] sm:$0xff]  }
  0x7b   : > { %v347_v31 = vadd.f32 %v346_v18, %v345_v23  ;;  %v373_v39 = vsel %vm340_vm0, %v5475_v24, 0.0  ;;  %v13079_v42 = vunpack.c.l.bf16 %v6153_v30  ;;  %v13078_v43 = vunpack.c.h.bf16 %v6153_v30  ;;  %13434 = vst [vmem:[#allocation19_spill] sm:$0xff] %v6221_v29 }
  0x7c   : > { %v372_v41 = vadd.f32 %v371_v34, %v370_v33  ;;  %v5483_v45 = vunpack.c.h.bf16 %v6140_v25  ;;  %v375_v46 = vsel %vm340_vm0, %v5478_v27, 0.0  ;;  %v5490_v47 = vunpack.c.l.bf16 %v6160_v35 }
  0x7d   : > { %v349_v40 = vadd.f32 %v348_v26, %v347_v31  ;;  %v5491_v48 = vunpack.c.h.bf16 %v6160_v35  ;;  %v354_v50 = vsel %vm340_vm0, %v5467_v22, 0.0  ;;  %v377_v52 = vsel %vm340_vm0, %v5479_v32, 0.0 }
  0x7e   : > { %v374_v51 = vadd.f32 %v373_v39, %v372_v41  ;;  %v13085_v54 = vunpack.c.l.bf16 %v6175_v44  ;;  %v1913_v55 = vsel %vm340_vm0, %v13079_v42, 0.0  ;;  %v1914_v56 = vsel %vm340_vm0, %v13078_v43, 0.0 }
  0x7f   : > { %v351_v49 = vadd.f32 %v350_v36, %v349_v40  ;;  %v1916_v57 = vsel %vm340_vm0, %v5490_v47, 0.0  ;;  %v13084_v60 = vunpack.c.h.bf16 %v6175_v44  ;;  %v1915_v62 = vadd.f32 %v1914_v56, %v1913_v55  ;;  %v6244_v56 = vld [vmem:[%s6088_s13 + $0x38] sm:$0xff]  }
  0x80   : > { %v376_v59 = vadd.f32 %v375_v46, %v374_v51  ;;  %v379_v11 = vsel %vm340_vm0, %v5482_v38, 0.0  ;;  %v381_v12 = vsel %vm340_vm0, %v5483_v45, 0.0  ;;  %v1918_v13 = vsel %vm340_vm0, %v5491_v48, 0.0  ;;  %13435 = vst [vmem:[#allocation20_spill] sm:$0xff] %v6244_v56 }
  0x81   : > { %v353_v58 = vadd.f32 %v352_v37, %v351_v49  ;;  %v13076_v16 = vunpack.c.l.bf16 %v6190_v53  ;;  %v1917_v26 = vadd.f32 %v1916_v57, %v1915_v62  ;;  %v13075_v28 = vunpack.c.h.bf16 %v6190_v53 }
  0x82   : > { %v378_v23 = vadd.f32 %v377_v52, %v376_v59  ;;  %v13083_v31 = vunpack.c.l.bf16 %v6204_v61  ;;  %v1920_v33 = vsel %vm340_vm0, %v13085_v54, 0.0  ;;  %v13073_v34 = vunpack.c.l.bf16 %v6207_v63 }
  0x83   : > { %v355_v18 = vadd.f32 %v354_v50, %v353_v58  ;;  %v13071_v36 = vunpack.c.h.bf16 %v6207_v63  ;;  %v13081_v39 = vunpack.c.h.bf16 %v6204_v61  ;;  %v1919_v40 = vadd.f32 %v1918_v13, %v1917_v26 }
  0x84   : > { %v380_v37 = vadd.f32 %v379_v11, %v378_v23  ;;  %v1922_v41 = vsel %vm340_vm0, %v13084_v60, 0.0  ;;  %v13069_v46 = vunpack.c.l.bf16 %v6221_v29  ;;  %v1939_v49 = vsel %vm340_vm0, %v13076_v16, 0.0 }
  0x85   : > { %356 = vadd.xlane.f32.xlu0 %v355_v18  ;;  %v1940_v50 = vsel %vm340_vm0, %v13075_v28, 0.0  ;;  %v1942_v51 = vsel %vm340_vm0, %v13073_v34, 0.0  ;;  %v1921_v55 = vadd.f32 %v1920_v33, %v1919_v40  ;;  %v1924_v58 = vsel %vm340_vm0, %v13083_v31, 0.0 }
  0x86   : > { %v382_v52 = vadd.f32 %v381_v12, %v380_v37  ;;  %v1941_v57 = vadd.f32 %v1940_v50, %v1939_v49  ;;  %v13068_v59 = vunpack.c.h.bf16 %v6221_v29  ;;  %v1944_v62 = vsel %vm340_vm0, %v13071_v36, 0.0 }
  0x87   : > { %v1923_v11 = vadd.f32 %v1922_v41, %v1921_v55  ;;  %v1926_v12 = vsel %vm340_vm0, %v13081_v39, 0.0  ;;  %v13070_v18 = vunpack.c.l.bf16 %v6244_v56  ;;  %v1946_v23 = vsel %vm340_vm0, %v13069_v46, 0.0 }
  0x88   : > { %v1943_v13 = vadd.f32 %v1942_v51, %v1941_v57  ;;  %v13072_v37 = vunpack.c.h.bf16 %v6244_v56  ;;  %v1948_v40 = vsel %vm340_vm0, %v13068_v59, 0.0  ;;  %v13074_v2 = vlaneseq }
  0x89   : > { %383 = vadd.xlane.f32.xlu0 %v382_v52  ;;  %v1925_v26 = vadd.f32 %v1924_v58, %v1923_v11  ;;  %v1950_v50 = vsel %vm340_vm0, %v13070_v18, 0.0 }
  0x8a   : > { %v1945_v33 = vadd.f32 %v1944_v62, %v1943_v13  ;;  %v1952_v52 = vsel %vm340_vm0, %v13072_v37, 0.0  ;;  %v6331_v7 = vshrl.u32 %v13074_v2, 7 }
  0x8b   : > { %v1927_v41 = vadd.f32 %v1926_v12, %v1925_v26 }
  0x8c   : > { %v1947_v49 = vadd.f32 %v1946_v23, %v1945_v33  ;;  %13446 = vst [vmem:[#allocation31_spill] sm:$0xff] %v6331_v7  ;;  %vm412_vm1 = vcmp.lt.s32.totalorder %v6331_v7, 1  ;;  %vm437_vm2 = vcmp.lt.s32.totalorder %v6331_v7, 7  ;;  %vm290_vm4 = vcmp.ge.s32.totalorder %v6331_v7, 1 }
  0x8d   : > { %1928 = vadd.xlane.f32.xlu1 %v1927_v41 }
  0x8e   : > { %v1949_v51 = vadd.f32 %v1948_v40, %v1947_v49 }
  0x90   : > { %v1951_v55 = vadd.f32 %v1950_v50, %v1949_v51 }
  0x92   : > { %v1953_v57 = vadd.f32 %v1952_v52, %v1951_v55 }
  0x94   : > { %1954 = vadd.xlane.f32.xlu0 %v1953_v57 }
 0x112   : > { %v357_v58 = vpop.xlane.xlu0 %356 }
 0x113   : > { %v358_v62 = vrot.slane %v357_v58, 4 }
 0x115   : > { %v359_v11 = vadd.f32 %v358_v62, %v357_v58 }
 0x116   : > { %v384_v13 = vpop.xlane.xlu0 %383 }
 0x117   : > { %v385_v59 = vrot.slane %v384_v13, 4  ;;  %v360_v12 = vrot.slane %v359_v11, 2 }
 0x119   : > { %v386_v23 = vadd.f32 %v385_v59, %v384_v13  ;;  %v361_v26 = vadd.f32 %v360_v12, %v359_v11 }
 0x11a   : > { %v1929_v18 = vpop.xlane.xlu1 %1928 }
 0x11b   : > { %v362_v33 = vrot.slane %v361_v26, 1  ;;  %v387_v46 = vrot.slane %v386_v23, 2  ;;  %v1930_v49 = vrot.slane %v1929_v18, 4 }
 0x11d   : > { %v363_v41 = vadd.f32 %v362_v33, %v361_v26  ;;  %v388_v40 = vadd.f32 %v387_v46, %v386_v23  ;;  %v1931_v37 = vadd.f32 %v1930_v49, %v1929_v18 }
 0x11f   : > { %5575 = vpush %v363_v41  ;;  %v389_v36 = vrot.slane %v388_v40, 1  ;;  %v1932_v51 = vrot.slane %v1931_v37, 2 }
 0x121   : > { %v390_v50 = vadd.f32 %v389_v36, %v388_v40  ;;  %v1955_v52 = vpop.xlane.xlu0 %1954  ;;  %v1933_v57 = vadd.f32 %v1932_v51, %v1931_v37 }
 0x122   : > { %v1956_v55 = vrot.slane %v1955_v52, 4 }
 0x123   : > { %5577 = vpush %v390_v50  ;;  %v1934_v62 = vrot.slane %v1933_v57, 1 }
 0x124   : > { %v1957_v58 = vadd.f32 %v1956_v55, %v1955_v52 }
 0x125   : > { %v1935_v34 = vadd.f32 %v1934_v62, %v1933_v57 }
 0x126   : > { %v1958_v59 = vrot.slane %v1957_v58, 2 }
 0x127   : > { %5579 = vpush %v1935_v34 }
 0x128   : > { %v1959_v11 = vadd.f32 %v1958_v59, %v1957_v58 }
 0x12a   : > { %v1960_v13 = vrot.slane %v1959_v11, 1 }
 0x12c   : > { %v1961_v12 = vadd.f32 %v1960_v13, %v1959_v11 }
 0x12e   : > { %5581 = vpush %v1961_v12 }
 0x150   : > { %s5576_s26 = spop %5575 }
 0x151   : > { %v365_v46 = vstv %s5576_s26  ;;  %s5318_s26 = sld [smem:[#allocation2 + $0x1f]] }
 0x152   : > { %v367_v18 = vmul.f32 0.00024414063, %v365_v46 }
 0x154   : > { %s5578_s22 = spop %5577 }
 0x155   : > { %v392_v23 = vstv %s5578_s22  ;;  %s5319_s22 = sld [smem:[#allocation2 + $0x55]] }
 0x156   : > { %v393_v36 = vmul.f32 0.00024414063, %v392_v23 }
 0x158   : > { %v394_v26 = vadd.f32 %v393_v36, %v367_v18  ;;  %s5580_s14 = spop %5579 }
 0x15a   : > { %v395_v33 = vmul.f32 0.5, %v394_v26 }
 0x15c   : > { %v6272_v37 = vsub.f32 %v5455_v4, %v395_v33  ;;  %v6276_v41 = vsub.f32 %v5454_v3, %v395_v33  ;;  %v6284_v34 = vsub.f32 %v5459_v6, %v395_v33  ;;  %v6288_v40 = vsub.f32 %v5458_v5, %v395_v33 }
 0x15d   : > { %v6296_v0 = vsub.f32 %v5463_v14, %v395_v33  ;;  %v6300_v3 = vsub.f32 %v5462_v10, %v395_v33  ;;  %v6308_v1 = vsub.f32 %v5467_v22, %v395_v33  ;;  %v6312_v4 = vsub.f32 %v5466_v15, %v395_v33 }
 0x15e   : > { %13436 = vst [vmem:[#allocation21_spill] sm:$0xff] %v6272_v37  ;;  %13437 = vst [vmem:[#allocation22_spill] sm:$0xff] %v6276_v41  ;;  %686 = vrot.lane.b32.xlu0 %v6272_v37, %s5863_s8  ;;  %683 = vrot.lane.b32.xlu1 %v6276_v41, %s5863_s8  ;;  %v6320_v5 = vsub.f32 %v5471_v20, %v395_v33  ;;  %v6324_v6 = vsub.f32 %v5470_v19, %v395_v33  ;;  %v404_v8 = vrot.slane %v6276_v41, 7 }
 0x15f   : > { %13438 = vst [vmem:[#allocation23_spill] sm:$0xff] %v6284_v34  ;;  %13439 = vst [vmem:[#allocation24_spill] sm:$0xff] %v6288_v40  ;;  %v6335_v10 = vsub.f32 %v5475_v24, %v395_v33  ;;  %v6339_v14 = vsub.f32 %v5474_v21, %v395_v33  ;;  %v411_v15 = vrot.slane %v6308_v1, 7  ;;  %v6350_v19 = vsub.f32 %v5479_v32, %v395_v33  ;;  %s5582_s20 = spop %5581 }
 0x160   : > { %13440 = vst [vmem:[#allocation25_spill] sm:$0xff] %v6296_v0  ;;  %13441 = vst [vmem:[#allocation26_spill] sm:$0xff] %v6300_v3  ;;  %v6354_v9 = vsub.f32 %v5478_v27, %v395_v33  ;;  %v6366_v21 = vsub.f32 %v5483_v45, %v395_v33  ;;  %v6370_v22 = vsub.f32 %v5482_v38, %v395_v33  ;;  %v405_v17 = vrot.slane %v6272_v37, 7 }
 0x161   : > { %13442 = vst [vmem:[#allocation27_spill] sm:$0xff] %v6308_v1  ;;  %13443 = vst [vmem:[#allocation28_spill] sm:$0xff] %v6312_v4  ;;  %v6362_v20 = vsel %vm412_vm1, %v411_v15, %v404_v8  ;;  %v406_v24 = vrot.slane %v6288_v40, 7  ;;  %v430_v27 = vrot.slane %v6272_v37, 1  ;;  %v431_v38 = vrot.slane %v6288_v40, 1 }
 0x162   : > { %692 = vrot.lane.b32.xlu0 %v6284_v34, %s5863_s8  ;;  %689 = vrot.lane.b32.xlu1 %v6288_v40, %s5863_s8  ;;  %13444 = vst [vmem:[#allocation29_spill] sm:$0xff] %v6320_v5  ;;  %13445 = vst [vmem:[#allocation30_spill] sm:$0xff] %v6324_v6  ;;  %v6381_v32 = vsel %vm412_vm1, %v404_v8, %v405_v17  ;;  %v407_v45 = vrot.slane %v6284_v34, 7  ;;  %v432_v49 = vrot.slane %v6284_v34, 1  ;;  %v433_v52 = vrot.slane %v6300_v3, 1 }
 0x163   : > { %13447 = vst [vmem:[#allocation32_spill] sm:$0xff] %v6335_v10  ;;  %13448 = vst [vmem:[#allocation33_spill] sm:$0xff] %v6339_v14  ;;  %v6385_v25 = vsel %vm412_vm1, %v405_v17, %v406_v24  ;;  %v6397_v50 = vsel %vm437_vm2, %v430_v27, %v431_v38  ;;  %v408_v55 = vrot.slane %v6300_v3, 7  ;;  %v434_v57 = vrot.slane %v6296_v0, 1 }
 0x164   : > { %13449 = vst [vmem:[#allocation34_spill] sm:$0xff] %v6350_v19  ;;  %13450 = vst [vmem:[#allocation35_spill] sm:$0xff] %v6354_v9  ;;  %v6401_v51 = vsel %vm412_vm1, %v406_v24, %v407_v45  ;;  %v6412_v58 = vsel %vm437_vm2, %v432_v49, %v433_v52  ;;  %v435_v59 = vrot.slane %v6312_v4, 1  ;;  %v409_v11 = vrot.slane %v6296_v0, 7 }
 0x165   : > { %13451 = vst [vmem:[#allocation36_spill] sm:$0xff] %v6366_v21  ;;  %13452 = vst [vmem:[#allocation37_spill] sm:$0xff] %v6370_v22  ;;  %v6416_v62 = vsel %vm412_vm1, %v407_v45, %v408_v55  ;;  %v13077_v13 = vrot.slane %v6324_v6, 7  ;;  %v1148_v23 = vrot.slane %v6320_v5, 7  ;;  %v410_v18 = vrot.slane %v6312_v4, 7 }
 0x166   : > { %698 = vrot.lane.b32.xlu0 %v6296_v0, %s5863_s8  ;;  %695 = vrot.lane.b32.xlu1 %v6300_v3, %s5863_s8  ;;  %13453 = vst [vmem:[#allocation38_spill] sm:$0xff] %v6412_v58  ;;  %v6427_v12 = vsel %vm437_vm2, %v434_v57, %v435_v59  ;;  %v6431_v46 = vsel %vm412_vm1, %v408_v55, %v409_v11  ;;  %v1149_v33 = vrot.slane %v6339_v14, 7  ;;  %v1150_v8 = vrot.slane %v6335_v10, 7 }
 0x167   : > { %13454 = vst [vmem:[#allocation39_spill] sm:$0xff] %v6427_v12  ;;  %v6443_v36 = vsel %vm412_vm1, %v13077_v13, %v1148_v23  ;;  %v6447_v26 = vsel %vm412_vm1, %v409_v11, %v410_v18  ;;  %v1151_v17 = vrot.slane %v6354_v9, 7  ;;  %v1937_v24 = vstv %s5580_s14  ;;  %s5324_s14 = sld [smem:[#allocation2 + $0x22]] }
 0x168   : > { %v1963_v45 = vstv %s5582_s20  ;;  %v6458_v55 = vsel %vm412_vm1, %v1149_v33, %v1150_v8  ;;  %v6462_v11 = vsel %vm412_vm1, %v410_v18, %v411_v15  ;;  %v1152_v2 = vrot.slane %v6350_v19, 7  ;;  %s5325_s20 = sld [smem:[#allocation2 + $0x58]] }
 0x169   : > { %v13080_v28 = vrot.slane %v6276_v41, 1  ;;  %v1938_v16 = vmul.f32 0.00024414063, %v1937_v24  ;;  %v1964_v13 = vmul.f32 0.00024414063, %v1963_v45  ;;  %v1153_v18 = vrot.slane %v6370_v22, 7 }
 0x16a   : > { %704 = vrot.lane.b32.xlu0 %v6308_v1, %s5863_s8  ;;  %701 = vrot.lane.b32.xlu1 %v6312_v4, %s5863_s8  ;;  %v6472_v43 = vsel %vm412_vm1, %v1151_v17, %v1152_v2  ;;  %v13082_v42 = vrot.slane %v6366_v21, 7  ;;  %v1173_v39 = vrot.slane %v6339_v14, 1  ;;  %v436_v31 = vrot.slane %v6308_v1, 1 }
 0x16b   : > { %v6478_v15 = vsel %vm437_vm2, %v13080_v28, %v430_v27  ;;  %v1965_v24 = vadd.f32 %v1964_v13, %v1938_v16  ;;  %v6494_v27 = vsel %vm437_vm2, %v431_v38, %v432_v49  ;;  %v1172_v28 = vrot.slane %v6320_v5, 1 }
 0x16c   : > { %13455 = vst [vmem:[#allocation40_spill] sm:$0xff] %v6478_v15  ;;  %v6490_v45 = vsel %vm412_vm1, %v1153_v18, %v13082_v42  ;;  %13456 = vst [vmem:[#allocation41_spill] sm:$0xff] %v6494_v27  ;;  %v6506_v13 = vsel %vm437_vm2, %v433_v52, %v434_v57  ;;  %v1174_v49 = vrot.slane %v6335_v10, 1  ;;  %v1175_v42 = vrot.slane %v6354_v9, 1 }
 0x16d   : > { %v6502_v16 = vmul.f32 0.5, %v1965_v24  ;;  %v6510_v38 = vsel %vm437_vm2, %v1172_v28, %v1173_v39  ;;  %v6535_v60 = vsel %vm437_vm2, %v435_v59, %v436_v31  ;;  %v1176_v54 = vrot.slane %v6350_v19, 1 }
 0x16e   : > { %1426 = vrot.lane.b32.xlu0 %v6320_v5, %s5863_s8  ;;  %1423 = vrot.lane.b32.xlu1 %v6324_v6, %s5863_s8  ;;  %v6531_v24 = vsel %vm437_vm2, %v1174_v49, %v1175_v42  ;;  %13461 = vst [vmem:[#allocation46_spill] sm:$0xff] %v6535_v60  ;;  %v1177_v56 = vrot.slane %v6370_v22, 1  ;;  %v13464_v59 = vunpack.c.h.bf16 %v6175_v44 }
 0x16f   : > { %13457 = vst [vmem:[#allocation42_spill] sm:$0xff] %v6502_v16  ;;  %v6522_v52 = vsub.f32 %v5490_v47, %v6502_v16  ;;  %v6527_v57 = vsub.f32 %v5491_v48, %v6502_v16  ;;  %13460 = vst [vmem:[#allocation45_spill] sm:$0xff] %v6531_v24  ;;  %v13462_v48 = vunpack.c.l.bf16 %v6175_v44 }
 0x170   : > { %v6553_v63 = vsub.f32 %v13464_v59, %v6502_v16  ;;  %v6557_v53 = vsel %vm437_vm2, %v1176_v54, %v1177_v56 }
 0x171   : > { %13458 = vst [vmem:[#allocation43_spill] sm:$0xff] %v6522_v52  ;;  %13459 = vst [vmem:[#allocation44_spill] sm:$0xff] %v6527_v57  ;;  %v1977_v35 = vrot.slane %v6522_v52, 7  ;;  %v1978_v47 = vrot.slane %v6527_v57, 7  ;;  %v6548_v29 = vsub.f32 %v13462_v48, %v6502_v16  ;;  %v13467_v48 = vunpack.c.l.bf16 %v6204_v61 }
 0x172   : > { %1432 = vrot.lane.b32.xlu0 %v6335_v10, %s5863_s8  ;;  %1429 = vrot.lane.b32.xlu1 %v6339_v14, %s5863_s8  ;;  %13465 = vst [vmem:[#allocation48_spill] sm:$0xff] %v6553_v63  ;;  %13466 = vst [vmem:[#allocation49_spill] sm:$0xff] %v6557_v53 }
 0x173   : > { %13463 = vst [vmem:[#allocation47_spill] sm:$0xff] %v6548_v29  ;;  %v6570_v44 = vsub.f32 %v13467_v48, %v6502_v16  ;;  %v6574_v59 = vsel %vm412_vm1, %v1977_v35, %v1978_v47  ;;  %v1979_v52 = vrot.slane %v6548_v29, 7 }
 0x174   : > { %13469 = vst [vmem:[#allocation51_spill] sm:$0xff] %v6574_v59 }
 0x175   : > { %13468 = vst [vmem:[#allocation50_spill] sm:$0xff] %v6570_v44  ;;  %v1981_v29 = vrot.slane %v6570_v44, 7 }
 0x176   : > { %1438 = vrot.lane.b32.xlu0 %v6350_v19, %s5863_s8  ;;  %1435 = vrot.lane.b32.xlu1 %v6354_v9, %s5863_s8 }
 0x17a   : > { %1444 = vrot.lane.b32.xlu0 %v6366_v21, %s5863_s8  ;;  %1441 = vrot.lane.b32.xlu1 %v6370_v22, %s5863_s8 }
 0x17e   : > { %458 = vrot.lane.b32.xlu1 %v6381_v32, %s5863_s8  ;;  %461 = vrot.lane.b32.xlu0 %v6385_v25, %s5863_s8 }
 0x182   : > { %914 = vrot.lane.b32.xlu0 %v6397_v50, %s5863_s8  ;;  %464 = vrot.lane.b32.xlu1 %v6401_v51, %s5863_s8 }
 0x186   : > { %920 = vrot.lane.b32.xlu0 %v6412_v58, %s5863_s8  ;;  %467 = vrot.lane.b32.xlu1 %v6416_v62, %s5863_s8 }
 0x18a   : > { %926 = vrot.lane.b32.xlu0 %v6427_v12, %s5863_s8  ;;  %470 = vrot.lane.b32.xlu1 %v6431_v46, %s5863_s8 }
 0x18e   : > { %1198 = vrot.lane.b32.xlu0 %v6443_v36, %s5863_s8  ;;  %473 = vrot.lane.b32.xlu1 %v6447_v26, %s5863_s8 }
 0x192   : > { %1204 = vrot.lane.b32.xlu0 %v6458_v55, %s5863_s8  ;;  %476 = vrot.lane.b32.xlu1 %v6462_v11, %s5863_s8 }
 0x196   : > { %1210 = vrot.lane.b32.xlu0 %v6472_v43, %s5863_s8  ;;  %911 = vrot.lane.b32.xlu1 %v6478_v15, %s5863_s8 }
 0x19a   : > { %1216 = vrot.lane.b32.xlu0 %v6490_v45, %s5863_s8  ;;  %917 = vrot.lane.b32.xlu1 %v6494_v27, %s5863_s8 }
 0x19e   : > { %1654 = vrot.lane.b32.xlu0 %v6510_v38, %s5863_s8  ;;  %923 = vrot.lane.b32.xlu1 %v6506_v13, %s5863_s8 }
 0x1a2   : > { %1660 = vrot.lane.b32.xlu0 %v6531_v24, %s5863_s8  ;;  %929 = vrot.lane.b32.xlu1 %v6535_v60, %s5863_s8  ;;  %v6561_v24 = vsel %vm412_vm1, %v1148_v23, %v1149_v33  ;;  %v1980_v23 = vrot.slane %v6553_v63, 7  ;;  %v13470_v33 = vunpack.c.h.bf16 %v6204_v61  ;;  %v13477_v63 = vrot.slane %v6276_v41, 1 }
 0x1a4   : > { %v6581_v57 = vsub.f32 %v13470_v33, %v6502_v16  ;;  %v6593_v48 = vsel %vm412_vm1, %v1979_v52, %v1980_v23  ;;  %v6599_v33 = vsel %vm412_vm1, %v1152_v2, %v1153_v18 }
 0x1a5   : > { %13472 = vst [vmem:[#allocation53_spill] sm:$0xff] %v6593_v48 }
 0x1a6   : > { %1666 = vrot.lane.b32.xlu0 %v6557_v53, %s5863_s8  ;;  %1201 = vrot.lane.b32.xlu1 %v6561_v24, %s5863_s8  ;;  %13471 = vst [vmem:[#allocation52_spill] sm:$0xff] %v6581_v57  ;;  %v6585_v53 = vsel %vm412_vm1, %v1150_v8, %v1151_v17  ;;  %v1982_v61 = vrot.slane %v6581_v57, 7  ;;  %v1171_v8 = vrot.slane %v6324_v6, 1  ;;  %v6607_v17 = vadd.s32 56, %v6331_v7 }
 0x1a7   : > { %v13475_v57 = vunpack.c.l.bf16 %v6153_v30 }
 0x1a8   : > { %13473 = vst [vmem:[#allocation54_spill] sm:$0xff] %v6607_v17  ;;  %v6611_v44 = vsel %vm412_vm1, %v1981_v29, %v1982_v61  ;;  %v6620_v18 = vsel %vm437_vm2, %v1171_v8, %v1172_v28  ;;  %vm305_vm3 = vcmp.lt.s32.totalorder %v6607_v17, 63  ;;  %v6635_v28 = vsel %vm437_vm2, %v1173_v39, %v1174_v49 }
 0x1a9   : > { %13474 = vst [vmem:[#allocation55_spill] sm:$0xff] %v6611_v44  ;;  %v6616_v2 = vsub.f32 %v13475_v57, %v6502_v16  ;;  %v1178_v57 = vrot.slane %v6366_v21, 1  ;;  %v6651_v39 = vsel %vm437_vm2, %v1175_v42, %v1176_v54 }
 0x1aa   : > { %2032 = vrot.lane.b32.xlu0 %v6574_v59, %s5863_s8  ;;  %1207 = vrot.lane.b32.xlu1 %v6585_v53, %s5863_s8 }
 0x1ab   : > { %13476 = vst [vmem:[#allocation56_spill] sm:$0xff] %v6616_v2  ;;  %v1975_v59 = vrot.slane %v6616_v2, 7  ;;  %v6673_v54 = vsel %vm437_vm2, %v1177_v56, %v1178_v57  ;;  %v6694_v56 = vsel %vm412_vm1, %v1978_v47, %v1979_v52  ;;  %v13484_v47 = vrot.slane %v6366_v21, 7 }
 0x1ac   : > { %13481 = vst [vmem:[#allocation59_spill] sm:$0xff] %v6694_v56 }
 0x1ae   : > { %2038 = vrot.lane.b32.xlu0 %v6593_v48, %s5863_s8  ;;  %1213 = vrot.lane.b32.xlu1 %v6599_v33, %s5863_s8  ;;  %v445_v48 = vsel %vm437_vm2, %v436_v31, %v13477_v63  ;;  %v1186_v63 = vsel %vm437_vm2, %v1178_v57, %v1171_v8  ;;  %v1990_v31 = vsel %vm412_vm1, %v1982_v61, %v1975_v59 }
 0x1af   : > { %v6655_v49 = vsel %vm305_vm3, %v1186_v63, 0.0  ;;  %v6669_v42 = vsel %vm290_vm4, %v1990_v31, 0.0  ;;  %v6707_v63 = vsel %vm290_vm4, %v6362_v20, 0.0 }
 0x1b2   : > { %2044 = vrot.lane.b32.xlu0 %v6611_v44, %s5863_s8  ;;  %1651 = vrot.lane.b32.xlu1 %v6620_v18, %s5863_s8  ;;  %v6639_v44 = vsel %vm305_vm3, %v445_v48, 0.0  ;;  %v13478_v48 = vunpack.c.h.bf16 %v6153_v30 }
 0x1b4   : > { %v6660_v2 = vsub.f32 %v13478_v48, %v6502_v16 }
 0x1b6   : > { %1657 = vrot.lane.b32.xlu1 %v6635_v28, %s5863_s8  ;;  %932 = vrot.lane.b32.xlu0 %v6639_v44, %s5863_s8  ;;  %13479 = vst [vmem:[#allocation57_spill] sm:$0xff] %v6660_v2  ;;  %v1976_v30 = vrot.slane %v6660_v2, 7 }
 0x1b8   : > { %v6682_v61 = vsel %vm412_vm1, %v1975_v59, %v1976_v30  ;;  %v6688_v8 = vsel %vm412_vm1, %v1976_v30, %v1977_v35  ;;  %v6700_v59 = vsel %vm412_vm1, %v1980_v23, %v1981_v29  ;;  %v13483_v29 = vrot.slane %v6324_v6, 7 }
 0x1b9   : > { %13480 = vst [vmem:[#allocation58_spill] sm:$0xff] %v6688_v8  ;;  %13482 = vst [vmem:[#allocation60_spill] sm:$0xff] %v6700_v59 }
 0x1ba   : > { %1663 = vrot.lane.b32.xlu1 %v6651_v39, %s5863_s8  ;;  %1672 = vrot.lane.b32.xlu0 %v6655_v49, %s5863_s8  ;;  %v1162_v23 = vsel %vm412_vm1, %v13484_v47, %v13483_v29 }
 0x1bb   : > { %v6722_v20 = vsel %vm290_vm4, %v1162_v23, 0.0 }
 0x1be   : > { %1669 = vrot.lane.b32.xlu1 %v6673_v54, %s5863_s8  ;;  %2023 = vrot.lane.b32.xlu0 %v6669_v42, %s5863_s8 }
 0x1c2   : > { %2026 = vrot.lane.b32.xlu1 %v6682_v61, %s5863_s8 }
 0x1c6   : > { %2029 = vrot.lane.b32.xlu1 %v6688_v8, %s5863_s8 }
 0x1ca   : > { %2035 = vrot.lane.b32.xlu1 %v6694_v56, %s5863_s8 }
 0x1ce   : > { %2041 = vrot.lane.b32.xlu1 %v6700_v59, %s5863_s8 }
 0x1d0   : > { %v684_v35 = vpop.permute.xlu1 %683  ;;  %v687_v57 = vpop.permute.xlu0 %686 }
 0x1d1   : > { %v688_v52 = vsel %vm454_vm5, %v687_v57, %v6272_v37  ;;  %v685_v16 = vsel %vm454_vm5, %v684_v35, %v6276_v41 }
 0x1d2   : > { %455 = vrot.lane.b32.xlu1 %v6707_v63, %s5863_s8  ;;  %709 = vrot.lane.b32.xlu0 %v688_v52, %s5863_s8 }
 0x1d4   : > { %v690_v31 = vpop.permute.xlu1 %689  ;;  %v693_v48 = vpop.permute.xlu0 %692 }
 0x1d5   : > { %v694_v30 = vsel %vm454_vm5, %v693_v48, %v6284_v34  ;;  %v691_v48 = vsel %vm454_vm5, %v690_v31, %v6288_v40 }
 0x1d6   : > { %1195 = vrot.lane.b32.xlu1 %v6722_v20, %s5863_s8  ;;  %713 = vrot.lane.b32.xlu0 %v694_v30, %s5863_s8 }
 0x1d8   : > { %v696_v57 = vpop.permute.xlu1 %695  ;;  %v699_v52 = vpop.permute.xlu0 %698 }
 0x1d9   : > { %v700_v29 = vsel %vm454_vm5, %v699_v52, %v6296_v0  ;;  %v697_v52 = vsel %vm454_vm5, %v696_v57, %v6300_v3 }
 0x1da   : > { %707 = vrot.lane.b32.xlu1 %v685_v16, %s5863_s8  ;;  %717 = vrot.lane.b32.xlu0 %v700_v29, %s5863_s8 }
 0x1dc   : > { %v702_v47 = vpop.permute.xlu1 %701  ;;  %v705_v23 = vpop.permute.xlu0 %704 }
 0x1dd   : > { %v706_v30 = vsel %vm454_vm5, %v705_v23, %v6308_v1  ;;  %v703_v23 = vsel %vm454_vm5, %v702_v47, %v6312_v4 }
 0x1de   : > { %711 = vrot.lane.b32.xlu1 %v691_v48, %s5863_s8  ;;  %721 = vrot.lane.b32.xlu0 %v706_v30, %s5863_s8 }
 0x1e0   : > { %v1424_v35 = vpop.permute.xlu1 %1423  ;;  %v1427_v17 = vpop.permute.xlu0 %1426 }
 0x1e1   : > { %v1428_v16 = vsel %vm454_vm5, %v1427_v17, %v6320_v5  ;;  %v1425_v17 = vsel %vm454_vm5, %v1424_v35, %v6324_v6 }
 0x1e2   : > { %715 = vrot.lane.b32.xlu1 %v697_v52, %s5863_s8  ;;  %1449 = vrot.lane.b32.xlu0 %v1428_v16, %s5863_s8 }
 0x1e4   : > { %v1430_v31 = vpop.permute.xlu1 %1429  ;;  %v1433_v29 = vpop.permute.xlu0 %1432 }
 0x1e5   : > { %v1434_v48 = vsel %vm454_vm5, %v1433_v29, %v6335_v10  ;;  %v1431_v29 = vsel %vm454_vm5, %v1430_v31, %v6339_v14 }
 0x1e6   : > { %719 = vrot.lane.b32.xlu1 %v703_v23, %s5863_s8  ;;  %1453 = vrot.lane.b32.xlu0 %v1434_v48, %s5863_s8 }
 0x1e8   : > { %v1436_v57 = vpop.permute.xlu1 %1435  ;;  %v1439_v30 = vpop.permute.xlu0 %1438 }
 0x1e9   : > { %v1440_v52 = vsel %vm454_vm5, %v1439_v30, %v6350_v19  ;;  %v1437_v30 = vsel %vm454_vm5, %v1436_v57, %v6354_v9 }
 0x1ea   : > { %1447 = vrot.lane.b32.xlu1 %v1425_v17, %s5863_s8  ;;  %1457 = vrot.lane.b32.xlu0 %v1440_v52, %s5863_s8 }
 0x1ec   : > { %v1442_v47 = vpop.permute.xlu1 %1441  ;;  %v1445_v16 = vpop.permute.xlu0 %1444 }
 0x1ed   : > { %v1446_v23 = vsel %vm454_vm5, %v1445_v16, %v6366_v21  ;;  %v1443_v16 = vsel %vm454_vm5, %v1442_v47, %v6370_v22 }
 0x1ee   : > { %1451 = vrot.lane.b32.xlu1 %v1431_v29, %s5863_s8  ;;  %1461 = vrot.lane.b32.xlu0 %v1446_v23, %s5863_s8 }
 0x1f0   : > { %v459_v35 = vpop.permute.xlu1 %458  ;;  %v462_v48 = vpop.permute.xlu0 %461 }
 0x1f1   : > { %v460_v17 = vsel %vm454_vm5, %v459_v35, %v6381_v32  ;;  %v463_v35 = vsel %vm454_vm5, %v462_v48, %v6385_v25 }
 0x1f2   : > { %1455 = vrot.lane.b32.xlu1 %v1437_v30, %s5863_s8  ;;  %481 = vrot.lane.b32.xlu0 %v460_v17, %s5863_s8 }
 0x1f4   : > { %v915_v31 = vpop.permute.xlu0 %914  ;;  %v465_v52 = vpop.permute.xlu1 %464 }
 0x1f5   : > { %v466_v29 = vsel %vm454_vm5, %v465_v52, %v6401_v51 }
 0x1f6   : > { %1459 = vrot.lane.b32.xlu1 %v1443_v16, %s5863_s8  ;;  %485 = vrot.lane.b32.xlu0 %v466_v29, %s5863_s8 }
 0x1f8   : > { %v921_v57 = vpop.permute.xlu0 %920  ;;  %v468_v23 = vpop.permute.xlu1 %467 }
 0x1f9   : > { %v469_v7 = vsel %vm454_vm5, %v468_v23, %v6416_v62 }
 0x1fa   : > { %483 = vrot.lane.b32.xlu1 %v463_v35, %s5863_s8 }
 0x1fc   : > { %v927_v30 = vpop.permute.xlu0 %926  ;;  %v471_v17 = vpop.permute.xlu1 %470 }
 0x1fd   : > { %v472_v47 = vsel %vm454_vm5, %v471_v17, %v6431_v46 }
 0x1fe   : > { %487 = vrot.lane.b32.xlu1 %v469_v7, %s5863_s8  ;;  %489 = vrot.lane.b32.xlu0 %v472_v47, %s5863_s8  ;;  %v916_v47 = vsel %vm454_vm5, %v915_v31, %v6397_v50 }
 0x200   : > { %v1199_v52 = vpop.permute.xlu0 %1198  ;;  %v474_v16 = vpop.permute.xlu1 %473 }
 0x201   : > { %v475_v29 = vsel %vm454_vm5, %v474_v16, %v6447_v26 }
 0x202   : > { %491 = vrot.lane.b32.xlu1 %v475_v29, %s5863_s8 }
 0x204   : > { %v1205_v48 = vpop.permute.xlu0 %1204  ;;  %v477_v35 = vpop.permute.xlu1 %476 }
 0x205   : > { %v478_v2 = vsel %vm454_vm5, %v477_v35, %v6462_v11 }
 0x206   : > { %493 = vrot.lane.b32.xlu0 %v478_v2, %s5863_s8  ;;  %v922_v2 = vsel %vm454_vm5, %v921_v57, %v6412_v58 }
 0x208   : > { %v1211_v23 = vpop.permute.xlu0 %1210  ;;  %v912_v17 = vpop.permute.xlu1 %911 }
 0x209   : > { %v913_v7 = vsel %vm454_vm5, %v912_v17, %v6478_v15 }
 0x20a   : > { %935 = vrot.lane.b32.xlu1 %v913_v7, %s5863_s8  ;;  %937 = vrot.lane.b32.xlu0 %v916_v47, %s5863_s8  ;;  %v928_v7 = vsel %vm454_vm5, %v927_v30, %v6427_v12 }
 0x20c   : > { %v1217_v16 = vpop.permute.xlu0 %1216  ;;  %v918_v29 = vpop.permute.xlu1 %917 }
 0x20d   : > { %v919_v59 = vsel %vm454_vm5, %v918_v29, %v6494_v27 }
 0x20e   : > { %939 = vrot.lane.b32.xlu1 %v919_v59, %s5863_s8  ;;  %941 = vrot.lane.b32.xlu0 %v922_v2, %s5863_s8  ;;  %v1200_v59 = vsel %vm454_vm5, %v1199_v52, %v6443_v36 }
 0x210   : > { %v1655_v35 = vpop.permute.xlu0 %1654  ;;  %v924_v17 = vpop.permute.xlu1 %923 }
 0x211   : > { %v925_v31 = vsel %vm454_vm5, %v924_v17, %v6506_v13  ;;  %v1206_v17 = vsel %vm454_vm5, %v1205_v48, %v6458_v55 }
 0x212   : > { %943 = vrot.lane.b32.xlu1 %v925_v31, %s5863_s8  ;;  %945 = vrot.lane.b32.xlu0 %v928_v7, %s5863_s8 }
 0x214   : > { %v930_v47 = vpop.permute.xlu1 %929  ;;  %v1661_v29 = vpop.permute.xlu0 %1660 }
 0x215   : > { %v931_v57 = vsel %vm454_vm5, %v930_v47, %v6535_v60  ;;  %v1212_v47 = vsel %vm454_vm5, %v1211_v23, %v6472_v43 }
 0x216   : > { %947 = vrot.lane.b32.xlu1 %v931_v57, %s5863_s8  ;;  %1221 = vrot.lane.b32.xlu0 %v1200_v59, %s5863_s8  ;;  %v1218_v59 = vsel %vm454_vm5, %v1217_v16, %v6490_v45 }
 0x218   : > { %v1202_v2 = vpop.permute.xlu1 %1201  ;;  %v1667_v31 = vpop.permute.xlu0 %1666 }
 0x219   : > { %v1203_v30 = vsel %vm454_vm5, %v1202_v2, %v6561_v24 }
 0x21a   : > { %1223 = vrot.lane.b32.xlu1 %v1203_v30, %s5863_s8  ;;  %1225 = vrot.lane.b32.xlu0 %v1206_v17, %s5863_s8  ;;  %v1656_v17 = vsel %vm454_vm5, %v1655_v35, %v6510_v38 }
 0x21c   : > { %v1208_v7 = vpop.permute.xlu1 %1207  ;;  %v2033_v2 = vpop.permute.xlu0 %2032 }
 0x21d   : > { %v1209_v52 = vsel %vm454_vm5, %v1208_v7, %v6585_v53 }
 0x21e   : > { %1227 = vrot.lane.b32.xlu1 %v1209_v52, %s5863_s8  ;;  %1229 = vrot.lane.b32.xlu0 %v1212_v47, %s5863_s8  ;;  %v13485_v47 = vld [vmem:[#allocation45_spill] sm:$0xff] }
 0x220   : > { %v1214_v57 = vpop.permute.xlu1 %1213  ;;  %v6840_v7 = vpop.permute.xlu0 %2038 }
 0x221   : > { %v1215_v48 = vsel %vm454_vm5, %v1214_v57, %v6599_v33  ;;  %v1662_v57 = vsel %vm454_vm5, %v1661_v29, %v13485_v47 }
 0x222   : > { %1231 = vrot.lane.b32.xlu1 %v1215_v48, %s5863_s8  ;;  %1233 = vrot.lane.b32.xlu0 %v1218_v59, %s5863_s8  ;;  %v13486_v59 = vld [vmem:[#allocation49_spill] sm:$0xff] }
 0x223   : > { %v1668_v35 = vsel %vm454_vm5, %v1667_v31, %v13486_v59 }
 0x224   : > { %v1652_v30 = vpop.permute.xlu1 %1651 }
 0x225   : > { %v1653_v23 = vsel %vm454_vm5, %v1652_v30, %v6620_v18 }
 0x226   : > { %1675 = vrot.lane.b32.xlu1 %v1653_v23, %s5863_s8  ;;  %1677 = vrot.lane.b32.xlu0 %v1656_v17, %s5863_s8  ;;  %v6852_v23 = vpop.permute.xlu0 %2044 }
 0x228   : > { %v1658_v52 = vpop.permute.xlu1 %1657 }
 0x229   : > { %v1659_v16 = vsel %vm454_vm5, %v1658_v52, %v6635_v28 }
 0x22a   : > { %1679 = vrot.lane.b32.xlu1 %v1659_v16, %s5863_s8  ;;  %1681 = vrot.lane.b32.xlu0 %v1662_v57, %s5863_s8  ;;  %v933_v52 = vpop.permute.xlu0 %932 }
 0x22c   : > { %v1664_v48 = vpop.permute.xlu1 %1663 }
 0x22d   : > { %v1665_v30 = vsel %vm454_vm5, %v1664_v48, %v6651_v39  ;;  %v13487_v48 = vld [vmem:[#allocation51_spill] sm:$0xff] }
 0x22e   : > { %1683 = vrot.lane.b32.xlu1 %v1665_v30, %s5863_s8  ;;  %1685 = vrot.lane.b32.xlu0 %v1668_v35, %s5863_s8  ;;  %v2034_v56 = vsel %vm454_vm5, %v2033_v2, %v13487_v48  ;;  %v1673_v30 = vpop.permute.xlu0 %1672 }
 0x22f   : > { %v1674_v2 = vsel %vm454_vm5, %v1673_v30, %v6655_v49 }
 0x230   : > { %v1670_v17 = vpop.permute.xlu1 %1669 }
 0x231   : > { %v1671_v29 = vsel %vm454_vm5, %v1670_v17, %v6673_v54 }
 0x232   : > { %1687 = vrot.lane.b32.xlu1 %v1671_v29, %s5863_s8  ;;  %v934_v29 = vsel %vm454_vm5, %v933_v52, %v6639_v44 }
 0x234   : > { %v2027_v16 = vpop.permute.xlu1 %2026 }
 0x235   : > { %v2028_v31 = vsel %vm454_vm5, %v2027_v16, %v6682_v61  ;;  %v2024_v16 = vpop.permute.xlu0 %2023 }
 0x236   : > { %2049 = vrot.lane.b32.xlu0 %v2028_v31, %s5863_s8 }
 0x238   : > { %v2030_v57 = vpop.permute.xlu1 %2029 }
 0x239   : > { %v2031_v35 = vsel %vm454_vm5, %v2030_v57, %v6688_v8 }
 0x23a   : > { %2051 = vrot.lane.b32.xlu1 %v2031_v35, %s5863_s8  ;;  %2053 = vrot.lane.b32.xlu0 %v2034_v56, %s5863_s8 }
 0x23c   : > { %v6868_v17 = vpop.permute.xlu1 %2035 }
 0x23e   : > { %949 = vrot.lane.b32.xlu0 %v934_v29, %s5863_s8 }
 0x240   : > { %v6873_v31 = vpop.permute.xlu1 %2041 }
 0x241   : > { %13488 = vst [vmem:[#allocation45_spill] sm:$0xff] %v6873_v31 }
 0x242   : > { %1689 = vrot.lane.b32.xlu0 %v1674_v2, %s5863_s8 }
 0x244   : > { %v456_v57 = vpop.permute.xlu1 %455  ;;  %v710_v8 = vpop.permute.xlu0 %709 }
 0x245   : > { %v457_v56 = vsel %vm454_vm5, %v456_v57, %v6707_v63  ;;  %v724_v35 = vsel %vm454_vm5, %v710_v8, %v6272_v37  ;;  %v2025_v8 = vsel %vm454_vm5, %v2024_v16, %v6669_v42 }
 0x246   : > { %479 = vrot.lane.b32.xlu1 %v457_v56, %s5863_s8  ;;  %741 = vrot.lane.b32.xlu0 %v724_v35, %s5864_s5 }
 0x248   : > { %v1196_v52 = vpop.permute.xlu1 %1195  ;;  %v714_v29 = vpop.permute.xlu0 %713 }
 0x249   : > { %v1197_v30 = vsel %vm454_vm5, %v1196_v52, %v6722_v20  ;;  %v726_v2 = vsel %vm454_vm5, %v714_v29, %v6284_v34 }
 0x24a   : > { %1219 = vrot.lane.b32.xlu1 %v1197_v30, %s5863_s8  ;;  %745 = vrot.lane.b32.xlu0 %v726_v2, %s5864_s5 }
 0x24c   : > { %v708_v57 = vpop.permute.xlu1 %707  ;;  %v718_v31 = vpop.permute.xlu0 %717 }
 0x24d   : > { %v728_v56 = vsel %vm454_vm5, %v718_v31, %v6296_v0  ;;  %v723_v29 = vsel %vm454_vm5, %v708_v57, %v6276_v41 }
 0x24e   : > { %2047 = vrot.lane.b32.xlu1 %v2025_v8, %s5863_s8  ;;  %749 = vrot.lane.b32.xlu0 %v728_v56, %s5864_s5 }
 0x250   : > { %v712_v52 = vpop.permute.xlu1 %711  ;;  %v722_v37 = vpop.permute.xlu0 %721 }
 0x251   : > { %v730_v30 = vsel %vm454_vm5, %v722_v37, %v6308_v1  ;;  %v725_v31 = vsel %vm454_vm5, %v712_v52, %v6288_v40 }
 0x252   : > { %739 = vrot.lane.b32.xlu1 %v723_v29, %s5864_s5  ;;  %753 = vrot.lane.b32.xlu0 %v730_v30, %s5864_s5 }
 0x254   : > { %v716_v16 = vpop.permute.xlu1 %715  ;;  %v1450_v34 = vpop.permute.xlu0 %1449 }
 0x255   : > { %v727_v57 = vsel %vm454_vm5, %v716_v16, %v6300_v3  ;;  %v1464_v3 = vsel %vm454_vm5, %v1450_v34, %v6320_v5 }
 0x256   : > { %743 = vrot.lane.b32.xlu1 %v725_v31, %s5864_s5  ;;  %845 = vrot.lane.b32.xlu0 %v724_v35, %s13317_s12 }
 0x258   : > { %v720_v8 = vpop.permute.xlu1 %719  ;;  %v1454_v0 = vpop.permute.xlu0 %1453 }
 0x259   : > { %v729_v41 = vsel %vm454_vm5, %v720_v8, %v6312_v4  ;;  %v1466_v8 = vsel %vm454_vm5, %v1454_v0, %v6335_v10 }
 0x25a   : > { %747 = vrot.lane.b32.xlu1 %v727_v57, %s5864_s5  ;;  %849 = vrot.lane.b32.xlu0 %v726_v2, %s13317_s12 }
 0x25c   : > { %v1448_v37 = vpop.permute.xlu1 %1447  ;;  %v1458_v1 = vpop.permute.xlu0 %1457 }
 0x25e   : > { %751 = vrot.lane.b32.xlu1 %v729_v41, %s5864_s5  ;;  %853 = vrot.lane.b32.xlu0 %v728_v56, %s13317_s12 }
 0x260   : > { %v1452_v52 = vpop.permute.xlu1 %1451  ;;  %v1462_v35 = vpop.permute.xlu0 %1461 }
 0x261   : > { %v1470_v0 = vsel %vm454_vm5, %v1462_v35, %v6366_v21 }
 0x262   : > { %843 = vrot.lane.b32.xlu1 %v723_v29, %s13317_s12  ;;  %857 = vrot.lane.b32.xlu0 %v730_v30, %s13317_s12  ;;  %v1468_v29 = vsel %vm454_vm5, %v1458_v1, %v6350_v19  ;;  %v1463_v30 = vsel %vm454_vm5, %v1448_v37, %v6324_v6  ;;  %v1465_v1 = vsel %vm454_vm5, %v1452_v52, %v6339_v14 }
 0x264   : > { %v1456_v16 = vpop.permute.xlu1 %1455  ;;  %v482_v4 = vpop.permute.xlu0 %481 }
 0x265   : > { %v1467_v37 = vsel %vm454_vm5, %v1456_v16, %v6354_v9 }
 0x266   : > { %847 = vrot.lane.b32.xlu1 %v725_v31, %s13317_s12  ;;  %1481 = vrot.lane.b32.xlu0 %v1464_v3, %s5864_s5 }
 0x268   : > { %v1460_v2 = vpop.permute.xlu1 %1459  ;;  %v486_v34 = vpop.permute.xlu0 %485 }
 0x269   : > { %v1469_v21 = vsel %vm454_vm5, %v1460_v2, %v6370_v22 }
 0x26a   : > { %851 = vrot.lane.b32.xlu1 %v727_v57, %s13317_s12  ;;  %1485 = vrot.lane.b32.xlu0 %v1466_v8, %s5864_s5 }
 0x26c   : > { %v484_v56 = vpop.permute.xlu1 %483 }
 0x26e   : > { %855 = vrot.lane.b32.xlu1 %v729_v41, %s13317_s12  ;;  %1489 = vrot.lane.b32.xlu0 %v1468_v29, %s5864_s5 }
 0x270   : > { %v488_v31 = vpop.permute.xlu1 %487  ;;  %v490_v57 = vpop.permute.xlu0 %489 }
 0x272   : > { %1479 = vrot.lane.b32.xlu1 %v1463_v30, %s5864_s5  ;;  %1493 = vrot.lane.b32.xlu0 %v1470_v0, %s5864_s5 }
 0x274   : > { %v492_v41 = vpop.permute.xlu1 %491 }
 0x276   : > { %1483 = vrot.lane.b32.xlu1 %v1465_v1, %s5864_s5  ;;  %1585 = vrot.lane.b32.xlu0 %v1464_v3, %s13317_s12 }
 0x278   : > { %v494_v19 = vpop.permute.xlu0 %493 }
 0x27a   : > { %1487 = vrot.lane.b32.xlu1 %v1467_v37, %s5864_s5  ;;  %1589 = vrot.lane.b32.xlu0 %v1466_v8, %s13317_s12  ;;  %v496_v8 = vsel %vm454_vm5, %v482_v4, %v6381_v32  ;;  %v500_v4 = vsel %vm454_vm5, %v490_v57, %v6431_v46 }
 0x27c   : > { %v936_v35 = vpop.permute.xlu1 %935  ;;  %v938_v6 = vpop.permute.xlu0 %937 }
 0x27e   : > { %1491 = vrot.lane.b32.xlu1 %v1469_v21, %s5864_s5  ;;  %1593 = vrot.lane.b32.xlu0 %v1468_v29, %s13317_s12  ;;  %v498_v29 = vsel %vm454_vm5, %v486_v34, %v6401_v51  ;;  %v497_v34 = vsel %vm454_vm5, %v484_v56, %v6385_v25 }
 0x280   : > { %v940_v52 = vpop.permute.xlu1 %939  ;;  %v942_v3 = vpop.permute.xlu0 %941 }
 0x282   : > { %1583 = vrot.lane.b32.xlu1 %v1463_v30, %s13317_s12  ;;  %1597 = vrot.lane.b32.xlu0 %v1470_v0, %s13317_s12 }
 0x284   : > { %v944_v16 = vpop.permute.xlu1 %943  ;;  %v946_v9 = vpop.permute.xlu0 %945 }
 0x286   : > { %1587 = vrot.lane.b32.xlu1 %v1465_v1, %s13317_s12  ;;  %513 = vrot.lane.b32.xlu0 %v496_v8, %s5864_s5 }
 0x288   : > { %v948_v2 = vpop.permute.xlu1 %947  ;;  %v6952_v22 = vpop.permute.xlu0 %1221 }
 0x28a   : > { %1591 = vrot.lane.b32.xlu1 %v1467_v37, %s13317_s12  ;;  %517 = vrot.lane.b32.xlu0 %v498_v29, %s5864_s5  ;;  %v502_v37 = vsel %vm454_vm5, %v494_v19, %v6462_v11  ;;  %v501_v19 = vsel %vm454_vm5, %v492_v41, %v6447_v26  ;;  %v952_v41 = vsel %vm454_vm5, %v938_v6, %v6397_v50 }
 0x28b   : > { %v953_v6 = vsel %vm454_vm5, %v940_v52, %v6494_v27 }
 0x28c   : > { %v6958_v30 = vpop.permute.xlu1 %1223  ;;  %v6960_v0 = vpop.permute.xlu0 %1225 }
 0x28e   : > { %1595 = vrot.lane.b32.xlu1 %v1469_v21, %s13317_s12  ;;  %521 = vrot.lane.b32.xlu0 %v500_v4, %s5864_s5  ;;  %v499_v21 = vsel %vm454_vm5, %v488_v31, %v6416_v62 }
 0x290   : > { %v6966_v1 = vpop.permute.xlu0 %1229  ;;  %v6972_v14 = vpop.permute.xlu1 %1227 }
 0x292   : > { %515 = vrot.lane.b32.xlu1 %v497_v34, %s5864_s5  ;;  %525 = vrot.lane.b32.xlu0 %v502_v37, %s5864_s5 }
 0x294   : > { %v6976_v10 = vpop.permute.xlu0 %1233  ;;  %v6982_v57 = vpop.permute.xlu1 %1231 }
 0x296   : > { %519 = vrot.lane.b32.xlu1 %v499_v21, %s5864_s5  ;;  %617 = vrot.lane.b32.xlu0 %v496_v8, %s13317_s12 }
 0x298   : > { %v6984_v56 = vpop.permute.xlu0 %1677  ;;  %v6990_v5 = vpop.permute.xlu1 %1675 }
 0x29a   : > { %523 = vrot.lane.b32.xlu1 %v501_v19, %s5864_s5  ;;  %621 = vrot.lane.b32.xlu0 %v498_v29, %s13317_s12 }
 0x29c   : > { %v6992_v40 = vpop.permute.xlu0 %1681  ;;  %v6998_v31 = vpop.permute.xlu1 %1679 }
 0x29e   : > { %619 = vrot.lane.b32.xlu1 %v497_v34, %s13317_s12  ;;  %625 = vrot.lane.b32.xlu0 %v500_v4, %s13317_s12  ;;  %v951_v4 = vsel %vm454_vm5, %v936_v35, %v6478_v15  ;;  %v954_v34 = vsel %vm454_vm5, %v942_v3, %v6412_v58  ;;  %v955_v15 = vsel %vm454_vm5, %v944_v16, %v6506_v13 }
 0x2a0   : > { %v7000_v8 = vpop.permute.xlu0 %1685 }
 0x2a2   : > { %623 = vrot.lane.b32.xlu1 %v499_v21, %s13317_s12  ;;  %629 = vrot.lane.b32.xlu0 %v502_v37, %s13317_s12  ;;  %v7012_v37 = vpop.permute.xlu1 %1683 }
 0x2a6   : > { %627 = vrot.lane.b32.xlu1 %v501_v19, %s13317_s12  ;;  %969 = vrot.lane.b32.xlu0 %v952_v41, %s5864_s5  ;;  %v956_v19 = vsel %vm454_vm5, %v946_v9, %v6427_v12  ;;  %v7024_v35 = vpop.permute.xlu1 %1687  ;;  %v957_v9 = vsel %vm454_vm5, %v948_v2, %v6535_v60  ;;  %v1236_v2 = vsel %vm454_vm5, %v6952_v22, %v6443_v36 }
 0x2a7   : > { %v1240_v22 = vsel %vm454_vm5, %v6966_v1, %v6472_v43 }
 0x2a8   : > { %v7006_v29 = vpop.permute.xlu0 %2049 }
 0x2aa   : > { %967 = vrot.lane.b32.xlu1 %v951_v4, %s5864_s5  ;;  %973 = vrot.lane.b32.xlu0 %v954_v34, %s5864_s5 }
 0x2ac   : > { %v7016_v21 = vpop.permute.xlu0 %2053  ;;  %v7032_v58 = vpop.permute.xlu1 %2051 }
 0x2ae   : > { %971 = vrot.lane.b32.xlu1 %v953_v6, %s5864_s5  ;;  %977 = vrot.lane.b32.xlu0 %v956_v19, %s5864_s5 }
 0x2b0   : > { %v7026_v3 = vpop.permute.xlu0 %949 }
 0x2b2   : > { %975 = vrot.lane.b32.xlu1 %v955_v15, %s5864_s5  ;;  %1073 = vrot.lane.b32.xlu0 %v952_v41, %s13317_s12 }
 0x2b4   : > { %v7034_v52 = vpop.permute.xlu0 %1689 }
 0x2b6   : > { %979 = vrot.lane.b32.xlu1 %v957_v9, %s5864_s5  ;;  %1077 = vrot.lane.b32.xlu0 %v954_v34, %s13317_s12 }
 0x2b8   : > { %v7040_v27 = vpop.permute.xlu1 %479  ;;  %v7042_v12 = vpop.permute.xlu0 %741 }
 0x2b9   : > { %13489 = vst [vmem:[#allocation49_spill] sm:$0xff] %v7042_v12 }
 0x2ba   : > { %1071 = vrot.lane.b32.xlu1 %v951_v4, %s13317_s12  ;;  %1081 = vrot.lane.b32.xlu0 %v956_v19, %s13317_s12  ;;  %v1238_v4 = vsel %vm454_vm5, %v6960_v0, %v6458_v55  ;;  %v1242_v0 = vsel %vm454_vm5, %v6976_v10, %v6490_v45  ;;  %v1241_v10 = vsel %vm454_vm5, %v6982_v57, %v6599_v33 }
 0x2bc   : > { %v7046_v16 = vpop.permute.xlu1 %1219  ;;  %v7048_v41 = vpop.permute.xlu0 %745 }
 0x2bd   : > { %13490 = vst [vmem:[#allocation51_spill] sm:$0xff] %v7048_v41 }
 0x2be   : > { %1075 = vrot.lane.b32.xlu1 %v953_v6, %s13317_s12  ;;  %1253 = vrot.lane.b32.xlu0 %v1236_v2, %s5864_s5 }
 0x2c0   : > { %v7055_v34 = vpop.permute.xlu1 %2047  ;;  %v7057_v60 = vpop.permute.xlu0 %749 }
 0x2c1   : > { %13491 = vst [vmem:[#allocation61_spill] sm:$0xff] %v7057_v60 }
 0x2c2   : > { %1079 = vrot.lane.b32.xlu1 %v955_v15, %s13317_s12  ;;  %1257 = vrot.lane.b32.xlu0 %v1238_v4, %s5864_s5  ;;  %v1237_v15 = vsel %vm454_vm5, %v6958_v30, %v6561_v24 }
 0x2c4   : > { %v7064_v19 = vpop.permute.xlu1 %739  ;;  %v7066_v41 = vpop.permute.xlu0 %753 }
 0x2c5   : > { %13492 = vst [vmem:[#allocation62_spill] sm:$0xff] %v7064_v19  ;;  %13493 = vst [vmem:[#allocation63_spill] sm:$0xff] %v7066_v41 }
 0x2c6   : > { %1083 = vrot.lane.b32.xlu1 %v957_v9, %s13317_s12  ;;  %1261 = vrot.lane.b32.xlu0 %v1240_v22, %s5864_s5 }
 0x2c8   : > { %v7073_v6 = vpop.permute.xlu1 %743  ;;  %v7075_v60 = vpop.permute.xlu0 %845 }
 0x2c9   : > { %13494 = vst [vmem:[#allocation64_spill] sm:$0xff] %v7073_v6  ;;  %13495 = vst [vmem:[#allocation65_spill] sm:$0xff] %v7075_v60  ;;  %v1239_v60 = vsel %vm454_vm5, %v6972_v14, %v6585_v53 }
 0x2ca   : > { %1255 = vrot.lane.b32.xlu1 %v1237_v15, %s5864_s5  ;;  %1265 = vrot.lane.b32.xlu0 %v1242_v0, %s5864_s5 }
 0x2cc   : > { %v7085_v1 = vpop.permute.xlu1 %747  ;;  %v7087_v9 = vpop.permute.xlu0 %849 }
 0x2cd   : > { %13496 = vst [vmem:[#allocation66_spill] sm:$0xff] %v7085_v1  ;;  %13497 = vst [vmem:[#allocation67_spill] sm:$0xff] %v7087_v9 }
 0x2ce   : > { %1259 = vrot.lane.b32.xlu1 %v1239_v60, %s5864_s5  ;;  %1357 = vrot.lane.b32.xlu0 %v1236_v2, %s13317_s12 }
 0x2d0   : > { %v7094_v30 = vpop.permute.xlu1 %751  ;;  %v7096_v6 = vpop.permute.xlu0 %853 }
 0x2d1   : > { %13498 = vst [vmem:[#allocation68_spill] sm:$0xff] %v7094_v30  ;;  %13499 = vst [vmem:[#allocation69_spill] sm:$0xff] %v7096_v6 }
 0x2d2   : > { %1263 = vrot.lane.b32.xlu1 %v1241_v10, %s5864_s5  ;;  %1361 = vrot.lane.b32.xlu0 %v1238_v4, %s13317_s12  ;;  %v1692_v4 = vsel %vm454_vm5, %v6984_v56, %v6510_v38 }
 0x2d4   : > { %v7103_v9 = vpop.permute.xlu1 %843  ;;  %v7105_v1 = vpop.permute.xlu0 %857 }
 0x2d5   : > { %13500 = vst [vmem:[#allocation70_spill] sm:$0xff] %v7103_v9  ;;  %13501 = vst [vmem:[#allocation71_spill] sm:$0xff] %v7105_v1 }
 0x2d6   : > { %1359 = vrot.lane.b32.xlu1 %v1237_v15, %s13317_s12  ;;  %1365 = vrot.lane.b32.xlu0 %v1240_v22, %s13317_s12 }
 0x2d8   : > { %v7109_v14 = vpop.permute.xlu1 %847  ;;  %v7111_v2 = vpop.permute.xlu0 %1481 }
 0x2d9   : > { %13502 = vst [vmem:[#allocation72_spill] sm:$0xff] %v7109_v14  ;;  %13503 = vst [vmem:[#allocation73_spill] sm:$0xff] %v7111_v2 }
 0x2da   : > { %1363 = vrot.lane.b32.xlu1 %v1239_v60, %s13317_s12  ;;  %1369 = vrot.lane.b32.xlu0 %v1242_v0, %s13317_s12  ;;  %v1691_v60 = vsel %vm454_vm5, %v6990_v5, %v6620_v18  ;;  %v1694_v0 = vsel %vm454_vm5, %v6992_v40, %v13485_v47  ;;  %v1696_v5 = vsel %vm454_vm5, %v7000_v8, %v13486_v59 }
 0x2db   : > { %v1697_v8 = vsel %vm454_vm5, %v7024_v35, %v6673_v54  ;;  %v958_v35 = vsel %vm454_vm5, %v7026_v3, %v6639_v44  ;;  %v1698_v3 = vsel %vm454_vm5, %v7034_v52, %v6655_v49  ;;  %v13526_v52 = vld [vmem:[#allocation53_spill] sm:$0xff] }
 0x2dc   : > { %v7115_v57 = vpop.permute.xlu1 %851  ;;  %v7117_v6 = vpop.permute.xlu0 %1485 }
 0x2dd   : > { %13504 = vst [vmem:[#allocation74_spill] sm:$0xff] %v7115_v57  ;;  %13505 = vst [vmem:[#allocation75_spill] sm:$0xff] %v7117_v6 }
 0x2de   : > { %1367 = vrot.lane.b32.xlu1 %v1241_v10, %s13317_s12  ;;  %1709 = vrot.lane.b32.xlu0 %v1692_v4, %s5864_s5 }
 0x2e0   : > { %v7124_v22 = vpop.permute.xlu1 %855  ;;  %v7126_v15 = vpop.permute.xlu0 %1489 }
 0x2e1   : > { %13506 = vst [vmem:[#allocation76_spill] sm:$0xff] %v7124_v22  ;;  %13507 = vst [vmem:[#allocation77_spill] sm:$0xff] %v7126_v15  ;;  %v1693_v15 = vsel %vm454_vm5, %v6998_v31, %v6635_v28 }
 0x2e2   : > { %1707 = vrot.lane.b32.xlu1 %v1691_v60, %s5864_s5  ;;  %1713 = vrot.lane.b32.xlu0 %v1694_v0, %s5864_s5 }
 0x2e4   : > { %v7136_v56 = vpop.permute.xlu1 %1479  ;;  %v7138_v10 = vpop.permute.xlu0 %1493 }
 0x2e5   : > { %13508 = vst [vmem:[#allocation78_spill] sm:$0xff] %v7136_v56  ;;  %13509 = vst [vmem:[#allocation79_spill] sm:$0xff] %v7138_v10  ;;  %v1695_v10 = vsel %vm454_vm5, %v7012_v37, %v6651_v39 }
 0x2e6   : > { %1711 = vrot.lane.b32.xlu1 %v1693_v15, %s5864_s5  ;;  %1717 = vrot.lane.b32.xlu0 %v1696_v5, %s5864_s5 }
 0x2e8   : > { %v7148_v40 = vpop.permute.xlu1 %1483  ;;  %v7150_v22 = vpop.permute.xlu0 %1585 }
 0x2e9   : > { %13510 = vst [vmem:[#allocation80_spill] sm:$0xff] %v7148_v40  ;;  %13511 = vst [vmem:[#allocation81_spill] sm:$0xff] %v7150_v22 }
 0x2ea   : > { %1715 = vrot.lane.b32.xlu1 %v1695_v10, %s5864_s5  ;;  %1813 = vrot.lane.b32.xlu0 %v1692_v4, %s13317_s12 }
 0x2ec   : > { %v7157_v31 = vpop.permute.xlu1 %1487  ;;  %v7159_v56 = vpop.permute.xlu0 %1589 }
 0x2ed   : > { %13512 = vst [vmem:[#allocation82_spill] sm:$0xff] %v7157_v31  ;;  %13513 = vst [vmem:[#allocation83_spill] sm:$0xff] %v7159_v56 }
 0x2ee   : > { %1719 = vrot.lane.b32.xlu1 %v1697_v8, %s5864_s5  ;;  %1817 = vrot.lane.b32.xlu0 %v1694_v0, %s13317_s12 }
 0x2f0   : > { %v7166_v22 = vpop.permute.xlu1 %1491  ;;  %v7168_v40 = vpop.permute.xlu0 %1593 }
 0x2f1   : > { %13514 = vst [vmem:[#allocation84_spill] sm:$0xff] %v7166_v22  ;;  %13515 = vst [vmem:[#allocation85_spill] sm:$0xff] %v7168_v40 }
 0x2f2   : > { %1811 = vrot.lane.b32.xlu1 %v1691_v60, %s13317_s12  ;;  %1821 = vrot.lane.b32.xlu0 %v1696_v5, %s13317_s12 }
 0x2f4   : > { %v7172_v37 = vpop.permute.xlu1 %1583  ;;  %v7174_v4 = vpop.permute.xlu0 %1597 }
 0x2f5   : > { %13516 = vst [vmem:[#allocation86_spill] sm:$0xff] %v7172_v37  ;;  %13517 = vst [vmem:[#allocation87_spill] sm:$0xff] %v7174_v4 }
 0x2f6   : > { %1815 = vrot.lane.b32.xlu1 %v1693_v15, %s13317_s12  ;;  %981 = vrot.lane.b32.xlu0 %v958_v35, %s5864_s5 }
 0x2f8   : > { %v7181_v0 = vpop.permute.xlu1 %1587  ;;  %v7183_v22 = vpop.permute.xlu0 %513 }
 0x2f9   : > { %13518 = vst [vmem:[#allocation88_spill] sm:$0xff] %v7181_v0  ;;  %13519 = vst [vmem:[#allocation89_spill] sm:$0xff] %v7183_v22 }
 0x2fa   : > { %1819 = vrot.lane.b32.xlu1 %v1695_v10, %s13317_s12  ;;  %1085 = vrot.lane.b32.xlu0 %v958_v35, %s13317_s12  ;;  %v495_v10 = vsel %vm454_vm5, %v7040_v27, %v6707_v63  ;;  %v1235_v27 = vsel %vm454_vm5, %v7046_v16, %v6722_v20 }
 0x2fc   : > { %v7187_v60 = vpop.permute.xlu1 %1591  ;;  %v7189_v5 = vpop.permute.xlu0 %517 }
 0x2fd   : > { %13520 = vst [vmem:[#allocation90_spill] sm:$0xff] %v7187_v60  ;;  %13521 = vst [vmem:[#allocation91_spill] sm:$0xff] %v7189_v5 }
 0x2fe   : > { %1823 = vrot.lane.b32.xlu1 %v1697_v8, %s13317_s12  ;;  %1721 = vrot.lane.b32.xlu0 %v1698_v3, %s5864_s5  ;;  %v2040_v8 = vsel %vm454_vm5, %v6840_v7, %v13526_v52 }
 0x300   : > { %v7196_v15 = vpop.permute.xlu1 %1595  ;;  %v7198_v0 = vpop.permute.xlu0 %521 }
 0x301   : > { %13522 = vst [vmem:[#allocation92_spill] sm:$0xff] %v7196_v15  ;;  %13523 = vst [vmem:[#allocation93_spill] sm:$0xff] %v7198_v0 }
 0x302   : > { %511 = vrot.lane.b32.xlu1 %v495_v10, %s5864_s5  ;;  %1825 = vrot.lane.b32.xlu0 %v1698_v3, %s13317_s12  ;;  %v13529_v3 = vld [vmem:[#allocation55_spill] sm:$0xff] }
 0x304   : > { %v7205_v35 = vpop.permute.xlu1 %515  ;;  %v7207_v60 = vpop.permute.xlu0 %525 }
 0x305   : > { %13524 = vst [vmem:[#allocation94_spill] sm:$0xff] %v7205_v35  ;;  %13525 = vst [vmem:[#allocation95_spill] sm:$0xff] %v7207_v60  ;;  %v2046_v60 = vsel %vm454_vm5, %v6852_v23, %v13529_v3 }
 0x306   : > { %615 = vrot.lane.b32.xlu1 %v495_v10, %s13317_s12  ;;  %2057 = vrot.lane.b32.xlu0 %v2040_v8, %s5863_s8  ;;  %v7233_v8 = vsel %vm454_vm5, %v7006_v29, %v6682_v61 }
 0x308   : > { %v7214_v15 = vpop.permute.xlu1 %519  ;;  %v7216_v0 = vpop.permute.xlu0 %617 }
 0x309   : > { %13527 = vst [vmem:[#allocation53_spill] sm:$0xff] %v7214_v15  ;;  %13528 = vst [vmem:[#allocation96_spill] sm:$0xff] %v7216_v0  ;;  %v13534_v15 = vld [vmem:[#allocation59_spill] sm:$0xff] }
 0x30a   : > { %1251 = vrot.lane.b32.xlu1 %v1235_v27, %s5864_s5  ;;  %2061 = vrot.lane.b32.xlu0 %v2046_v60, %s5863_s8  ;;  %v2037_v60 = vsel %vm454_vm5, %v6868_v17, %v13534_v15 }
 0x30c   : > { %v7226_v7 = vpop.permute.xlu1 %523  ;;  %v7228_v10 = vpop.permute.xlu0 %621 }
 0x30d   : > { %13530 = vst [vmem:[#allocation55_spill] sm:$0xff] %v7226_v7  ;;  %13531 = vst [vmem:[#allocation97_spill] sm:$0xff] %v7228_v10  ;;  %v7248_v7 = vsel %vm454_vm5, %v7016_v21, %v13487_v48  ;;  %v7268_v21 = vsel %vm454_vm5, %v7055_v34, %v6669_v42 }
 0x30e   : > { %1355 = vrot.lane.b32.xlu1 %v1235_v27, %s13317_s12  ;;  %2081 = vrot.lane.b32.xlu0 %v7233_v8, %s5864_s5 }
 0x310   : > { %v7238_v16 = vpop.permute.xlu1 %619  ;;  %v7240_v23 = vpop.permute.xlu0 %625 }
 0x311   : > { %13532 = vst [vmem:[#allocation98_spill] sm:$0xff] %v7238_v16  ;;  %13533 = vst [vmem:[#allocation99_spill] sm:$0xff] %v7240_v23  ;;  %v13537_v16 = vld [vmem:[#allocation60_spill] sm:$0xff]  ;;  %v13538_v23 = vld [vmem:[#allocation45_spill] sm:$0xff] }
 0x312   : > { %2055 = vrot.lane.b32.xlu1 %v2037_v60, %s5863_s8  ;;  %2085 = vrot.lane.b32.xlu0 %v7248_v7, %s5864_s5  ;;  %v2043_v10 = vsel %vm454_vm5, %v13538_v23, %v13537_v16 }
 0x314   : > { %v7253_v29 = vpop.permute.xlu1 %623  ;;  %v7255_v27 = vpop.permute.xlu0 %629 }
 0x315   : > { %13535 = vst [vmem:[#allocation59_spill] sm:$0xff] %v7253_v29  ;;  %13536 = vst [vmem:[#allocation100_spill] sm:$0xff] %v7255_v27  ;;  %v13543_v29 = vld [vmem:[#allocation58_spill] sm:$0xff] }
 0x316   : > { %2059 = vrot.lane.b32.xlu1 %v2043_v10, %s5863_s8  ;;  %v7279_v10 = vsel %vm454_vm5, %v7032_v58, %v13543_v29 }
 0x318   : > { %v7261_v17 = vpop.permute.xlu1 %627  ;;  %v7263_v35 = vpop.permute.xlu0 %969 }
 0x319   : > { %13539 = vst [vmem:[#allocation60_spill] sm:$0xff] %v7261_v17  ;;  %13540 = vst [vmem:[#allocation45_spill] sm:$0xff] %v7263_v35 }
 0x31a   : > { %2079 = vrot.lane.b32.xlu1 %v7268_v21, %s5864_s5 }
 0x31c   : > { %v7272_v60 = vpop.permute.xlu1 %967  ;;  %v7274_v27 = vpop.permute.xlu0 %973 }
 0x31d   : > { %13541 = vst [vmem:[#allocation101_spill] sm:$0xff] %v7272_v60  ;;  %13542 = vst [vmem:[#allocation102_spill] sm:$0xff] %v7274_v27 }
 0x31e   : > { %2083 = vrot.lane.b32.xlu1 %v7279_v10, %s5864_s5 }
 0x320   : > { %v7283_v23 = vpop.permute.xlu1 %971  ;;  %v7285_v35 = vpop.permute.xlu0 %977 }
 0x321   : > { %13544 = vst [vmem:[#allocation58_spill] sm:$0xff] %v7283_v23  ;;  %13545 = vst [vmem:[#allocation103_spill] sm:$0xff] %v7285_v35 }
 0x324   : > { %v7287_v34 = vpop.permute.xlu1 %975  ;;  %v7289_v17 = vpop.permute.xlu0 %1073 }
 0x325   : > { %13546 = vst [vmem:[#allocation104_spill] sm:$0xff] %v7287_v34  ;;  %13547 = vst [vmem:[#allocation105_spill] sm:$0xff] %v7289_v17 }
 0x328   : > { %v7291_v0 = vpop.permute.xlu1 %979  ;;  %v7293_v60 = vpop.permute.xlu0 %1077 }
 0x329   : > { %13548 = vst [vmem:[#allocation106_spill] sm:$0xff] %v7291_v0  ;;  %13549 = vst [vmem:[#allocation107_spill] sm:$0xff] %v7293_v60 }
 0x32c   : > { %v7295_v27 = vpop.permute.xlu1 %1071  ;;  %v7297_v5 = vpop.permute.xlu0 %1081 }
 0x32d   : > { %13550 = vst [vmem:[#allocation108_spill] sm:$0xff] %v7295_v27  ;;  %13551 = vst [vmem:[#allocation109_spill] sm:$0xff] %v7297_v5 }
 0x330   : > { %v7299_v58 = vpop.permute.xlu1 %1075  ;;  %v7301_v4 = vpop.permute.xlu0 %1253 }
 0x331   : > { %13552 = vst [vmem:[#allocation110_spill] sm:$0xff] %v7299_v58  ;;  %13553 = vst [vmem:[#allocation111_spill] sm:$0xff] %v7301_v4 }
 0x334   : > { %v7303_v37 = vpop.permute.xlu1 %1079  ;;  %v7305_v23 = vpop.permute.xlu0 %1257 }
 0x335   : > { %13554 = vst [vmem:[#allocation112_spill] sm:$0xff] %v7303_v37  ;;  %13555 = vst [vmem:[#allocation113_spill] sm:$0xff] %v7305_v23 }
 0x338   : > { %v7307_v35 = vpop.permute.xlu1 %1083  ;;  %v7309_v34 = vpop.permute.xlu0 %1261 }
 0x339   : > { %13556 = vst [vmem:[#allocation114_spill] sm:$0xff] %v7307_v35  ;;  %13557 = vst [vmem:[#allocation115_spill] sm:$0xff] %v7309_v34 }
 0x33c   : > { %v7311_v17 = vpop.permute.xlu1 %1255  ;;  %v7313_v0 = vpop.permute.xlu0 %1265 }
 0x33d   : > { %13558 = vst [vmem:[#allocation116_spill] sm:$0xff] %v7311_v17  ;;  %13559 = vst [vmem:[#allocation117_spill] sm:$0xff] %v7313_v0 }
 0x340   : > { %v7315_v60 = vpop.permute.xlu1 %1259  ;;  %v7317_v27 = vpop.permute.xlu0 %1357 }
 0x341   : > { %13560 = vst [vmem:[#allocation118_spill] sm:$0xff] %v7315_v60  ;;  %13561 = vst [vmem:[#allocation119_spill] sm:$0xff] %v7317_v27 }
 0x344   : > { %v7319_v5 = vpop.permute.xlu1 %1263  ;;  %v7321_v58 = vpop.permute.xlu0 %1361 }
 0x345   : > { %13562 = vst [vmem:[#allocation120_spill] sm:$0xff] %v7319_v5  ;;  %13563 = vst [vmem:[#allocation121_spill] sm:$0xff] %v7321_v58 }
 0x348   : > { %v7323_v4 = vpop.permute.xlu1 %1359  ;;  %v7325_v37 = vpop.permute.xlu0 %1365 }
 0x349   : > { %13564 = vst [vmem:[#allocation122_spill] sm:$0xff] %v7323_v4  ;;  %13565 = vst [vmem:[#allocation123_spill] sm:$0xff] %v7325_v37 }
 0x34c   : > { %v7327_v23 = vpop.permute.xlu1 %1363  ;;  %v7329_v35 = vpop.permute.xlu0 %1369 }
 0x34d   : > { %13566 = vst [vmem:[#allocation124_spill] sm:$0xff] %v7327_v23  ;;  %13567 = vst [vmem:[#allocation125_spill] sm:$0xff] %v7329_v35 }
 0x350   : > { %v7331_v34 = vpop.permute.xlu1 %1367  ;;  %v7333_v17 = vpop.permute.xlu0 %1709 }
 0x351   : > { %13568 = vst [vmem:[#allocation126_spill] sm:$0xff] %v7331_v34  ;;  %13569 = vst [vmem:[#allocation127_spill] sm:$0xff] %v7333_v17 }
 0x354   : > { %v7335_v0 = vpop.permute.xlu1 %1707  ;;  %v7337_v60 = vpop.permute.xlu0 %1713 }
 0x355   : > { %13570 = vst [vmem:[#allocation128_spill] sm:$0xff] %v7335_v0  ;;  %13571 = vst [vmem:[#allocation129_spill] sm:$0xff] %v7337_v60 }
 0x358   : > { %v7339_v27 = vpop.permute.xlu1 %1711  ;;  %v7341_v5 = vpop.permute.xlu0 %1717 }
 0x359   : > { %13572 = vst [vmem:[#allocation130_spill] sm:$0xff] %v7339_v27  ;;  %13573 = vst [vmem:[#allocation131_spill] sm:$0xff] %v7341_v5 }
 0x35c   : > { %v7343_v58 = vpop.permute.xlu1 %1715  ;;  %v7345_v4 = vpop.permute.xlu0 %1813 }
 0x35d   : > { %13574 = vst [vmem:[#allocation132_spill] sm:$0xff] %v7343_v58  ;;  %13575 = vst [vmem:[#allocation133_spill] sm:$0xff] %v7345_v4 }
 0x360   : > { %v7347_v37 = vpop.permute.xlu1 %1719  ;;  %v7349_v23 = vpop.permute.xlu0 %1817 }
 0x361   : > { %13576 = vst [vmem:[#allocation134_spill] sm:$0xff] %v7347_v37  ;;  %13577 = vst [vmem:[#allocation135_spill] sm:$0xff] %v7349_v23 }
 0x364   : > { %v7351_v35 = vpop.permute.xlu1 %1811  ;;  %v7353_v34 = vpop.permute.xlu0 %1821 }
 0x365   : > { %13578 = vst [vmem:[#allocation136_spill] sm:$0xff] %v7351_v35  ;;  %13579 = vst [vmem:[#allocation137_spill] sm:$0xff] %v7353_v34 }
 0x368   : > { %v7355_v17 = vpop.permute.xlu1 %1815  ;;  %v7357_v0 = vpop.permute.xlu0 %981 }
 0x369   : > { %13580 = vst [vmem:[#allocation138_spill] sm:$0xff] %v7355_v17  ;;  %13581 = vst [vmem:[#allocation139_spill] sm:$0xff] %v7357_v0 }
 0x36c   : > { %v7359_v60 = vpop.permute.xlu1 %1819  ;;  %v7361_v27 = vpop.permute.xlu0 %1085 }
 0x36d   : > { %13582 = vst [vmem:[#allocation140_spill] sm:$0xff] %v7359_v60  ;;  %13583 = vst [vmem:[#allocation141_spill] sm:$0xff] %v7361_v27 }
 0x370   : > { %v7363_v5 = vpop.permute.xlu1 %1823  ;;  %v7365_v58 = vpop.permute.xlu0 %1721 }
 0x371   : > { %13584 = vst [vmem:[#allocation142_spill] sm:$0xff] %v7363_v5  ;;  %13585 = vst [vmem:[#allocation143_spill] sm:$0xff] %v7365_v58 }
 0x374   : > { %v7367_v4 = vpop.permute.xlu1 %511  ;;  %v7369_v37 = vpop.permute.xlu0 %1825 }
 0x375   : > { %13586 = vst [vmem:[#allocation144_spill] sm:$0xff] %v7367_v4  ;;  %13587 = vst [vmem:[#allocation145_spill] sm:$0xff] %v7369_v37 }
 0x378   : > { %v7371_v23 = vpop.permute.xlu1 %615  ;;  %v2058_v35 = vpop.permute.xlu0 %2057 }
 0x379   : > { %13588 = vst [vmem:[#allocation146_spill] sm:$0xff] %v7371_v23  ;;  %v2068_v17 = vsel %vm454_vm5, %v2058_v35, %v13526_v52 }
 0x37a   : > { %2089 = vrot.lane.b32.xlu0 %v2068_v17, %s5864_s5 }
 0x37c   : > { %v7376_v34 = vpop.permute.xlu1 %1251  ;;  %v2062_v60 = vpop.permute.xlu0 %2061 }
 0x37d   : > { %13589 = vst [vmem:[#allocation147_spill] sm:$0xff] %v7376_v34  ;;  %v2070_v5 = vsel %vm454_vm5, %v2062_v60, %v13529_v3 }
 0x37e   : > { %2093 = vrot.lane.b32.xlu0 %v2070_v5, %s5864_s5 }
 0x380   : > { %v7381_v58 = vpop.permute.xlu1 %1355 }
 0x381   : > { %13590 = vst [vmem:[#allocation148_spill] sm:$0xff] %v7381_v58 }
 0x382   : > { %2185 = vrot.lane.b32.xlu0 %v7233_v8, %s13317_s12  ;;  %v13593_v8 = vld [vmem:[#allocation48_spill] sm:$0xff] }
 0x384   : > { %v2056_v37 = vpop.permute.xlu1 %2055 }
 0x385   : > { %v2067_v27 = vsel %vm454_vm5, %v2056_v37, %v13534_v15  ;;  %v13591_v37 = vld [vmem:[#allocation57_spill] sm:$0xff] }
 0x386   : > { %2087 = vrot.lane.b32.xlu1 %v2067_v27, %s5864_s5  ;;  %2189 = vrot.lane.b32.xlu0 %v7248_v7, %s13317_s12  ;;  %v13592_v7 = vld [vmem:[#allocation44_spill] sm:$0xff] }
 0x388   : > { %v2060_v35 = vpop.permute.xlu1 %2059 }
 0x389   : > { %v2069_v60 = vsel %vm454_vm5, %v2060_v35, %v13537_v16  ;;  %v7417_v35 = vpop.permute.xlu0 %2081 }
 0x38a   : > { %2091 = vrot.lane.b32.xlu1 %v2069_v60, %s5864_s5  ;;  %2193 = vrot.lane.b32.xlu0 %v2068_v17, %s13317_s12  ;;  %v13594_v17 = vld [vmem:[#allocation56_spill] sm:$0xff]  ;;  %13599 = vst [vmem:[#allocation149_spill] sm:$0xff] %v7417_v35 }
 0x38c   : > { %v7423_v34 = vpop.permute.xlu1 %2079 }
 0x38d   : > { %13602 = vst [vmem:[#allocation152_spill] sm:$0xff] %v7423_v34 }
 0x38e   : > { %2183 = vrot.lane.b32.xlu1 %v7268_v21, %s13317_s12  ;;  %2197 = vrot.lane.b32.xlu0 %v2070_v5, %s13317_s12  ;;  %v13595_v5 = vld [vmem:[#allocation52_spill] sm:$0xff]  ;;  %v13596_v21 = vld [vmem:[#allocation43_spill] sm:$0xff] }
 0x38f   : > { %v2006_v57 = vrot.slane %v13595_v5, 1 }
 0x390   : > { %v7427_v23 = vpop.permute.xlu1 %2083 }
 0x391   : > { %13604 = vst [vmem:[#allocation154_spill] sm:$0xff] %v7427_v23 }
 0x392   : > { %2187 = vrot.lane.b32.xlu1 %v7279_v10, %s13317_s12  ;;  %2254 = vrot.lane.b32.xlu0 %v13591_v37, %s5863_s8  ;;  %v13597_v10 = vld [vmem:[#allocation47_spill] sm:$0xff] }
 0x393   : > { %v2003_v6 = vrot.slane %v13597_v10, 1 }
 0x396   : > { %2191 = vrot.lane.b32.xlu1 %v2067_v27, %s13317_s12  ;;  %2260 = vrot.lane.b32.xlu0 %v13592_v7, %s5863_s8  ;;  %v13598_v27 = vld [vmem:[#allocation50_spill] sm:$0xff] }
 0x39a   : > { %2195 = vrot.lane.b32.xlu1 %v2069_v60, %s13317_s12  ;;  %2266 = vrot.lane.b32.xlu0 %v13593_v8, %s5863_s8  ;;  %v7419_v60 = vpop.permute.xlu0 %2085 }
 0x39b   : > { %13600 = vst [vmem:[#allocation150_spill] sm:$0xff] %v7419_v60 }
 0x39e   : > { %2251 = vrot.lane.b32.xlu1 %v13594_v17, %s5863_s8  ;;  %2272 = vrot.lane.b32.xlu0 %v13595_v5, %s5863_s8 }
 0x3a2   : > { %2257 = vrot.lane.b32.xlu1 %v13596_v21, %s5863_s8 }
 0x3a6   : > { %2263 = vrot.lane.b32.xlu1 %v13597_v10, %s5863_s8 }
 0x3aa   : > { %2269 = vrot.lane.b32.xlu1 %v13598_v27, %s5863_s8 }
 0x3ec   : > { %v7421_v58 = vpop.permute.xlu0 %2089 }
 0x3ed   : > { %13601 = vst [vmem:[#allocation151_spill] sm:$0xff] %v7421_v58 }
 0x3f0   : > { %v7425_v0 = vpop.permute.xlu0 %2093 }
 0x3f1   : > { %13603 = vst [vmem:[#allocation153_spill] sm:$0xff] %v7425_v0 }
 0x3f4   : > { %v7429_v4 = vpop.permute.xlu0 %2185 }
 0x3f5   : > { %13605 = vst [vmem:[#allocation155_spill] sm:$0xff] %v7429_v4 }
 0x3f8   : > { %v7431_v40 = vpop.permute.xlu1 %2087  ;;  %v7433_v22 = vpop.permute.xlu0 %2189 }
 0x3f9   : > { %13606 = vst [vmem:[#allocation156_spill] sm:$0xff] %v7431_v40  ;;  %13607 = vst [vmem:[#allocation157_spill] sm:$0xff] %v7433_v22 }
 0x3fc   : > { %v7435_v56 = vpop.permute.xlu1 %2091  ;;  %v7437_v31 = vpop.permute.xlu0 %2193 }
 0x3fd   : > { %13608 = vst [vmem:[#allocation158_spill] sm:$0xff] %v7435_v56  ;;  %13609 = vst [vmem:[#allocation159_spill] sm:$0xff] %v7437_v31 }
 0x400   : > { %v7439_v35 = vpop.permute.xlu1 %2183  ;;  %v7441_v60 = vpop.permute.xlu0 %2197 }
 0x401   : > { %13610 = vst [vmem:[#allocation160_spill] sm:$0xff] %v7439_v35  ;;  %13611 = vst [vmem:[#allocation161_spill] sm:$0xff] %v7441_v60 }
 0x404   : > { %v7443_v58 = vpop.permute.xlu1 %2187  ;;  %v2255_v34 = vpop.permute.xlu0 %2254 }
 0x405   : > { %13612 = vst [vmem:[#allocation162_spill] sm:$0xff] %v7443_v58  ;;  %v2256_v0 = vsel %vm454_vm5, %v2255_v34, %v13591_v37 }
 0x406   : > { %2277 = vrot.lane.b32.xlu0 %v2256_v0, %s5863_s8 }
 0x408   : > { %v7448_v4 = vpop.permute.xlu1 %2191  ;;  %v2261_v40 = vpop.permute.xlu0 %2260 }
 0x409   : > { %13613 = vst [vmem:[#allocation163_spill] sm:$0xff] %v7448_v4  ;;  %v2262_v56 = vsel %vm454_vm5, %v2261_v40, %v13592_v7 }
 0x40a   : > { %2281 = vrot.lane.b32.xlu0 %v2262_v56, %s5863_s8 }
 0x40c   : > { %v7453_v31 = vpop.permute.xlu1 %2195  ;;  %v2267_v35 = vpop.permute.xlu0 %2266 }
 0x40d   : > { %13614 = vst [vmem:[#allocation164_spill] sm:$0xff] %v7453_v31  ;;  %v2268_v58 = vsel %vm454_vm5, %v2267_v35, %v13593_v8 }
 0x40e   : > { %2285 = vrot.lane.b32.xlu0 %v2268_v58, %s5863_s8 }
 0x410   : > { %v2252_v60 = vpop.permute.xlu1 %2251  ;;  %v2273_v34 = vpop.permute.xlu0 %2272 }
 0x411   : > { %v2253_v0 = vsel %vm454_vm5, %v2252_v60, %v13594_v17  ;;  %v2274_v40 = vsel %vm454_vm5, %v2273_v34, %v13595_v5 }
 0x412   : > { %2275 = vrot.lane.b32.xlu1 %v2253_v0, %s5863_s8  ;;  %2289 = vrot.lane.b32.xlu0 %v2274_v40, %s5863_s8 }
 0x414   : > { %v2258_v56 = vpop.permute.xlu1 %2257 }
 0x415   : > { %v2259_v31 = vsel %vm454_vm5, %v2258_v56, %v13596_v21 }
 0x416   : > { %2279 = vrot.lane.b32.xlu1 %v2259_v31, %s5863_s8 }
 0x418   : > { %v2264_v35 = vpop.permute.xlu1 %2263 }
 0x419   : > { %v2265_v58 = vsel %vm454_vm5, %v2264_v35, %v13597_v10 }
 0x41a   : > { %2283 = vrot.lane.b32.xlu1 %v2265_v58, %s5863_s8 }
 0x41c   : > { %v2270_v60 = vpop.permute.xlu1 %2269 }
 0x41d   : > { %v2271_v0 = vsel %vm454_vm5, %v2270_v60, %v13598_v27 }
 0x41e   : > { %2287 = vrot.lane.b32.xlu1 %v2271_v0, %s5863_s8 }
 0x478   : > { %v2278_v34 = vpop.permute.xlu0 %2277 }
 0x479   : > { %v2292_v40 = vsel %vm454_vm5, %v2278_v34, %v13591_v37 }
 0x47a   : > { %2309 = vrot.lane.b32.xlu0 %v2292_v40, %s5864_s5 }
 0x47c   : > { %v2282_v56 = vpop.permute.xlu0 %2281 }
 0x47d   : > { %v2294_v31 = vsel %vm454_vm5, %v2282_v56, %v13592_v7 }
 0x47e   : > { %2313 = vrot.lane.b32.xlu0 %v2294_v31, %s5864_s5 }
 0x480   : > { %v2286_v35 = vpop.permute.xlu0 %2285 }
 0x481   : > { %v2296_v58 = vsel %vm454_vm5, %v2286_v35, %v13593_v8 }
 0x482   : > { %2317 = vrot.lane.b32.xlu0 %v2296_v58, %s5864_s5 }
 0x484   : > { %v2276_v60 = vpop.permute.xlu1 %2275  ;;  %v2290_v4 = vpop.permute.xlu0 %2289 }
 0x485   : > { %v2291_v0 = vsel %vm454_vm5, %v2276_v60, %v13594_v17  ;;  %v2298_v34 = vsel %vm454_vm5, %v2290_v4, %v13595_v5 }
 0x486   : > { %2307 = vrot.lane.b32.xlu1 %v2291_v0, %s5864_s5  ;;  %2321 = vrot.lane.b32.xlu0 %v2298_v34, %s5864_s5 }
 0x488   : > { %v2280_v56 = vpop.permute.xlu1 %2279 }
 0x489   : > { %v2293_v22 = vsel %vm454_vm5, %v2280_v56, %v13596_v21  ;;  %v2001_v56 = vrot.slane %v13596_v21, 1 }
 0x48a   : > { %2311 = vrot.lane.b32.xlu1 %v2293_v22, %s5864_s5  ;;  %2413 = vrot.lane.b32.xlu0 %v2292_v40, %s13317_s12  ;;  %v2000_v40 = vrot.slane %v13591_v37, 1 }
 0x48c   : > { %v2284_v35 = vpop.permute.xlu1 %2283 }
 0x48d   : > { %v2295_v60 = vsel %vm454_vm5, %v2284_v35, %v13597_v10 }
 0x48e   : > { %2315 = vrot.lane.b32.xlu1 %v2295_v60, %s5864_s5  ;;  %2417 = vrot.lane.b32.xlu0 %v2294_v31, %s13317_s12  ;;  %v7507_v31 = vsel %vm437_vm2, %v2000_v40, %v2001_v56 }
 0x48f   : > { %13616 = vst [vmem:[#allocation165_spill] sm:$0xff] %v7507_v31 }
 0x490   : > { %v2288_v23 = vpop.permute.xlu1 %2287 }
 0x491   : > { %v2297_v4 = vsel %vm454_vm5, %v2288_v23, %v13598_v27  ;;  %v2002_v23 = vrot.slane %v13592_v7, 1 }
 0x492   : > { %2319 = vrot.lane.b32.xlu1 %v2297_v4, %s5864_s5  ;;  %2421 = vrot.lane.b32.xlu0 %v2296_v58, %s13317_s12 }
 0x493   : > { %v7516_v58 = vsel %vm437_vm2, %v2002_v23, %v2003_v6  ;;  %v7547_v9 = vsel %vm437_vm2, %v2001_v56, %v2002_v23 }
 0x494   : > { %13617 = vst [vmem:[#allocation166_spill] sm:$0xff] %v7516_v58  ;;  %13622 = vst [vmem:[#allocation170_spill] sm:$0xff] %v7547_v9 }
 0x496   : > { %2411 = vrot.lane.b32.xlu1 %v2291_v0, %s13317_s12  ;;  %2425 = vrot.lane.b32.xlu0 %v2298_v34, %s13317_s12  ;;  %v2004_v0 = vrot.slane %v13593_v8, 1  ;;  %v1999_v34 = vrot.slane %v13594_v17, 1 }
 0x498   : > { %v2014_v2 = vsel %vm437_vm2, %v2006_v57, %v1999_v34  ;;  %v7535_v14 = vsel %vm437_vm2, %v1999_v34, %v2000_v40  ;;  %v7553_v40 = vsel %vm437_vm2, %v2003_v6, %v2004_v0 }
 0x499   : > { %13619 = vst [vmem:[#allocation168_spill] sm:$0xff] %v7535_v14  ;;  %13623 = vst [vmem:[#allocation171_spill] sm:$0xff] %v7553_v40 }
 0x49a   : > { %2415 = vrot.lane.b32.xlu1 %v2293_v22, %s13317_s12  ;;  %2482 = vrot.lane.b32.xlu0 %v7507_v31, %s5863_s8  ;;  %v2005_v22 = vrot.slane %v13598_v27, 1 }
 0x49e   : > { %2419 = vrot.lane.b32.xlu1 %v2295_v60, %s13317_s12  ;;  %2488 = vrot.lane.b32.xlu0 %v7516_v58, %s5863_s8  ;;  %v7527_v60 = vsel %vm437_vm2, %v2004_v0, %v2005_v22 }
 0x49f   : > { %13618 = vst [vmem:[#allocation167_spill] sm:$0xff] %v7527_v60 }
 0x4a2   : > { %2423 = vrot.lane.b32.xlu1 %v2297_v4, %s13317_s12  ;;  %2494 = vrot.lane.b32.xlu0 %v7527_v60, %s5863_s8  ;;  %v7541_v4 = vsel %vm305_vm3, %v2014_v2, 0.0  ;;  %v7559_v2 = vsel %vm437_vm2, %v2005_v22, %v2006_v57 }
 0x4a3   : > { %13621 = vst [vmem:[#allocation169_spill] sm:$0xff] %v7541_v4  ;;  %13624 = vst [vmem:[#allocation172_spill] sm:$0xff] %v7559_v2 }
 0x4a6   : > { %2479 = vrot.lane.b32.xlu1 %v7535_v14, %s5863_s8  ;;  %2500 = vrot.lane.b32.xlu0 %v7541_v4, %s5863_s8 }
 0x4aa   : > { %2485 = vrot.lane.b32.xlu1 %v7547_v9, %s5863_s8 }
 0x4ae   : > { %2491 = vrot.lane.b32.xlu1 %v7553_v40, %s5863_s8 }
 0x4b2   : > { %2497 = vrot.lane.b32.xlu1 %v7559_v2, %s5863_s8 }
 0x4ec   : > { %v7563_v34 = vpop.permute.xlu0 %2309 }
 0x4ed   : > { %13625 = vst [vmem:[#allocation173_spill] sm:$0xff] %v7563_v34 }
 0x4f0   : > { %v7565_v56 = vpop.permute.xlu0 %2313 }
 0x4f1   : > { %13626 = vst [vmem:[#allocation174_spill] sm:$0xff] %v7565_v56 }
 0x4f4   : > { %v7567_v23 = vpop.permute.xlu0 %2317 }
 0x4f5   : > { %13627 = vst [vmem:[#allocation175_spill] sm:$0xff] %v7567_v23 }
 0x4f8   : > { %v7569_v30 = vpop.permute.xlu1 %2307  ;;  %v7571_v6 = vpop.permute.xlu0 %2321 }
 0x4f9   : > { %13628 = vst [vmem:[#allocation176_spill] sm:$0xff] %v7569_v30  ;;  %13629 = vst [vmem:[#allocation177_spill] sm:$0xff] %v7571_v6 }
 0x4fc   : > { %v7573_v0 = vpop.permute.xlu1 %2311  ;;  %v7575_v41 = vpop.permute.xlu0 %2413 }
 0x4fd   : > { %13630 = vst [vmem:[#allocation178_spill] sm:$0xff] %v7573_v0  ;;  %13631 = vst [vmem:[#allocation179_spill] sm:$0xff] %v7575_v41 }
 0x500   : > { %v7577_v19 = vpop.permute.xlu1 %2315  ;;  %v7579_v57 = vpop.permute.xlu0 %2417 }
 0x501   : > { %13632 = vst [vmem:[#allocation180_spill] sm:$0xff] %v7577_v19  ;;  %13633 = vst [vmem:[#allocation181_spill] sm:$0xff] %v7579_v57 }
 0x504   : > { %v7581_v22 = vpop.permute.xlu1 %2319  ;;  %v7583_v12 = vpop.permute.xlu0 %2421 }
 0x505   : > { %13634 = vst [vmem:[#allocation182_spill] sm:$0xff] %v7581_v22  ;;  %13635 = vst [vmem:[#allocation183_spill] sm:$0xff] %v7583_v12 }
 0x508   : > { %v7585_v34 = vpop.permute.xlu1 %2411  ;;  %v7587_v56 = vpop.permute.xlu0 %2425 }
 0x509   : > { %13636 = vst [vmem:[#allocation184_spill] sm:$0xff] %v7585_v34  ;;  %13637 = vst [vmem:[#allocation185_spill] sm:$0xff] %v7587_v56 }
 0x50c   : > { %v7589_v23 = vpop.permute.xlu1 %2415  ;;  %v2483_v30 = vpop.permute.xlu0 %2482 }
 0x50d   : > { %13638 = vst [vmem:[#allocation186_spill] sm:$0xff] %v7589_v23  ;;  %v2484_v0 = vsel %vm454_vm5, %v2483_v30, %v7507_v31 }
 0x50e   : > { %2505 = vrot.lane.b32.xlu0 %v2484_v0, %s5863_s8 }
 0x510   : > { %v7594_v41 = vpop.permute.xlu1 %2419  ;;  %v2489_v19 = vpop.permute.xlu0 %2488 }
 0x511   : > { %13639 = vst [vmem:[#allocation187_spill] sm:$0xff] %v7594_v41  ;;  %v2490_v57 = vsel %vm454_vm5, %v2489_v19, %v7516_v58 }
 0x512   : > { %2509 = vrot.lane.b32.xlu0 %v2490_v57, %s5863_s8 }
 0x514   : > { %v7599_v12 = vpop.permute.xlu1 %2423  ;;  %v2495_v34 = vpop.permute.xlu0 %2494 }
 0x515   : > { %13640 = vst [vmem:[#allocation188_spill] sm:$0xff] %v7599_v12  ;;  %v2496_v23 = vsel %vm454_vm5, %v2495_v34, %v7527_v60 }
 0x516   : > { %2513 = vrot.lane.b32.xlu0 %v2496_v23, %s5863_s8 }
 0x518   : > { %v2480_v56 = vpop.permute.xlu1 %2479  ;;  %v2501_v0 = vpop.permute.xlu0 %2500 }
 0x519   : > { %v2481_v30 = vsel %vm454_vm5, %v2480_v56, %v7535_v14  ;;  %v2502_v19 = vsel %vm454_vm5, %v2501_v0, %v7541_v4 }
 0x51a   : > { %2503 = vrot.lane.b32.xlu1 %v2481_v30, %s5863_s8  ;;  %2517 = vrot.lane.b32.xlu0 %v2502_v19, %s5863_s8 }
 0x51c   : > { %v2486_v57 = vpop.permute.xlu1 %2485 }
 0x51d   : > { %v2487_v12 = vsel %vm454_vm5, %v2486_v57, %v7547_v9 }
 0x51e   : > { %2507 = vrot.lane.b32.xlu1 %v2487_v12, %s5863_s8 }
 0x520   : > { %v2492_v34 = vpop.permute.xlu1 %2491 }
 0x521   : > { %v2493_v23 = vsel %vm454_vm5, %v2492_v34, %v7553_v40 }
 0x522   : > { %2511 = vrot.lane.b32.xlu1 %v2493_v23, %s5863_s8 }
 0x524   : > { %v2498_v56 = vpop.permute.xlu1 %2497 }
 0x525   : > { %v2499_v30 = vsel %vm454_vm5, %v2498_v56, %v7559_v2 }
 0x526   : > { %2515 = vrot.lane.b32.xlu1 %v2499_v30, %s5863_s8 }
 0x580   : > { %v2506_v0 = vpop.permute.xlu0 %2505 }
 0x581   : > { %v2520_v19 = vsel %vm454_vm5, %v2506_v0, %v7507_v31 }
 0x582   : > { %2537 = vrot.lane.b32.xlu0 %v2520_v19, %s5864_s5 }
 0x584   : > { %v2510_v57 = vpop.permute.xlu0 %2509 }
 0x585   : > { %v2522_v12 = vsel %vm454_vm5, %v2510_v57, %v7516_v58 }
 0x586   : > { %2541 = vrot.lane.b32.xlu0 %v2522_v12, %s5864_s5 }
 0x588   : > { %v2514_v34 = vpop.permute.xlu0 %2513 }
 0x589   : > { %v2524_v23 = vsel %vm454_vm5, %v2514_v34, %v7527_v60 }
 0x58a   : > { %2545 = vrot.lane.b32.xlu0 %v2524_v23, %s5864_s5 }
 0x58c   : > { %v2504_v56 = vpop.permute.xlu1 %2503  ;;  %v2518_v41 = vpop.permute.xlu0 %2517 }
 0x58d   : > { %v2519_v30 = vsel %vm454_vm5, %v2504_v56, %v7535_v14  ;;  %v2526_v0 = vsel %vm454_vm5, %v2518_v41, %v7541_v4  ;;  %v13641_v4 = vld [vmem:[#allocation42_spill] sm:$0xff] }
 0x58e   : > { %2535 = vrot.lane.b32.xlu1 %v2519_v30, %s5864_s5  ;;  %2549 = vrot.lane.b32.xlu0 %v2526_v0, %s5864_s5 }
 0x590   : > { %v2508_v57 = vpop.permute.xlu1 %2507 }
 0x591   : > { %v2521_v22 = vsel %vm454_vm5, %v2508_v57, %v7547_v9  ;;  %v13642_v57 = vld [vmem:[#allocation17_spill] sm:$0xff] }
 0x592   : > { %2539 = vrot.lane.b32.xlu1 %v2521_v22, %s5864_s5  ;;  %2641 = vrot.lane.b32.xlu0 %v2520_v19, %s13317_s12  ;;  %v13643_v9 = vunpack.c.l.bf16 %v13642_v57  ;;  %v13645_v19 = vunpack.c.h.bf16 %v13642_v57 }
 0x594   : > { %v2512_v34 = vpop.permute.xlu1 %2511  ;;  %v7648_v14 = vsub.f32 %v13643_v9, %v13641_v4  ;;  %v7653_v60 = vsub.f32 %v13645_v19, %v13641_v4  ;;  %v13655_v19 = vld [vmem:[#allocation20_spill] sm:$0xff] }
 0x595   : > { %v2523_v56 = vsel %vm454_vm5, %v2512_v34, %v7553_v40  ;;  %v13647_v34 = vld [vmem:[#allocation18_spill] sm:$0xff]  ;;  %v13656_v31 = vunpack.c.h.bf16 %v13655_v19 }
 0x596   : > { %2543 = vrot.lane.b32.xlu1 %v2523_v56, %s5864_s5  ;;  %2645 = vrot.lane.b32.xlu0 %v2522_v12, %s13317_s12  ;;  %13644 = vst [vmem:[#allocation42_spill] sm:$0xff] %v7648_v14  ;;  %13646 = vst [vmem:[#allocation17_spill] sm:$0xff] %v7653_v60  ;;  %v2715_v12 = vrot.slane %v7648_v14, 7  ;;  %v13650_v9 = vunpack.c.h.bf16 %v13647_v34 }
 0x597   : > { %v7679_v27 = vsub.f32 %v13656_v31, %v13641_v4 }
 0x598   : > { %v2516_v6 = vpop.permute.xlu1 %2515  ;;  %v7667_v58 = vsub.f32 %v13650_v9, %v13641_v4 }
 0x599   : > { %v2525_v41 = vsel %vm454_vm5, %v2516_v6, %v7559_v2  ;;  %v2716_v6 = vrot.slane %v7653_v60, 7  ;;  %v13648_v2 = vunpack.c.l.bf16 %v13647_v34  ;;  %13657 = vst [vmem:[#allocation20_spill] sm:$0xff] %v7679_v27  ;;  %v2722_v31 = vrot.slane %v7679_v27, 7 }
 0x59a   : > { %2547 = vrot.lane.b32.xlu1 %v2525_v41, %s5864_s5  ;;  %2649 = vrot.lane.b32.xlu0 %v2524_v23, %s13317_s12  ;;  %13651 = vst [vmem:[#allocation189_spill] sm:$0xff] %v7667_v58  ;;  %v13652_v23 = vld [vmem:[#allocation19_spill] sm:$0xff] }
 0x59b   : > { %v7662_v40 = vsub.f32 %v13648_v2, %v13641_v4  ;;  %v7683_v2 = vsel %vm412_vm1, %v2715_v12, %v2716_v6 }
 0x59d   : > { %13649 = vst [vmem:[#allocation18_spill] sm:$0xff] %v7662_v40  ;;  %v2717_v34 = vrot.slane %v7662_v40, 7 }
 0x59e   : > { %2639 = vrot.lane.b32.xlu1 %v2519_v30, %s13317_s12  ;;  %2653 = vrot.lane.b32.xlu0 %v2526_v0, %s13317_s12  ;;  %v13653_v30 = vunpack.c.l.bf16 %v13652_v23  ;;  %v2718_v0 = vrot.slane %v7667_v58, 7 }
 0x5a0   : > { %v7674_v57 = vsub.f32 %v13653_v30, %v13641_v4  ;;  %v7698_v30 = vsel %vm412_vm1, %v2717_v34, %v2718_v0 }
 0x5a2   : > { %2643 = vrot.lane.b32.xlu1 %v2521_v22, %s13317_s12  ;;  %13654 = vst [vmem:[#allocation19_spill] sm:$0xff] %v7674_v57  ;;  %v13658_v22 = vunpack.c.h.bf16 %v13652_v23  ;;  %2766 = vrot.lane.b32.xlu0 %v7683_v2, %s5863_s8  ;;  %v2719_v10 = vrot.slane %v7674_v57, 7  ;;  %v13660_v23 = vunpack.c.l.bf16 %v13655_v19 }
 0x5a4   : > { %v7690_v9 = vsub.f32 %v13658_v22, %v13641_v4  ;;  %v7705_v22 = vsub.f32 %v13660_v23, %v13641_v4  ;;  %v7739_v19 = vsel %vm412_vm1, %v2718_v0, %v2719_v10 }
 0x5a5   : > { %13666 = vst [vmem:[#allocation196_spill] sm:$0xff] %v7739_v19 }
 0x5a6   : > { %13659 = vst [vmem:[#allocation190_spill] sm:$0xff] %v7690_v9  ;;  %2647 = vrot.lane.b32.xlu1 %v2523_v56, %s13317_s12  ;;  %v2720_v21 = vrot.slane %v7690_v9, 7  ;;  %13661 = vst [vmem:[#allocation191_spill] sm:$0xff] %v7705_v22  ;;  %2772 = vrot.lane.b32.xlu0 %v7698_v30, %s5863_s8  ;;  %v2730_v56 = vsel %vm412_vm1, %v2722_v31, %v2715_v12  ;;  %v2721_v17 = vrot.slane %v7705_v22, 7 }
 0x5a7   : > { %v7721_v4 = vsel %vm290_vm4, %v2730_v56, 0.0  ;;  %v7733_v12 = vsel %vm412_vm1, %v2716_v6, %v2717_v34 }
 0x5a8   : > { %v7714_v5 = vsel %vm412_vm1, %v2719_v10, %v2720_v21  ;;  %13663 = vst [vmem:[#allocation193_spill] sm:$0xff] %v7721_v4  ;;  %13665 = vst [vmem:[#allocation195_spill] sm:$0xff] %v7733_v12 }
 0x5a9   : > { %13662 = vst [vmem:[#allocation192_spill] sm:$0xff] %v7714_v5 }
 0x5aa   : > { %2651 = vrot.lane.b32.xlu1 %v2525_v41, %s13317_s12  ;;  %2778 = vrot.lane.b32.xlu0 %v7714_v5, %s5863_s8  ;;  %v7727_v41 = vsel %vm412_vm1, %v2721_v17, %v2722_v31  ;;  %v7745_v31 = vsel %vm412_vm1, %v2720_v21, %v2721_v17 }
 0x5ab   : > { %13664 = vst [vmem:[#allocation194_spill] sm:$0xff] %v7727_v41  ;;  %13667 = vst [vmem:[#allocation197_spill] sm:$0xff] %v7745_v31 }
 0x5ae   : > { %2763 = vrot.lane.b32.xlu1 %v7721_v4, %s5863_s8  ;;  %2784 = vrot.lane.b32.xlu0 %v7727_v41, %s5863_s8 }
 0x5b2   : > { %2769 = vrot.lane.b32.xlu1 %v7733_v12, %s5863_s8 }
 0x5b6   : > { %2775 = vrot.lane.b32.xlu1 %v7739_v19, %s5863_s8 }
 0x5ba   : > { %2781 = vrot.lane.b32.xlu1 %v7745_v31, %s5863_s8 }
 0x5f4   : > { %v7749_v23 = vpop.permute.xlu0 %2537 }
 0x5f5   : > { %13668 = vst [vmem:[#allocation198_spill] sm:$0xff] %v7749_v23 }
 0x5f8   : > { %v7751_v6 = vpop.permute.xlu0 %2541 }
 0x5f9   : > { %13669 = vst [vmem:[#allocation199_spill] sm:$0xff] %v7751_v6 }
 0x5fc   : > { %v7753_v34 = vpop.permute.xlu0 %2545 }
 0x5fd   : > { %13670 = vst [vmem:[#allocation200_spill] sm:$0xff] %v7753_v34 }
 0x600   : > { %v7755_v56 = vpop.permute.xlu1 %2535  ;;  %v7757_v10 = vpop.permute.xlu0 %2549 }
 0x601   : > { %13671 = vst [vmem:[#allocation201_spill] sm:$0xff] %v7755_v56  ;;  %13672 = vst [vmem:[#allocation202_spill] sm:$0xff] %v7757_v10 }
 0x604   : > { %v7759_v0 = vpop.permute.xlu1 %2539  ;;  %v7761_v8 = vpop.permute.xlu0 %2641 }
 0x605   : > { %13673 = vst [vmem:[#allocation203_spill] sm:$0xff] %v7759_v0  ;;  %13674 = vst [vmem:[#allocation204_spill] sm:$0xff] %v7761_v8 }
 0x608   : > { %v7763_v7 = vpop.permute.xlu1 %2543  ;;  %v7765_v17 = vpop.permute.xlu0 %2645 }
 0x609   : > { %13675 = vst [vmem:[#allocation205_spill] sm:$0xff] %v7763_v7  ;;  %13676 = vst [vmem:[#allocation206_spill] sm:$0xff] %v7765_v17 }
 0x60c   : > { %v7767_v21 = vpop.permute.xlu1 %2547  ;;  %v7769_v37 = vpop.permute.xlu0 %2649 }
 0x60d   : > { %13677 = vst [vmem:[#allocation207_spill] sm:$0xff] %v7767_v21  ;;  %13678 = vst [vmem:[#allocation208_spill] sm:$0xff] %v7769_v37 }
 0x610   : > { %v7771_v23 = vpop.permute.xlu1 %2639  ;;  %v7773_v6 = vpop.permute.xlu0 %2653 }
 0x611   : > { %13679 = vst [vmem:[#allocation209_spill] sm:$0xff] %v7771_v23  ;;  %13680 = vst [vmem:[#allocation210_spill] sm:$0xff] %v7773_v6 }
 0x614   : > { %v7775_v34 = vpop.permute.xlu1 %2643  ;;  %v2767_v56 = vpop.permute.xlu0 %2766 }
 0x615   : > { %13681 = vst [vmem:[#allocation211_spill] sm:$0xff] %v7775_v34  ;;  %v2768_v0 = vsel %vm454_vm5, %v2767_v56, %v7683_v2 }
 0x616   : > { %2789 = vrot.lane.b32.xlu0 %v2768_v0, %s5863_s8 }
 0x618   : > { %v7780_v8 = vpop.permute.xlu1 %2647  ;;  %v2773_v7 = vpop.permute.xlu0 %2772 }
 0x619   : > { %13682 = vst [vmem:[#allocation212_spill] sm:$0xff] %v7780_v8  ;;  %v2774_v17 = vsel %vm454_vm5, %v2773_v7, %v7698_v30 }
 0x61a   : > { %2793 = vrot.lane.b32.xlu0 %v2774_v17, %s5863_s8 }
 0x61c   : > { %v7785_v37 = vpop.permute.xlu1 %2651  ;;  %v2779_v23 = vpop.permute.xlu0 %2778 }
 0x61d   : > { %13683 = vst [vmem:[#allocation213_spill] sm:$0xff] %v7785_v37  ;;  %v2780_v34 = vsel %vm454_vm5, %v2779_v23, %v7714_v5 }
 0x61e   : > { %2797 = vrot.lane.b32.xlu0 %v2780_v34, %s5863_s8 }
 0x620   : > { %v2764_v6 = vpop.permute.xlu1 %2763  ;;  %v2785_v0 = vpop.permute.xlu0 %2784 }
 0x621   : > { %v2765_v56 = vsel %vm454_vm5, %v2764_v6, %v7721_v4  ;;  %v2786_v7 = vsel %vm454_vm5, %v2785_v0, %v7727_v41 }
 0x622   : > { %2787 = vrot.lane.b32.xlu1 %v2765_v56, %s5863_s8  ;;  %2801 = vrot.lane.b32.xlu0 %v2786_v7, %s5863_s8 }
 0x624   : > { %v2770_v17 = vpop.permute.xlu1 %2769 }
 0x625   : > { %v2771_v37 = vsel %vm454_vm5, %v2770_v17, %v7733_v12 }
 0x626   : > { %2791 = vrot.lane.b32.xlu1 %v2771_v37, %s5863_s8 }
 0x628   : > { %v2776_v23 = vpop.permute.xlu1 %2775 }
 0x629   : > { %v2777_v34 = vsel %vm454_vm5, %v2776_v23, %v7739_v19 }
 0x62a   : > { %2795 = vrot.lane.b32.xlu1 %v2777_v34, %s5863_s8 }
 0x62c   : > { %v2782_v6 = vpop.permute.xlu1 %2781 }
 0x62d   : > { %v2783_v56 = vsel %vm454_vm5, %v2782_v6, %v7745_v31 }
 0x62e   : > { %2799 = vrot.lane.b32.xlu1 %v2783_v56, %s5863_s8 }
 0x688   : > { %v2790_v0 = vpop.permute.xlu0 %2789 }
 0x689   : > { %v2804_v7 = vsel %vm454_vm5, %v2790_v0, %v7683_v2 }
 0x68a   : > { %2821 = vrot.lane.b32.xlu0 %v2804_v7, %s5864_s5 }
 0x68c   : > { %v2794_v17 = vpop.permute.xlu0 %2793 }
 0x68d   : > { %v2806_v37 = vsel %vm454_vm5, %v2794_v17, %v7698_v30 }
 0x68e   : > { %2825 = vrot.lane.b32.xlu0 %v2806_v37, %s5864_s5 }
 0x690   : > { %v2798_v23 = vpop.permute.xlu0 %2797 }
 0x691   : > { %v2808_v34 = vsel %vm454_vm5, %v2798_v23, %v7714_v5 }
 0x692   : > { %2829 = vrot.lane.b32.xlu0 %v2808_v34, %s5864_s5 }
 0x694   : > { %v2788_v6 = vpop.permute.xlu1 %2787  ;;  %v2802_v8 = vpop.permute.xlu0 %2801 }
 0x695   : > { %v2803_v56 = vsel %vm454_vm5, %v2788_v6, %v7721_v4  ;;  %v2810_v0 = vsel %vm454_vm5, %v2802_v8, %v7727_v41 }
 0x696   : > { %2819 = vrot.lane.b32.xlu1 %v2803_v56, %s5864_s5  ;;  %2833 = vrot.lane.b32.xlu0 %v2810_v0, %s5864_s5 }
 0x698   : > { %v2792_v17 = vpop.permute.xlu1 %2791 }
 0x699   : > { %v2805_v21 = vsel %vm454_vm5, %v2792_v17, %v7733_v12 }
 0x69a   : > { %2823 = vrot.lane.b32.xlu1 %v2805_v21, %s5864_s5  ;;  %2925 = vrot.lane.b32.xlu0 %v2804_v7, %s13317_s12 }
 0x69c   : > { %v2796_v23 = vpop.permute.xlu1 %2795 }
 0x69d   : > { %v2807_v6 = vsel %vm454_vm5, %v2796_v23, %v7739_v19 }
 0x69e   : > { %2827 = vrot.lane.b32.xlu1 %v2807_v6, %s5864_s5  ;;  %2929 = vrot.lane.b32.xlu0 %v2806_v37, %s13317_s12 }
 0x6a0   : > { %v2800_v10 = vpop.permute.xlu1 %2799 }
 0x6a1   : > { %v2809_v8 = vsel %vm454_vm5, %v2800_v10, %v7745_v31 }
 0x6a2   : > { %2831 = vrot.lane.b32.xlu1 %v2809_v8, %s5864_s5  ;;  %2933 = vrot.lane.b32.xlu0 %v2808_v34, %s13317_s12 }
 0x6a6   : > { %2923 = vrot.lane.b32.xlu1 %v2803_v56, %s13317_s12  ;;  %2937 = vrot.lane.b32.xlu0 %v2810_v0, %s13317_s12 }
 0x6aa   : > { %2927 = vrot.lane.b32.xlu1 %v2805_v21, %s13317_s12  ;;  %2994 = vrot.lane.b32.xlu0 %v7653_v60, %s5863_s8 }
 0x6ae   : > { %2931 = vrot.lane.b32.xlu1 %v2807_v6, %s13317_s12  ;;  %3000 = vrot.lane.b32.xlu0 %v7667_v58, %s5863_s8 }
 0x6b2   : > { %2935 = vrot.lane.b32.xlu1 %v2809_v8, %s13317_s12  ;;  %3006 = vrot.lane.b32.xlu0 %v7690_v9, %s5863_s8 }
 0x6b6   : > { %2991 = vrot.lane.b32.xlu1 %v7648_v14, %s5863_s8  ;;  %3012 = vrot.lane.b32.xlu0 %v7679_v27, %s5863_s8 }
 0x6ba   : > { %2997 = vrot.lane.b32.xlu1 %v7662_v40, %s5863_s8 }
 0x6be   : > { %3003 = vrot.lane.b32.xlu1 %v7674_v57, %s5863_s8 }
 0x6c2   : > { %3009 = vrot.lane.b32.xlu1 %v7705_v22, %s5863_s8 }
 0x6fc   : > { %v7853_v10 = vpop.permute.xlu0 %2821 }
 0x6fd   : > { %13684 = vst [vmem:[#allocation214_spill] sm:$0xff] %v7853_v10 }
 0x700   : > { %v7855_v21 = vpop.permute.xlu0 %2825 }
 0x701   : > { %13685 = vst [vmem:[#allocation215_spill] sm:$0xff] %v7855_v21 }
 0x704   : > { %v7857_v7 = vpop.permute.xlu0 %2829 }
 0x705   : > { %13686 = vst [vmem:[#allocation216_spill] sm:$0xff] %v7857_v7 }
 0x708   : > { %v7859_v37 = vpop.permute.xlu1 %2819  ;;  %v7861_v34 = vpop.permute.xlu0 %2833 }
 0x709   : > { %13687 = vst [vmem:[#allocation217_spill] sm:$0xff] %v7859_v37  ;;  %13688 = vst [vmem:[#allocation218_spill] sm:$0xff] %v7861_v34 }
 0x70c   : > { %v7863_v56 = vpop.permute.xlu1 %2823  ;;  %v7865_v0 = vpop.permute.xlu0 %2925 }
 0x70d   : > { %13689 = vst [vmem:[#allocation219_spill] sm:$0xff] %v7863_v56  ;;  %13690 = vst [vmem:[#allocation220_spill] sm:$0xff] %v7865_v0 }
 0x710   : > { %v7867_v17 = vpop.permute.xlu1 %2827  ;;  %v7869_v23 = vpop.permute.xlu0 %2929 }
 0x711   : > { %13691 = vst [vmem:[#allocation221_spill] sm:$0xff] %v7867_v17  ;;  %13692 = vst [vmem:[#allocation222_spill] sm:$0xff] %v7869_v23 }
 0x714   : > { %v7871_v6 = vpop.permute.xlu1 %2831  ;;  %v7873_v8 = vpop.permute.xlu0 %2933 }
 0x715   : > { %13693 = vst [vmem:[#allocation223_spill] sm:$0xff] %v7871_v6  ;;  %13694 = vst [vmem:[#allocation224_spill] sm:$0xff] %v7873_v8 }
 0x718   : > { %v7875_v10 = vpop.permute.xlu1 %2923  ;;  %v7877_v21 = vpop.permute.xlu0 %2937 }
 0x719   : > { %13695 = vst [vmem:[#allocation225_spill] sm:$0xff] %v7875_v10  ;;  %13696 = vst [vmem:[#allocation226_spill] sm:$0xff] %v7877_v21 }
 0x71c   : > { %v7879_v7 = vpop.permute.xlu1 %2927  ;;  %v2995_v37 = vpop.permute.xlu0 %2994 }
 0x71d   : > { %13697 = vst [vmem:[#allocation227_spill] sm:$0xff] %v7879_v7  ;;  %v2996_v56 = vsel %vm454_vm5, %v2995_v37, %v7653_v60 }
 0x71e   : > { %3017 = vrot.lane.b32.xlu0 %v2996_v56, %s5863_s8 }
 0x720   : > { %v7884_v0 = vpop.permute.xlu1 %2931  ;;  %v3001_v17 = vpop.permute.xlu0 %3000 }
 0x721   : > { %13698 = vst [vmem:[#allocation228_spill] sm:$0xff] %v7884_v0  ;;  %v3002_v23 = vsel %vm454_vm5, %v3001_v17, %v7667_v58 }
 0x722   : > { %3021 = vrot.lane.b32.xlu0 %v3002_v23, %s5863_s8 }
 0x724   : > { %v7889_v8 = vpop.permute.xlu1 %2935  ;;  %v3007_v10 = vpop.permute.xlu0 %3006 }
 0x725   : > { %13699 = vst [vmem:[#allocation229_spill] sm:$0xff] %v7889_v8  ;;  %v3008_v7 = vsel %vm454_vm5, %v3007_v10, %v7690_v9 }
 0x726   : > { %3025 = vrot.lane.b32.xlu0 %v3008_v7, %s5863_s8 }
 0x728   : > { %v2992_v21 = vpop.permute.xlu1 %2991  ;;  %v3013_v56 = vpop.permute.xlu0 %3012 }
 0x729   : > { %v2993_v37 = vsel %vm454_vm5, %v2992_v21, %v7648_v14  ;;  %v3014_v17 = vsel %vm454_vm5, %v3013_v56, %v7679_v27 }
 0x72a   : > { %3015 = vrot.lane.b32.xlu1 %v2993_v37, %s5863_s8  ;;  %3029 = vrot.lane.b32.xlu0 %v3014_v17, %s5863_s8 }
 0x72c   : > { %v2998_v23 = vpop.permute.xlu1 %2997 }
 0x72d   : > { %v2999_v8 = vsel %vm454_vm5, %v2998_v23, %v7662_v40 }
 0x72e   : > { %3019 = vrot.lane.b32.xlu1 %v2999_v8, %s5863_s8 }
 0x730   : > { %v3004_v10 = vpop.permute.xlu1 %3003 }
 0x731   : > { %v3005_v7 = vsel %vm454_vm5, %v3004_v10, %v7674_v57 }
 0x732   : > { %3023 = vrot.lane.b32.xlu1 %v3005_v7, %s5863_s8 }
 0x734   : > { %v3010_v21 = vpop.permute.xlu1 %3009 }
 0x735   : > { %v3011_v37 = vsel %vm454_vm5, %v3010_v21, %v7705_v22 }
 0x736   : > { %3027 = vrot.lane.b32.xlu1 %v3011_v37, %s5863_s8 }
 0x790   : > { %v3018_v56 = vpop.permute.xlu0 %3017 }
 0x791   : > { %v3032_v17 = vsel %vm454_vm5, %v3018_v56, %v7653_v60 }
 0x792   : > { %3049 = vrot.lane.b32.xlu0 %v3032_v17, %s5864_s5 }
 0x794   : > { %v3022_v23 = vpop.permute.xlu0 %3021 }
 0x795   : > { %v3034_v8 = vsel %vm454_vm5, %v3022_v23, %v7667_v58 }
 0x796   : > { %3053 = vrot.lane.b32.xlu0 %v3034_v8, %s5864_s5 }
 0x798   : > { %v3026_v10 = vpop.permute.xlu0 %3025 }
 0x799   : > { %v3036_v7 = vsel %vm454_vm5, %v3026_v10, %v7690_v9 }
 0x79a   : > { %3057 = vrot.lane.b32.xlu0 %v3036_v7, %s5864_s5 }
 0x79c   : > { %v3016_v21 = vpop.permute.xlu1 %3015  ;;  %v3030_v0 = vpop.permute.xlu0 %3029 }
 0x79d   : > { %v3031_v37 = vsel %vm454_vm5, %v3016_v21, %v7648_v14  ;;  %v3038_v56 = vsel %vm454_vm5, %v3030_v0, %v7679_v27 }
 0x79e   : > { %3047 = vrot.lane.b32.xlu1 %v3031_v37, %s5864_s5  ;;  %3061 = vrot.lane.b32.xlu0 %v3038_v56, %s5864_s5 }
 0x7a0   : > { %v3020_v23 = vpop.permute.xlu1 %3019 }
 0x7a1   : > { %v3033_v6 = vsel %vm454_vm5, %v3020_v23, %v7662_v40  ;;  %v2741_v23 = vrot.slane %v7662_v40, 1 }
 0x7a2   : > { %3051 = vrot.lane.b32.xlu1 %v3033_v6, %s5864_s5  ;;  %3153 = vrot.lane.b32.xlu0 %v3032_v17, %s13317_s12  ;;  %v2740_v17 = vrot.slane %v7653_v60, 1 }
 0x7a4   : > { %v3024_v10 = vpop.permute.xlu1 %3023 }
 0x7a5   : > { %v3035_v21 = vsel %vm454_vm5, %v3024_v10, %v7674_v57  ;;  %v2743_v10 = vrot.slane %v7674_v57, 1  ;;  %v2746_v57 = vrot.slane %v7679_v27, 1 }
 0x7a6   : > { %3055 = vrot.lane.b32.xlu1 %v3035_v21, %s5864_s5  ;;  %3157 = vrot.lane.b32.xlu0 %v3034_v8, %s13317_s12  ;;  %v7943_v8 = vsel %vm437_vm2, %v2740_v17, %v2741_v23 }
 0x7a7   : > { %13700 = vst [vmem:[#allocation230_spill] sm:$0xff] %v7943_v8 }
 0x7a8   : > { %v3028_v34 = vpop.permute.xlu1 %3027 }
 0x7a9   : > { %v3037_v0 = vsel %vm454_vm5, %v3028_v34, %v7705_v22  ;;  %v2742_v34 = vrot.slane %v7667_v58, 1 }
 0x7aa   : > { %3059 = vrot.lane.b32.xlu1 %v3037_v0, %s5864_s5  ;;  %3161 = vrot.lane.b32.xlu0 %v3036_v7, %s13317_s12 }
 0x7ab   : > { %v7952_v7 = vsel %vm437_vm2, %v2742_v34, %v2743_v10  ;;  %v7983_v27 = vsel %vm437_vm2, %v2741_v23, %v2742_v34 }
 0x7ac   : > { %13701 = vst [vmem:[#allocation231_spill] sm:$0xff] %v7952_v7  ;;  %13705 = vst [vmem:[#allocation235_spill] sm:$0xff] %v7983_v27 }
 0x7ae   : > { %3151 = vrot.lane.b32.xlu1 %v3031_v37, %s13317_s12  ;;  %3165 = vrot.lane.b32.xlu0 %v3038_v56, %s13317_s12  ;;  %v2744_v37 = vrot.slane %v7690_v9, 1  ;;  %v2739_v56 = vrot.slane %v7648_v14, 1 }
 0x7b0   : > { %v2754_v40 = vsel %vm437_vm2, %v2746_v57, %v2739_v56 }
 0x7b2   : > { %3155 = vrot.lane.b32.xlu1 %v3033_v6, %s13317_s12  ;;  %3222 = vrot.lane.b32.xlu0 %v7943_v8, %s5863_s8  ;;  %v2745_v6 = vrot.slane %v7705_v22, 1  ;;  %v7971_v22 = vsel %vm437_vm2, %v2739_v56, %v2740_v17  ;;  %v7989_v17 = vsel %vm437_vm2, %v2743_v10, %v2744_v37 }
 0x7b3   : > { %13703 = vst [vmem:[#allocation233_spill] sm:$0xff] %v7971_v22  ;;  %13706 = vst [vmem:[#allocation236_spill] sm:$0xff] %v7989_v17 }
 0x7b6   : > { %3159 = vrot.lane.b32.xlu1 %v3035_v21, %s13317_s12  ;;  %3228 = vrot.lane.b32.xlu0 %v7952_v7, %s5863_s8  ;;  %v7963_v21 = vsel %vm437_vm2, %v2744_v37, %v2745_v6 }
 0x7b7   : > { %13702 = vst [vmem:[#allocation232_spill] sm:$0xff] %v7963_v21 }
 0x7ba   : > { %3163 = vrot.lane.b32.xlu1 %v3037_v0, %s13317_s12  ;;  %3234 = vrot.lane.b32.xlu0 %v7963_v21, %s5863_s8  ;;  %v7977_v0 = vsel %vm305_vm3, %v2754_v40, 0.0  ;;  %v7995_v40 = vsel %vm437_vm2, %v2745_v6, %v2746_v57 }
 0x7bb   : > { %13704 = vst [vmem:[#allocation234_spill] sm:$0xff] %v7977_v0  ;;  %13707 = vst [vmem:[#allocation237_spill] sm:$0xff] %v7995_v40 }
 0x7be   : > { %3219 = vrot.lane.b32.xlu1 %v7971_v22, %s5863_s8  ;;  %3240 = vrot.lane.b32.xlu0 %v7977_v0, %s5863_s8 }
 0x7c2   : > { %3225 = vrot.lane.b32.xlu1 %v7983_v27, %s5863_s8 }
 0x7c6   : > { %3231 = vrot.lane.b32.xlu1 %v7989_v17, %s5863_s8 }
 0x7ca   : > { %3237 = vrot.lane.b32.xlu1 %v7995_v40, %s5863_s8 }
 0x804   : > { %v7999_v56 = vpop.permute.xlu0 %3049 }
 0x805   : > { %13708 = vst [vmem:[#allocation238_spill] sm:$0xff] %v7999_v56 }
 0x808   : > { %v8001_v23 = vpop.permute.xlu0 %3053 }
 0x809   : > { %13709 = vst [vmem:[#allocation239_spill] sm:$0xff] %v8001_v23 }
 0x80c   : > { %v8003_v34 = vpop.permute.xlu0 %3057 }
 0x80d   : > { %13710 = vst [vmem:[#allocation240_spill] sm:$0xff] %v8003_v34 }
 0x810   : > { %v8005_v14 = vpop.permute.xlu1 %3047  ;;  %v8007_v10 = vpop.permute.xlu0 %3061 }
 0x811   : > { %13711 = vst [vmem:[#allocation241_spill] sm:$0xff] %v8005_v14  ;;  %13712 = vst [vmem:[#allocation242_spill] sm:$0xff] %v8007_v10 }
 0x814   : > { %v8009_v37 = vpop.permute.xlu1 %3051  ;;  %v8011_v9 = vpop.permute.xlu0 %3153 }
 0x815   : > { %13713 = vst [vmem:[#allocation243_spill] sm:$0xff] %v8009_v37  ;;  %13714 = vst [vmem:[#allocation244_spill] sm:$0xff] %v8011_v9 }
 0x818   : > { %v8013_v58 = vpop.permute.xlu1 %3055  ;;  %v8015_v57 = vpop.permute.xlu0 %3157 }
 0x819   : > { %13715 = vst [vmem:[#allocation245_spill] sm:$0xff] %v8013_v58  ;;  %13716 = vst [vmem:[#allocation246_spill] sm:$0xff] %v8015_v57 }
 0x81c   : > { %v8017_v6 = vpop.permute.xlu1 %3059  ;;  %v8019_v60 = vpop.permute.xlu0 %3161 }
 0x81d   : > { %13717 = vst [vmem:[#allocation247_spill] sm:$0xff] %v8017_v6  ;;  %13718 = vst [vmem:[#allocation248_spill] sm:$0xff] %v8019_v60 }
 0x820   : > { %v8021_v56 = vpop.permute.xlu1 %3151  ;;  %v8023_v23 = vpop.permute.xlu0 %3165 }
 0x821   : > { %13719 = vst [vmem:[#allocation249_spill] sm:$0xff] %v8021_v56  ;;  %13720 = vst [vmem:[#allocation250_spill] sm:$0xff] %v8023_v23 }
 0x824   : > { %v8025_v34 = vpop.permute.xlu1 %3155  ;;  %v3223_v14 = vpop.permute.xlu0 %3222 }
 0x825   : > { %13721 = vst [vmem:[#allocation251_spill] sm:$0xff] %v8025_v34  ;;  %v3224_v37 = vsel %vm454_vm5, %v3223_v14, %v7943_v8 }
 0x826   : > { %3245 = vrot.lane.b32.xlu0 %v3224_v37, %s5863_s8 }
 0x828   : > { %v8030_v9 = vpop.permute.xlu1 %3159  ;;  %v3229_v58 = vpop.permute.xlu0 %3228 }
 0x829   : > { %13722 = vst [vmem:[#allocation252_spill] sm:$0xff] %v8030_v9  ;;  %v3230_v6 = vsel %vm454_vm5, %v3229_v58, %v7952_v7 }
 0x82a   : > { %3249 = vrot.lane.b32.xlu0 %v3230_v6, %s5863_s8 }
 0x82c   : > { %v8035_v60 = vpop.permute.xlu1 %3163  ;;  %v3235_v56 = vpop.permute.xlu0 %3234 }
 0x82d   : > { %13723 = vst [vmem:[#allocation253_spill] sm:$0xff] %v8035_v60  ;;  %v3236_v34 = vsel %vm454_vm5, %v3235_v56, %v7963_v21 }
 0x82e   : > { %3253 = vrot.lane.b32.xlu0 %v3236_v34, %s5863_s8 }
 0x830   : > { %v3220_v23 = vpop.permute.xlu1 %3219  ;;  %v3241_v37 = vpop.permute.xlu0 %3240 }
 0x831   : > { %v3221_v14 = vsel %vm454_vm5, %v3220_v23, %v7971_v22  ;;  %v3242_v58 = vsel %vm454_vm5, %v3241_v37, %v7977_v0 }
 0x832   : > { %3243 = vrot.lane.b32.xlu1 %v3221_v14, %s5863_s8  ;;  %3257 = vrot.lane.b32.xlu0 %v3242_v58, %s5863_s8 }
 0x834   : > { %v3226_v6 = vpop.permute.xlu1 %3225 }
 0x835   : > { %v3227_v60 = vsel %vm454_vm5, %v3226_v6, %v7983_v27 }
 0x836   : > { %3247 = vrot.lane.b32.xlu1 %v3227_v60, %s5863_s8 }
 0x838   : > { %v3232_v56 = vpop.permute.xlu1 %3231 }
 0x839   : > { %v3233_v34 = vsel %vm454_vm5, %v3232_v56, %v7989_v17 }
 0x83a   : > { %3251 = vrot.lane.b32.xlu1 %v3233_v34, %s5863_s8 }
 0x83c   : > { %v3238_v23 = vpop.permute.xlu1 %3237 }
 0x83d   : > { %v3239_v14 = vsel %vm454_vm5, %v3238_v23, %v7995_v40 }
 0x83e   : > { %3255 = vrot.lane.b32.xlu1 %v3239_v14, %s5863_s8 }
 0x898   : > { %v3246_v37 = vpop.permute.xlu0 %3245 }
 0x899   : > { %v3260_v58 = vsel %vm454_vm5, %v3246_v37, %v7943_v8 }
 0x89a   : > { %3277 = vrot.lane.b32.xlu0 %v3260_v58, %s5864_s5 }
 0x89c   : > { %v3250_v6 = vpop.permute.xlu0 %3249 }
 0x89d   : > { %v3262_v60 = vsel %vm454_vm5, %v3250_v6, %v7952_v7  ;;  %v8148_v7 = vld [vmem:[%s6081_s11 + $0x50] sm:$0xff]  }
 0x89e   : > { %3281 = vrot.lane.b32.xlu0 %v3262_v60, %s5864_s5 }
 0x8a0   : > { %v3254_v56 = vpop.permute.xlu0 %3253 }
 0x8a1   : > { %v3264_v34 = vsel %vm454_vm5, %v3254_v56, %v7963_v21 }
 0x8a2   : > { %3285 = vrot.lane.b32.xlu0 %v3264_v34, %s5864_s5 }
 0x8a4   : > { %v3244_v23 = vpop.permute.xlu1 %3243  ;;  %v3258_v37 = vpop.permute.xlu0 %3257 }
 0x8a5   : > { %v3259_v14 = vsel %vm454_vm5, %v3244_v23, %v7971_v22  ;;  %v3266_v9 = vsel %vm454_vm5, %v3258_v37, %v7977_v0  ;;  %v8081_v0 = vld [vmem:[%s6088_s13 + $0x40] sm:$0xff]  }
 0x8a6   : > { %3275 = vrot.lane.b32.xlu1 %v3259_v14, %s5864_s5  ;;  %3289 = vrot.lane.b32.xlu0 %v3266_v9, %s5864_s5  ;;  %13724 = vst [vmem:[#allocation254_spill] sm:$0xff] %v8081_v0 }
 0x8a8   : > { %v3248_v6 = vpop.permute.xlu1 %3247 }
 0x8a9   : > { %v3261_v56 = vsel %vm454_vm5, %v3248_v6, %v7983_v27  ;;  %v13223_v6 = vunpack.c.h.bf16 %v8081_v0 }
 0x8aa   : > { %3279 = vrot.lane.b32.xlu1 %v3261_v56, %s5864_s5  ;;  %3381 = vrot.lane.b32.xlu0 %v3260_v58, %s13317_s12  ;;  %v13220_v58 = vunpack.c.l.bf16 %v8081_v0 }
 0x8ac   : > { %v3252_v57 = vpop.permute.xlu1 %3251 }
 0x8ad   : > { %v3263_v23 = vsel %vm454_vm5, %v3252_v57, %v7989_v17  ;;  %v8088_v57 = vld [vmem:[%s6088_s13 + $0x48] sm:$0xff]  }
 0x8ae   : > { %3283 = vrot.lane.b32.xlu1 %v3263_v23, %s5864_s5  ;;  %3385 = vrot.lane.b32.xlu0 %v3262_v60, %s13317_s12  ;;  %13725 = vst [vmem:[#allocation255_spill] sm:$0xff] %v8088_v57  ;;  %v13224_v60 = vunpack.c.l.bf16 %v8088_v57  ;;  %v13227_v17 = vunpack.c.h.bf16 %v8088_v57 }
 0x8b0   : > { %v3256_v37 = vpop.permute.xlu1 %3255 }
 0x8b1   : > { %v3265_v10 = vsel %vm454_vm5, %v3256_v37, %v7995_v40  ;;  %v3507_v37 = vsel %vm340_vm0, %v13220_v58, 0.0 }
 0x8b2   : > { %3287 = vrot.lane.b32.xlu1 %v3265_v10, %s5864_s5  ;;  %3389 = vrot.lane.b32.xlu0 %v3264_v34, %s13317_s12  ;;  %v3508_v34 = vsel %vm340_vm0, %v13223_v6, 0.0  ;;  %v8113_v6 = vld [vmem:[%s6081_s11 + $0x40] sm:$0xff]  }
 0x8b3   : > { %v3509_v40 = vadd.f32 %v3508_v34, %v3507_v37  ;;  %v13235_v34 = vunpack.c.l.bf16 %v8113_v6 }
 0x8b6   : > { %3379 = vrot.lane.b32.xlu1 %v3259_v14, %s13317_s12  ;;  %3393 = vrot.lane.b32.xlu0 %v3266_v9, %s13317_s12  ;;  %v3510_v9 = vsel %vm340_vm0, %v13224_v60, 0.0  ;;  %v8105_v14 = vld [vmem:[%s6088_s13 + $0x50] sm:$0xff]   ;;  %v13236_v60 = vunpack.c.h.bf16 %v8113_v6 }
 0x8b7   : > { %13726 = vst [vmem:[#allocation256_spill] sm:$0xff] %v8105_v14  ;;  %v3511_v58 = vadd.f32 %v3510_v9, %v3509_v40  ;;  %v13230_v0 = vunpack.c.l.bf16 %v8105_v14  ;;  %v13243_v27 = vunpack.c.h.bf16 %v8105_v14  ;;  %v8126_v9 = vld [vmem:[%s6088_s13 + $0x58] sm:$0xff]   ;;  %s5313_s13 = sld [smem:[#allocation2 + $0x52]] }
 0x8b8   : > { %13727 = vst [vmem:[#allocation257_spill] sm:$0xff] %v8126_v9 }
 0x8b9   : > { %v3514_v40 = vsel %vm340_vm0, %v13230_v0, 0.0  ;;  %v3516_v0 = vsel %vm340_vm0, %v13243_v27, 0.0 }
 0x8ba   : > { %3383 = vrot.lane.b32.xlu1 %v3261_v56, %s13317_s12  ;;  %v3512_v56 = vsel %vm340_vm0, %v13227_v17, 0.0 }
 0x8bb   : > { %v3513_v37 = vadd.f32 %v3512_v56, %v3511_v58  ;;  %v3482_v58 = vsel %vm340_vm0, %v13236_v60, 0.0  ;;  %v13245_v56 = vunpack.c.l.bf16 %v8126_v9 }
 0x8bd   : > { %v3515_v17 = vadd.f32 %v3514_v40, %v3513_v37  ;;  %v3518_v60 = vsel %vm340_vm0, %v13245_v56, 0.0 }
 0x8be   : > { %3387 = vrot.lane.b32.xlu1 %v3263_v23, %s13317_s12  ;;  %v8123_v23 = vld [vmem:[%s6081_s11 + $0x48] sm:$0xff]  }
 0x8bf   : > { %v13244_v57 = vunpack.c.l.bf16 %v8123_v23  ;;  %v3517_v21 = vadd.f32 %v3516_v0, %v3515_v17  ;;  %v13246_v37 = vunpack.c.h.bf16 %v8123_v23 }
 0x8c1   : > { %v3484_v40 = vsel %vm340_vm0, %v13244_v57, 0.0  ;;  %v3519_v8 = vadd.f32 %v3518_v60, %v3517_v21  ;;  %v3486_v0 = vsel %vm340_vm0, %v13246_v37, 0.0  ;;  %v13249_v57 = vunpack.c.h.bf16 %v8148_v7 }
 0x8c2   : > { %3391 = vrot.lane.b32.xlu1 %v3265_v10, %s13317_s12  ;;  %v3481_v10 = vsel %vm340_vm0, %v13235_v34, 0.0  ;;  %v13247_v34 = vunpack.c.h.bf16 %v8126_v9 }
 0x8c3   : > { %v3483_v22 = vadd.f32 %v3482_v58, %v3481_v10  ;;  %v13248_v10 = vunpack.c.l.bf16 %v8148_v7 }
 0x8c4   : > { %v3520_v17 = vsel %vm340_vm0, %v13247_v34, 0.0 }
 0x8c5   : > { %v3485_v14 = vadd.f32 %v3484_v40, %v3483_v22  ;;  %v3521_v27 = vadd.f32 %v3520_v17, %v3519_v8  ;;  %v3488_v56 = vsel %vm340_vm0, %v13248_v10, 0.0  ;;  %v8162_v22 = vld [vmem:[%s6081_s11 + $0x58] sm:$0xff]   ;;  %v3490_v40 = vsel %vm340_vm0, %v13249_v57, 0.0  ;;  %s5307_s11 = sld [smem:[#allocation2 + $0x3d]] }
 0x8c6   : > { %v13250_v60 = vunpack.c.l.bf16 %v8162_v22 }
 0x8c7   : > { %v3487_v58 = vadd.f32 %v3486_v0, %v3485_v14  ;;  %v5531_v14 = vunpack.c.h.bf16 %v8162_v22 }
 0x8c8   : > { %v3492_v8 = vsel %vm340_vm0, %v13250_v60, 0.0 }
 0x8c9   : > { %v3489_v21 = vadd.f32 %v3488_v56, %v3487_v58  ;;  %v3494_v17 = vsel %vm340_vm0, %v5531_v14, 0.0 }
 0x8cb   : > { %v3491_v37 = vadd.f32 %v3490_v40, %v3489_v21 }
 0x8cd   : > { %v3493_v0 = vadd.f32 %v3492_v8, %v3491_v37 }
 0x8cf   : > { %v3495_v34 = vadd.f32 %v3494_v17, %v3493_v0 }
 0x8d5   : > { %3522 = vadd.xlane.f32.xlu0 %v3521_v27 }
 0x8e6   : > { %3496 = vadd.xlane.f32.xlu1 %v3495_v34 }
 0x90c   : > { %v8173_v56 = vpop.permute.xlu0 %3277 }
 0x90d   : > { %13728 = vst [vmem:[#allocation258_spill] sm:$0xff] %v8173_v56 }
 0x910   : > { %v8175_v27 = vpop.permute.xlu0 %3281 }
 0x911   : > { %13729 = vst [vmem:[#allocation259_spill] sm:$0xff] %v8175_v27 }
 0x914   : > { %v8179_v10 = vpop.permute.xlu0 %3285 }
 0x915   : > { %13731 = vst [vmem:[#allocation261_spill] sm:$0xff] %v8179_v10 }
 0x918   : > { %v8177_v58 = vpop.permute.xlu1 %3275  ;;  %v8183_v40 = vpop.permute.xlu0 %3289 }
 0x919   : > { %13730 = vst [vmem:[#allocation260_spill] sm:$0xff] %v8177_v58  ;;  %13733 = vst [vmem:[#allocation263_spill] sm:$0xff] %v8183_v40 }
 0x91c   : > { %v8181_v21 = vpop.permute.xlu1 %3279  ;;  %v8187_v60 = vpop.permute.xlu0 %3381 }
 0x91d   : > { %13732 = vst [vmem:[#allocation262_spill] sm:$0xff] %v8181_v21  ;;  %13735 = vst [vmem:[#allocation265_spill] sm:$0xff] %v8187_v60 }
 0x920   : > { %v8185_v57 = vpop.permute.xlu1 %3283  ;;  %v8191_v8 = vpop.permute.xlu0 %3385 }
 0x921   : > { %13734 = vst [vmem:[#allocation264_spill] sm:$0xff] %v8185_v57  ;;  %13737 = vst [vmem:[#allocation267_spill] sm:$0xff] %v8191_v8 }
 0x924   : > { %v8189_v37 = vpop.permute.xlu1 %3287  ;;  %v8195_v0 = vpop.permute.xlu0 %3389 }
 0x925   : > { %13736 = vst [vmem:[#allocation266_spill] sm:$0xff] %v8189_v37  ;;  %13739 = vst [vmem:[#allocation269_spill] sm:$0xff] %v8195_v0 }
 0x928   : > { %v8193_v34 = vpop.permute.xlu1 %3379  ;;  %v8199_v58 = vpop.permute.xlu0 %3393 }
 0x929   : > { %13738 = vst [vmem:[#allocation268_spill] sm:$0xff] %v8193_v34  ;;  %13741 = vst [vmem:[#allocation271_spill] sm:$0xff] %v8199_v58 }
 0x92c   : > { %v8197_v17 = vpop.permute.xlu1 %3383 }
 0x92d   : > { %13740 = vst [vmem:[#allocation270_spill] sm:$0xff] %v8197_v17 }
 0x930   : > { %v8201_v21 = vpop.permute.xlu1 %3387 }
 0x931   : > { %13742 = vst [vmem:[#allocation272_spill] sm:$0xff] %v8201_v21 }
 0x934   : > { %v8203_v10 = vpop.permute.xlu1 %3391 }
 0x935   : > { %13743 = vst [vmem:[#allocation273_spill] sm:$0xff] %v8203_v10 }
 0x962   : > { %v3523_v56 = vpop.xlane.xlu0 %3522 }
 0x963   : > { %v3524_v40 = vrot.slane %v3523_v56, 4 }
 0x965   : > { %v3525_v57 = vadd.f32 %v3524_v40, %v3523_v56 }
 0x967   : > { %v3526_v27 = vrot.slane %v3525_v57, 2 }
 0x969   : > { %v3527_v8 = vadd.f32 %v3526_v27, %v3525_v57  ;;  %v13745_v57 = vunpack.c.l.bf16 %v8113_v6 }
 0x96b   : > { %v3528_v19 = vrot.slane %v3527_v8, 1 }
 0x96d   : > { %v3529_v17 = vadd.f32 %v3528_v19, %v3527_v8 }
 0x973   : > { %v3497_v60 = vpop.xlane.xlu1 %3496 }
 0x974   : > { %v3498_v37 = vrot.slane %v3497_v60, 4 }
 0x976   : > { %v3499_v9 = vadd.f32 %v3498_v37, %v3497_v60 }
 0x978   : > { %v3500_v31 = vrot.slane %v3499_v9, 2 }
 0x97a   : > { %v3501_v34 = vadd.f32 %v3500_v31, %v3499_v9  ;;  %v13747_v31 = vunpack.c.h.bf16 %v8113_v6  ;;  %v13750_v9 = vunpack.c.l.bf16 %v8123_v23 }
 0x97c   : > { %v3502_v0 = vrot.slane %v3501_v34, 1 }
 0x97e   : > { %v3503_v12 = vadd.f32 %v3502_v0, %v3501_v34 }
 0x980   : > { %5583 = vpush %v3503_v12 }
 0x981   : > { %5585 = vpush %v3529_v17 }
 0x9b1   : > { %s5584_s23 = spop %5583 }
 0x9b2   : > { %v3505_v58 = vstv %s5584_s23  ;;  %s5586_s7 = spop %5585  ;;  %s8568_s23 = sld [smem:[#allocation2 + $0xa]] }
 0x9b3   : > { %v3506_v21 = vmul.f32 0.00024414063, %v3505_v58  ;;  %v3531_v41 = vstv %s5586_s7  ;;  %s8616_s7 = sld [smem:[#allocation2 + $0x40]] }
 0x9b4   : > { %v3532_v10 = vmul.f32 0.00024414063, %v3531_v41 }
 0x9b6   : > { %v3533_v56 = vadd.f32 %v3532_v10, %v3506_v21  ;;  %v13752_v10 = vunpack.c.h.bf16 %v8123_v23  ;;  %v13755_v23 = vunpack.c.l.bf16 %v8148_v7 }
 0x9b8   : > { %v8205_v40 = vmul.f32 0.5, %v3533_v56  ;;  %v13758_v56 = vunpack.c.h.bf16 %v8148_v7 }
 0x9ba   : > { %13744 = vst [vmem:[#allocation274_spill] sm:$0xff] %v8205_v40  ;;  %v8210_v60 = vsub.f32 %v13745_v57, %v8205_v40  ;;  %v8215_v19 = vsub.f32 %v13747_v31, %v8205_v40  ;;  %v8218_v12 = vsub.f32 %v5531_v14, %v8205_v40  ;;  %v8223_v41 = vsub.f32 %v13750_v9, %v8205_v40 }
 0x9bb   : > { %v8228_v27 = vsub.f32 %v13752_v10, %v8205_v40  ;;  %v8243_v34 = vsub.f32 %v13755_v23, %v8205_v40  ;;  %v8255_v57 = vsub.f32 %v13758_v56, %v8205_v40  ;;  %v13761_v10 = vunpack.c.l.bf16 %v8162_v22 }
 0x9bc   : > { %13746 = vst [vmem:[#allocation275_spill] sm:$0xff] %v8210_v60  ;;  %13748 = vst [vmem:[#allocation276_spill] sm:$0xff] %v8215_v19  ;;  %v3543_v58 = vrot.slane %v8210_v60, 7  ;;  %v3544_v21 = vrot.slane %v8215_v19, 7  ;;  %v3550_v6 = vrot.slane %v8218_v12, 7  ;;  %v3545_v8 = vrot.slane %v8223_v41, 7 }
 0x9bd   : > { %13749 = vst [vmem:[#allocation277_spill] sm:$0xff] %v8218_v12  ;;  %13751 = vst [vmem:[#allocation278_spill] sm:$0xff] %v8223_v41  ;;  %v3546_v17 = vrot.slane %v8228_v27, 7  ;;  %v3547_v9 = vrot.slane %v8243_v34, 7 }
 0x9be   : > { %13753 = vst [vmem:[#allocation279_spill] sm:$0xff] %v8228_v27  ;;  %v8235_v14 = vsel %vm412_vm1, %v3543_v58, %v3544_v21  ;;  %v3558_v37 = vsel %vm412_vm1, %v3550_v6, %v3543_v58  ;;  %13756 = vst [vmem:[#allocation281_spill] sm:$0xff] %v8243_v34  ;;  %v8261_v31 = vsel %vm412_vm1, %v3544_v21, %v3545_v8 }
 0x9bf   : > { %13754 = vst [vmem:[#allocation280_spill] sm:$0xff] %v8235_v14  ;;  %3594 = vrot.lane.b32.xlu1 %v8235_v14, %s5863_s8  ;;  %v8249_v0 = vsel %vm290_vm4, %v3558_v37, 0.0  ;;  %13759 = vst [vmem:[#allocation283_spill] sm:$0xff] %v8255_v57  ;;  %v8267_v58 = vsub.f32 %v13761_v10, %v8205_v40  ;;  %v8273_v7 = vsel %vm412_vm1, %v3545_v8, %v3546_v17  ;;  %v3548_v37 = vrot.slane %v8255_v57, 7 }
 0x9c0   : > { %13757 = vst [vmem:[#allocation282_spill] sm:$0xff] %v8249_v0  ;;  %3591 = vrot.lane.b32.xlu0 %v8249_v0, %s5863_s8  ;;  %13760 = vst [vmem:[#allocation284_spill] sm:$0xff] %v8261_v31  ;;  %v8280_v21 = vsel %vm412_vm1, %v3546_v17, %v3547_v9 }
 0x9c1   : > { %13762 = vst [vmem:[#allocation285_spill] sm:$0xff] %v8267_v58  ;;  %13763 = vst [vmem:[#allocation286_spill] sm:$0xff] %v8273_v7  ;;  %v3549_v22 = vrot.slane %v8267_v58, 7  ;;  %v8287_v23 = vsel %vm412_vm1, %v3547_v9, %v3548_v37 }
 0x9c2   : > { %13764 = vst [vmem:[#allocation287_spill] sm:$0xff] %v8280_v21  ;;  %13765 = vst [vmem:[#allocation288_spill] sm:$0xff] %v8287_v23 }
 0x9c3   : > { %3597 = vrot.lane.b32.xlu1 %v8261_v31, %s5863_s8  ;;  %v8293_v8 = vsel %vm412_vm1, %v3548_v37, %v3549_v22  ;;  %v8299_v17 = vsel %vm412_vm1, %v3549_v22, %v3550_v6 }
 0x9c4   : > { %3600 = vrot.lane.b32.xlu0 %v8273_v7, %s5863_s8  ;;  %13766 = vst [vmem:[#allocation289_spill] sm:$0xff] %v8293_v8  ;;  %13767 = vst [vmem:[#allocation290_spill] sm:$0xff] %v8299_v17 }
 0x9c7   : > { %3603 = vrot.lane.b32.xlu1 %v8280_v21, %s5863_s8 }
 0x9c8   : > { %3606 = vrot.lane.b32.xlu0 %v8287_v23, %s5863_s8 }
 0x9cb   : > { %3609 = vrot.lane.b32.xlu1 %v8293_v8, %s5863_s8 }
 0x9cc   : > { %3612 = vrot.lane.b32.xlu0 %v8299_v17, %s5863_s8 }
 0xa31   : > { %v3595_v56 = vpop.permute.xlu1 %3594 }
 0xa32   : > { %v3596_v9 = vsel %vm454_vm5, %v3595_v56, %v8235_v14  ;;  %v3592_v10 = vpop.permute.xlu0 %3591 }
 0xa33   : > { %v3593_v40 = vsel %vm454_vm5, %v3592_v10, %v8249_v0  ;;  %3617 = vrot.lane.b32.xlu0 %v3596_v9, %s5863_s8 }
 0xa34   : > { %3615 = vrot.lane.b32.xlu1 %v3593_v40, %s5863_s8 }
 0xa35   : > { %v3598_v37 = vpop.permute.xlu1 %3597 }
 0xa36   : > { %v3599_v6 = vsel %vm454_vm5, %v3598_v37, %v8261_v31  ;;  %v3601_v22 = vpop.permute.xlu0 %3600 }
 0xa37   : > { %v3602_v4 = vsel %vm454_vm5, %v3601_v22, %v8273_v7 }
 0xa38   : > { %3621 = vrot.lane.b32.xlu0 %v3602_v4, %s5863_s8  ;;  %3619 = vrot.lane.b32.xlu1 %v3599_v6, %s5863_s8 }
 0xa39   : > { %v3604_v56 = vpop.permute.xlu1 %3603 }
 0xa3a   : > { %v3605_v10 = vsel %vm454_vm5, %v3604_v56, %v8280_v21  ;;  %v3607_v5 = vpop.permute.xlu0 %3606 }
 0xa3b   : > { %v3608_v40 = vsel %vm454_vm5, %v3607_v5, %v8287_v23 }
 0xa3c   : > { %3625 = vrot.lane.b32.xlu0 %v3608_v40, %s5863_s8  ;;  %3623 = vrot.lane.b32.xlu1 %v3605_v10, %s5863_s8 }
 0xa3d   : > { %v3610_v9 = vpop.permute.xlu1 %3609 }
 0xa3e   : > { %v3611_v37 = vsel %vm454_vm5, %v3610_v9, %v8293_v8  ;;  %v3613_v22 = vpop.permute.xlu0 %3612 }
 0xa3f   : > { %v3614_v4 = vsel %vm454_vm5, %v3613_v22, %v8299_v17 }
 0xa40   : > { %3629 = vrot.lane.b32.xlu0 %v3614_v4, %s5863_s8  ;;  %3627 = vrot.lane.b32.xlu1 %v3611_v37, %s5863_s8 }
 0xaa5   : > { %v3618_v6 = vpop.permute.xlu0 %3617 }
 0xaa6   : > { %v3632_v5 = vsel %vm454_vm5, %v3618_v6, %v8235_v14  ;;  %v3616_v56 = vpop.permute.xlu1 %3615 }
 0xaa7   : > { %v3631_v10 = vsel %vm454_vm5, %v3616_v56, %v8249_v0  ;;  %3649 = vrot.lane.b32.xlu0 %v3632_v5, %s5864_s5 }
 0xaa8   : > { %3647 = vrot.lane.b32.xlu1 %v3631_v10, %s5864_s5 }
 0xaaa   : > { %v3622_v40 = vpop.permute.xlu0 %3621  ;;  %v3620_v9 = vpop.permute.xlu1 %3619 }
 0xaab   : > { %v3634_v22 = vsel %vm454_vm5, %v3622_v40, %v8273_v7  ;;  %v3633_v37 = vsel %vm454_vm5, %v3620_v9, %v8261_v31 }
 0xaac   : > { %3653 = vrot.lane.b32.xlu0 %v3634_v22, %s5864_s5  ;;  %3651 = vrot.lane.b32.xlu1 %v3633_v37, %s5864_s5 }
 0xaae   : > { %v3626_v4 = vpop.permute.xlu0 %3625  ;;  %v3624_v6 = vpop.permute.xlu1 %3623 }
 0xaaf   : > { %v3636_v56 = vsel %vm454_vm5, %v3626_v4, %v8287_v23  ;;  %v3635_v0 = vsel %vm454_vm5, %v3624_v6, %v8280_v21  ;;  %v8588_v21 = vstv %s5324_s14  ;;  %s9202_s14 = sld [smem:[#allocation2 + $0x3]] }
 0xab0   : > { %3657 = vrot.lane.b32.xlu0 %v3636_v56, %s5864_s5  ;;  %3655 = vrot.lane.b32.xlu1 %v3635_v0, %s5864_s5 }
 0xab2   : > { %v3630_v40 = vpop.permute.xlu0 %3629  ;;  %v3628_v14 = vpop.permute.xlu1 %3627 }
 0xab3   : > { %v3638_v9 = vsel %vm454_vm5, %v3630_v40, %v8299_v17  ;;  %v3637_v31 = vsel %vm454_vm5, %v3628_v14, %v8293_v8  ;;  %v8584_v8 = vstv %s5318_s26  ;;  %v8586_v17 = vstv %s5319_s22  ;;  %s9162_s26 = sld [smem:[#allocation2 + $0x2b]]  ;;  %s9176_s22 = sld [smem:[#allocation2 + $0x61]] }
 0xab4   : > { %3661 = vrot.lane.b32.xlu0 %v3638_v9, %s5864_s5  ;;  %3659 = vrot.lane.b32.xlu1 %v3637_v31, %s5864_s5 }
 0xab8   : > { %3753 = vrot.lane.b32.xlu0 %v3632_v5, %s13317_s12  ;;  %3751 = vrot.lane.b32.xlu1 %v3631_v10, %s13317_s12 }
 0xabc   : > { %3757 = vrot.lane.b32.xlu0 %v3634_v22, %s13317_s12  ;;  %3755 = vrot.lane.b32.xlu1 %v3633_v37, %s13317_s12 }
 0xac0   : > { %3761 = vrot.lane.b32.xlu0 %v3636_v56, %s13317_s12  ;;  %3759 = vrot.lane.b32.xlu1 %v3635_v0, %s13317_s12 }
 0xac4   : > { %3765 = vrot.lane.b32.xlu0 %v3638_v9, %s13317_s12  ;;  %3763 = vrot.lane.b32.xlu1 %v3637_v31, %s13317_s12 }
 0xac8   : > { %3822 = vrot.lane.b32.xlu0 %v8215_v19, %s5863_s8  ;;  %3819 = vrot.lane.b32.xlu1 %v8210_v60, %s5863_s8 }
 0xacc   : > { %3828 = vrot.lane.b32.xlu0 %v8228_v27, %s5863_s8  ;;  %3825 = vrot.lane.b32.xlu1 %v8223_v41, %s5863_s8 }
 0xad0   : > { %3834 = vrot.lane.b32.xlu0 %v8255_v57, %s5863_s8  ;;  %3831 = vrot.lane.b32.xlu1 %v8243_v34, %s5863_s8 }
 0xad4   : > { %3840 = vrot.lane.b32.xlu0 %v8218_v12, %s5863_s8  ;;  %3837 = vrot.lane.b32.xlu1 %v8267_v58, %s5863_s8 }
 0xb19   : > { %v8375_v14 = vpop.permute.xlu0 %3649 }
 0xb1a   : > { %13768 = vst [vmem:[#allocation291_spill] sm:$0xff] %v8375_v14  ;;  %v8377_v0 = vpop.permute.xlu1 %3647 }
 0xb1b   : > { %13769 = vst [vmem:[#allocation292_spill] sm:$0xff] %v8377_v0 }
 0xb1e   : > { %v8379_v31 = vpop.permute.xlu0 %3653  ;;  %v8381_v5 = vpop.permute.xlu1 %3651 }
 0xb1f   : > { %13770 = vst [vmem:[#allocation293_spill] sm:$0xff] %v8379_v31  ;;  %13771 = vst [vmem:[#allocation294_spill] sm:$0xff] %v8381_v5 }
 0xb22   : > { %v8383_v10 = vpop.permute.xlu0 %3657  ;;  %v8385_v22 = vpop.permute.xlu1 %3655 }
 0xb23   : > { %13772 = vst [vmem:[#allocation295_spill] sm:$0xff] %v8383_v10  ;;  %13773 = vst [vmem:[#allocation296_spill] sm:$0xff] %v8385_v22 }
 0xb26   : > { %v8387_v37 = vpop.permute.xlu0 %3661  ;;  %v8389_v4 = vpop.permute.xlu1 %3659 }
 0xb27   : > { %13774 = vst [vmem:[#allocation297_spill] sm:$0xff] %v8387_v37  ;;  %13775 = vst [vmem:[#allocation298_spill] sm:$0xff] %v8389_v4 }
 0xb2a   : > { %v8391_v6 = vpop.permute.xlu0 %3753  ;;  %v8393_v56 = vpop.permute.xlu1 %3751 }
 0xb2b   : > { %13776 = vst [vmem:[#allocation299_spill] sm:$0xff] %v8391_v6  ;;  %13777 = vst [vmem:[#allocation300_spill] sm:$0xff] %v8393_v56 }
 0xb2e   : > { %v8395_v40 = vpop.permute.xlu0 %3757  ;;  %v8397_v9 = vpop.permute.xlu1 %3755 }
 0xb2f   : > { %13778 = vst [vmem:[#allocation301_spill] sm:$0xff] %v8395_v40  ;;  %13779 = vst [vmem:[#allocation302_spill] sm:$0xff] %v8397_v9 }
 0xb32   : > { %v8399_v0 = vpop.permute.xlu0 %3761  ;;  %v8401_v14 = vpop.permute.xlu1 %3759 }
 0xb33   : > { %13780 = vst [vmem:[#allocation303_spill] sm:$0xff] %v8399_v0  ;;  %13781 = vst [vmem:[#allocation304_spill] sm:$0xff] %v8401_v14 }
 0xb36   : > { %v8403_v5 = vpop.permute.xlu0 %3765  ;;  %v8405_v10 = vpop.permute.xlu1 %3763 }
 0xb37   : > { %13782 = vst [vmem:[#allocation305_spill] sm:$0xff] %v8403_v5  ;;  %13783 = vst [vmem:[#allocation306_spill] sm:$0xff] %v8405_v10 }
 0xb3a   : > { %v3823_v22 = vpop.permute.xlu0 %3822  ;;  %v3820_v37 = vpop.permute.xlu1 %3819 }
 0xb3b   : > { %v3824_v4 = vsel %vm454_vm5, %v3823_v22, %v8215_v19  ;;  %v3821_v56 = vsel %vm454_vm5, %v3820_v37, %v8210_v60 }
 0xb3c   : > { %3845 = vrot.lane.b32.xlu0 %v3824_v4, %s5863_s8  ;;  %3843 = vrot.lane.b32.xlu1 %v3821_v56, %s5863_s8 }
 0xb3e   : > { %v3829_v9 = vpop.permute.xlu0 %3828  ;;  %v3826_v6 = vpop.permute.xlu1 %3825 }
 0xb3f   : > { %v3830_v14 = vsel %vm454_vm5, %v3829_v9, %v8228_v27  ;;  %v3827_v10 = vsel %vm454_vm5, %v3826_v6, %v8223_v41 }
 0xb40   : > { %3849 = vrot.lane.b32.xlu0 %v3830_v14, %s5863_s8  ;;  %3847 = vrot.lane.b32.xlu1 %v3827_v10, %s5863_s8 }
 0xb42   : > { %v3835_v22 = vpop.permute.xlu0 %3834  ;;  %v3832_v5 = vpop.permute.xlu1 %3831 }
 0xb43   : > { %v3836_v37 = vsel %vm454_vm5, %v3835_v22, %v8255_v57  ;;  %v3833_v4 = vsel %vm454_vm5, %v3832_v5, %v8243_v34 }
 0xb44   : > { %3853 = vrot.lane.b32.xlu0 %v3836_v37, %s5863_s8  ;;  %3851 = vrot.lane.b32.xlu1 %v3833_v4, %s5863_s8 }
 0xb46   : > { %v3841_v56 = vpop.permute.xlu0 %3840  ;;  %v3838_v9 = vpop.permute.xlu1 %3837 }
 0xb47   : > { %v3842_v6 = vsel %vm454_vm5, %v3841_v56, %v8218_v12  ;;  %v3839_v14 = vsel %vm454_vm5, %v3838_v9, %v8267_v58 }
 0xb48   : > { %3857 = vrot.lane.b32.xlu0 %v3842_v6, %s5863_s8  ;;  %3855 = vrot.lane.b32.xlu1 %v3839_v14, %s5863_s8 }
 0xbae   : > { %v3846_v10 = vpop.permute.xlu0 %3845  ;;  %v3844_v22 = vpop.permute.xlu1 %3843 }
 0xbaf   : > { %v3860_v5 = vsel %vm454_vm5, %v3846_v10, %v8215_v19  ;;  %v3859_v37 = vsel %vm454_vm5, %v3844_v22, %v8210_v60 }
 0xbb0   : > { %3877 = vrot.lane.b32.xlu0 %v3860_v5, %s5864_s5  ;;  %3875 = vrot.lane.b32.xlu1 %v3859_v37, %s5864_s5 }
 0xbb2   : > { %v3850_v4 = vpop.permute.xlu0 %3849  ;;  %v3848_v56 = vpop.permute.xlu1 %3847 }
 0xbb3   : > { %v3862_v9 = vsel %vm454_vm5, %v3850_v4, %v8228_v27  ;;  %v3861_v6 = vsel %vm454_vm5, %v3848_v56, %v8223_v41 }
 0xbb4   : > { %3881 = vrot.lane.b32.xlu0 %v3862_v9, %s5864_s5  ;;  %3879 = vrot.lane.b32.xlu1 %v3861_v6, %s5864_s5 }
 0xbb6   : > { %v3854_v14 = vpop.permute.xlu0 %3853  ;;  %v3852_v10 = vpop.permute.xlu1 %3851 }
 0xbb7   : > { %v3864_v22 = vsel %vm454_vm5, %v3854_v14, %v8255_v57  ;;  %v3863_v0 = vsel %vm454_vm5, %v3852_v10, %v8243_v34  ;;  %v3568_v14 = vrot.slane %v8215_v19, 1  ;;  %v3567_v10 = vrot.slane %v8210_v60, 1 }
 0xbb8   : > { %3885 = vrot.lane.b32.xlu0 %v3864_v22, %s5864_s5  ;;  %3883 = vrot.lane.b32.xlu1 %v3863_v0, %s5864_s5 }
 0xbba   : > { %v3858_v4 = vpop.permute.xlu0 %3857  ;;  %v3856_v40 = vpop.permute.xlu1 %3855 }
 0xbbb   : > { %v3866_v56 = vsel %vm454_vm5, %v3858_v4, %v8218_v12  ;;  %v3865_v31 = vsel %vm454_vm5, %v3856_v40, %v8267_v58  ;;  %v3569_v40 = vrot.slane %v8223_v41, 1  ;;  %v3573_v4 = vrot.slane %v8267_v58, 1 }
 0xbbc   : > { %3889 = vrot.lane.b32.xlu0 %v3866_v56, %s5864_s5  ;;  %3887 = vrot.lane.b32.xlu1 %v3865_v31, %s5864_s5 }
 0xbc0   : > { %3981 = vrot.lane.b32.xlu0 %v3860_v5, %s13317_s12  ;;  %3979 = vrot.lane.b32.xlu1 %v3859_v37, %s13317_s12  ;;  %v8468_v5 = vsel %vm437_vm2, %v3568_v14, %v3569_v40  ;;  %v8472_v37 = vsel %vm437_vm2, %v3567_v10, %v3568_v14 }
 0xbc1   : > { %13784 = vst [vmem:[#allocation307_spill] sm:$0xff] %v8468_v5  ;;  %13785 = vst [vmem:[#allocation308_spill] sm:$0xff] %v8472_v37 }
 0xbc4   : > { %3985 = vrot.lane.b32.xlu0 %v3862_v9, %s13317_s12  ;;  %3983 = vrot.lane.b32.xlu1 %v3861_v6, %s13317_s12  ;;  %v3571_v9 = vrot.slane %v8243_v34, 1 }
 0xbc8   : > { %3989 = vrot.lane.b32.xlu0 %v3864_v22, %s13317_s12  ;;  %3987 = vrot.lane.b32.xlu1 %v3863_v0, %s13317_s12  ;;  %v3570_v0 = vrot.slane %v8228_v27, 1  ;;  %v3572_v22 = vrot.slane %v8255_v57, 1  ;;  %v8574_v27 = vstv %s5307_s11  ;;  %s9066_s11 = sld [smem:[#allocation2 + $0x5b]] }
 0xbca   : > { %v8486_v6 = vsel %vm437_vm2, %v3569_v40, %v3570_v0  ;;  %v8497_v14 = vsel %vm437_vm2, %v3572_v22, %v3573_v4  ;;  %v8501_v40 = vsel %vm437_vm2, %v3571_v9, %v3572_v22 }
 0xbcb   : > { %13787 = vst [vmem:[#allocation310_spill] sm:$0xff] %v8486_v6  ;;  %13788 = vst [vmem:[#allocation311_spill] sm:$0xff] %v8497_v14 }
 0xbcc   : > { %3993 = vrot.lane.b32.xlu0 %v3866_v56, %s13317_s12  ;;  %3991 = vrot.lane.b32.xlu1 %v3865_v31, %s13317_s12  ;;  %v8482_v31 = vsel %vm437_vm2, %v3570_v0, %v3571_v9  ;;  %v3574_v56 = vrot.slane %v8218_v12, 1  ;;  %13789 = vst [vmem:[#allocation312_spill] sm:$0xff] %v8501_v40  ;;  %s9310_s12 = sld [smem:[#allocation2 + $0x8]] }
 0xbcd   : > { %13786 = vst [vmem:[#allocation309_spill] sm:$0xff] %v8482_v31 }
 0xbce   : > { %v3582_v0 = vsel %vm437_vm2, %v3574_v56, %v3567_v10  ;;  %v8515_v60 = vsel %vm437_vm2, %v3573_v4, %v3574_v56 }
 0xbcf   : > { %v8511_v41 = vsel %vm305_vm3, %v3582_v0, 0.0  ;;  %13791 = vst [vmem:[#allocation314_spill] sm:$0xff] %v8515_v60 }
 0xbd0   : > { %4050 = vrot.lane.b32.xlu0 %v8468_v5, %s5863_s8  ;;  %4047 = vrot.lane.b32.xlu1 %v8472_v37, %s5863_s8  ;;  %13790 = vst [vmem:[#allocation313_spill] sm:$0xff] %v8511_v41 }
 0xbd4   : > { %4056 = vrot.lane.b32.xlu0 %v8482_v31, %s5863_s8  ;;  %4053 = vrot.lane.b32.xlu1 %v8486_v6, %s5863_s8 }
 0xbd8   : > { %4062 = vrot.lane.b32.xlu0 %v8497_v14, %s5863_s8  ;;  %4059 = vrot.lane.b32.xlu1 %v8501_v40, %s5863_s8 }
 0xbdc   : > { %4068 = vrot.lane.b32.xlu0 %v8511_v41, %s5863_s8  ;;  %4065 = vrot.lane.b32.xlu1 %v8515_v60, %s5863_s8 }
 0xc22   : > { %v8521_v9 = vpop.permute.xlu0 %3877  ;;  %v8523_v22 = vpop.permute.xlu1 %3875 }
 0xc23   : > { %13792 = vst [vmem:[#allocation315_spill] sm:$0xff] %v8521_v9  ;;  %13793 = vst [vmem:[#allocation316_spill] sm:$0xff] %v8523_v22 }
 0xc26   : > { %v8525_v19 = vpop.permute.xlu0 %3881  ;;  %v8527_v10 = vpop.permute.xlu1 %3879 }
 0xc27   : > { %13794 = vst [vmem:[#allocation317_spill] sm:$0xff] %v8525_v19  ;;  %13795 = vst [vmem:[#allocation318_spill] sm:$0xff] %v8527_v10  ;;  %v8564_v19 = vstv %s5300_s9  ;;  %s8986_s9 = sld [smem:[#allocation2 + $0x10]] }
 0xc2a   : > { %v8529_v0 = vpop.permute.xlu0 %3885  ;;  %v8531_v58 = vpop.permute.xlu1 %3883 }
 0xc2b   : > { %13796 = vst [vmem:[#allocation319_spill] sm:$0xff] %v8529_v0  ;;  %13797 = vst [vmem:[#allocation320_spill] sm:$0xff] %v8531_v58  ;;  %v13808_v58 = vlaneseq }
 0xc2d   : > { %v8562_v0 = vand.u32 127, %v13808_v58 }
 0xc2e   : > { %v8533_v4 = vpop.permute.xlu0 %3889  ;;  %v8535_v56 = vpop.permute.xlu1 %3887 }
 0xc2f   : > { %13798 = vst [vmem:[#allocation321_spill] sm:$0xff] %v8533_v4  ;;  %13799 = vst [vmem:[#allocation322_spill] sm:$0xff] %v8535_v56  ;;  %v8553_v56 = vstv %s5294_s25  ;;  %s8902_s25 = sld [smem:[#allocation2 + $0xd]]  ;;  %vm306_vm6 = vcmp.ge.s32.totalorder %v8562_v0, 1  ;;  %vm307_vm7 = vcmp.lt.s32.totalorder %v8562_v0, 63 }
 0xc30   : > { %v8582_v58 = vmul.f32 %v8553_v56, %v6381_v32  ;;  %v8596_v7 = vmul.f32 %v8553_v56, %v6401_v51 }
 0xc32   : > { %v8537_v12 = vpop.permute.xlu0 %3981  ;;  %v8539_v34 = vpop.permute.xlu1 %3979 }
 0xc33   : > { %13800 = vst [vmem:[#allocation323_spill] sm:$0xff] %v8537_v12  ;;  %13801 = vst [vmem:[#allocation324_spill] sm:$0xff] %v8539_v34 }
 0xc36   : > { %v8541_v57 = vpop.permute.xlu0 %3985  ;;  %v8543_v9 = vpop.permute.xlu1 %3983 }
 0xc37   : > { %13802 = vst [vmem:[#allocation325_spill] sm:$0xff] %v8541_v57  ;;  %13803 = vst [vmem:[#allocation326_spill] sm:$0xff] %v8543_v9 }
 0xc3a   : > { %v8545_v10 = vpop.permute.xlu0 %3989  ;;  %v8547_v22 = vpop.permute.xlu1 %3987 }
 0xc3b   : > { %13804 = vst [vmem:[#allocation327_spill] sm:$0xff] %v8545_v10  ;;  %13805 = vst [vmem:[#allocation328_spill] sm:$0xff] %v8547_v22  ;;  %v8555_v10 = vstv %s5295_s10  ;;  %s8904_s10 = sld [smem:[#allocation2 + $0x43]] }
 0xc3c   : > { %v8592_v23 = vmul.f32 %v8555_v10, %v6381_v32  ;;  %v8612_v32 = vmul.f32 %v8555_v10, %v6431_v46 }
 0xc3e   : > { %v8549_v12 = vpop.permute.xlu0 %3993  ;;  %v8551_v34 = vpop.permute.xlu1 %3991  ;;  %13809 = vst [vmem:[#allocation331_spill] sm:$0xff] %v8592_v23  ;;  %v8614_v23 = vstv %s5325_s20  ;;  %s9212_s20 = sld [smem:[#allocation2 + $0x39]] }
 0xc3f   : > { %13806 = vst [vmem:[#allocation329_spill] sm:$0xff] %v8549_v12  ;;  %13807 = vst [vmem:[#allocation330_spill] sm:$0xff] %v8551_v34  ;;  %v8566_v12 = vstv %s5301_s6  ;;  %v8572_v34 = vstv %s5306_s30  ;;  %s8988_s6 = sld [smem:[#allocation2 + $0x46]]  ;;  %s9048_s30 = sld [smem:[#allocation2 + $0x25]] }
 0xc42   : > { %v4051_v9 = vpop.permute.xlu0 %4050  ;;  %v4048_v57 = vpop.permute.xlu1 %4047 }
 0xc43   : > { %v4052_v22 = vsel %vm454_vm5, %v4051_v9, %v8468_v5  ;;  %v4049_v4 = vsel %vm454_vm5, %v4048_v57, %v8472_v37  ;;  %v8576_v9 = vstv %s5312_s29  ;;  %v8578_v57 = vstv %s5313_s13  ;;  %s9114_s29 = sld [smem:[#allocation2 + $0x28]]  ;;  %s9116_s13 = sld [smem:[#allocation2 + $0x5e]] }
 0xc44   : > { %4073 = vrot.lane.b32.xlu0 %v4052_v22, %s5863_s8  ;;  %4071 = vrot.lane.b32.xlu1 %v4049_v4, %s5863_s8  ;;  %v8604_v37 = vmul.f32 %v8555_v10, %v6401_v51  ;;  %v8608_v5 = vmul.f32 %v8553_v56, %v6431_v46  ;;  %v8622_v51 = vmul.f32 %v8553_v56, %v6385_v25 }
 0xc45   : > { %v8630_v46 = vmul.f32 %v8553_v56, %v6462_v11 }
 0xc46   : > { %v4057_v22 = vpop.permute.xlu0 %4056  ;;  %v4054_v4 = vpop.permute.xlu1 %4053 }
 0xc47   : > { %v4058_v1 = vsel %vm454_vm5, %v4057_v22, %v8482_v31  ;;  %v4055_v35 = vsel %vm454_vm5, %v4054_v4, %v8486_v6  ;;  %v8626_v22 = vmul.f32 %v8555_v10, %v6385_v25  ;;  %13811 = vst [vmem:[#allocation333_spill] sm:$0xff] %v8630_v46  ;;  %v8634_v4 = vmul.f32 %v8555_v10, %v6462_v11  ;;  %v13815_v31 = vld [vmem:[#allocation21_spill] sm:$0xff] }
 0xc48   : > { %4077 = vrot.lane.b32.xlu0 %v4058_v1, %s5863_s8  ;;  %4075 = vrot.lane.b32.xlu1 %v4055_v35, %s5863_s8  ;;  %v8638_v1 = vmul.f32 %v8553_v56, %v6416_v62  ;;  %v8642_v35 = vmul.f32 %v8555_v10, %v6416_v62  ;;  %v8646_v25 = vmul.f32 %v8564_v19, %v13815_v31 }
 0xc49   : > { %13810 = vst [vmem:[#allocation332_spill] sm:$0xff] %v8626_v22  ;;  %13812 = vst [vmem:[#allocation334_spill] sm:$0xff] %v8634_v4  ;;  %v8650_v6 = vmul.f32 %v8566_v12, %v13815_v31  ;;  %v8654_v11 = vmul.f32 %v8553_v56, %v6447_v26  ;;  %v13821_v4 = vld [vmem:[#allocation24_spill] sm:$0xff] }
 0xc4a   : > { %13813 = vst [vmem:[#allocation335_spill] sm:$0xff] %v8638_v1  ;;  %13814 = vst [vmem:[#allocation336_spill] sm:$0xff] %v8642_v35  ;;  %v4063_v46 = vpop.permute.xlu0 %4062  ;;  %v4060_v22 = vpop.permute.xlu1 %4059  ;;  %v8658_v1 = vmul.f32 %v8555_v10, %v6447_v26  ;;  %v13819_v35 = vld [vmem:[#allocation23_spill] sm:$0xff]  ;;  %v8677_v26 = vstv %s8568_s23  ;;  %s9214_s23 = sld [smem:[#allocation2 + $0x5]] }
 0xc4b   : > { %13816 = vst [vmem:[#allocation21_spill] sm:$0xff] %v8646_v25  ;;  %13817 = vst [vmem:[#allocation337_spill] sm:$0xff] %v8650_v6  ;;  %v4064_v62 = vsel %vm454_vm5, %v4063_v46, %v8497_v14  ;;  %v4061_v25 = vsel %vm454_vm5, %v4060_v22, %v8501_v40  ;;  %v8666_v31 = vmul.f32 %v8564_v19, %v13819_v35  ;;  %v13824_v46 = vld [vmem:[#allocation25_spill] sm:$0xff]  ;;  %v13827_v14 = vld [vmem:[#allocation26_spill] sm:$0xff] }
 0xc4c   : > { %13818 = vst [vmem:[#allocation338_spill] sm:$0xff] %v8654_v11  ;;  %v8670_v6 = vmul.f32 %v8566_v12, %v13819_v35  ;;  %v8674_v11 = vmul.f32 %v8564_v19, %v13821_v4  ;;  %4081 = vrot.lane.b32.xlu0 %v4064_v62, %s5863_s8  ;;  %4079 = vrot.lane.b32.xlu1 %v4061_v25, %s5863_s8  ;;  %v13830_v62 = vld [vmem:[#allocation28_spill] sm:$0xff] }
 0xc4d   : > { %v8683_v22 = vmul.f32 %v8566_v12, %v13821_v4  ;;  %v8687_v40 = vmul.f32 %v8564_v19, %v13824_v46  ;;  %v8691_v35 = vmul.f32 %v8566_v12, %v13824_v46  ;;  %v8699_v25 = vmul.f32 %v8566_v12, %v13827_v14 }
 0xc4e   : > { %13820 = vst [vmem:[#allocation23_spill] sm:$0xff] %v8670_v6  ;;  %13822 = vst [vmem:[#allocation24_spill] sm:$0xff] %v8674_v11  ;;  %v8695_v11 = vmul.f32 %v8564_v19, %v13827_v14  ;;  %v8703_v4 = vmul.f32 %v8564_v19, %v13830_v62  ;;  %v8711_v46 = vmul.f32 %v8572_v34, %v6397_v50  ;;  %v13835_v14 = vld [vmem:[#allocation38_spill] sm:$0xff] }
 0xc4f   : > { %13823 = vst [vmem:[#allocation339_spill] sm:$0xff] %v8683_v22  ;;  %13825 = vst [vmem:[#allocation25_spill] sm:$0xff] %v8687_v40  ;;  %v8707_v40 = vmul.f32 %v8566_v12, %v13830_v62  ;;  %v4066_v22 = vpop.permute.xlu1 %4065 }
 0xc50   : > { %13826 = vst [vmem:[#allocation340_spill] sm:$0xff] %v8691_v35  ;;  %13828 = vst [vmem:[#allocation26_spill] sm:$0xff] %v8695_v11  ;;  %v4069_v35 = vpop.permute.xlu0 %4068  ;;  %v8715_v11 = vmul.f32 %v8574_v27, %v6397_v50  ;;  %v4067_v62 = vsel %vm454_vm5, %v4066_v22, %v8515_v60  ;;  %v8752_v60 = vmul.f32 %v8572_v34, %v6506_v13 }
 0xc51   : > { %13829 = vst [vmem:[#allocation341_spill] sm:$0xff] %v8699_v25  ;;  %13831 = vst [vmem:[#allocation28_spill] sm:$0xff] %v8703_v4  ;;  %v8719_v25 = vmul.f32 %v8572_v34, %v13835_v14  ;;  %v4070_v4 = vsel %vm454_vm5, %v4069_v35, %v8511_v41  ;;  %4083 = vrot.lane.b32.xlu1 %v4067_v62, %s5863_s8  ;;  %v13841_v35 = vld [vmem:[#allocation41_spill] sm:$0xff]  ;;  %v13846_v41 = vld [vmem:[#allocation46_spill] sm:$0xff] }
 0xc52   : > { %13832 = vst [vmem:[#allocation342_spill] sm:$0xff] %v8707_v40  ;;  %13833 = vst [vmem:[#allocation343_spill] sm:$0xff] %v8711_v46  ;;  %v8727_v40 = vmul.f32 %v8574_v27, %v13835_v14  ;;  %v13838_v46 = vld [vmem:[#allocation39_spill] sm:$0xff]  ;;  %4085 = vrot.lane.b32.xlu0 %v4070_v4, %s5863_s8  ;;  %v8744_v22 = vmul.f32 %v8572_v34, %v13841_v35  ;;  %v8748_v14 = vmul.f32 %v8574_v27, %v13841_v35 }
 0xc53   : > { %13834 = vst [vmem:[#allocation344_spill] sm:$0xff] %v8715_v11  ;;  %13836 = vst [vmem:[#allocation38_spill] sm:$0xff] %v8719_v25  ;;  %v8731_v6 = vmul.f32 %v8572_v34, %v13838_v46  ;;  %v8735_v50 = vmul.f32 %v8574_v27, %v13838_v46  ;;  %v8738_v11 = vstv %s8616_s7  ;;  %v8756_v46 = vmul.f32 %v8574_v27, %v6506_v13  ;;  %s9229_s7 = sld [smem:[#allocation2 + $0x3b]]  ;;  %v14134_v25 = vld [vmem:[#allocation97_spill] sm:$0xff] }
 0xc54   : > { %13837 = vst [vmem:[#allocation345_spill] sm:$0xff] %v8727_v40  ;;  %13842 = vst [vmem:[#allocation41_spill] sm:$0xff] %v8744_v22  ;;  %v8760_v4 = vmul.f32 %v8572_v34, %v13846_v41  ;;  %v8764_v62 = vmul.f32 %v8574_v27, %v13846_v41  ;;  %v8768_v35 = vmul.f32 %v8576_v9, %v6443_v36  ;;  %v14117_v22 = vld [vmem:[#allocation88_spill] sm:$0xff]  ;;  %v14130_v40 = vld [vmem:[#allocation94_spill] sm:$0xff] }
 0xc55   : > { %13839 = vst [vmem:[#allocation39_spill] sm:$0xff] %v8731_v6  ;;  %13840 = vst [vmem:[#allocation346_spill] sm:$0xff] %v8735_v50  ;;  %v8776_v13 = vmul.f32 %v8576_v9, %v6458_v55  ;;  %v8784_v41 = vmul.f32 %v8576_v9, %v6561_v24 }
 0xc56   : > { %13843 = vst [vmem:[#allocation347_spill] sm:$0xff] %v8748_v14  ;;  %13844 = vst [vmem:[#allocation348_spill] sm:$0xff] %v8752_v60  ;;  %v8772_v14 = vmul.f32 %v8578_v57, %v6443_v36  ;;  %v8792_v36 = vmul.f32 %v8576_v9, %v6472_v43 }
 0xc57   : > { %13845 = vst [vmem:[#allocation349_spill] sm:$0xff] %v8756_v46  ;;  %13847 = vst [vmem:[#allocation46_spill] sm:$0xff] %v8760_v4  ;;  %v8780_v46 = vmul.f32 %v8578_v57, %v6458_v55  ;;  %v8800_v55 = vmul.f32 %v8576_v9, %v6585_v53 }
 0xc58   : > { %13848 = vst [vmem:[#allocation350_spill] sm:$0xff] %v8764_v62  ;;  %13849 = vst [vmem:[#allocation351_spill] sm:$0xff] %v8768_v35  ;;  %v8788_v62 = vmul.f32 %v8578_v57, %v6561_v24  ;;  %v8808_v24 = vmul.f32 %v8576_v9, %v6599_v33 }
 0xc59   : > { %13850 = vst [vmem:[#allocation352_spill] sm:$0xff] %v8772_v14  ;;  %13851 = vst [vmem:[#allocation353_spill] sm:$0xff] %v8776_v13  ;;  %v8796_v14 = vmul.f32 %v8578_v57, %v6472_v43 }
 0xc5a   : > { %13852 = vst [vmem:[#allocation354_spill] sm:$0xff] %v8780_v46  ;;  %13853 = vst [vmem:[#allocation355_spill] sm:$0xff] %v8784_v41  ;;  %v8804_v46 = vmul.f32 %v8578_v57, %v6585_v53 }
 0xc5b   : > { %13854 = vst [vmem:[#allocation356_spill] sm:$0xff] %v8788_v62  ;;  %13855 = vst [vmem:[#allocation357_spill] sm:$0xff] %v8792_v36  ;;  %v8812_v62 = vmul.f32 %v8578_v57, %v6599_v33  ;;  %v13861_v36 = vld [vmem:[#allocation29_spill] sm:$0xff] }
 0xc5c   : > { %13856 = vst [vmem:[#allocation358_spill] sm:$0xff] %v8796_v14  ;;  %13857 = vst [vmem:[#allocation359_spill] sm:$0xff] %v8800_v55  ;;  %v8816_v43 = vmul.f32 %v8584_v8, %v13861_v36  ;;  %v8820_v14 = vmul.f32 %v8586_v17, %v13861_v36  ;;  %v13864_v55 = vld [vmem:[#allocation32_spill] sm:$0xff] }
 0xc5d   : > { %13858 = vst [vmem:[#allocation360_spill] sm:$0xff] %v8804_v46  ;;  %13859 = vst [vmem:[#allocation361_spill] sm:$0xff] %v8808_v24  ;;  %v8824_v53 = vmul.f32 %v8584_v8, %v13864_v55  ;;  %v8828_v46 = vmul.f32 %v8586_v17, %v13864_v55  ;;  %v13867_v24 = vld [vmem:[#allocation33_spill] sm:$0xff] }
 0xc5e   : > { %13860 = vst [vmem:[#allocation362_spill] sm:$0xff] %v8812_v62  ;;  %13862 = vst [vmem:[#allocation29_spill] sm:$0xff] %v8816_v43  ;;  %v8832_v33 = vmul.f32 %v8584_v8, %v13867_v24  ;;  %v8836_v62 = vmul.f32 %v8586_v17, %v13867_v24  ;;  %v13870_v43 = vld [vmem:[#allocation34_spill] sm:$0xff]  ;;  %v8856_v24 = vmul.f32 %v8588_v21, %v6510_v38 }
 0xc5f   : > { %13863 = vst [vmem:[#allocation363_spill] sm:$0xff] %v8820_v14  ;;  %13865 = vst [vmem:[#allocation32_spill] sm:$0xff] %v8824_v53  ;;  %v8840_v36 = vmul.f32 %v8584_v8, %v13870_v43  ;;  %v8844_v14 = vmul.f32 %v8586_v17, %v13870_v43  ;;  %v13873_v53 = vld [vmem:[#allocation35_spill] sm:$0xff] }
 0xc60   : > { %13866 = vst [vmem:[#allocation364_spill] sm:$0xff] %v8828_v46  ;;  %13868 = vst [vmem:[#allocation33_spill] sm:$0xff] %v8832_v33  ;;  %v8848_v55 = vmul.f32 %v8584_v8, %v13873_v53  ;;  %v8852_v46 = vmul.f32 %v8586_v17, %v13873_v53  ;;  %v8872_v53 = vmul.f32 %v8588_v21, %v13485_v47 }
 0xc61   : > { %13869 = vst [vmem:[#allocation365_spill] sm:$0xff] %v8836_v62  ;;  %13871 = vst [vmem:[#allocation34_spill] sm:$0xff] %v8840_v36  ;;  %v8860_v62 = vmul.f32 %v8614_v23, %v6510_v38  ;;  %v13878_v36 = vld [vmem:[#allocation37_spill] sm:$0xff]  ;;  %v8880_v38 = vmul.f32 %v8588_v21, %v13486_v59 }
 0xc62   : > { %13872 = vst [vmem:[#allocation366_spill] sm:$0xff] %v8844_v14  ;;  %13874 = vst [vmem:[#allocation35_spill] sm:$0xff] %v8848_v55  ;;  %v8864_v43 = vmul.f32 %v8584_v8, %v13878_v36  ;;  %v8868_v14 = vmul.f32 %v8586_v17, %v13878_v36  ;;  %v8888_v36 = vmul.f32 %v8588_v21, %v6635_v28 }
 0xc63   : > { %13875 = vst [vmem:[#allocation367_spill] sm:$0xff] %v8852_v46  ;;  %13876 = vst [vmem:[#allocation368_spill] sm:$0xff] %v8856_v24  ;;  %v8876_v46 = vmul.f32 %v8614_v23, %v13485_v47 }
 0xc64   : > { %13877 = vst [vmem:[#allocation369_spill] sm:$0xff] %v8860_v62  ;;  %13879 = vst [vmem:[#allocation37_spill] sm:$0xff] %v8864_v43  ;;  %v8884_v62 = vmul.f32 %v8614_v23, %v13486_v59  ;;  %v8908_v59 = vmul.f32 %v8588_v21, %v6651_v39  ;;  %v8952_v43 = vmul.f32 %v8555_v10, %v6707_v63 }
 0xc65   : > { %13880 = vst [vmem:[#allocation370_spill] sm:$0xff] %v8868_v14  ;;  %13881 = vst [vmem:[#allocation371_spill] sm:$0xff] %v8872_v53  ;;  %v8892_v14 = vmul.f32 %v8614_v23, %v6635_v28  ;;  %v13887_v53 = vld [vmem:[#allocation27_spill] sm:$0xff]  ;;  %v8912_v28 = vmul.f32 %v8614_v23, %v6651_v39  ;;  %v8932_v39 = vmul.f32 %v8588_v21, %v6673_v54 }
 0xc66   : > { %13882 = vst [vmem:[#allocation372_spill] sm:$0xff] %v8876_v46  ;;  %13883 = vst [vmem:[#allocation373_spill] sm:$0xff] %v8880_v38  ;;  %v8896_v47 = vmul.f32 %v8564_v19, %v13887_v53  ;;  %v8900_v46 = vmul.f32 %v8566_v12, %v13887_v53  ;;  %v8920_v53 = vmul.f32 %v8578_v57, %v6490_v45 }
 0xc67   : > { %13884 = vst [vmem:[#allocation374_spill] sm:$0xff] %v8884_v62  ;;  %13885 = vst [vmem:[#allocation375_spill] sm:$0xff] %v8888_v36  ;;  %v8924_v36 = vmul.f32 %v8572_v34, %v6639_v44  ;;  %v8928_v62 = vmul.f32 %v8574_v27, %v6639_v44  ;;  %v8948_v44 = vmul.f32 %v8553_v56, %v6707_v63 }
 0xc68   : > { %13886 = vst [vmem:[#allocation376_spill] sm:$0xff] %v8892_v14  ;;  %13888 = vst [vmem:[#allocation27_spill] sm:$0xff] %v8896_v47  ;;  %v8916_v14 = vmul.f32 %v8576_v9, %v6490_v45 }
 0xc69   : > { %13889 = vst [vmem:[#allocation377_spill] sm:$0xff] %v8900_v46  ;;  %13890 = vst [vmem:[#allocation378_spill] sm:$0xff] %v8908_v59  ;;  %v13898_v59 = vld [vmem:[#allocation36_spill] sm:$0xff] }
 0xc6a   : > { %13891 = vst [vmem:[#allocation379_spill] sm:$0xff] %v8912_v28  ;;  %13892 = vst [vmem:[#allocation380_spill] sm:$0xff] %v8916_v14  ;;  %v8936_v28 = vmul.f32 %v8614_v23, %v6673_v54  ;;  %v8940_v45 = vmul.f32 %v8584_v8, %v13898_v59  ;;  %v8944_v38 = vmul.f32 %v8586_v17, %v13898_v59 }
 0xc6b   : > { %13893 = vst [vmem:[#allocation381_spill] sm:$0xff] %v8920_v53  ;;  %13894 = vst [vmem:[#allocation382_spill] sm:$0xff] %v8924_v36  ;;  %v8956_v54 = vmul.f32 %v8588_v21, %v6655_v49 }
 0xc6c   : > { %13895 = vst [vmem:[#allocation383_spill] sm:$0xff] %v8928_v62  ;;  %13896 = vst [vmem:[#allocation384_spill] sm:$0xff] %v8932_v39  ;;  %v13905_v39 = vld [vmem:[#allocation22_spill] sm:$0xff] }
 0xc6d   : > { %13897 = vst [vmem:[#allocation385_spill] sm:$0xff] %v8936_v28  ;;  %13899 = vst [vmem:[#allocation36_spill] sm:$0xff] %v8940_v45  ;;  %v8960_v28 = vmul.f32 %v8614_v23, %v6655_v49  ;;  %v8964_v59 = vmul.f32 %v8564_v19, %v13905_v39  ;;  %v8968_v56 = vmul.f32 %v8566_v12, %v13905_v39  ;;  %v13913_v12 = vld [vmem:[#allocation30_spill] sm:$0xff]  ;;  %v2394_v39 = vstv %s8904_s10  ;;  %s9245_s10 = sld [smem:[#allocation2 + $0x54]] }
 0xc6e   : > { %13900 = vst [vmem:[#allocation386_spill] sm:$0xff] %v8944_v38  ;;  %13901 = vst [vmem:[#allocation387_spill] sm:$0xff] %v8948_v44  ;;  %v13908_v38 = vld [vmem:[#allocation40_spill] sm:$0xff]  ;;  %v8980_v49 = vmul.f32 %v8576_v9, %v6722_v20  ;;  %v8984_v19 = vmul.f32 %v8578_v57, %v6722_v20  ;;  %v9000_v9 = vmul.f32 %v8588_v21, %v6620_v18  ;;  %v14069_v44 = vld [vmem:[#allocation73_spill] sm:$0xff] }
 0xc6f   : > { %13902 = vst [vmem:[#allocation388_spill] sm:$0xff] %v8952_v43  ;;  %13903 = vst [vmem:[#allocation389_spill] sm:$0xff] %v8956_v54  ;;  %v8972_v63 = vmul.f32 %v8572_v34, %v13908_v38  ;;  %v8976_v10 = vmul.f32 %v8574_v27, %v13908_v38  ;;  %v8992_v34 = vmul.f32 %v8584_v8, %v13913_v12  ;;  %v2376_v38 = vstv %s8902_s25  ;;  %s9231_s25 = sld [smem:[#allocation2 + $0x1e]]  ;;  %v14058_v54 = vld [vmem:[#allocation64_spill] sm:$0xff] }
 0xc70   : > { %13904 = vst [vmem:[#allocation390_spill] sm:$0xff] %v8960_v28  ;;  %13906 = vst [vmem:[#allocation22_spill] sm:$0xff] %v8964_v59  ;;  %v8996_v27 = vmul.f32 %v8586_v17, %v13913_v12  ;;  %v9004_v20 = vmul.f32 %v8614_v23, %v6620_v18  ;;  %v9008_v57 = vmul.f32 %v8677_v26, %v6682_v61  ;;  %v14057_v28 = vld [vmem:[#allocation63_spill] sm:$0xff] }
 0xc71   : > { %13907 = vst [vmem:[#allocation391_spill] sm:$0xff] %v8968_v56  ;;  %13909 = vst [vmem:[#allocation40_spill] sm:$0xff] %v8972_v63  ;;  %v9012_v8 = vmul.f32 %v8738_v11, %v6682_v61  ;;  %v9016_v17 = vmul.f32 %v8677_v26, %v13487_v48  ;;  %v9020_v21 = vmul.f32 %v8738_v11, %v13487_v48 }
 0xc72   : > { %13910 = vst [vmem:[#allocation392_spill] sm:$0xff] %v8976_v10  ;;  %13911 = vst [vmem:[#allocation393_spill] sm:$0xff] %v8980_v49  ;;  %v9024_v18 = vmul.f32 %v8677_v26, %v13526_v52  ;;  %v9028_v23 = vmul.f32 %v8738_v11, %v13526_v52  ;;  %v9034_v61 = vmul.f32 %v8677_v26, %v6669_v42  ;;  %v14063_v10 = vld [vmem:[#allocation67_spill] sm:$0xff] }
 0xc73   : > { %13912 = vst [vmem:[#allocation394_spill] sm:$0xff] %v8984_v19  ;;  %13914 = vst [vmem:[#allocation30_spill] sm:$0xff] %v8992_v34  ;;  %v9038_v12 = vmul.f32 %v8738_v11, %v6669_v42  ;;  %v9042_v48 = vmul.f32 %v8677_v26, %v13529_v3  ;;  %v9052_v52 = vmul.f32 %v8677_v26, %v13543_v29  ;;  %v14059_v19 = vld [vmem:[#allocation65_spill] sm:$0xff] }
 0xc74   : > { %13915 = vst [vmem:[#allocation395_spill] sm:$0xff] %v8996_v27  ;;  %13916 = vst [vmem:[#allocation396_spill] sm:$0xff] %v9000_v9  ;;  %v9056_v42 = vmul.f32 %v8738_v11, %v13543_v29  ;;  %v13934_v29 = vld [vmem:[#allocation57_spill] sm:$0xff]  ;;  %v765_v27 = vsel %vm306_vm6, %v14058_v54, 0.0  ;;  %v868_v49 = vsel %vm307_vm7, %v14059_v19, 0.0  ;;  %v870_v19 = vsel %vm307_vm7, %v14063_v10, 0.0 }
 0xc75   : > { %13917 = vst [vmem:[#allocation397_spill] sm:$0xff] %v9004_v20  ;;  %13918 = vst [vmem:[#allocation398_spill] sm:$0xff] %v9008_v57  ;;  %v9421_v20 = vstv %s9310_s12  ;;  %v14066_v10 = vld [vmem:[#allocation70_spill] sm:$0xff]  ;;  %s9809_s12 = sld [smem:[#allocation2 + $0x3e]] }
 0xc76   : > { %13919 = vst [vmem:[#allocation399_spill] sm:$0xff] %v9012_v8  ;;  %13920 = vst [vmem:[#allocation400_spill] sm:$0xff] %v9016_v17  ;;  %v14055_v17 = vld [vmem:[#allocation62_spill] sm:$0xff] }
 0xc77   : > { %13921 = vst [vmem:[#allocation401_spill] sm:$0xff] %v9020_v21  ;;  %13922 = vst [vmem:[#allocation402_spill] sm:$0xff] %v9024_v18  ;;  %v9046_v18 = vmul.f32 %v8738_v11, %v13529_v3  ;;  %v9064_v3 = vmul.f32 %v8738_v11, %v13534_v15 }
 0xc78   : > { %13923 = vst [vmem:[#allocation403_spill] sm:$0xff] %v9028_v23  ;;  %13924 = vst [vmem:[#allocation404_spill] sm:$0xff] %v9034_v61  ;;  %v9060_v23 = vmul.f32 %v8677_v26, %v13534_v15  ;;  %v9080_v61 = vmul.f32 %v2394_v39, %v13934_v29 }
 0xc79   : > { %13925 = vst [vmem:[#allocation405_spill] sm:$0xff] %v9038_v12  ;;  %13926 = vst [vmem:[#allocation406_spill] sm:$0xff] %v9042_v48  ;;  %v9074_v48 = vmul.f32 %v8738_v11, %v13537_v16  ;;  %v9077_v12 = vmul.f32 %v2376_v38, %v13934_v29  ;;  %v2604_v29 = vstv %s8986_s9  ;;  %s9247_s9 = sld [smem:[#allocation2 + $0x20]] }
 0xc7a   : > { %13927 = vst [vmem:[#allocation407_spill] sm:$0xff] %v9046_v18  ;;  %13928 = vst [vmem:[#allocation408_spill] sm:$0xff] %v9052_v52  ;;  %v9070_v18 = vmul.f32 %v8677_v26, %v13537_v16  ;;  %v13943_v16 = vld [vmem:[#allocation56_spill] sm:$0xff] }
 0xc7b   : > { %13929 = vst [vmem:[#allocation409_spill] sm:$0xff] %v9056_v42  ;;  %13930 = vst [vmem:[#allocation410_spill] sm:$0xff] %v9060_v23  ;;  %v13937_v23 = vld [vmem:[#allocation44_spill] sm:$0xff]  ;;  %v9095_v11 = vmul.f32 %v2376_v38, %v13943_v16 }
 0xc7c   : > { %13931 = vst [vmem:[#allocation411_spill] sm:$0xff] %v9064_v3  ;;  %13932 = vst [vmem:[#allocation412_spill] sm:$0xff] %v9070_v18  ;;  %v9083_v42 = vmul.f32 %v2376_v38, %v13937_v23  ;;  %v9086_v15 = vmul.f32 %v2394_v39, %v13937_v23  ;;  %v13940_v3 = vld [vmem:[#allocation48_spill] sm:$0xff] }
 0xc7d   : > { %13933 = vst [vmem:[#allocation413_spill] sm:$0xff] %v9074_v48  ;;  %13935 = vst [vmem:[#allocation57_spill] sm:$0xff] %v9077_v12  ;;  %v9089_v52 = vmul.f32 %v2376_v38, %v13940_v3  ;;  %v9092_v26 = vmul.f32 %v2394_v39, %v13940_v3  ;;  %v9098_v12 = vmul.f32 %v2394_v39, %v13943_v16  ;;  %v13946_v48 = vld [vmem:[#allocation52_spill] sm:$0xff]  ;;  %v13952_v16 = vld [vmem:[#allocation47_spill] sm:$0xff] }
 0xc7e   : > { %13936 = vst [vmem:[#allocation414_spill] sm:$0xff] %v9080_v61  ;;  %13938 = vst [vmem:[#allocation44_spill] sm:$0xff] %v9083_v42  ;;  %v2622_v61 = vstv %s8988_s6  ;;  %v9103_v18 = vmul.f32 %v2376_v38, %v13946_v48  ;;  %v9106_v23 = vmul.f32 %v2394_v39, %v13946_v48  ;;  %v13955_v48 = vld [vmem:[#allocation50_spill] sm:$0xff]  ;;  %s9261_s6 = sld [smem:[#allocation2 + $0x56]] }
 0xc7f   : > { %13939 = vst [vmem:[#allocation415_spill] sm:$0xff] %v9086_v15  ;;  %13941 = vst [vmem:[#allocation48_spill] sm:$0xff] %v9089_v52  ;;  %v13949_v15 = vld [vmem:[#allocation43_spill] sm:$0xff] }
 0xc80   : > { %13942 = vst [vmem:[#allocation416_spill] sm:$0xff] %v9092_v26  ;;  %13944 = vst [vmem:[#allocation56_spill] sm:$0xff] %v9095_v11  ;;  %v9109_v52 = vmul.f32 %v2376_v38, %v13949_v15  ;;  %v9112_v3 = vmul.f32 %v2394_v39, %v13949_v15  ;;  %v9128_v11 = vmul.f32 %v2394_v39, %v13955_v48  ;;  %v13961_v26 = vld [vmem:[#allocation166_spill] sm:$0xff] }
 0xc81   : > { %13945 = vst [vmem:[#allocation417_spill] sm:$0xff] %v9098_v12  ;;  %13947 = vst [vmem:[#allocation52_spill] sm:$0xff] %v9103_v18  ;;  %v9119_v12 = vmul.f32 %v2376_v38, %v13952_v16  ;;  %v9122_v18 = vmul.f32 %v2394_v39, %v13952_v16  ;;  %v9137_v42 = vmul.f32 %v2604_v29, %v13961_v26  ;;  %v13964_v16 = vld [vmem:[#allocation167_spill] sm:$0xff]  ;;  %v13967_v39 = vld [vmem:[#allocation168_spill] sm:$0xff] }
 0xc82   : > { %13948 = vst [vmem:[#allocation418_spill] sm:$0xff] %v9106_v23  ;;  %13950 = vst [vmem:[#allocation43_spill] sm:$0xff] %v9109_v52  ;;  %v9125_v23 = vmul.f32 %v2376_v38, %v13955_v48  ;;  %v13958_v52 = vld [vmem:[#allocation165_spill] sm:$0xff]  ;;  %v9146_v38 = vmul.f32 %v2622_v61, %v13964_v16  ;;  %v9149_v48 = vmul.f32 %v2604_v29, %v13967_v39 }
 0xc83   : > { %13951 = vst [vmem:[#allocation419_spill] sm:$0xff] %v9112_v3  ;;  %13953 = vst [vmem:[#allocation47_spill] sm:$0xff] %v9119_v12  ;;  %v9131_v15 = vmul.f32 %v2604_v29, %v13958_v52  ;;  %v9134_v3 = vmul.f32 %v2622_v61, %v13958_v52  ;;  %v9140_v12 = vmul.f32 %v2622_v61, %v13961_v26  ;;  %v13970_v52 = vld [vmem:[#allocation169_spill] sm:$0xff]  ;;  %v2906_v26 = vstv %s9066_s11  ;;  %s9275_s11 = sld [smem:[#allocation2 + $0x36]] }
 0xc84   : > { %13954 = vst [vmem:[#allocation420_spill] sm:$0xff] %v9122_v18  ;;  %13956 = vst [vmem:[#allocation50_spill] sm:$0xff] %v9125_v23  ;;  %v9143_v18 = vmul.f32 %v2604_v29, %v13964_v16 }
 0xc85   : > { %13957 = vst [vmem:[#allocation421_spill] sm:$0xff] %v9128_v11  ;;  %13959 = vst [vmem:[#allocation165_spill] sm:$0xff] %v9131_v15  ;;  %v2888_v11 = vstv %s9048_s30  ;;  %v9153_v15 = vmul.f32 %v2622_v61, %v13967_v39  ;;  %s9263_s30 = sld [smem:[#allocation2]] }
 0xc86   : > { %13960 = vst [vmem:[#allocation422_spill] sm:$0xff] %v9134_v3  ;;  %13962 = vst [vmem:[#allocation166_spill] sm:$0xff] %v9137_v42  ;;  %v9156_v3 = vmul.f32 %v2604_v29, %v13970_v52  ;;  %v9159_v42 = vmul.f32 %v2622_v61, %v13970_v52  ;;  %v13979_v52 = vld [vmem:[#allocation172_spill] sm:$0xff] }
 0xc87   : > { %13963 = vst [vmem:[#allocation423_spill] sm:$0xff] %v9140_v12  ;;  %13965 = vst [vmem:[#allocation167_spill] sm:$0xff] %v9143_v18  ;;  %v13973_v18 = vld [vmem:[#allocation170_spill] sm:$0xff] }
 0xc88   : > { %13966 = vst [vmem:[#allocation424_spill] sm:$0xff] %v9146_v38  ;;  %13968 = vst [vmem:[#allocation168_spill] sm:$0xff] %v9149_v48  ;;  %v9165_v12 = vmul.f32 %v2604_v29, %v13973_v18  ;;  %v9168_v16 = vmul.f32 %v2622_v61, %v13973_v18  ;;  %v13976_v48 = vld [vmem:[#allocation171_spill] sm:$0xff]  ;;  %v9188_v18 = vmul.f32 %v2888_v11, %v7698_v30 }
 0xc89   : > { %13969 = vst [vmem:[#allocation425_spill] sm:$0xff] %v9153_v15  ;;  %13971 = vst [vmem:[#allocation169_spill] sm:$0xff] %v9156_v3  ;;  %v9171_v39 = vmul.f32 %v2604_v29, %v13976_v48  ;;  %v9174_v15 = vmul.f32 %v2622_v61, %v13976_v48  ;;  %v9182_v3 = vmul.f32 %v2622_v61, %v13979_v52 }
 0xc8a   : > { %13972 = vst [vmem:[#allocation426_spill] sm:$0xff] %v9159_v42  ;;  %13974 = vst [vmem:[#allocation170_spill] sm:$0xff] %v9165_v12  ;;  %v9179_v42 = vmul.f32 %v2604_v29, %v13979_v52  ;;  %v9185_v12 = vmul.f32 %v2888_v11, %v7683_v2  ;;  %v9194_v48 = vmul.f32 %v2906_v26, %v7698_v30  ;;  %v13988_v29 = vld [vmem:[#allocation193_spill] sm:$0xff]  ;;  %v13992_v30 = vld [vmem:[#allocation194_spill] sm:$0xff] }
 0xc8b   : > { %13975 = vst [vmem:[#allocation427_spill] sm:$0xff] %v9168_v16  ;;  %13977 = vst [vmem:[#allocation171_spill] sm:$0xff] %v9171_v39  ;;  %v9191_v16 = vmul.f32 %v2906_v26, %v7683_v2  ;;  %v9208_v52 = vmul.f32 %v2906_v26, %v13988_v29  ;;  %v3134_v2 = vstv %s9116_s13  ;;  %s9292_s13 = sld [smem:[#allocation2 + $0x38]] }
 0xc8c   : > { %13978 = vst [vmem:[#allocation428_spill] sm:$0xff] %v9174_v15  ;;  %13980 = vst [vmem:[#allocation172_spill] sm:$0xff] %v9179_v42  ;;  %v13986_v15 = vld [vmem:[#allocation192_spill] sm:$0xff]  ;;  %v9200_v42 = vmul.f32 %v2888_v11, %v13988_v29 }
 0xc8d   : > { %13981 = vst [vmem:[#allocation429_spill] sm:$0xff] %v9182_v3  ;;  %13982 = vst [vmem:[#allocation430_spill] sm:$0xff] %v9185_v12  ;;  %v9197_v39 = vmul.f32 %v2888_v11, %v13986_v15  ;;  %v9205_v61 = vmul.f32 %v2906_v26, %v13986_v15  ;;  %v13998_v29 = vld [vmem:[#allocation196_spill] sm:$0xff]  ;;  %v9394_v12 = vstv %s9263_s30  ;;  %v9397_v3 = vstv %s9275_s11  ;;  %s10253_s30 = sld [smem:[#allocation2 + $0x9]]  ;;  %s10297_s11 = sld [smem:[#allocation2 + $0x3f]] }
 0xc8e   : > { %13983 = vst [vmem:[#allocation431_spill] sm:$0xff] %v9188_v18  ;;  %13984 = vst [vmem:[#allocation432_spill] sm:$0xff] %v9191_v16  ;;  %v3116_v18 = vstv %s9114_s29  ;;  %s9277_s29 = sld [smem:[#allocation2 + $0x2]] }
 0xc8f   : > { %13985 = vst [vmem:[#allocation433_spill] sm:$0xff] %v9194_v48  ;;  %13987 = vst [vmem:[#allocation192_spill] sm:$0xff] %v9197_v39  ;;  %v9217_v48 = vmul.f32 %v2888_v11, %v13992_v30  ;;  %v9220_v39 = vmul.f32 %v2906_v26, %v13992_v30  ;;  %v14001_v30 = vld [vmem:[#allocation197_spill] sm:$0xff] }
 0xc90   : > { %13989 = vst [vmem:[#allocation193_spill] sm:$0xff] %v9200_v42  ;;  %13990 = vst [vmem:[#allocation434_spill] sm:$0xff] %v9205_v61  ;;  %v13995_v42 = vld [vmem:[#allocation195_spill] sm:$0xff] }
 0xc91   : > { %13991 = vst [vmem:[#allocation435_spill] sm:$0xff] %v9208_v52  ;;  %13993 = vst [vmem:[#allocation194_spill] sm:$0xff] %v9217_v48  ;;  %v9223_v16 = vmul.f32 %v2888_v11, %v13995_v42  ;;  %v9226_v15 = vmul.f32 %v2906_v26, %v13995_v42  ;;  %v9234_v52 = vmul.f32 %v2888_v11, %v13998_v29  ;;  %v14004_v42 = vld [vmem:[#allocation17_spill] sm:$0xff]  ;;  %v9409_v21 = vstv %s9292_s13  ;;  %s10521_s13 = sld [smem:[#allocation2 + $0x41]] }
 0xc92   : > { %13994 = vst [vmem:[#allocation436_spill] sm:$0xff] %v9220_v39  ;;  %v9237_v48 = vmul.f32 %v2906_v26, %v13998_v29  ;;  %v9240_v39 = vmul.f32 %v2888_v11, %v14001_v30  ;;  %v9253_v61 = vmul.f32 %v3134_v2, %v14004_v42 }
 0xc93   : > { %13996 = vst [vmem:[#allocation195_spill] sm:$0xff] %v9223_v16  ;;  %13997 = vst [vmem:[#allocation437_spill] sm:$0xff] %v9226_v15  ;;  %v9243_v16 = vmul.f32 %v2906_v26, %v14001_v30  ;;  %v9250_v15 = vmul.f32 %v3116_v18, %v14004_v42  ;;  %v14010_v26 = vld [vmem:[#allocation190_spill] sm:$0xff]  ;;  %v3344_v42 = vstv %s9162_s26  ;;  %s9294_s26 = sld [smem:[#allocation2 + $0x6]] }
 0xc94   : > { %13999 = vst [vmem:[#allocation196_spill] sm:$0xff] %v9234_v52  ;;  %14000 = vst [vmem:[#allocation438_spill] sm:$0xff] %v9237_v48  ;;  %v14007_v52 = vld [vmem:[#allocation189_spill] sm:$0xff]  ;;  %v9266_v30 = vmul.f32 %v3116_v18, %v14010_v26  ;;  %v9406_v23 = vstv %s9277_s29  ;;  %s10519_s29 = sld [smem:[#allocation2 + $0xb]] }
 0xc95   : > { %14002 = vst [vmem:[#allocation197_spill] sm:$0xff] %v9240_v39  ;;  %14003 = vst [vmem:[#allocation439_spill] sm:$0xff] %v9243_v16  ;;  %v9256_v29 = vmul.f32 %v3116_v18, %v14007_v52  ;;  %v9259_v11 = vmul.f32 %v3134_v2, %v14007_v52  ;;  %v9269_v16 = vmul.f32 %v3134_v2, %v14010_v26  ;;  %v14020_v26 = vld [vmem:[#allocation18_spill] sm:$0xff] }
 0xc96   : > { %14005 = vst [vmem:[#allocation17_spill] sm:$0xff] %v9250_v15  ;;  %14006 = vst [vmem:[#allocation440_spill] sm:$0xff] %v9253_v61  ;;  %v14013_v15 = vld [vmem:[#allocation42_spill] sm:$0xff]  ;;  %v14016_v61 = vld [vmem:[#allocation20_spill] sm:$0xff] }
 0xc97   : > { %14008 = vst [vmem:[#allocation189_spill] sm:$0xff] %v9256_v29  ;;  %14009 = vst [vmem:[#allocation441_spill] sm:$0xff] %v9259_v11  ;;  %v9272_v39 = vmul.f32 %v3116_v18, %v14013_v15  ;;  %v9280_v52 = vmul.f32 %v3134_v2, %v14013_v15  ;;  %v9283_v11 = vmul.f32 %v3116_v18, %v14016_v61 }
 0xc98   : > { %14011 = vst [vmem:[#allocation190_spill] sm:$0xff] %v9266_v30  ;;  %14012 = vst [vmem:[#allocation442_spill] sm:$0xff] %v9269_v16  ;;  %v9286_v29 = vmul.f32 %v3134_v2, %v14016_v61  ;;  %v9289_v30 = vstv %s9176_s22  ;;  %v9300_v15 = vmul.f32 %v3134_v2, %v14020_v26  ;;  %s9308_s22 = sld [smem:[#allocation2 + $0x3c]] }
 0xc99   : > { %14014 = vst [vmem:[#allocation42_spill] sm:$0xff] %v9272_v39  ;;  %14015 = vst [vmem:[#allocation443_spill] sm:$0xff] %v9280_v52  ;;  %v9297_v39 = vmul.f32 %v3116_v18, %v14020_v26  ;;  %v14023_v52 = vld [vmem:[#allocation19_spill] sm:$0xff]  ;;  %v9415_v8 = vstv %s9294_s26  ;;  %s10618_s26 = sld [smem:[#allocation2 + $0xc]] }
 0xc9a   : > { %14017 = vst [vmem:[#allocation20_spill] sm:$0xff] %v9283_v11  ;;  %14018 = vst [vmem:[#allocation444_spill] sm:$0xff] %v9286_v29  ;;  %v9303_v16 = vmul.f32 %v3116_v18, %v14023_v52  ;;  %v9306_v61 = vmul.f32 %v3134_v2, %v14023_v52  ;;  %v14026_v29 = vld [vmem:[#allocation191_spill] sm:$0xff] }
 0xc9b   : > { %14019 = vst [vmem:[#allocation445_spill] sm:$0xff] %v9289_v30  ;;  %14021 = vst [vmem:[#allocation18_spill] sm:$0xff] %v9297_v39  ;;  %v9313_v11 = vmul.f32 %v3116_v18, %v14026_v29  ;;  %v9316_v48 = vmul.f32 %v3134_v2, %v14026_v29  ;;  %v14029_v39 = vld [vmem:[#allocation230_spill] sm:$0xff] }
 0xc9c   : > { %14022 = vst [vmem:[#allocation446_spill] sm:$0xff] %v9300_v15  ;;  %14024 = vst [vmem:[#allocation19_spill] sm:$0xff] %v9303_v16  ;;  %v9319_v26 = vmul.f32 %v3344_v42, %v14029_v39  ;;  %v14031_v15 = vld [vmem:[#allocation231_spill] sm:$0xff]  ;;  %v9326_v52 = vmul.f32 %v9289_v30, %v14029_v39 }
 0xc9d   : > { %14025 = vst [vmem:[#allocation447_spill] sm:$0xff] %v9306_v61  ;;  %14027 = vst [vmem:[#allocation191_spill] sm:$0xff] %v9313_v11  ;;  %v9322_v16 = vmul.f32 %v3344_v42, %v14031_v15  ;;  %v9330_v18 = vmul.f32 %v9289_v30, %v14031_v15  ;;  %v14035_v11 = vld [vmem:[#allocation232_spill] sm:$0xff]  ;;  %v790_v61 = vstv %s9212_s20  ;;  %s9877_s20 = sld [smem:[#allocation2 + $0x51]] }
 0xc9e   : > { %14028 = vst [vmem:[#allocation448_spill] sm:$0xff] %v9316_v48  ;;  %14030 = vst [vmem:[#allocation230_spill] sm:$0xff] %v9319_v26  ;;  %v9333_v2 = vmul.f32 %v3344_v42, %v14035_v11  ;;  %v9337_v29 = vmul.f32 %v9289_v30, %v14035_v11  ;;  %v14038_v26 = vld [vmem:[#allocation233_spill] sm:$0xff]  ;;  %v9418_v57 = vstv %s9308_s22  ;;  %s10637_s22 = sld [smem:[#allocation2 + $0x42]] }
 0xc9f   : > { %14032 = vst [vmem:[#allocation231_spill] sm:$0xff] %v9322_v16  ;;  %14033 = vst [vmem:[#allocation449_spill] sm:$0xff] %v9326_v52  ;;  %v9340_v16 = vmul.f32 %v3344_v42, %v14038_v26  ;;  %v9344_v39 = vmul.f32 %v9289_v30, %v14038_v26  ;;  %v14041_v52 = vld [vmem:[#allocation234_spill] sm:$0xff] }
 0xca0   : > { %14034 = vst [vmem:[#allocation450_spill] sm:$0xff] %v9330_v18  ;;  %14036 = vst [vmem:[#allocation232_spill] sm:$0xff] %v9333_v2  ;;  %v9347_v15 = vmul.f32 %v3344_v42, %v14041_v52  ;;  %v9351_v2 = vmul.f32 %v9289_v30, %v14041_v52  ;;  %v14044_v18 = vld [vmem:[#allocation235_spill] sm:$0xff]  ;;  %v9369_v52 = vstv %s9214_s23  ;;  %s9986_s23 = sld [smem:[#allocation2 + $0x1d]] }
 0xca1   : > { %14037 = vst [vmem:[#allocation451_spill] sm:$0xff] %v9337_v29  ;;  %14039 = vst [vmem:[#allocation233_spill] sm:$0xff] %v9340_v16  ;;  %v9354_v11 = vmul.f32 %v3344_v42, %v14044_v18  ;;  %v14046_v29 = vld [vmem:[#allocation236_spill] sm:$0xff]  ;;  %v9376_v18 = vstv %s9229_s7  ;;  %v9463_v63 = vmul.f32 %v9369_v52, %v868_v49  ;;  %v9482_v59 = vmul.f32 %v9369_v52, %v870_v19  ;;  %s10020_s7 = sld [smem:[#allocation2 + $0x53]] }
 0xca2   : > { %14040 = vst [vmem:[#allocation452_spill] sm:$0xff] %v9344_v39  ;;  %14042 = vst [vmem:[#allocation234_spill] sm:$0xff] %v9347_v15  ;;  %v9357_v48 = vmul.f32 %v3344_v42, %v14046_v29  ;;  %v9361_v26 = vmul.f32 %v9289_v30, %v14046_v29  ;;  %v14049_v39 = vld [vmem:[#allocation237_spill] sm:$0xff]  ;;  %v772_v15 = vstv %s9202_s14  ;;  %v9379_v29 = vstv %s9231_s25  ;;  %s9843_s14 = sld [smem:[#allocation2 + $0x1b]]  ;;  %s10131_s25 = sld [smem:[#allocation2 + $0x21]] }
 0xca3   : > { %14043 = vst [vmem:[#allocation453_spill] sm:$0xff] %v9351_v2  ;;  %14045 = vst [vmem:[#allocation454_spill] sm:$0xff] %v9354_v11  ;;  %v9364_v16 = vmul.f32 %v3344_v42, %v14049_v39  ;;  %v9373_v11 = vmul.f32 %v9289_v30, %v14049_v39  ;;  %v9385_v42 = vstv %s9247_s9  ;;  %v9391_v2 = vstv %s9261_s6  ;;  %v14053_v39 = vld [vmem:[#allocation51_spill] sm:$0xff]  ;;  %s10190_s9 = sld [smem:[#allocation2 + $0x23]]  ;;  %s10221_s6 = sld [smem:[#allocation2 + $0x59]] }
 0xca4   : > { %14047 = vst [vmem:[#allocation236_spill] sm:$0xff] %v9357_v48  ;;  %14048 = vst [vmem:[#allocation455_spill] sm:$0xff] %v9361_v26  ;;  %v9382_v26 = vstv %s9245_s10  ;;  %v766_v30 = vsel %vm306_vm6, %v14053_v39, 0.0  ;;  %v9455_v55 = vmul.f32 %v772_v15, %v765_v27  ;;  %v9472_v36 = vmul.f32 %v9376_v18, %v868_v49  ;;  %v14068_v49 = vld [vmem:[#allocation72_spill] sm:$0xff]  ;;  %s10157_s10 = sld [smem:[#allocation2 + $0x57]] }
 0xca5   : > { %14050 = vst [vmem:[#allocation237_spill] sm:$0xff] %v9364_v16  ;;  %14051 = vst [vmem:[#allocation456_spill] sm:$0xff] %v9373_v11  ;;  %v14052_v16 = vld [vmem:[#allocation49_spill] sm:$0xff]  ;;  %v9433_v34 = vmul.f32 %v772_v15, %v766_v30 }
 0xca6   : > { %v764_v48 = vsel %vm306_vm6, %v14052_v16, 0.0  ;;  %v14054_v11 = vld [vmem:[#allocation61_spill] sm:$0xff]  ;;  %v763_v16 = vsel %vm306_vm6, %v14055_v17, 0.0  ;;  %14056 = vst [vmem:[#allocation49_spill] sm:$0xff] %v9421_v20  ;;  %v9435_v17 = vmul.f32 %v790_v61, %v766_v30  ;;  %v14144_v20 = vld [vmem:[#allocation335_spill] sm:$0xff] }
 0xca7   : > { %v768_v38 = vsel %vm306_vm6, %v14054_v11, 0.0  ;;  %v9423_v9 = vmul.f32 %v772_v15, %v764_v48  ;;  %v9425_v39 = vmul.f32 %v790_v61, %v764_v48  ;;  %v770_v11 = vsel %vm306_vm6, %v14057_v28, 0.0  ;;  %v14062_v28 = vld [vmem:[#allocation66_spill] sm:$0xff] }
 0xca8   : > { %v9437_v45 = vmul.f32 %v772_v15, %v768_v38  ;;  %v9442_v48 = vmul.f32 %v790_v61, %v768_v38  ;;  %v9444_v53 = vmul.f32 %v772_v15, %v763_v16  ;;  %v9446_v14 = vmul.f32 %v790_v61, %v763_v16  ;;  %v14064_v16 = vld [vmem:[#allocation68_spill] sm:$0xff] }
 0xca9   : > { %v767_v54 = vsel %vm306_vm6, %v14062_v28, 0.0  ;;  %v9451_v24 = vmul.f32 %v772_v15, %v770_v11  ;;  %v9453_v30 = vmul.f32 %v790_v61, %v770_v11  ;;  %v9460_v38 = vmul.f32 %v790_v61, %v765_v27  ;;  %v14065_v28 = vld [vmem:[#allocation69_spill] sm:$0xff] }
 0xcaa   : > { %14060 = vst [vmem:[#allocation51_spill] sm:$0xff] %v9444_v53  ;;  %14061 = vst [vmem:[#allocation61_spill] sm:$0xff] %v9446_v14  ;;  %v769_v62 = vsel %vm306_vm6, %v14064_v16, 0.0  ;;  %v872_v11 = vsel %vm307_vm7, %v14065_v28, 0.0  ;;  %v9474_v33 = vmul.f32 %v772_v15, %v767_v54  ;;  %v9476_v56 = vmul.f32 %v790_v61, %v767_v54  ;;  %v14067_v14 = vld [vmem:[#allocation71_spill] sm:$0xff] }
 0xcab   : > { %v867_v27 = vsel %vm307_vm7, %v14066_v10, 0.0  ;;  %v9485_v16 = vmul.f32 %v9376_v18, %v870_v19  ;;  %v874_v28 = vsel %vm307_vm7, %v14067_v14, 0.0  ;;  %v869_v53 = vsel %vm307_vm7, %v14068_v49, 0.0 }
 0xcac   : > { %v9493_v54 = vmul.f32 %v772_v15, %v769_v62  ;;  %v9495_v43 = vmul.f32 %v790_v61, %v769_v62  ;;  %v9498_v10 = vmul.f32 %v9369_v52, %v872_v11  ;;  %v1504_v19 = vsel %vm306_vm6, %v14069_v44, 0.0  ;;  %v14073_v15 = vld [vmem:[#allocation74_spill] sm:$0xff] }
 0xcad   : > { %v9504_v41 = vmul.f32 %v9376_v18, %v872_v11  ;;  %v9507_v14 = vmul.f32 %v9369_v52, %v867_v27  ;;  %v9510_v13 = vmul.f32 %v9376_v18, %v867_v27  ;;  %v871_v62 = vsel %vm307_vm7, %v14073_v15, 0.0  ;;  %v14076_v11 = vld [vmem:[#allocation75_spill] sm:$0xff]  ;;  %v14078_v15 = vld [vmem:[#allocation76_spill] sm:$0xff] }
 0xcae   : > { %v9516_v61 = vmul.f32 %v9369_v52, %v874_v28  ;;  %v9519_v49 = vmul.f32 %v9376_v18, %v874_v28  ;;  %v9522_v44 = vmul.f32 %v9369_v52, %v869_v53  ;;  %v9528_v27 = vmul.f32 %v9376_v18, %v869_v53 }
 0xcaf   : > { %14070 = vst [vmem:[#allocation62_spill] sm:$0xff] %v9504_v41  ;;  %14071 = vst [vmem:[#allocation63_spill] sm:$0xff] %v9507_v14  ;;  %v1506_v14 = vsel %vm306_vm6, %v14076_v11, 0.0  ;;  %v873_v35 = vsel %vm307_vm7, %v14078_v15, 0.0  ;;  %v9543_v46 = vmul.f32 %v9369_v52, %v871_v62  ;;  %v9546_v53 = vmul.f32 %v9376_v18, %v871_v62  ;;  %v14083_v11 = vld [vmem:[#allocation78_spill] sm:$0xff]  ;;  %v14145_v41 = vld [vmem:[#allocation100_spill] sm:$0xff] }
 0xcb0   : > { %14072 = vst [vmem:[#allocation64_spill] sm:$0xff] %v9510_v13  ;;  %14074 = vst [vmem:[#allocation65_spill] sm:$0xff] %v9516_v61  ;;  %v9531_v13 = vmul.f32 %v9379_v29, %v1504_v19  ;;  %v14079_v61 = vld [vmem:[#allocation77_spill] sm:$0xff]  ;;  %v9552_v47 = vmul.f32 %v9379_v29, %v1506_v14  ;;  %v9555_v15 = vmul.f32 %v9382_v26, %v1506_v14 }
 0xcb1   : > { %14075 = vst [vmem:[#allocation66_spill] sm:$0xff] %v9519_v49  ;;  %v1508_v28 = vsel %vm306_vm6, %v14079_v61, 0.0  ;;  %v9540_v49 = vmul.f32 %v9382_v26, %v1504_v19  ;;  %14081 = vst [vmem:[#allocation69_spill] sm:$0xff] %v9543_v46  ;;  %v14086_v61 = vld [vmem:[#allocation79_spill] sm:$0xff]  ;;  %v9564_v62 = vmul.f32 %v9369_v52, %v873_v35  ;;  %v9567_v60 = vmul.f32 %v9376_v18, %v873_v35  ;;  %v14095_v52 = vld [vmem:[#allocation82_spill] sm:$0xff] }
 0xcb2   : > { %14077 = vst [vmem:[#allocation67_spill] sm:$0xff] %v9531_v13  ;;  %14082 = vst [vmem:[#allocation70_spill] sm:$0xff] %v9546_v53  ;;  %v1503_v13 = vsel %vm306_vm6, %v14083_v11, 0.0  ;;  %v1510_v19 = vsel %vm306_vm6, %v14086_v61, 0.0  ;;  %v9570_v11 = vmul.f32 %v9379_v29, %v1508_v28  ;;  %v1507_v35 = vsel %vm306_vm6, %v14095_v52, 0.0  ;;  %v14102_v52 = vld [vmem:[#allocation84_spill] sm:$0xff] }
 0xcb3   : > { %14080 = vst [vmem:[#allocation68_spill] sm:$0xff] %v9540_v49  ;;  %14084 = vst [vmem:[#allocation71_spill] sm:$0xff] %v9552_v47  ;;  %v14087_v49 = vld [vmem:[#allocation80_spill] sm:$0xff]  ;;  %v14091_v47 = vld [vmem:[#allocation81_spill] sm:$0xff]  ;;  %v9579_v61 = vmul.f32 %v9379_v29, %v1503_v13  ;;  %v9588_v18 = vmul.f32 %v9379_v29, %v1510_v19 }
 0xcb4   : > { %14085 = vst [vmem:[#allocation72_spill] sm:$0xff] %v9555_v15  ;;  %v1505_v4 = vsel %vm306_vm6, %v14087_v49, 0.0  ;;  %14088 = vst [vmem:[#allocation73_spill] sm:$0xff] %v9564_v62  ;;  %v1608_v14 = vsel %vm307_vm7, %v14091_v47, 0.0  ;;  %v9576_v15 = vmul.f32 %v9382_v26, %v1508_v28  ;;  %v9582_v49 = vmul.f32 %v9382_v26, %v1503_v13  ;;  %v14099_v28 = vld [vmem:[#allocation83_spill] sm:$0xff]  ;;  %v14139_v62 = vld [vmem:[#allocation332_spill] sm:$0xff] }
 0xcb5   : > { %14089 = vst [vmem:[#allocation74_spill] sm:$0xff] %v9567_v60  ;;  %14090 = vst [vmem:[#allocation75_spill] sm:$0xff] %v9570_v11  ;;  %v9591_v11 = vmul.f32 %v9382_v26, %v1510_v19  ;;  %v9594_v47 = vmul.f32 %v9379_v29, %v1505_v4  ;;  %v9600_v13 = vmul.f32 %v9382_v26, %v1505_v4 }
 0xcb6   : > { %14092 = vst [vmem:[#allocation76_spill] sm:$0xff] %v9576_v15  ;;  %14093 = vst [vmem:[#allocation77_spill] sm:$0xff] %v9579_v61  ;;  %v1610_v61 = vsel %vm307_vm7, %v14099_v28, 0.0  ;;  %v14103_v15 = vld [vmem:[#allocation89_spill] sm:$0xff]  ;;  %v9618_v4 = vmul.f32 %v9382_v26, %v1507_v35 }
 0xcb7   : > { %14094 = vst [vmem:[#allocation78_spill] sm:$0xff] %v9582_v49  ;;  %14096 = vst [vmem:[#allocation79_spill] sm:$0xff] %v9588_v18  ;;  %v9603_v49 = vmul.f32 %v9385_v42, %v1608_v14  ;;  %v1509_v18 = vsel %vm306_vm6, %v14102_v52, 0.0  ;;  %v536_v19 = vsel %vm306_vm6, %v14103_v15, 0.0  ;;  %v14107_v28 = vld [vmem:[#allocation85_spill] sm:$0xff]  ;;  %v9627_v52 = vmul.f32 %v9391_v2, %v1610_v61  ;;  %v14110_v15 = vld [vmem:[#allocation86_spill] sm:$0xff] }
 0xcb8   : > { %14097 = vst [vmem:[#allocation80_spill] sm:$0xff] %v9591_v11  ;;  %14098 = vst [vmem:[#allocation81_spill] sm:$0xff] %v9594_v47  ;;  %v9612_v11 = vmul.f32 %v9391_v2, %v1608_v14  ;;  %v9615_v47 = vmul.f32 %v9379_v29, %v1507_v35  ;;  %v1607_v14 = vsel %vm307_vm7, %v14110_v15, 0.0  ;;  %v9636_v35 = vmul.f32 %v9379_v29, %v1509_v18 }
 0xcb9   : > { %14100 = vst [vmem:[#allocation82_spill] sm:$0xff] %v9600_v13  ;;  %14101 = vst [vmem:[#allocation83_spill] sm:$0xff] %v9603_v49  ;;  %v1612_v13 = vsel %vm307_vm7, %v14107_v28, 0.0  ;;  %v9624_v49 = vmul.f32 %v9385_v42, %v1610_v61  ;;  %v546_v28 = vmul.f32 %v9394_v12, %v536_v19  ;;  %v1609_v29 = vsel %vm307_vm7, %v14117_v22, 0.0  ;;  %v14122_v22 = vld [vmem:[#allocation93_spill] sm:$0xff] }
 0xcba   : > { %14104 = vst [vmem:[#allocation84_spill] sm:$0xff] %v9612_v11  ;;  %14105 = vst [vmem:[#allocation89_spill] sm:$0xff] %v9615_v47  ;;  %v14111_v11 = vld [vmem:[#allocation87_spill] sm:$0xff]  ;;  %v9649_v15 = vmul.f32 %v9391_v2, %v1612_v13 }
 0xcbb   : > { %14106 = vst [vmem:[#allocation457_spill] sm:$0xff] %v9618_v4  ;;  %14108 = vst [vmem:[#allocation85_spill] sm:$0xff] %v9624_v49  ;;  %v1614_v47 = vsel %vm307_vm7, %v14111_v11, 0.0  ;;  %v9639_v4 = vmul.f32 %v9382_v26, %v1509_v18  ;;  %v14114_v49 = vld [vmem:[#allocation91_spill] sm:$0xff]  ;;  %v564_v11 = vmul.f32 %v9397_v3, %v536_v19  ;;  %v9656_v26 = vmul.f32 %v9385_v42, %v1607_v14 }
 0xcbc   : > { %14109 = vst [vmem:[#allocation458_spill] sm:$0xff] %v9627_v52  ;;  %14112 = vst [vmem:[#allocation86_spill] sm:$0xff] %v9636_v35  ;;  %v538_v61 = vsel %vm306_vm6, %v14114_v49, 0.0  ;;  %v9646_v52 = vmul.f32 %v9385_v42, %v1612_v13  ;;  %v9659_v18 = vmul.f32 %v9391_v2, %v1607_v14  ;;  %v9662_v49 = vmul.f32 %v9385_v42, %v1614_v47  ;;  %v14123_v35 = vld [vmem:[#allocation96_spill] sm:$0xff] }
 0xcbd   : > { %14113 = vst [vmem:[#allocation87_spill] sm:$0xff] %v9639_v4  ;;  %14116 = vst [vmem:[#allocation459_spill] sm:$0xff] %v9649_v15  ;;  %v14121_v4 = vld [vmem:[#allocation90_spill] sm:$0xff]  ;;  %v548_v15 = vmul.f32 %v9394_v12, %v538_v61  ;;  %v540_v19 = vsel %vm306_vm6, %v14122_v22, 0.0  ;;  %v640_v14 = vsel %vm307_vm7, %v14123_v35, 0.0  ;;  %v14129_v22 = vld [vmem:[#allocation92_spill] sm:$0xff] }
 0xcbe   : > { %14115 = vst [vmem:[#allocation91_spill] sm:$0xff] %v9646_v52  ;;  %14118 = vst [vmem:[#allocation88_spill] sm:$0xff] %v9656_v26  ;;  %v1611_v13 = vsel %vm307_vm7, %v14121_v4, 0.0  ;;  %v566_v52 = vmul.f32 %v9397_v3, %v538_v61  ;;  %v9679_v26 = vmul.f32 %v9385_v42, %v1609_v29  ;;  %v9682_v4 = vmul.f32 %v9391_v2, %v1609_v29  ;;  %v14127_v61 = vld [vmem:[#allocation331_spill] sm:$0xff] }
 0xcbf   : > { %14119 = vst [vmem:[#allocation460_spill] sm:$0xff] %v9659_v18  ;;  %14120 = vst [vmem:[#allocation461_spill] sm:$0xff] %v9662_v49  ;;  %v9676_v18 = vmul.f32 %v9391_v2, %v1614_v47  ;;  %v590_v49 = vadd.f32 %v8582_v58, %v546_v28  ;;  %v608_v50 = vadd.f32 %v14127_v61, %v564_v11  ;;  %v1613_v35 = vsel %vm307_vm7, %v14129_v22, 0.0 }
 0xcc0   : > { %14125 = vst [vmem:[#allocation93_spill] sm:$0xff] %v9679_v26  ;;  %14126 = vst [vmem:[#allocation96_spill] sm:$0xff] %v9682_v4  ;;  %v9687_v6 = vmul.f32 %v9385_v42, %v1611_v13  ;;  %v537_v47 = vsel %vm306_vm6, %v14130_v40, 0.0  ;;  %v568_v29 = vmul.f32 %v9397_v3, %v540_v19  ;;  %v14131_v4 = vld [vmem:[#allocation95_spill] sm:$0xff]  ;;  %v650_v28 = vmul.f32 %v9406_v23, %v640_v14 }
 0xcc1   : > { %14124 = vst [vmem:[#allocation90_spill] sm:$0xff] %v9676_v18  ;;  %v550_v18 = vmul.f32 %v9394_v12, %v540_v19  ;;  %v542_v58 = vsel %vm306_vm6, %v14131_v4, 0.0  ;;  %v9702_v11 = vmul.f32 %v9391_v2, %v1611_v13  ;;  %v592_v61 = vadd.f32 %v8596_v7, %v548_v15  ;;  %v14136_v15 = vld [vmem:[#allocation53_spill] sm:$0xff] }
 0xcc2   : > { %14128 = vst [vmem:[#allocation331_spill] sm:$0xff] %v9687_v6  ;;  %v610_v22 = vadd.f32 %v8604_v37, %v566_v52  ;;  %v668_v6 = vmul.f32 %v9409_v21, %v640_v14  ;;  %v9708_v40 = vmul.f32 %v9385_v42, %v1613_v35  ;;  %v547_v19 = vmul.f32 %v9394_v12, %v537_v47  ;;  %v14137_v52 = vld [vmem:[#allocation98_spill] sm:$0xff] }
 0xcc3   : > { %14132 = vst [vmem:[#allocation92_spill] sm:$0xff] %v9702_v11  ;;  %v565_v26 = vmul.f32 %v9397_v3, %v537_v47  ;;  %v642_v4 = vsel %vm307_vm7, %v14134_v25, 0.0  ;;  %v9716_v13 = vmul.f32 %v9391_v2, %v1613_v35  ;;  %v552_v7 = vmul.f32 %v9394_v12, %v542_v58  ;;  %v14138_v11 = vld [vmem:[#allocation99_spill] sm:$0xff] }
 0xcc4   : > { %14133 = vst [vmem:[#allocation94_spill] sm:$0xff] %v9708_v40  ;;  %v539_v37 = vsel %vm306_vm6, %v14136_v15, 0.0  ;;  %v641_v42 = vsel %vm307_vm7, %v14137_v52, 0.0  ;;  %v594_v14 = vadd.f32 %v8608_v5, %v550_v18  ;;  %v612_v47 = vadd.f32 %v8612_v32, %v568_v29  ;;  %v14140_v18 = vld [vmem:[#allocation333_spill] sm:$0xff]  ;;  %v14141_v29 = vld [vmem:[#allocation55_spill] sm:$0xff] }
 0xcc5   : > { %14135 = vst [vmem:[#allocation95_spill] sm:$0xff] %v9716_v13  ;;  %v658_v40 = vadd.f32 %v650_v28, %v590_v49  ;;  %v644_v25 = vsel %vm307_vm7, %v14138_v11, 0.0  ;;  %v570_v2 = vmul.f32 %v9397_v3, %v542_v58  ;;  %v676_v35 = vadd.f32 %v668_v6, %v608_v50 }
 0xcc6   : > { %v652_v13 = vmul.f32 %v9406_v23, %v642_v4  ;;  %v670_v15 = vmul.f32 %v9409_v21, %v642_v4  ;;  %v591_v60 = vadd.f32 %v8622_v51, %v547_v19  ;;  %v609_v52 = vadd.f32 %v14139_v62, %v565_v26  ;;  %v14142_v26 = vld [vmem:[#allocation59_spill] sm:$0xff]  ;;  %v14143_v19 = vld [vmem:[#allocation334_spill] sm:$0xff] }
 0xcc7   : > { %v549_v5 = vmul.f32 %v9394_v12, %v539_v37  ;;  %v651_v32 = vmul.f32 %v9406_v23, %v641_v42  ;;  %v596_v49 = vadd.f32 %v14140_v18, %v552_v7  ;;  %v541_v28 = vsel %vm306_vm6, %v14141_v29, 0.0 }
 0xcc8   : > { %v669_v6 = vmul.f32 %v9409_v21, %v641_v42  ;;  %v654_v50 = vmul.f32 %v9406_v23, %v644_v25  ;;  %v567_v58 = vmul.f32 %v9397_v3, %v539_v37  ;;  %v782_v51 = vadd.f32 %v9423_v9, %v658_v40 }
 0xcc9   : > { %v672_v62 = vmul.f32 %v9409_v21, %v644_v25  ;;  %v643_v11 = vsel %vm307_vm7, %v14142_v26, 0.0  ;;  %v614_v4 = vadd.f32 %v14143_v19, %v570_v2  ;;  %v800_v7 = vadd.f32 %v9425_v39, %v676_v35  ;;  %v14146_v2 = vld [vmem:[#allocation336_spill] sm:$0xff]  ;;  %v14147_v39 = vld [vmem:[#allocation21_spill] sm:$0xff] }
 0xcca   : > { %v660_v18 = vadd.f32 %v652_v13, %v592_v61  ;;  %v678_v29 = vadd.f32 %v670_v15, %v610_v22  ;;  %v593_v42 = vadd.f32 %v14144_v20, %v549_v5  ;;  %v551_v53 = vmul.f32 %v9394_v12, %v541_v28  ;;  %v14148_v13 = vld [vmem:[#allocation337_spill] sm:$0xff]  ;;  %v14150_v5 = vld [vmem:[#allocation338_spill] sm:$0xff] }
 0xccb   : > { %v569_v37 = vmul.f32 %v9397_v3, %v541_v28  ;;  %v659_v46 = vadd.f32 %v651_v32, %v591_v60  ;;  %v677_v9 = vadd.f32 %v669_v6, %v609_v52  ;;  %v662_v40 = vadd.f32 %v654_v50, %v594_v14  ;;  %v14149_v14 = vld [vmem:[#allocation60_spill] sm:$0xff] }
 0xccc   : > { %v653_v25 = vmul.f32 %v9406_v23, %v643_v11  ;;  %v646_v26 = vsel %vm307_vm7, %v14145_v41, 0.0  ;;  %v611_v19 = vadd.f32 %v14146_v2, %v567_v58  ;;  %v818_v61 = vadd.f32 %v14147_v39, %v782_v51  ;;  %v14157_v2 = vld [vmem:[#allocation340_spill] sm:$0xff] }
 0xccd   : > { %v680_v22 = vadd.f32 %v672_v62, %v612_v47  ;;  %v671_v20 = vmul.f32 %v9409_v21, %v643_v11  ;;  %v836_v35 = vadd.f32 %v14148_v13, %v800_v7  ;;  %v784_v15 = vadd.f32 %v9433_v34, %v660_v18  ;;  %v14152_v18 = vld [vmem:[#allocation24_spill] sm:$0xff] }
 0xcce   : > { %v802_v60 = vadd.f32 %v9435_v17, %v678_v29  ;;  %v645_v52 = vsel %vm307_vm7, %v14149_v14, 0.0  ;;  %v595_v32 = vadd.f32 %v14150_v5, %v551_v53  ;;  %v783_v41 = vadd.f32 %v9455_v55, %v659_v46  ;;  %v14151_v55 = vld [vmem:[#allocation23_spill] sm:$0xff] }
 0xccf   : > { %v656_v28 = vmul.f32 %v9406_v23, %v646_v26  ;;  %v674_v47 = vmul.f32 %v9409_v21, %v646_v26  ;;  %v613_v6 = vadd.f32 %v8658_v1, %v569_v37  ;;  %v801_v50 = vadd.f32 %v9460_v38, %v677_v9  ;;  %v14154_v37 = vld [vmem:[#allocation339_spill] sm:$0xff]  ;;  %v14156_v26 = vld [vmem:[#allocation102_spill] sm:$0xff] }
 0xcd0   : > { %v786_v34 = vadd.f32 %v9437_v45, %v662_v40  ;;  %v661_v58 = vadd.f32 %v653_v25, %v593_v42  ;;  %v804_v17 = vadd.f32 %v9442_v48, %v680_v22  ;;  %v679_v51 = vadd.f32 %v671_v20, %v611_v19  ;;  %v14153_v42 = vld [vmem:[#allocation45_spill] sm:$0xff] }
 0xcd1   : > { %v655_v62 = vmul.f32 %v9406_v23, %v645_v52  ;;  %v673_v53 = vmul.f32 %v9409_v21, %v645_v52  ;;  %v820_v46 = vadd.f32 %v8666_v31, %v784_v15  ;;  %v838_v11 = vadd.f32 %v14151_v55, %v802_v60  ;;  %v14155_v40 = vld [vmem:[#allocation25_spill] sm:$0xff]  ;;  %v14159_v60 = vld [vmem:[#allocation26_spill] sm:$0xff] }
 0xcd2   : > { %v886_v7 = vadd.f32 %v9463_v63, %v818_v61  ;;  %v904_v1 = vadd.f32 %v9472_v36, %v836_v35  ;;  %v819_v38 = vadd.f32 %v14152_v18, %v783_v41  ;;  %v664_v29 = vadd.f32 %v656_v28, %v596_v49  ;;  %v14158_v35 = vld [vmem:[#allocation101_spill] sm:$0xff] }
 0xcd3   : > { %v682_v45 = vadd.f32 %v674_v47, %v614_v4  ;;  %v992_v48 = vsel %vm306_vm6, %v14153_v42, 0.0  ;;  %v837_v9 = vadd.f32 %v14154_v37, %v801_v50  ;;  %v822_v25 = vadd.f32 %v14155_v40, %v786_v34  ;;  %v14167_v28 = vld [vmem:[#allocation341_spill] sm:$0xff]  ;;  %v14168_v34 = vld [vmem:[#allocation58_spill] sm:$0xff] }
 0xcd4   : > { %v785_v31 = vadd.f32 %v9474_v33, %v661_v58  ;;  %v994_v63 = vsel %vm306_vm6, %v14156_v26, 0.0  ;;  %v840_v36 = vadd.f32 %v14157_v2, %v804_v17  ;;  %v803_v19 = vadd.f32 %v9476_v56, %v679_v51  ;;  %v14172_v37 = vld [vmem:[#allocation62_spill] sm:$0xff] }
 0xcd5   : > { %v663_v49 = vadd.f32 %v655_v62, %v595_v32  ;;  %v681_v4 = vadd.f32 %v673_v53, %v613_v6  ;;  %v1002_v39 = vmul.f32 %v9415_v8, %v992_v48  ;;  %v1020_v61 = vmul.f32 %v9418_v57, %v992_v48  ;;  %v14171_v48 = vld [vmem:[#allocation342_spill] sm:$0xff] }
 0xcd6   : > { %v888_v22 = vadd.f32 %v9482_v59, %v820_v46  ;;  %v906_v20 = vadd.f32 %v9485_v16, %v838_v11  ;;  %v9798_v33 = vadd.f32 %v9451_v24, %v664_v29  ;;  %v9801_v13 = vadd.f32 %v9453_v30, %v682_v45  ;;  %v14160_v59 = vld [vmem:[#allocation274_spill] sm:$0xff]  ;;  %v14164_v30 = vld [vmem:[#allocation257_spill] sm:$0xff]  ;;  %v14169_v11 = vld [vmem:[#allocation103_spill] sm:$0xff] }
 0xcd7   : > { %v991_v56 = vsel %vm306_vm6, %v14158_v35, 0.0  ;;  %v1004_v15 = vmul.f32 %v9415_v8, %v994_v63  ;;  %v821_v14 = vadd.f32 %v14159_v60, %v785_v31  ;;  %v1022_v52 = vmul.f32 %v9418_v57, %v994_v63  ;;  %v14161_v16 = vld [vmem:[#allocation254_spill] sm:$0xff]  ;;  %v14170_v45 = vld [vmem:[#allocation28_spill] sm:$0xff]  ;;  %v14173_v31 = vld [vmem:[#allocation69_spill] sm:$0xff] }
 0xcd8   : > { %v14162_v5 = vunpack.c.l.bf16 %v14161_v16  ;;  %v14165_v32 = vunpack.c.h.bf16 %v14164_v30  ;;  %v839_v47 = vadd.f32 %v14167_v28, %v803_v19  ;;  %v787_v6 = vadd.f32 %v9493_v54, %v663_v49  ;;  %v14174_v63 = vld [vmem:[#allocation70_spill] sm:$0xff]  ;;  %v4074_v19 = vpop.permute.xlu0 %4073  ;;  %v4072_v49 = vpop.permute.xlu1 %4071  ;;  %v14186_v28 = vld [vmem:[#allocation343_spill] sm:$0xff] }
 0xcd9   : > { %v805_v50 = vadd.f32 %v9495_v43, %v681_v4  ;;  %v993_v58 = vsel %vm306_vm6, %v14168_v34, 0.0  ;;  %v1010_v17 = vadd.f32 %v1002_v39, %v886_v7  ;;  %v1028_v51 = vadd.f32 %v1020_v61, %v904_v1  ;;  %v14175_v4 = vld [vmem:[#allocation307_spill] sm:$0xff]  ;;  %v14177_v61 = vld [vmem:[#allocation308_spill] sm:$0xff] }
 0xcda   : > { %v9814_v24 = vsub.f32 %v14162_v5, %v14160_v59  ;;  %v9819_v41 = vsub.f32 %v14165_v32, %v14160_v59  ;;  %v9828_v62 = vmul.f32 %v9415_v8, %v991_v56  ;;  %v9831_v53 = vmul.f32 %v9418_v57, %v991_v56  ;;  %v14185_v5 = vld [vmem:[#allocation104_spill] sm:$0xff] }
 0xcdb   : > { %v9833_v46 = vadd.f32 %v1004_v15, %v888_v22  ;;  %v887_v55 = vadd.f32 %v9522_v44, %v819_v38  ;;  %v905_v54 = vadd.f32 %v9528_v27, %v837_v9  ;;  %v996_v43 = vsel %vm306_vm6, %v14169_v11, 0.0 }
 0xcdc   : > { %14163 = vst [vmem:[#allocation97_spill] sm:$0xff] %v9814_v24  ;;  %14166 = vst [vmem:[#allocation53_spill] sm:$0xff] %v9819_v41  ;;  %v9840_v18 = vadd.f32 %v1022_v52, %v906_v20  ;;  %v1003_v7 = vmul.f32 %v9415_v8, %v993_v58  ;;  %v4283_v1 = vrot.slane %v9814_v24, 7  ;;  %v13321_v29 = vrot.slane %v9819_v41, 7  ;;  %v4076_v11 = vpop.permute.xlu1 %4075 }
 0xcdd   : > { %v823_v42 = vadd.f32 %v14170_v45, %v787_v6  ;;  %v841_v44 = vadd.f32 %v14171_v48, %v805_v50  ;;  %v1021_v27 = vmul.f32 %v9418_v57, %v993_v58  ;;  %v890_v38 = vadd.f32 %v9498_v10, %v822_v25  ;;  %v14187_v6 = vld [vmem:[#allocation344_spill] sm:$0xff]  ;;  %v14188_v58 = vld [vmem:[#allocation105_spill] sm:$0xff] }
 0xcde   : > { %v908_v9 = vadd.f32 %v14172_v37, %v840_v36  ;;  %v1006_v40 = vmul.f32 %v9415_v8, %v996_v43  ;;  %v889_v26 = vadd.f32 %v14173_v31, %v821_v14  ;;  %v907_v2 = vadd.f32 %v14174_v63, %v839_v47  ;;  %v14181_v36 = vld [vmem:[#allocation255_spill] sm:$0xff] }
 0xcdf   : > { %v9857_v39 = vsel %vm454_vm5, %v4074_v19, %v14175_v4  ;;  %v9861_v22 = vsel %vm454_vm5, %v4072_v49, %v14177_v61  ;;  %v14179_v10 = vunpack.c.h.bf16 %v14161_v16  ;;  %v14182_v20 = vunpack.c.l.bf16 %v14181_v36  ;;  %v14197_v49 = vld [vmem:[#allocation49_spill] sm:$0xff]  ;;  %v14218_v4 = vld [vmem:[#allocation111_spill] sm:$0xff] }
 0xce0   : > { %14176 = vst [vmem:[#allocation98_spill] sm:$0xff] %v9857_v39  ;;  %14178 = vst [vmem:[#allocation99_spill] sm:$0xff] %v9861_v22  ;;  %v1011_v56 = vadd.f32 %v1003_v7, %v887_v55  ;;  %v1024_v15 = vmul.f32 %v9418_v57, %v996_v43  ;;  %v9875_v60 = vstv %s9809_s12  ;;  %4105 = vrot.lane.b32.xlu0 %v9857_v39, %s5864_s5  ;;  %4103 = vrot.lane.b32.xlu1 %v9861_v22, %s5864_s5  ;;  %v14229_v22 = vld [vmem:[#allocation377_spill] sm:$0xff]  ;;  %v14282_v14 = vld [vmem:[#allocation391_spill] sm:$0xff]  ;;  %s10696_s12 = sld [smem:[#allocation2 + $0xe]] }
 0xce1   : > { %v9866_v25 = vsub.f32 %v14179_v10, %v14160_v59  ;;  %v9871_v35 = vsub.f32 %v14182_v20, %v14160_v59  ;;  %v4298_v52 = vsel %vm412_vm1, %v13321_v29, %v4283_v1  ;;  %v1029_v16 = vadd.f32 %v1021_v27, %v905_v54  ;;  %v14191_v54 = vld [vmem:[#allocation256_spill] sm:$0xff]  ;;  %v14194_v27 = vld [vmem:[#allocation310_spill] sm:$0xff]  ;;  %v14198_v20 = vld [vmem:[#allocation73_spill] sm:$0xff] }
 0xce2   : > { %v995_v32 = vsel %vm306_vm6, %v14185_v5, 0.0  ;;  %v1046_v47 = vadd.f32 %v14186_v28, %v1010_v17  ;;  %v1064_v50 = vadd.f32 %v14187_v6, %v1028_v51  ;;  %v1014_v34 = vadd.f32 %v1006_v40, %v890_v38  ;;  %v14200_v5 = vld [vmem:[#allocation106_spill] sm:$0xff]  ;;  %v14201_v28 = vld [vmem:[#allocation107_spill] sm:$0xff] }
 0xce3   : > { %14180 = vst [vmem:[#allocation332_spill] sm:$0xff] %v9866_v25  ;;  %14183 = vst [vmem:[#allocation333_spill] sm:$0xff] %v9871_v35  ;;  %v1096_v55 = vsel %vm307_vm7, %v14188_v58, 0.0  ;;  %v14189_v43 = vunpack.c.h.bf16 %v14181_v36  ;;  %v14192_v45 = vunpack.c.l.bf16 %v14191_v54  ;;  %v9907_v17 = vsel %vm454_vm5, %v4076_v11, %v14194_v27  ;;  %v14217_v27 = vld [vmem:[#allocation109_spill] sm:$0xff] }
 0xce4   : > { %14195 = vst [vmem:[#allocation334_spill] sm:$0xff] %v9907_v17  ;;  %v9911_v51 = vsel %vm290_vm4, %v4298_v52, 0.0  ;;  %v4284_v38 = vrot.slane %v9866_v25, 7  ;;  %v4285_v37 = vrot.slane %v9871_v35, 7  ;;  %v1032_v40 = vadd.f32 %v1024_v15, %v908_v9  ;;  %4107 = vrot.lane.b32.xlu1 %v9907_v17, %s5864_s5  ;;  %v14199_v9 = vld [vmem:[#allocation74_spill] sm:$0xff] }
 0xce5   : > { %v9898_v7 = vsub.f32 %v14189_v43, %v14160_v59  ;;  %v9903_v48 = vsub.f32 %v14192_v45, %v14160_v59  ;;  %14196 = vst [vmem:[#allocation335_spill] sm:$0xff] %v9911_v51  ;;  %v1005_v31 = vmul.f32 %v9415_v8, %v995_v32  ;;  %v1023_v63 = vmul.f32 %v9418_v57, %v995_v32  ;;  %v14221_v17 = vld [vmem:[#allocation110_spill] sm:$0xff] }
 0xce6   : > { %v9918_v19 = vstv %s9843_s14  ;;  %4331 = vrot.lane.b32.xlu0 %v9911_v51, %s5863_s8  ;;  %v1106_v10 = vmul.f32 %v14197_v49, %v1096_v55  ;;  %v1124_v36 = vmul.f32 %v9875_v60, %v1096_v55  ;;  %v891_v52 = vadd.f32 %v14198_v20, %v823_v42  ;;  %s10712_s14 = sld [smem:[#allocation2 + $0x44]] }
 0xce7   : > { %14190 = vst [vmem:[#allocation55_spill] sm:$0xff] %v9898_v7  ;;  %14193 = vst [vmem:[#allocation59_spill] sm:$0xff] %v9903_v48  ;;  %v909_v15 = vadd.f32 %v14199_v9, %v841_v44  ;;  %v997_v32 = vsel %vm306_vm6, %v14200_v5, 0.0  ;;  %v1098_v6 = vsel %vm307_vm7, %v14201_v28, 0.0  ;;  %v14202_v58 = vunpack.c.h.bf16 %v14191_v54  ;;  %v14208_v5 = vld [vmem:[#allocation38_spill] sm:$0xff] }
 0xce8   : > { %v14204_v55 = vunpack.c.l.bf16 %v14164_v30  ;;  %v9946_v42 = vsel %vm412_vm1, %v4284_v38, %v4285_v37  ;;  %v9950_v44 = vsel %vm412_vm1, %v4283_v1, %v4284_v38  ;;  %v4286_v45 = vrot.slane %v9898_v7, 7 }
 0xce9   : > { %v9937_v11 = vsub.f32 %v14202_v58, %v14160_v59  ;;  %14206 = vst [vmem:[#allocation21_spill] sm:$0xff] %v9946_v42  ;;  %14207 = vst [vmem:[#allocation337_spill] sm:$0xff] %v9950_v44  ;;  %v4287_v20 = vrot.slane %v9903_v48, 7  ;;  %v1013_v54 = vadd.f32 %v1005_v31, %v889_v26  ;;  %v1031_v9 = vadd.f32 %v1023_v63, %v907_v2  ;;  %v14209_v58 = vld [vmem:[#allocation345_spill] sm:$0xff]  ;;  %v14210_v63 = vld [vmem:[#allocation39_spill] sm:$0xff] }
 0xcea   : > { %v9942_v43 = vsub.f32 %v14204_v55, %v14160_v59  ;;  %v1048_v28 = vadd.f32 %v14208_v5, %v9833_v46  ;;  %v9957_v30 = vstv %s9877_s20  ;;  %4337 = vrot.lane.b32.xlu0 %v9946_v42, %s5863_s8  ;;  %4334 = vrot.lane.b32.xlu1 %v9950_v44, %s5863_s8  ;;  %v1114_v59 = vadd.f32 %v1106_v10, %v1046_v47  ;;  %s10831_s20 = sld [smem:[#allocation2 + $0xf]] }
 0xceb   : > { %14203 = vst [vmem:[#allocation100_spill] sm:$0xff] %v9937_v11  ;;  %v1007_v1 = vmul.f32 %v9415_v8, %v997_v32  ;;  %v1025_v38 = vmul.f32 %v9418_v57, %v997_v32  ;;  %v1066_v26 = vadd.f32 %v14209_v58, %v9840_v18  ;;  %v1132_v2 = vadd.f32 %v1124_v36, %v1064_v50  ;;  %v14213_v18 = vld [vmem:[#allocation108_spill] sm:$0xff]  ;;  %v14214_v36 = vld [vmem:[#allocation346_spill] sm:$0xff]  ;;  %v14215_v58 = vld [vmem:[#allocation41_spill] sm:$0xff] }
 0xcec   : > { %14205 = vst [vmem:[#allocation336_spill] sm:$0xff] %v9942_v43  ;;  %v1108_v31 = vmul.f32 %v14197_v49, %v1098_v6  ;;  %v1126_v46 = vmul.f32 %v9875_v60, %v1098_v6  ;;  %v1050_v55 = vadd.f32 %v14210_v63, %v1014_v34  ;;  %v9972_v5 = vsel %vm412_vm1, %v4286_v45, %v4287_v20  ;;  %v14216_v63 = vld [vmem:[#allocation347_spill] sm:$0xff] }
 0xced   : > { %14211 = vst [vmem:[#allocation60_spill] sm:$0xff] %v9972_v5  ;;  %v9976_v47 = vsel %vm412_vm1, %v4285_v37, %v4286_v45  ;;  %v4288_v10 = vrot.slane %v9937_v11, 7  ;;  %v4289_v32 = vrot.slane %v9942_v43, 7  ;;  %v1095_v50 = vsel %vm307_vm7, %v14213_v18, 0.0 }
 0xcee   : > { %14212 = vst [vmem:[#allocation338_spill] sm:$0xff] %v9976_v47  ;;  %v1068_v6 = vadd.f32 %v14214_v36, %v1032_v40  ;;  %v1047_v34 = vadd.f32 %v14215_v58, %v1011_v56  ;;  %v1065_v29 = vadd.f32 %v14216_v63, %v1029_v16  ;;  %4343 = vrot.lane.b32.xlu0 %v9972_v5, %s5863_s8  ;;  %v1100_v18 = vsel %vm307_vm7, %v14217_v27, 0.0  ;;  %v14219_v36 = vld [vmem:[#allocation348_spill] sm:$0xff]  ;;  %v14220_v63 = vld [vmem:[#allocation349_spill] sm:$0xff] }
 0xcef   : > { %4340 = vrot.lane.b32.xlu1 %v9976_v47, %s5863_s8  ;;  %v1015_v37 = vadd.f32 %v1007_v1, %v891_v52  ;;  %v1033_v45 = vadd.f32 %v1025_v38, %v909_v15  ;;  %v1276_v56 = vsel %vm306_vm6, %v14218_v4, 0.0  ;;  %v1116_v40 = vadd.f32 %v1108_v31, %v1048_v28  ;;  %v14224_v28 = vld [vmem:[#allocation113_spill] sm:$0xff]  ;;  %v14225_v38 = vld [vmem:[#allocation46_spill] sm:$0xff] }
 0xcf0   : > { %v1134_v16 = vadd.f32 %v1126_v46, %v1066_v26  ;;  %v1049_v58 = vadd.f32 %v14219_v36, %v1013_v54  ;;  %v1067_v61 = vadd.f32 %v14220_v63, %v1031_v9  ;;  %v10001_v39 = vmul.f32 %v14197_v49, %v1095_v50  ;;  %v14226_v31 = vld [vmem:[#allocation350_spill] sm:$0xff]  ;;  %v14228_v63 = vld [vmem:[#allocation27_spill] sm:$0xff] }
 0xcf1   : > { %v1097_v52 = vsel %vm307_vm7, %v14221_v17, 0.0  ;;  %v10008_v27 = vsel %vm412_vm1, %v4288_v10, %v4289_v32  ;;  %v10012_v4 = vsel %vm412_vm1, %v4287_v20, %v4288_v10  ;;  %v1110_v15 = vmul.f32 %v14197_v49, %v1100_v18 }
 0xcf2   : > { %14222 = vst [vmem:[#allocation23_spill] sm:$0xff] %v10008_v27  ;;  %14223 = vst [vmem:[#allocation24_spill] sm:$0xff] %v10012_v4  ;;  %v1128_v54 = vmul.f32 %v9875_v60, %v1100_v18  ;;  %v1286_v9 = vmul.f32 %v9918_v19, %v1276_v56  ;;  %v1278_v1 = vsel %vm306_vm6, %v14224_v28, 0.0  ;;  %4349 = vrot.lane.b32.xlu0 %v10008_v27, %s5863_s8  ;;  %v14227_v18 = vld [vmem:[#allocation112_spill] sm:$0xff]  ;;  %v10050_v47 = vstv %s9986_s23  ;;  %s10833_s23 = sld [smem:[#allocation2 + $0x45]] }
 0xcf3   : > { %4346 = vrot.lane.b32.xlu1 %v10012_v4, %s5863_s8  ;;  %v10027_v17 = vmul.f32 %v9875_v60, %v1095_v50  ;;  %v1304_v20 = vmul.f32 %v9957_v30, %v1276_v56  ;;  %v1051_v26 = vadd.f32 %v14225_v38, %v1015_v37  ;;  %v1069_v46 = vadd.f32 %v14226_v31, %v1033_v45 }
 0xcf4   : > { %v1107_v10 = vmul.f32 %v14197_v49, %v1097_v52  ;;  %v1099_v36 = vsel %vm307_vm7, %v14227_v18, 0.0  ;;  %v824_v28 = vadd.f32 %v14228_v63, %v9798_v33  ;;  %v842_v4 = vadd.f32 %v14229_v22, %v9801_v13  ;;  %v14232_v22 = vld [vmem:[#allocation115_spill] sm:$0xff] }
 0xcf5   : > { %v1125_v50 = vmul.f32 %v9875_v60, %v1097_v52  ;;  %v1288_v56 = vmul.f32 %v9918_v19, %v1278_v1  ;;  %v1306_v37 = vmul.f32 %v9957_v30, %v1278_v1  ;;  %v14230_v45 = vrot.slane %v9819_v41, 7  ;;  %v14233_v52 = vld [vmem:[#allocation116_spill] sm:$0xff]  ;;  %v14236_v1 = vld [vmem:[#allocation66_spill] sm:$0xff] }
 0xcf6   : > { %v1118_v31 = vadd.f32 %v1110_v15, %v1050_v55  ;;  %v1136_v18 = vadd.f32 %v1128_v54, %v1068_v6  ;;  %v1294_v27 = vadd.f32 %v1286_v9, %v1114_v59  ;;  %4559 = vrot.lane.b32.xlu0 %v9814_v24, %s5863_s8  ;;  %v1312_v33 = vadd.f32 %v1304_v20, %v1132_v2  ;;  %v14234_v6 = vld [vmem:[#allocation114_spill] sm:$0xff]  ;;  %v14235_v54 = vld [vmem:[#allocation65_spill] sm:$0xff] }
 0xcf7   : > { %v10047_v38 = vsel %vm412_vm1, %v4289_v32, %v14230_v45  ;;  %v1109_v13 = vmul.f32 %v14197_v49, %v1099_v36  ;;  %v1280_v32 = vsel %vm306_vm6, %v14232_v22, 0.0  ;;  %v1277_v59 = vsel %vm306_vm6, %v14233_v52, 0.0 }
 0xcf8   : > { %14231 = vst [vmem:[#allocation45_spill] sm:$0xff] %v10047_v38  ;;  %4352 = vrot.lane.b32.xlu1 %v10047_v38, %s5863_s8  ;;  %v1115_v55 = vadd.f32 %v1107_v10, %v1047_v34  ;;  %v1101_v15 = vsel %vm307_vm7, %v14234_v6, 0.0  ;;  %v10067_v9 = vadd.f32 %v14235_v54, %v824_v28  ;;  %v10070_v2 = vadd.f32 %v14236_v1, %v842_v4  ;;  %v14240_v6 = vld [vmem:[#allocation119_spill] sm:$0xff] }
 0xcf9   : > { %v1133_v20 = vadd.f32 %v1125_v50, %v1065_v29  ;;  %v1127_v63 = vmul.f32 %v9875_v60, %v1099_v36  ;;  %v1296_v45 = vadd.f32 %v1288_v56, %v1116_v40  ;;  %v1314_v22 = vadd.f32 %v1306_v37, %v1134_v16  ;;  %v14237_v36 = vld [vmem:[#allocation351_spill] sm:$0xff]  ;;  %v14238_v16 = vld [vmem:[#allocation352_spill] sm:$0xff]  ;;  %v14239_v37 = vld [vmem:[#allocation118_spill] sm:$0xff] }
 0xcfa   : > { %v1290_v38 = vmul.f32 %v9918_v19, %v1280_v32  ;;  %v1308_v52 = vmul.f32 %v9957_v30, %v1280_v32  ;;  %v1287_v34 = vmul.f32 %v9918_v19, %v1277_v59  ;;  %v10077_v10 = vstv %s10020_s7  ;;  %4565 = vrot.lane.b32.xlu0 %v9871_v35, %s5863_s8  ;;  %s10915_s7 = sld [smem:[#allocation2 + $0x11]] }
 0xcfb   : > { %v1117_v4 = vadd.f32 %v1109_v13, %v1049_v58  ;;  %v1111_v29 = vmul.f32 %v14197_v49, %v1101_v15  ;;  %v1330_v40 = vadd.f32 %v14237_v36, %v1294_v27  ;;  %v1348_v28 = vadd.f32 %v14238_v16, %v1312_v33  ;;  %v14241_v58 = vld [vmem:[#allocation117_spill] sm:$0xff]  ;;  %v14243_v33 = vld [vmem:[#allocation354_spill] sm:$0xff] }
 0xcfc   : > { %4562 = vrot.lane.b32.xlu1 %v9866_v25, %s5863_s8  ;;  %v1129_v50 = vmul.f32 %v9875_v60, %v1101_v15  ;;  %v1305_v56 = vmul.f32 %v9957_v30, %v1277_v59  ;;  %v1279_v32 = vsel %vm306_vm6, %v14239_v37, 0.0  ;;  %v1380_v54 = vsel %vm307_vm7, %v14240_v6, 0.0  ;;  %v14242_v27 = vld [vmem:[#allocation353_spill] sm:$0xff] }
 0xcfd   : > { %v1135_v1 = vadd.f32 %v1127_v63, %v1067_v61  ;;  %v1282_v13 = vsel %vm306_vm6, %v14241_v58, 0.0  ;;  %v10098_v36 = vadd.f32 %v14242_v27, %v1296_v45  ;;  %v10101_v15 = vadd.f32 %v14243_v33, %v1314_v22  ;;  %v14248_v27 = vld [vmem:[#allocation144_spill] sm:$0xff] }
 0xcfe   : > { %v1298_v59 = vadd.f32 %v1290_v38, %v1118_v31  ;;  %v1316_v16 = vadd.f32 %v1308_v52, %v1136_v18  ;;  %v1295_v5 = vadd.f32 %v1287_v34, %v1115_v55  ;;  %4571 = vrot.lane.b32.xlu0 %v9903_v48, %s5863_s8  ;;  %v1119_v61 = vadd.f32 %v1111_v29, %v1051_v26  ;;  %v14244_v18 = vld [vmem:[#allocation120_spill] sm:$0xff]  ;;  %v14245_v34 = vld [vmem:[#allocation355_spill] sm:$0xff] }
 0xcff   : > { %v1289_v63 = vmul.f32 %v9918_v19, %v1279_v32  ;;  %v1390_v37 = vmul.f32 %v10050_v47, %v1380_v54  ;;  %v1408_v45 = vmul.f32 %v10077_v10, %v1380_v54  ;;  %v1137_v6 = vadd.f32 %v1129_v50, %v1069_v46  ;;  %v14246_v46 = vld [vmem:[#allocation357_spill] sm:$0xff]  ;;  %v14247_v50 = vld [vmem:[#allocation358_spill] sm:$0xff] }
 0xd00   : > { %4568 = vrot.lane.b32.xlu1 %v9898_v7, %s5863_s8  ;;  %v1313_v58 = vadd.f32 %v1305_v56, %v1133_v20  ;;  %v10111_v22 = vmul.f32 %v9918_v19, %v1282_v13  ;;  %v1307_v38 = vmul.f32 %v9957_v30, %v1279_v32  ;;  %v10115_v31 = vmul.f32 %v9957_v30, %v1282_v13 }
 0xd01   : > { %v1281_v26 = vsel %vm306_vm6, %v14244_v18, 0.0  ;;  %v4308_v52 = vrot.slane %v9866_v25, 1  ;;  %v10123_v29 = vadd.f32 %v14245_v34, %v1295_v5  ;;  %v10126_v20 = vadd.f32 %v14246_v46, %v1298_v59  ;;  %v14250_v34 = vld [vmem:[#allocation356_spill] sm:$0xff]  ;;  %v14273_v25 = vld [vmem:[#allocation363_spill] sm:$0xff] }
 0xd02   : > { %v10129_v56 = vadd.f32 %v14247_v50, %v1316_v16  ;;  %4577 = vrot.lane.b32.xlu0 %v9942_v43, %s5863_s8  ;;  %v1297_v32 = vadd.f32 %v1289_v63, %v1117_v4  ;;  %v1398_v54 = vadd.f32 %v1390_v37, %v1330_v40  ;;  %v1416_v13 = vadd.f32 %v1408_v45, %v1348_v28  ;;  %v14249_v16 = vld [vmem:[#allocation121_spill] sm:$0xff]  ;;  %v14251_v50 = vld [vmem:[#allocation146_spill] sm:$0xff] }
 0xd03   : > { %v535_v5 = vsel %vm306_vm6, %v14248_v27, 0.0  ;;  %v1315_v33 = vadd.f32 %v1307_v38, %v1135_v1  ;;  %v1291_v59 = vmul.f32 %v9918_v19, %v1281_v26  ;;  %v1382_v18 = vsel %vm307_vm7, %v14249_v16, 0.0  ;;  %v14255_v27 = vld [vmem:[#allocation68_spill] sm:$0xff] }
 0xd04   : > { %4574 = vrot.lane.b32.xlu1 %v9937_v11, %s5863_s8  ;;  %v1349_v46 = vadd.f32 %v14250_v34, %v1313_v58  ;;  %v639_v55 = vsel %vm307_vm7, %v14251_v50, 0.0  ;;  %v14252_v4 = vrot.slane %v9814_v24, 1  ;;  %v4309_v28 = vrot.slane %v9871_v35, 1  ;;  %v14254_v58 = vld [vmem:[#allocation67_spill] sm:$0xff] }
 0xd05   : > { %v4310_v1 = vrot.slane %v9898_v7, 1  ;;  %v1309_v63 = vmul.f32 %v9957_v30, %v1281_v26  ;;  %v545_v37 = vmul.f32 %v9394_v12, %v535_v5  ;;  %v563_v45 = vmul.f32 %v9397_v3, %v535_v5  ;;  %v14256_v26 = vld [vmem:[#allocation359_spill] sm:$0xff]  ;;  %v14272_v7 = vld [vmem:[#allocation61_spill] sm:$0xff] }
 0xd06   : > { %v10152_v40 = vsel %vm437_vm2, %v14252_v4, %v4308_v52  ;;  %v1522_v38 = vadd.f32 %v14254_v58, %v1398_v54  ;;  %v1540_v16 = vadd.f32 %v14255_v27, %v1416_v13  ;;  %v1392_v34 = vmul.f32 %v10050_v47, %v1382_v18  ;;  %v14257_v4 = vld [vmem:[#allocation122_spill] sm:$0xff] }
 0xd07   : > { %14253 = vst [vmem:[#allocation339_spill] sm:$0xff] %v10152_v40  ;;  %4787 = vrot.lane.b32.xlu0 %v10152_v40, %s5863_s8  ;;  %v10169_v50 = vadd.f32 %v14256_v26, %v1297_v32  ;;  %v1410_v12 = vmul.f32 %v10077_v10, %v1382_v18  ;;  %v1381_v3 = vsel %vm307_vm7, %v14257_v4, 0.0  ;;  %v649_v5 = vmul.f32 %v9406_v23, %v639_v55  ;;  %v14260_v23 = vld [vmem:[#allocation387_spill] sm:$0xff] }
 0xd08   : > { %4580 = vrot.lane.b32.xlu1 %v9819_v41, %s5863_s8  ;;  %v667_v40 = vmul.f32 %v9409_v21, %v639_v55  ;;  %v10179_v54 = vsel %vm437_vm2, %v4309_v28, %v4310_v1  ;;  %v10183_v13 = vsel %vm437_vm2, %v4308_v52, %v4309_v28  ;;  %v4311_v32 = vrot.slane %v9903_v48, 1  ;;  %v14261_v21 = vld [vmem:[#allocation388_spill] sm:$0xff] }
 0xd09   : > { %14258 = vst [vmem:[#allocation25_spill] sm:$0xff] %v10179_v54  ;;  %14259 = vst [vmem:[#allocation102_spill] sm:$0xff] %v10183_v13  ;;  %v4312_v18 = vrot.slane %v9937_v11, 1  ;;  %v1299_v58 = vadd.f32 %v1291_v59, %v1119_v61  ;;  %v10188_v27 = vstv %s10131_s25  ;;  %v589_v26 = vadd.f32 %v14260_v23, %v545_v37  ;;  %v14262_v59 = vld [vmem:[#allocation123_spill] sm:$0xff]  ;;  %s10934_s25 = sld [smem:[#allocation2 + $0x47]] }
 0xd0a   : > { %v607_v55 = vadd.f32 %v14261_v21, %v563_v45  ;;  %v1317_v52 = vadd.f32 %v1309_v63, %v1137_v6  ;;  %v1400_v28 = vadd.f32 %v1392_v34, %v10098_v36  ;;  %v1391_v61 = vmul.f32 %v10050_v47, %v1381_v3 }
 0xd0b   : > { %4793 = vrot.lane.b32.xlu0 %v10179_v54, %s5863_s8  ;;  %v1384_v4 = vsel %vm307_vm7, %v14262_v59, 0.0  ;;  %v1418_v37 = vadd.f32 %v1410_v12, %v10101_v15  ;;  %v1409_v45 = vmul.f32 %v10077_v10, %v1381_v3  ;;  %v657_v23 = vadd.f32 %v649_v5, %v589_v26  ;;  %v14265_v12 = vld [vmem:[#allocation360_spill] sm:$0xff] }
 0xd0c   : > { %4790 = vrot.lane.b32.xlu1 %v10183_v13, %s5863_s8  ;;  %v675_v21 = vadd.f32 %v667_v40, %v607_v55  ;;  %v10207_v54 = vsel %vm437_vm2, %v4311_v32, %v4312_v18  ;;  %v10211_v6 = vsel %vm437_vm2, %v4310_v1, %v4311_v32  ;;  %v4313_v36 = vrot.slane %v9942_v43, 1  ;;  %v4078_v40 = vpop.permute.xlu0 %4077  ;;  %v14266_v1 = vld [vmem:[#allocation71_spill] sm:$0xff]  ;;  %v14267_v55 = vld [vmem:[#allocation361_spill] sm:$0xff] }
 0xd0d   : > { %14263 = vst [vmem:[#allocation340_spill] sm:$0xff] %v10207_v54  ;;  %14264 = vst [vmem:[#allocation101_spill] sm:$0xff] %v10211_v6  ;;  %v4314_v63 = vrot.slane %v9819_v41, 1  ;;  %v1394_v34 = vmul.f32 %v10050_v47, %v1384_v4  ;;  %v1412_v15 = vmul.f32 %v10077_v10, %v1384_v4  ;;  %v1351_v3 = vadd.f32 %v14265_v12, %v1315_v33  ;;  %v14268_v33 = vld [vmem:[#allocation29_spill] sm:$0xff]  ;;  %v14269_v12 = vld [vmem:[#allocation72_spill] sm:$0xff] }
 0xd0e   : > { %v10219_v5 = vstv %s10157_s10  ;;  %v1524_v32 = vadd.f32 %v14266_v1, %v1400_v28  ;;  %v1399_v26 = vadd.f32 %v1391_v61, %v10123_v29  ;;  %v10230_v59 = vadd.f32 %v14267_v55, %v1299_v58  ;;  %v14270_v41 = vld [vmem:[#allocation124_spill] sm:$0xff]  ;;  %v4080_v1 = vpop.permute.xlu1 %4079  ;;  %s14484_s10 = smov 127  }
 0xd0f   : > { %4799 = vrot.lane.b32.xlu0 %v10207_v54, %s5863_s8  ;;  %v1558_v4 = vadd.f32 %v14268_v33, %v1522_v38  ;;  %v1542_v13 = vadd.f32 %v14269_v12, %v1418_v37  ;;  %v1383_v11 = vsel %vm307_vm7, %v14270_v41, 0.0  ;;  %v14271_v54 = vld [vmem:[#allocation51_spill] sm:$0xff]  ;;  %v799_v48 = vadd.f32 %v14272_v7, %v675_v21  ;;  %v14284_v33 = vld [vmem:[#allocation125_spill] sm:$0xff] }
 0xd10   : > { %4796 = vrot.lane.b32.xlu1 %v10211_v6, %s5863_s8  ;;  %v781_v43 = vadd.f32 %v14271_v54, %v657_v23  ;;  %v1417_v6 = vadd.f32 %v1409_v45, %v1349_v46  ;;  %v1576_v28 = vadd.f32 %v14273_v25, %v1540_v16  ;;  %v10242_v29 = vsel %vm437_vm2, %v4313_v36, %v4314_v63  ;;  %v14277_v46 = vld [vmem:[#allocation81_spill] sm:$0xff]  ;;  %v14280_v23 = vld [vmem:[#allocation139_spill] sm:$0xff] }
 0xd11   : > { %14274 = vst [vmem:[#allocation26_spill] sm:$0xff] %v10242_v29  ;;  %v10246_v38 = vsel %vm437_vm2, %v4312_v18, %v4313_v36  ;;  %v1402_v58 = vadd.f32 %v1394_v34, %v10126_v20  ;;  %v1420_v61 = vadd.f32 %v1412_v15, %v10129_v56  ;;  %v10251_v41 = vstv %s10190_s9  ;;  %v14278_v56 = vld [vmem:[#allocation362_spill] sm:$0xff]  ;;  %v14279_v18 = vld [vmem:[#allocation83_spill] sm:$0xff]  ;;  %v4082_v15 = vpop.permute.xlu0 %4081  ;;  %s11020_s9 = sld [smem:[#allocation2 + $0x24]] }
 0xd12   : > { %14275 = vst [vmem:[#allocation274_spill] sm:$0xff] %v10246_v38  ;;  %v14276_v25 = vrot.slane %v9814_v24, 1  ;;  %v1523_v16 = vadd.f32 %v14277_v46, %v1399_v26  ;;  %v1393_v20 = vmul.f32 %v10050_v47, %v1383_v11  ;;  %v1353_v54 = vadd.f32 %v14278_v56, %v1317_v52  ;;  %v14281_v36 = vld [vmem:[#allocation22_spill] sm:$0xff]  ;;  %v14289_v46 = vld [vmem:[#allocation75_spill] sm:$0xff]  ;;  %v14290_v56 = vld [vmem:[#allocation76_spill] sm:$0xff] }
 0xd13   : > { %4805 = vrot.lane.b32.xlu0 %v10242_v29, %s5863_s8  ;;  %v10267_v37 = vadd.f32 %v14279_v18, %v1558_v4  ;;  %v1411_v45 = vmul.f32 %v10077_v10, %v1383_v11  ;;  %v998_v21 = vsel %vm306_vm6, %v14280_v23, 0.0  ;;  %v817_v34 = vadd.f32 %v14281_v36, %v781_v43  ;;  %v14283_v26 = vld [vmem:[#allocation82_spill] sm:$0xff]  ;;  %v14285_v4 = vld [vmem:[#allocation309_spill] sm:$0xff]  ;;  %v14291_v18 = vld [vmem:[#allocation84_spill] sm:$0xff] }
 0xd14   : > { %4802 = vrot.lane.b32.xlu1 %v10246_v38, %s5863_s8  ;;  %v4322_v7 = vsel %vm437_vm2, %v4314_v63, %v14276_v25  ;;  %v835_v63 = vadd.f32 %v14282_v14, %v799_v48  ;;  %v1541_v55 = vadd.f32 %v14283_v26, %v1417_v6  ;;  %v1386_v52 = vsel %vm307_vm7, %v14284_v33, 0.0  ;;  %v14293_v26 = vld [vmem:[#allocation63_spill] sm:$0xff]  ;;  %v14294_v11 = vld [vmem:[#allocation64_spill] sm:$0xff]  ;;  %v14307_v38 = vld [vmem:[#allocation313_spill] sm:$0xff] }
 0xd15   : > { %v10281_v12 = vsel %vm454_vm5, %v4078_v40, %v14285_v4  ;;  %v10285_v25 = vsel %vm305_vm3, %v4322_v7, 0.0  ;;  %v1526_v43 = vadd.f32 %v14289_v46, %v1402_v58  ;;  %v10289_v48 = vadd.f32 %v14290_v56, %v1420_v61  ;;  %v14292_v58 = vld [vmem:[#allocation126_spill] sm:$0xff] }
 0xd16   : > { %14286 = vst [vmem:[#allocation254_spill] sm:$0xff] %v10281_v12  ;;  %14288 = vst [vmem:[#allocation257_spill] sm:$0xff] %v10285_v25  ;;  %v10292_v23 = vadd.f32 %v14291_v18, %v1576_v28  ;;  %v10295_v6 = vstv %s10221_s6  ;;  %v1401_v40 = vadd.f32 %v1393_v20, %v10169_v50  ;;  %v1385_v61 = vsel %vm307_vm7, %v14292_v58, 0.0  ;;  %v14295_v50 = vld [vmem:[#allocation32_spill] sm:$0xff]  ;;  %v14296_v18 = vld [vmem:[#allocation311_spill] sm:$0xff]  ;;  %s11022_s6 = sld [smem:[#allocation2 + $0x5a]] }
 0xd17   : > { %4109 = vrot.lane.b32.xlu0 %v10281_v12, %s5864_s5  ;;  %v1008_v28 = vmul.f32 %v9415_v8, %v998_v21  ;;  %v1026_v7 = vmul.f32 %v9418_v57, %v998_v21  ;;  %v1419_v36 = vadd.f32 %v1411_v45, %v1351_v3  ;;  %v10310_v14 = vmul.f32 %v10050_v47, %v1386_v52  ;;  %v14298_v8 = vld [vmem:[#allocation312_spill] sm:$0xff]  ;;  %v14305_v12 = vld [vmem:[#allocation457_spill] sm:$0xff] }
 0xd18   : > { %4808 = vrot.lane.b32.xlu1 %v10285_v25, %s5863_s8  ;;  %v885_v33 = vadd.f32 %v14293_v26, %v817_v34  ;;  %v903_v46 = vadd.f32 %v14294_v11, %v835_v63  ;;  %v10315_v56 = vmul.f32 %v10077_v10, %v1386_v52  ;;  %v1560_v20 = vadd.f32 %v14295_v50, %v1524_v32  ;;  %v14300_v21 = vld [vmem:[#allocation364_spill] sm:$0xff]  ;;  %v4086_v52 = vpop.permute.xlu0 %4085  ;;  %v4084_v26 = vpop.permute.xlu1 %4083  ;;  %v14301_v32 = vld [vmem:[#allocation127_spill] sm:$0xff]  ;;  %v14303_v50 = vld [vmem:[#allocation89_spill] sm:$0xff] }
 0xd19   : > { %v10320_v58 = vsel %vm454_vm5, %v4082_v15, %v14296_v18  ;;  %v10324_v57 = vsel %vm454_vm5, %v4080_v1, %v14298_v8  ;;  %v1395_v3 = vmul.f32 %v10050_v47, %v1385_v61  ;;  %v1413_v45 = vmul.f32 %v10077_v10, %v1385_v61  ;;  %v14302_v1 = vld [vmem:[#allocation33_spill] sm:$0xff] }
 0xd1a   : > { %14297 = vst [vmem:[#allocation341_spill] sm:$0xff] %v10320_v58  ;;  %14299 = vst [vmem:[#allocation58_spill] sm:$0xff] %v10324_v57  ;;  %v1578_v34 = vadd.f32 %v14300_v21, %v1542_v13  ;;  %v10330_v63 = vstv %s10253_s30  ;;  %v1732_v15 = vsel %vm306_vm6, %v14301_v32, 0.0  ;;  %v1559_v11 = vadd.f32 %v14302_v1, %v1523_v16  ;;  %v14304_v18 = vld [vmem:[#allocation141_spill] sm:$0xff]  ;;  %s11090_s30 = sld [smem:[#allocation2 + $0x5c]] }
 0xd1b   : > { %4113 = vrot.lane.b32.xlu0 %v10320_v58, %s5864_s5  ;;  %v1016_v61 = vadd.f32 %v1008_v28, %v10067_v9  ;;  %v1034_v13 = vadd.f32 %v1026_v7, %v10070_v2  ;;  %v1525_v21 = vadd.f32 %v14303_v50, %v1401_v40  ;;  %v1102_v8 = vsel %vm307_vm7, %v14304_v18, 0.0  ;;  %v14306_v25 = vld [vmem:[#allocation365_spill] sm:$0xff]  ;;  %v14308_v9 = vld [vmem:[#allocation314_spill] sm:$0xff]  ;;  %v14312_v18 = vld [vmem:[#allocation40_spill] sm:$0xff] }
 0xd1c   : > { %4111 = vrot.lane.b32.xlu1 %v10324_v57, %s5864_s5  ;;  %v1009_v4 = vadd.f32 %v9828_v62, %v885_v33  ;;  %v1027_v58 = vadd.f32 %v9831_v53, %v903_v46  ;;  %v1543_v57 = vadd.f32 %v14305_v12, %v1419_v36  ;;  %v1577_v32 = vadd.f32 %v14306_v25, %v1541_v55  ;;  %v14309_v53 = vld [vmem:[#allocation382_spill] sm:$0xff]  ;;  %v14310_v12 = vld [vmem:[#allocation383_spill] sm:$0xff] }
 0xd1d   : > { %v10352_v16 = vsel %vm454_vm5, %v4086_v52, %v14307_v38  ;;  %v10356_v2 = vsel %vm454_vm5, %v4084_v26, %v14308_v9  ;;  %v1403_v40 = vadd.f32 %v1395_v3, %v10230_v59  ;;  %v1421_v28 = vadd.f32 %v1413_v45, %v1353_v54  ;;  %v14311_v54 = vld [vmem:[#allocation85_spill] sm:$0xff]  ;;  %v14313_v45 = vld [vmem:[#allocation392_spill] sm:$0xff]  ;;  %v14315_v50 = vld [vmem:[#allocation458_spill] sm:$0xff] }
 0xd1e   : > { %v1742_v7 = vmul.f32 %v10188_v27, %v1732_v15  ;;  %v10361_v62 = vstv %s10297_s11  ;;  %v1052_v55 = vadd.f32 %v14309_v53, %v1016_v61  ;;  %v1070_v25 = vadd.f32 %v14310_v12, %v1034_v13  ;;  %v14314_v26 = vld [vmem:[#allocation128_spill] sm:$0xff]  ;;  %v14316_v53 = vld [vmem:[#allocation93_spill] sm:$0xff]  ;;  %v14318_v38 = vld [vmem:[#allocation86_spill] sm:$0xff]  ;;  %s11165_s11 = sld [smem:[#allocation2 + $0x27]] }
 0xd1f   : > { %4117 = vrot.lane.b32.xlu0 %v10352_v16, %s5864_s5  ;;  %v1112_v36 = vmul.f32 %v14197_v49, %v1102_v8  ;;  %v1130_v33 = vmul.f32 %v9875_v60, %v1102_v8  ;;  %v1760_v59 = vmul.f32 %v10219_v5, %v1732_v15  ;;  %v1628_v46 = vadd.f32 %v14311_v54, %v1560_v20  ;;  %v14317_v12 = vld [vmem:[#allocation96_spill] sm:$0xff]  ;;  %v14319_v8 = vld [vmem:[#allocation87_spill] sm:$0xff]  ;;  %v14320_v9 = vld [vmem:[#allocation129_spill] sm:$0xff] }
 0xd20   : > { %4115 = vrot.lane.b32.xlu1 %v10356_v2, %s5864_s5  ;;  %v1045_v3 = vadd.f32 %v14312_v18, %v1009_v4  ;;  %v1063_v52 = vadd.f32 %v14313_v45, %v1027_v58  ;;  %v1731_v1 = vsel %vm306_vm6, %v14314_v26, 0.0  ;;  %v1646_v61 = vadd.f32 %v14315_v50, %v1578_v34  ;;  %v14321_v20 = vld [vmem:[#allocation34_spill] sm:$0xff]  ;;  %v14322_v26 = vld [vmem:[#allocation147_spill] sm:$0xff] }
 0xd21   : > { %v1627_v13 = vadd.f32 %v14316_v53, %v1559_v11  ;;  %v1645_v49 = vadd.f32 %v14317_v12, %v1577_v32  ;;  %v1527_v60 = vadd.f32 %v14318_v38, %v1403_v40  ;;  %v1545_v15 = vadd.f32 %v14319_v8, %v1421_v28  ;;  %v14323_v38 = vld [vmem:[#allocation366_spill] sm:$0xff]  ;;  %v14328_v50 = vld [vmem:[#allocation91_spill] sm:$0xff] }
 0xd22   : > { %v1734_v4 = vsel %vm306_vm6, %v14320_v9, 0.0  ;;  %v1562_v58 = vadd.f32 %v14321_v20, %v1526_v43  ;;  %v1750_v54 = vadd.f32 %v1742_v7, %v10267_v37  ;;  %v1120_v18 = vadd.f32 %v1112_v36, %v1052_v55  ;;  %v14324_v55 = vld [vmem:[#allocation130_spill] sm:$0xff]  ;;  %v14326_v36 = vld [vmem:[#allocation131_spill] sm:$0xff] }
 0xd23   : > { %v1138_v45 = vadd.f32 %v1130_v33, %v1070_v25  ;;  %v1275_v34 = vsel %vm306_vm6, %v14322_v26, 0.0  ;;  %v1768_v11 = vadd.f32 %v1760_v59, %v10292_v23  ;;  %v1580_v32 = vadd.f32 %v14323_v38, %v10289_v48  ;;  %v14325_v25 = vld [vmem:[#allocation35_spill] sm:$0xff]  ;;  %v14330_v26 = vld [vmem:[#allocation368_spill] sm:$0xff] }
 0xd24   : > { %v1113_v40 = vadd.f32 %v10001_v39, %v1045_v3  ;;  %v1131_v28 = vadd.f32 %v10027_v17, %v1063_v52  ;;  %v10397_v9 = vmul.f32 %v10188_v27, %v1731_v1  ;;  %v10400_v37 = vmul.f32 %v10219_v5, %v1731_v1  ;;  %v14327_v59 = vld [vmem:[#allocation367_spill] sm:$0xff] }
 0xd25   : > { %v1744_v43 = vmul.f32 %v10188_v27, %v1734_v4  ;;  %v1762_v7 = vmul.f32 %v10219_v5, %v1734_v4  ;;  %v1733_v23 = vsel %vm306_vm6, %v14324_v55, 0.0  ;;  %v1561_v48 = vadd.f32 %v14325_v25, %v1525_v21  ;;  %v14329_v12 = vld [vmem:[#allocation459_spill] sm:$0xff]  ;;  %v14338_v25 = vld [vmem:[#allocation393_spill] sm:$0xff] }
 0xd26   : > { %v1285_v39 = vmul.f32 %v9918_v19, %v1275_v34  ;;  %v1303_v17 = vmul.f32 %v9957_v30, %v1275_v34  ;;  %v1736_v33 = vsel %vm306_vm6, %v14326_v36, 0.0  ;;  %v1579_v3 = vadd.f32 %v14327_v59, %v1543_v57  ;;  %v14331_v55 = vld [vmem:[#allocation331_spill] sm:$0xff] }
 0xd27   : > { %v1300_v52 = vadd.f32 %v10111_v22, %v1120_v18  ;;  %v1318_v1 = vadd.f32 %v10115_v31, %v1138_v45  ;;  %v1630_v53 = vadd.f32 %v14328_v50, %v1562_v58  ;;  %v1648_v8 = vadd.f32 %v14329_v12, %v1580_v32  ;;  %v14332_v18 = vld [vmem:[#allocation132_spill] sm:$0xff] }
 0xd28   : > { %v1293_v4 = vadd.f32 %v1285_v39, %v1113_v40  ;;  %v1311_v21 = vadd.f32 %v1303_v17, %v1131_v28  ;;  %v1752_v20 = vadd.f32 %v1744_v43, %v1628_v46  ;;  %v1770_v19 = vadd.f32 %v1762_v7, %v1646_v61  ;;  %v14333_v58 = vld [vmem:[#allocation92_spill] sm:$0xff]  ;;  %v14335_v46 = vld [vmem:[#allocation381_spill] sm:$0xff]  ;;  %v14339_v39 = vld [vmem:[#allocation394_spill] sm:$0xff] }
 0xd29   : > { %v1743_v30 = vmul.f32 %v10188_v27, %v1733_v23  ;;  %v1786_v34 = vadd.f32 %v14330_v26, %v1750_v54  ;;  %v1761_v38 = vmul.f32 %v10219_v5, %v1733_v23  ;;  %v1746_v57 = vmul.f32 %v10188_v27, %v1736_v33  ;;  %v14334_v32 = vld [vmem:[#allocation380_spill] sm:$0xff]  ;;  %v14337_v7 = vld [vmem:[#allocation369_spill] sm:$0xff] }
 0xd2a   : > { %v1629_v22 = vadd.f32 %v14331_v55, %v1561_v48  ;;  %v1735_v31 = vsel %vm306_vm6, %v14332_v18, 0.0  ;;  %v1647_v45 = vadd.f32 %v14333_v58, %v1579_v3  ;;  %v1336_v40 = vadd.f32 %v14334_v32, %v1300_v52  ;;  %v14336_v28 = vld [vmem:[#allocation148_spill] sm:$0xff]  ;;  %v14340_v3 = vld [vmem:[#allocation37_spill] sm:$0xff]  ;;  %v14341_v52 = vld [vmem:[#allocation370_spill] sm:$0xff] }
 0xd2b   : > { %v1354_v61 = vadd.f32 %v14335_v46, %v1318_v1  ;;  %v1379_v54 = vsel %vm307_vm7, %v14336_v28, 0.0  ;;  %v1764_v43 = vmul.f32 %v10219_v5, %v1736_v33  ;;  %v1804_v23 = vadd.f32 %v14337_v7, %v1768_v11  ;;  %v14342_v11 = vld [vmem:[#allocation133_spill] sm:$0xff]  ;;  %v14346_v32 = vld [vmem:[#allocation372_spill] sm:$0xff] }
 0xd2c   : > { %v1329_v48 = vadd.f32 %v14338_v25, %v1293_v4  ;;  %v1347_v17 = vadd.f32 %v14339_v39, %v1311_v21  ;;  %v1751_v36 = vadd.f32 %v1743_v30, %v1627_v13  ;;  %v1745_v59 = vmul.f32 %v10188_v27, %v1735_v31  ;;  %v14351_v7 = vld [vmem:[#allocation80_spill] sm:$0xff]  ;;  %v14353_v39 = vld [vmem:[#allocation375_spill] sm:$0xff] }
 0xd2d   : > { %v1563_v50 = vadd.f32 %v14340_v3, %v1527_v60  ;;  %v1581_v12 = vadd.f32 %v14341_v52, %v1545_v15  ;;  %v1769_v1 = vadd.f32 %v1761_v38, %v1645_v49  ;;  %v1754_v26 = vadd.f32 %v1746_v57, %v1630_v53  ;;  %v14343_v60 = vld [vmem:[#allocation371_spill] sm:$0xff]  ;;  %v14344_v38 = vld [vmem:[#allocation94_spill] sm:$0xff] }
 0xd2e   : > { %v1389_v55 = vmul.f32 %v10050_v47, %v1379_v54  ;;  %v1407_v18 = vmul.f32 %v10077_v10, %v1379_v54  ;;  %v1763_v33 = vmul.f32 %v10219_v5, %v1735_v31  ;;  %v1836_v4 = vsel %vm307_vm7, %v14342_v11, 0.0  ;;  %v14345_v57 = vld [vmem:[#allocation95_spill] sm:$0xff]  ;;  %v14347_v54 = vld [vmem:[#allocation134_spill] sm:$0xff]  ;;  %v14356_v11 = vld [vmem:[#allocation376_spill] sm:$0xff] }
 0xd2f   : > { %v1404_v13 = vadd.f32 %v10310_v14, %v1336_v40  ;;  %v1422_v21 = vadd.f32 %v10315_v56, %v1354_v61  ;;  %v1772_v30 = vadd.f32 %v1764_v43, %v1648_v8  ;;  %v1788_v58 = vadd.f32 %v14343_v60, %v1752_v20  ;;  %v14348_v56 = vld [vmem:[#allocation135_spill] sm:$0xff]  ;;  %v14359_v60 = vld [vmem:[#allocation137_spill] sm:$0xff] }
 0xd30   : > { %v1397_v15 = vadd.f32 %v1389_v55, %v1329_v48  ;;  %v1415_v49 = vadd.f32 %v1407_v18, %v1347_v17  ;;  %v1753_v53 = vadd.f32 %v1745_v59, %v1629_v22  ;;  %v1631_v47 = vadd.f32 %v14344_v38, %v1563_v50  ;;  %v14349_v22 = vld [vmem:[#allocation373_spill] sm:$0xff]  ;;  %v14350_v61 = vld [vmem:[#allocation79_spill] sm:$0xff]  ;;  %v14355_v50 = vld [vmem:[#allocation78_spill] sm:$0xff] }
 0xd31   : > { %v1649_v10 = vadd.f32 %v14345_v57, %v1581_v12  ;;  %v1806_v31 = vadd.f32 %v14346_v32, %v1770_v19  ;;  %v1846_v46 = vmul.f32 %v10251_v41, %v1836_v4  ;;  %v1864_v28 = vmul.f32 %v10295_v6, %v1836_v4  ;;  %v14352_v19 = vld [vmem:[#allocation374_spill] sm:$0xff]  ;;  %v14354_v59 = vld [vmem:[#allocation77_spill] sm:$0xff] }
 0xd32   : > { %v1737_v14 = vsel %vm306_vm6, %v14347_v54, 0.0  ;;  %v1838_v8 = vsel %vm307_vm7, %v14348_v56, 0.0  ;;  %v1771_v20 = vadd.f32 %v1763_v33, %v1647_v45  ;;  %v1790_v40 = vadd.f32 %v14349_v22, %v1754_v26  ;;  %v14361_v57 = vld [vmem:[#allocation386_spill] sm:$0xff]  ;;  %v14365_v54 = vld [vmem:[#allocation395_spill] sm:$0xff] }
 0xd33   : > { %v1528_v43 = vadd.f32 %v14350_v61, %v1404_v13  ;;  %v1546_v25 = vadd.f32 %v14351_v7, %v1422_v21  ;;  %v1808_v48 = vadd.f32 %v14352_v19, %v1772_v30  ;;  %v1787_v17 = vadd.f32 %v14353_v39, %v1751_v36  ;;  %v14357_v13 = vld [vmem:[#allocation378_spill] sm:$0xff]  ;;  %v14358_v21 = vld [vmem:[#allocation136_spill] sm:$0xff]  ;;  %v14367_v39 = vld [vmem:[#allocation143_spill] sm:$0xff] }
 0xd34   : > { %v1521_v3 = vadd.f32 %v14354_v59, %v1397_v15  ;;  %v1539_v52 = vadd.f32 %v14355_v50, %v1415_v49  ;;  %v1747_v12 = vmul.f32 %v10188_v27, %v1737_v14  ;;  %v1765_v55 = vmul.f32 %v10219_v5, %v1737_v14  ;;  %v14360_v49 = vld [vmem:[#allocation36_spill] sm:$0xff] }
 0xd35   : > { %v1848_v45 = vmul.f32 %v10251_v41, %v1838_v8  ;;  %v1866_v26 = vmul.f32 %v10295_v6, %v1838_v8  ;;  %v10470_v18 = vadd.f32 %v1846_v46, %v1786_v34  ;;  %v10472_v33 = vadd.f32 %v1864_v28, %v1804_v23  ;;  %v14362_v34 = vld [vmem:[#allocation138_spill] sm:$0xff]  ;;  %v14363_v46 = vld [vmem:[#allocation379_spill] sm:$0xff] }
 0xd36   : > { %v1805_v4 = vadd.f32 %v14356_v11, %v1769_v1  ;;  %v1789_v36 = vadd.f32 %v14357_v13, %v1753_v53  ;;  %v1835_v30 = vsel %vm307_vm7, %v14358_v21, 0.0  ;;  %v1840_v15 = vsel %vm307_vm7, %v14359_v60, 0.0  ;;  %v14364_v28 = vld [vmem:[#allocation30_spill] sm:$0xff] }
 0xd37   : > { %v1564_v38 = vadd.f32 %v14360_v49, %v1528_v43  ;;  %v1582_v32 = vadd.f32 %v14361_v57, %v1546_v25  ;;  %v1837_v23 = vsel %vm307_vm7, %v14362_v34, 0.0  ;;  %v1807_v1 = vadd.f32 %v14363_v46, %v1771_v20  ;;  %v14366_v25 = vld [vmem:[#allocation140_spill] sm:$0xff]  ;;  %v14374_v34 = vld [vmem:[#allocation385_spill] sm:$0xff] }
 0xd38   : > { %v1557_v53 = vadd.f32 %v14364_v28, %v1521_v3  ;;  %v1575_v14 = vadd.f32 %v14365_v54, %v1539_v52  ;;  %v1755_v56 = vadd.f32 %v1747_v12, %v1631_v47  ;;  %v1773_v8 = vadd.f32 %v1765_v55, %v1649_v10  ;;  %v14370_v52 = vld [vmem:[#allocation142_spill] sm:$0xff]  ;;  %v14371_v55 = vld [vmem:[#allocation88_spill] sm:$0xff]  ;;  %v14375_v54 = vld [vmem:[#allocation149_spill] sm:$0xff] }
 0xd39   : > { %v10490_v22 = vadd.f32 %v1848_v45, %v1788_v58  ;;  %v10492_v61 = vadd.f32 %v1866_v26, %v1806_v31  ;;  %v1845_v43 = vmul.f32 %v10251_v41, %v1835_v30  ;;  %v1850_v7 = vmul.f32 %v10251_v41, %v1840_v15  ;;  %v14368_v58 = vld [vmem:[#allocation461_spill] sm:$0xff]  ;;  %v14369_v31 = vld [vmem:[#allocation90_spill] sm:$0xff]  ;;  %v14372_v26 = vld [vmem:[#allocation460_spill] sm:$0xff] }
 0xd3a   : > { %v1839_v19 = vsel %vm307_vm7, %v14366_v25, 0.0  ;;  %v1738_v20 = vsel %vm306_vm6, %v14367_v39, 0.0  ;;  %v1868_v59 = vmul.f32 %v10295_v6, %v1840_v15  ;;  %v1847_v47 = vmul.f32 %v10251_v41, %v1837_v23  ;;  %v14373_v57 = vld [vmem:[#allocation384_spill] sm:$0xff] }
 0xd3b   : > { %v1632_v10 = vadd.f32 %v14368_v58, %v1564_v38  ;;  %v1650_v3 = vadd.f32 %v14369_v31, %v1582_v32  ;;  %v1865_v50 = vmul.f32 %v10295_v6, %v1837_v23  ;;  %v1841_v12 = vsel %vm307_vm7, %v14370_v52, 0.0  ;;  %v14377_v58 = vld [vmem:[#allocation150_spill] sm:$0xff]  ;;  %v14382_v52 = vld [vmem:[#allocation397_spill] sm:$0xff] }
 0xd3c   : > { %v1625_v45 = vadd.f32 %v14371_v55, %v1557_v53  ;;  %v1643_v11 = vadd.f32 %v14372_v26, %v1575_v14  ;;  %v1849_v13 = vmul.f32 %v10251_v41, %v1839_v19  ;;  %v1867_v21 = vmul.f32 %v10295_v6, %v1839_v19  ;;  %v14376_v14 = vld [vmem:[#allocation145_spill] sm:$0xff] }
 0xd3d   : > { %v1748_v60 = vmul.f32 %v10188_v27, %v1738_v20  ;;  %v1766_v15 = vmul.f32 %v10219_v5, %v1738_v20  ;;  %v1863_v49 = vmul.f32 %v10295_v6, %v1835_v30  ;;  %v1858_v38 = vadd.f32 %v1850_v7, %v1790_v40 }
 0xd3e   : > { %v1791_v32 = vadd.f32 %v14373_v57, %v1755_v56  ;;  %v1809_v23 = vadd.f32 %v14374_v34, %v1773_v8  ;;  %v1851_v46 = vmul.f32 %v10251_v41, %v1841_v12  ;;  %v2104_v27 = vsel %vm306_vm6, %v14375_v54, 0.0 }
 0xd3f   : > { %v1756_v28 = vadd.f32 %v1748_v60, %v1632_v10  ;;  %v1774_v53 = vadd.f32 %v1766_v15, %v1650_v3  ;;  %v1876_v5 = vadd.f32 %v1868_v59, %v1808_v48  ;;  %v1842_v40 = vsel %vm307_vm7, %v14376_v14, 0.0  ;;  %v14378_v59 = vld [vmem:[#allocation154_spill] sm:$0xff]  ;;  %v14381_v3 = vld [vmem:[#allocation396_spill] sm:$0xff] }
 0xd40   : > { %v1749_v30 = vadd.f32 %v10397_v9, %v1625_v45  ;;  %v1767_v56 = vadd.f32 %v10400_v37, %v1643_v11  ;;  %v1855_v8 = vadd.f32 %v1847_v47, %v1787_v17  ;;  %v1873_v7 = vadd.f32 %v1865_v50, %v1805_v4  ;;  %v14379_v17 = vld [vmem:[#allocation389_spill] sm:$0xff]  ;;  %v14383_v11 = vld [vmem:[#allocation151_spill] sm:$0xff] }
 0xd41   : > { %v10532_v25 = vadd.f32 %v1849_v13, %v1789_v36  ;;  %v10534_v19 = vadd.f32 %v1867_v21, %v1807_v1  ;;  %v1869_v39 = vmul.f32 %v10295_v6, %v1841_v12  ;;  %v2114_v20 = vmul.f32 %v10330_v63, %v2104_v27  ;;  %v14380_v36 = vld [vmem:[#allocation390_spill] sm:$0xff] }
 0xd42   : > { %v2106_v48 = vsel %vm306_vm6, %v14377_v58, 0.0  ;;  %v2105_v9 = vsel %vm306_vm6, %v14378_v59, 0.0  ;;  %v10544_v37 = vadd.f32 %v1851_v46, %v1791_v32  ;;  %v1792_v4 = vadd.f32 %v14379_v17, %v1756_v28  ;;  %v14384_v32 = vld [vmem:[#allocation152_spill] sm:$0xff]  ;;  %v14388_v17 = vld [vmem:[#allocation155_spill] sm:$0xff] }
 0xd43   : > { %v1810_v1 = vadd.f32 %v14380_v36, %v1774_v53  ;;  %v1852_v47 = vmul.f32 %v10251_v41, %v1842_v40  ;;  %v1870_v10 = vmul.f32 %v10295_v6, %v1842_v40  ;;  %v2132_v31 = vmul.f32 %v10361_v62, %v2104_v27  ;;  %v14389_v36 = vld [vmem:[#allocation399_spill] sm:$0xff] }
 0xd44   : > { %v1785_v50 = vadd.f32 %v14381_v3, %v1749_v30  ;;  %v1803_v12 = vadd.f32 %v14382_v52, %v1767_v56  ;;  %v2116_v55 = vmul.f32 %v10330_v63, %v2106_v48  ;;  %v2134_v45 = vmul.f32 %v10361_v62, %v2106_v48  ;;  %v14392_v3 = vld [vmem:[#allocation408_spill] sm:$0xff] }
 0xd45   : > { %v2115_v26 = vmul.f32 %v10330_v63, %v2105_v9  ;;  %v2108_v13 = vsel %vm306_vm6, %v14383_v11, 0.0  ;;  %v10559_v21 = vadd.f32 %v1869_v39, %v1809_v23  ;;  %v2122_v41 = vadd.f32 %v2114_v20, %v10470_v18  ;;  %v14385_v23 = vld [vmem:[#allocation153_spill] sm:$0xff] }
 0xd46   : > { %v10563_v6 = vstv %s10519_s29  ;;  %v10566_v60 = vstv %s10521_s13  ;;  %v1860_v15 = vadd.f32 %v1852_v47, %v1792_v4  ;;  %v1878_v57 = vadd.f32 %v1870_v10, %v1810_v1  ;;  %v14390_v47 = vld [vmem:[#allocation400_spill] sm:$0xff]  ;;  %s11168_s29 = sld [smem:[#allocation2 + $0x5d]]  ;;  %s11189_s13 = sld [smem:[#allocation2 + $0x29]] }
 0xd47   : > { %v2103_v34 = vsel %vm306_vm6, %v14384_v32, 0.0  ;;  %v2133_v46 = vmul.f32 %v10361_v62, %v2105_v9  ;;  %v1853_v28 = vadd.f32 %v1845_v43, %v1785_v50  ;;  %v1871_v53 = vadd.f32 %v1863_v49, %v1803_v12  ;;  %v14386_v49 = vld [vmem:[#allocation398_spill] sm:$0xff]  ;;  %v14387_v9 = vld [vmem:[#allocation156_spill] sm:$0xff]  ;;  %v14395_v32 = vld [vmem:[#allocation409_spill] sm:$0xff] }
 0xd48   : > { %v2118_v54 = vmul.f32 %v10330_v63, %v2108_v13  ;;  %v2110_v18 = vsel %vm306_vm6, %v14385_v23, 0.0  ;;  %v2140_v27 = vadd.f32 %v2132_v31, %v10472_v33  ;;  %v2124_v14 = vadd.f32 %v2116_v55, %v10490_v22  ;;  %v14393_v55 = vld [vmem:[#allocation157_spill] sm:$0xff] }
 0xd49   : > { %v2142_v40 = vadd.f32 %v2134_v45, %v10492_v61  ;;  %v2123_v30 = vadd.f32 %v2115_v26, %v1855_v8  ;;  %v2113_v56 = vmul.f32 %v10330_v63, %v2103_v34  ;;  %v2131_v39 = vmul.f32 %v10361_v62, %v2103_v34  ;;  %v14394_v45 = vld [vmem:[#allocation158_spill] sm:$0xff]  ;;  %v14398_v23 = vld [vmem:[#allocation405_spill] sm:$0xff] }
 0xd4a   : > { %v2136_v43 = vmul.f32 %v10361_v62, %v2108_v13  ;;  %v2158_v20 = vadd.f32 %v14386_v49, %v2122_v41  ;;  %v2141_v58 = vadd.f32 %v2133_v46, %v1873_v7  ;;  %v2120_v48 = vmul.f32 %v10330_v63, %v2110_v18  ;;  %v14391_v7 = vld [vmem:[#allocation401_spill] sm:$0xff] }
 0xd4b   : > { %v2138_v59 = vmul.f32 %v10361_v62, %v2110_v18  ;;  %v2107_v33 = vsel %vm306_vm6, %v14387_v9, 0.0  ;;  %v2121_v22 = vadd.f32 %v2113_v56, %v1853_v28  ;;  %v2139_v61 = vadd.f32 %v2131_v39, %v1871_v53  ;;  %v14397_v53 = vld [vmem:[#allocation404_spill] sm:$0xff] }
 0xd4c   : > { %v2126_v8 = vadd.f32 %v2118_v54, %v1858_v38  ;;  %v2208_v4 = vsel %vm307_vm7, %v14388_v17, 0.0  ;;  %v2176_v1 = vadd.f32 %v14389_v36, %v2140_v27  ;;  %v2160_v10 = vadd.f32 %v14390_v47, %v2124_v14  ;;  %v14404_v17 = vld [vmem:[#allocation161_spill] sm:$0xff] }
 0xd4d   : > { %v2178_v31 = vadd.f32 %v14391_v7, %v2142_v40  ;;  %v10595_v50 = vadd.f32 %v14392_v3, %v2123_v30  ;;  %v2144_v52 = vadd.f32 %v2136_v43, %v1876_v5  ;;  %v2117_v12 = vmul.f32 %v10330_v63, %v2107_v33  ;;  %v14396_v5 = vld [vmem:[#allocation402_spill] sm:$0xff]  ;;  %v14400_v43 = vld [vmem:[#allocation403_spill] sm:$0xff] }
 0xd4e   : > { %v2210_v38 = vsel %vm307_vm7, %v14393_v55, 0.0  ;;  %v2109_v26 = vsel %vm306_vm6, %v14394_v45, 0.0  ;;  %v2128_v11 = vadd.f32 %v2120_v48, %v1860_v15  ;;  %v2146_v13 = vadd.f32 %v2138_v59, %v1878_v57  ;;  %v14399_v57 = vld [vmem:[#allocation159_spill] sm:$0xff]  ;;  %v14401_v48 = vld [vmem:[#allocation160_spill] sm:$0xff]  ;;  %v14402_v59 = vld [vmem:[#allocation406_spill] sm:$0xff] }
 0xd4f   : > { %v2218_v41 = vmul.f32 %v10563_v6, %v2208_v4  ;;  %v10606_v34 = vadd.f32 %v14395_v32, %v2141_v58  ;;  %v2135_v46 = vmul.f32 %v10361_v62, %v2107_v33  ;;  %v2162_v28 = vadd.f32 %v14396_v5, %v2126_v8  ;;  %v14403_v33 = vld [vmem:[#allocation407_spill] sm:$0xff]  ;;  %v14407_v7 = vld [vmem:[#allocation162_spill] sm:$0xff] }
 0xd50   : > { %v2157_v54 = vadd.f32 %v14397_v53, %v2121_v22  ;;  %v2175_v18 = vadd.f32 %v14398_v23, %v2139_v61  ;;  %v2236_v27 = vmul.f32 %v10566_v60, %v2208_v4  ;;  %v2220_v14 = vmul.f32 %v10563_v6, %v2210_v38  ;;  %v14412_v53 = vld [vmem:[#allocation412_spill] sm:$0xff] }
 0xd51   : > { %v2119_v15 = vmul.f32 %v10330_v63, %v2109_v26  ;;  %v2212_v40 = vsel %vm307_vm7, %v14399_v57, 0.0  ;;  %v2125_v30 = vadd.f32 %v2117_v12, %v10532_v25  ;;  %v2238_v56 = vmul.f32 %v10566_v60, %v2210_v38  ;;  %v14408_v38 = vld [vmem:[#allocation410_spill] sm:$0xff] }
 0xd52   : > { %v2137_v39 = vmul.f32 %v10361_v62, %v2109_v26  ;;  %v2180_v49 = vadd.f32 %v14400_v43, %v2144_v52  ;;  %v10624_v58 = vadd.f32 %v2218_v41, %v2158_v20  ;;  %v2207_v63 = vsel %vm307_vm7, %v14401_v48, 0.0  ;;  %v10639_v20 = vpop.permute.xlu0 %4105  ;;  %v10641_v4 = vpop.permute.xlu1 %4103 }
 0xd53   : > { %v2164_v9 = vadd.f32 %v14402_v59, %v2128_v11  ;;  %v2182_v22 = vadd.f32 %v14403_v33, %v2146_v13  ;;  %v2143_v61 = vadd.f32 %v2135_v46, %v10534_v19  ;;  %v2222_v25 = vmul.f32 %v10563_v6, %v2212_v40  ;;  %14405 = vst [vmem:[#allocation103_spill] sm:$0xff] %v10639_v20  ;;  %v14463_v20 = vld [vmem:[#allocation25_spill] sm:$0xff] }
 0xd54   : > { %v2240_v8 = vmul.f32 %v10566_v60, %v2212_v40  ;;  %v2214_v62 = vsel %vm307_vm7, %v14404_v17, 0.0  ;;  %14406 = vst [vmem:[#allocation28_spill] sm:$0xff] %v10641_v4  ;;  %v10643_v36 = vadd.f32 %v2236_v27, %v2176_v1  ;;  %v10645_v47 = vadd.f32 %v2220_v14, %v2160_v10  ;;  %v14413_v14 = vld [vmem:[#allocation173_spill] sm:$0xff]  ;;  %v14417_v17 = vld [vmem:[#allocation175_spill] sm:$0xff] }
 0xd55   : > { %v2127_v19 = vadd.f32 %v2119_v15, %v10544_v37  ;;  %v2209_v3 = vsel %vm307_vm7, %v14407_v7, 0.0  ;;  %v10651_v52 = vadd.f32 %v2238_v56, %v2178_v31  ;;  %v2145_v12 = vadd.f32 %v2137_v39, %v10559_v21  ;;  %v14409_v37 = vld [vmem:[#allocation163_spill] sm:$0xff]  ;;  %v14414_v56 = vld [vmem:[#allocation413_spill] sm:$0xff] }
 0xd56   : > { %v2217_v55 = vmul.f32 %v10563_v6, %v2207_v63  ;;  %v2161_v45 = vadd.f32 %v14408_v38, %v2125_v30  ;;  %v2235_v1 = vmul.f32 %v10566_v60, %v2207_v63  ;;  %v2224_v10 = vmul.f32 %v10563_v6, %v2214_v62  ;;  %v14410_v21 = vld [vmem:[#allocation411_spill] sm:$0xff]  ;;  %v10666_v5 = vpop.permute.xlu1 %4107  ;;  %v14415_v63 = vld [vmem:[#allocation164_spill] sm:$0xff] }
 0xd57   : > { %v2242_v26 = vmul.f32 %v10566_v60, %v2214_v62  ;;  %v2211_v11 = vsel %vm307_vm7, %v14409_v37, 0.0  ;;  %v2230_v13 = vadd.f32 %v2222_v25, %v2162_v28  ;;  %v10662_v41 = vadd.f32 %v2240_v8, %v2180_v49  ;;  %14411 = vst [vmem:[#allocation342_spill] sm:$0xff] %v10666_v5  ;;  %v14416_v25 = vld [vmem:[#allocation174_spill] sm:$0xff]  ;;  %v14419_v37 = vld [vmem:[#allocation177_spill] sm:$0xff] }
 0xd58   : > { %v2219_v31 = vmul.f32 %v10563_v6, %v2209_v3  ;;  %v2179_v32 = vadd.f32 %v14410_v21, %v2143_v61  ;;  %v4332_v46 = vpop.permute.xlu0 %4331  ;;  %v2163_v23 = vadd.f32 %v14412_v53, %v2127_v19  ;;  %v10670_v27 = vstv %s10618_s26  ;;  %v14464_v5 = vld [vmem:[#allocation102_spill] sm:$0xff]  ;;  %s11203_s26 = sld [smem:[#allocation2 + $0x5f]] }
 0xd59   : > { %v2332_v15 = vsel %vm306_vm6, %v14413_v14, 0.0  ;;  %v4333_v28 = vsel %vm454_vm5, %v4332_v46, %v9911_v51  ;;  %v2225_v57 = vadd.f32 %v2217_v55, %v2157_v54  ;;  %v2237_v40 = vmul.f32 %v10566_v60, %v2209_v3  ;;  %v14420_v14 = vld [vmem:[#allocation60_spill] sm:$0xff] }
 0xd5a   : > { %v2221_v30 = vmul.f32 %v10563_v6, %v2211_v11  ;;  %v2181_v39 = vadd.f32 %v14414_v56, %v2145_v12  ;;  %4355 = vrot.lane.b32.xlu1 %v4333_v28, %s5863_s8  ;;  %v2243_v43 = vadd.f32 %v2235_v1, %v2175_v18  ;;  %v2232_v49 = vadd.f32 %v2224_v10, %v2164_v9  ;;  %v14418_v10 = vld [vmem:[#allocation176_spill] sm:$0xff]  ;;  %v14421_v28 = vld [vmem:[#allocation338_spill] sm:$0xff] }
 0xd5b   : > { %v10681_v48 = vadd.f32 %v2242_v26, %v2182_v22  ;;  %v2213_v59 = vsel %vm307_vm7, %v14415_v63, 0.0  ;;  %v10687_v33 = vadd.f32 %v2219_v31, %v10595_v50  ;;  %v10690_v54 = vstv %s10637_s22  ;;  %s11260_s22 = sld [smem:[#allocation2 + $0x2a]] }
 0xd5c   : > { %v2342_v61 = vmul.f32 %v10670_v27, %v2332_v15  ;;  %v2334_v8 = vsel %vm306_vm6, %v14416_v25, 0.0  ;;  %v4338_v18 = vpop.permute.xlu0 %4337  ;;  %v4335_v9 = vpop.permute.xlu1 %4334  ;;  %v2239_v22 = vmul.f32 %v10566_v60, %v2211_v11  ;;  %v2336_v62 = vsel %vm306_vm6, %v14417_v17, 0.0  ;;  %v14422_v25 = vld [vmem:[#allocation57_spill] sm:$0xff] }
 0xd5d   : > { %v4339_v50 = vsel %vm454_vm5, %v4338_v18, %v9946_v42  ;;  %v4336_v19 = vsel %vm454_vm5, %v4335_v9, %v9950_v44  ;;  %v10707_v7 = vadd.f32 %v2237_v40, %v10606_v34  ;;  %v10709_v3 = vadd.f32 %v2221_v30, %v2161_v45 }
 0xd5e   : > { %v2223_v12 = vmul.f32 %v10563_v6, %v2213_v59  ;;  %4359 = vrot.lane.b32.xlu1 %v4339_v50, %s5863_s8  ;;  %4357 = vrot.lane.b32.xlu0 %v4336_v19, %s5863_s8  ;;  %v2360_v55 = vmul.f32 %v10690_v54, %v2332_v15  ;;  %v2344_v38 = vmul.f32 %v10670_v27, %v2334_v8  ;;  %v2331_v34 = vsel %vm306_vm6, %v14418_v10, 0.0  ;;  %v14425_v50 = vld [vmem:[#allocation24_spill] sm:$0xff] }
 0xd5f   : > { %v2362_v1 = vmul.f32 %v10690_v54, %v2334_v8  ;;  %v2241_v45 = vmul.f32 %v10566_v60, %v2213_v59  ;;  %v2350_v6 = vadd.f32 %v2342_v61, %v10624_v58  ;;  %v2346_v26 = vmul.f32 %v10670_v27, %v2336_v62  ;;  %v14427_v10 = vld [vmem:[#allocation44_spill] sm:$0xff] }
 0xd60   : > { %v2338_v11 = vsel %vm306_vm6, %v14419_v37, 0.0  ;;  %v4344_v31 = vpop.permute.xlu0 %4343  ;;  %v10728_v46 = vadd.f32 %v2239_v22, %v2179_v32  ;;  %v2364_v53 = vmul.f32 %v10690_v54, %v2336_v62  ;;  %v10735_v58 = vadd.f32 %v2223_v12, %v2163_v23  ;;  %v14423_v62 = vld [vmem:[#allocation178_spill] sm:$0xff] }
 0xd61   : > { %v4341_v21 = vpop.permute.xlu1 %4340  ;;  %v4345_v15 = vsel %vm454_vm5, %v4344_v31, %v14420_v14  ;;  %v2341_v40 = vmul.f32 %v10670_v27, %v2331_v34  ;;  %v2359_v30 = vmul.f32 %v10690_v54, %v2331_v34  ;;  %v2368_v32 = vadd.f32 %v2360_v55, %v10643_v36 }
 0xd62   : > { %v4342_v60 = vsel %vm454_vm5, %v4341_v21, %v14421_v28  ;;  %4363 = vrot.lane.b32.xlu1 %v4345_v15, %s5863_s8  ;;  %v2352_v56 = vadd.f32 %v2344_v38, %v10645_v47  ;;  %v2370_v63 = vadd.f32 %v2362_v1, %v10651_v52  ;;  %v2348_v59 = vmul.f32 %v10670_v27, %v2338_v11  ;;  %v14424_v47 = vld [vmem:[#allocation23_spill] sm:$0xff]  ;;  %v14426_v38 = vld [vmem:[#allocation414_spill] sm:$0xff] }
 0xd63   : > { %4361 = vrot.lane.b32.xlu0 %v4342_v60, %s5863_s8  ;;  %v10745_v61 = vadd.f32 %v2241_v45, %v2181_v39  ;;  %v2354_v23 = vadd.f32 %v2346_v26, %v2230_v13  ;;  %v2386_v8 = vadd.f32 %v14422_v25, %v2350_v6  ;;  %v10749_v18 = vstv %s10696_s12  ;;  %v14428_v45 = vld [vmem:[#allocation415_spill] sm:$0xff]  ;;  %v14432_v60 = vld [vmem:[#allocation416_spill] sm:$0xff]  ;;  %s11262_s12 = sld [smem:[#allocation2 + $0x60]] }
 0xd64   : > { %v4350_v9 = vpop.permute.xlu0 %4349  ;;  %v2372_v17 = vadd.f32 %v2364_v53, %v10662_v41  ;;  %v2333_v36 = vsel %vm306_vm6, %v14423_v62, 0.0  ;;  %v2349_v19 = vadd.f32 %v2341_v40, %v2225_v57  ;;  %v2367_v13 = vadd.f32 %v2359_v30, %v2243_v43  ;;  %v14429_v43 = vld [vmem:[#allocation179_spill] sm:$0xff]  ;;  %v14431_v53 = vld [vmem:[#allocation48_spill] sm:$0xff]  ;;  %v14436_v62 = vld [vmem:[#allocation417_spill] sm:$0xff] }
 0xd65   : > { %v4347_v22 = vpop.permute.xlu1 %4346  ;;  %v4351_v52 = vsel %vm454_vm5, %v4350_v9, %v14424_v47  ;;  %v2366_v12 = vmul.f32 %v10690_v54, %v2338_v11  ;;  %v10761_v55 = vstv %s10712_s14  ;;  %v2356_v41 = vadd.f32 %v2348_v59, %v2232_v49  ;;  %v14430_v11 = vld [vmem:[#allocation180_spill] sm:$0xff]  ;;  %v14434_v59 = vld [vmem:[#allocation182_spill] sm:$0xff]  ;;  %s11311_s14 = sld [smem:[#allocation2 + $0x2c]] }
 0xd66   : > { %v4348_v39 = vsel %vm454_vm5, %v4347_v22, %v14425_v50  ;;  %4367 = vrot.lane.b32.xlu1 %v4351_v52, %s5863_s8  ;;  %v2404_v1 = vadd.f32 %v14426_v38, %v2368_v32  ;;  %v2388_v34 = vadd.f32 %v14427_v10, %v2352_v56  ;;  %v2406_v6 = vadd.f32 %v14428_v45, %v2370_v63  ;;  %v14433_v32 = vld [vmem:[#allocation45_spill] sm:$0xff]  ;;  %v14435_v9 = vld [vmem:[#allocation56_spill] sm:$0xff] }
 0xd67   : > { %4365 = vrot.lane.b32.xlu0 %v4348_v39, %s5863_s8  ;;  %v2343_v26 = vmul.f32 %v10670_v27, %v2333_v36  ;;  %v2361_v57 = vmul.f32 %v10690_v54, %v2333_v36  ;;  %v2436_v37 = vsel %vm307_vm7, %v14429_v43, 0.0  ;;  %v2335_v31 = vsel %vm306_vm6, %v14430_v11, 0.0  ;;  %v14437_v52 = vld [vmem:[#allocation181_spill] sm:$0xff]  ;;  %v14438_v38 = vld [vmem:[#allocation52_spill] sm:$0xff] }
 0xd68   : > { %v4560_v21 = vpop.permute.xlu0 %4559  ;;  %v2390_v15 = vadd.f32 %v14431_v53, %v2354_v23  ;;  %v2408_v40 = vadd.f32 %v14432_v60, %v2372_v17  ;;  %v2374_v63 = vadd.f32 %v2366_v12, %v10681_v48  ;;  %v2337_v25 = vsel %vm306_vm6, %v14434_v59, 0.0  ;;  %v14440_v53 = vld [vmem:[#allocation332_spill] sm:$0xff] }
 0xd69   : > { %v4561_v30 = vsel %vm454_vm5, %v4560_v21, %v9814_v24  ;;  %v10787_v22 = vadd.f32 %v14435_v9, %v2349_v19  ;;  %v10790_v36 = vadd.f32 %v14436_v62, %v2367_v13  ;;  %v2446_v23 = vmul.f32 %v10749_v18, %v2436_v37  ;;  %v14443_v9 = vld [vmem:[#allocation43_spill] sm:$0xff] }
 0xd6a   : > { %v4353_v49 = vpop.permute.xlu1 %4352  ;;  %4583 = vrot.lane.b32.xlu1 %v4561_v30, %s5863_s8  ;;  %v2464_v17 = vmul.f32 %v10761_v55, %v2436_v37  ;;  %v2345_v48 = vmul.f32 %v10670_v27, %v2335_v31  ;;  %v2438_v39 = vsel %vm307_vm7, %v14437_v52, 0.0  ;;  %v2351_v19 = vadd.f32 %v2343_v26, %v10687_v33  ;;  %v14439_v37 = vld [vmem:[#allocation183_spill] sm:$0xff] }
 0xd6b   : > { %v4354_v56 = vsel %vm454_vm5, %v4353_v49, %v14433_v32  ;;  %v2369_v12 = vadd.f32 %v2361_v57, %v10707_v7  ;;  %v2363_v13 = vmul.f32 %v10690_v54, %v2335_v31  ;;  %v10804_v10 = vadd.f32 %v14438_v38, %v2356_v41  ;;  %v14441_v41 = vld [vmem:[#allocation418_spill] sm:$0xff] }
 0xd6c   : > { %4369 = vrot.lane.b32.xlu0 %v4354_v56, %s5863_s8  ;;  %v4566_v45 = vpop.permute.xlu0 %4565  ;;  %v2347_v11 = vmul.f32 %v10670_v27, %v2337_v25  ;;  %v2440_v21 = vsel %vm307_vm7, %v14439_v37, 0.0  ;;  %v2448_v7 = vmul.f32 %v10749_v18, %v2438_v39  ;;  %v2365_v26 = vmul.f32 %v10690_v54, %v2337_v25  ;;  %v14442_v25 = vld [vmem:[#allocation184_spill] sm:$0xff] }
 0xd6d   : > { %v4567_v49 = vsel %vm454_vm5, %v4566_v45, %v9871_v35  ;;  %v2410_v57 = vadd.f32 %v14441_v41, %v2374_v63  ;;  %v10819_v27 = vadd.f32 %v2446_v23, %v2386_v8  ;;  %v10821_v31 = vadd.f32 %v2464_v17, %v2404_v1  ;;  %v14444_v23 = vld [vmem:[#allocation59_spill] sm:$0xff]  ;;  %v14451_v41 = vld [vmem:[#allocation50_spill] sm:$0xff] }
 0xd6e   : > { %v4563_v43 = vpop.permute.xlu1 %4562  ;;  %4587 = vrot.lane.b32.xlu1 %v4567_v49, %s5863_s8  ;;  %v2353_v60 = vadd.f32 %v2345_v48, %v10709_v3  ;;  %v2466_v30 = vmul.f32 %v10761_v55, %v2438_v39  ;;  %v2371_v56 = vadd.f32 %v2363_v13, %v10728_v46  ;;  %v2450_v59 = vmul.f32 %v10749_v18, %v2440_v21  ;;  %v14445_v17 = vld [vmem:[#allocation55_spill] sm:$0xff]  ;;  %v14450_v49 = vld [vmem:[#allocation420_spill] sm:$0xff] }
 0xd6f   : > { %v4564_v33 = vsel %vm454_vm5, %v4563_v43, %v14440_v53  ;;  %v2468_v54 = vmul.f32 %v10761_v55, %v2440_v21  ;;  %v2435_v63 = vsel %vm307_vm7, %v14442_v25, 0.0  ;;  %v2355_v3 = vadd.f32 %v2347_v11, %v10735_v58  ;;  %v14446_v13 = vld [vmem:[#allocation419_spill] sm:$0xff]  ;;  %v14452_v25 = vld [vmem:[#allocation336_spill] sm:$0xff] }
 0xd70   : > { %4585 = vrot.lane.b32.xlu0 %v4564_v33, %s5863_s8  ;;  %v4572_v8 = vpop.permute.xlu0 %4571  ;;  %v2387_v62 = vadd.f32 %v14443_v9, %v2351_v19  ;;  %v10841_v52 = vadd.f32 %v2448_v7, %v2388_v34  ;;  %v2373_v39 = vadd.f32 %v2365_v26, %v10745_v61  ;;  %v2405_v38 = vadd.f32 %v14446_v13, %v2369_v12  ;;  %v14447_v19 = vld [vmem:[#allocation185_spill] sm:$0xff]  ;;  %v14448_v11 = vld [vmem:[#allocation47_spill] sm:$0xff]  ;;  %v14449_v61 = vld [vmem:[#allocation186_spill] sm:$0xff] }
 0xd71   : > { %v4573_v46 = vsel %vm454_vm5, %v4572_v8, %v14444_v23  ;;  %v10847_v45 = vadd.f32 %v2466_v30, %v2406_v6  ;;  %v2445_v58 = vmul.f32 %v10749_v18, %v2435_v63  ;;  %v2442_v43 = vsel %vm307_vm7, %v14447_v19, 0.0  ;;  %v14454_v8 = vld [vmem:[#allocation421_spill] sm:$0xff]  ;;  %v14455_v9 = vld [vmem:[#allocation187_spill] sm:$0xff] }
 0xd72   : > { %v4569_v1 = vpop.permute.xlu1 %4568  ;;  %4591 = vrot.lane.b32.xlu1 %v4573_v46, %s5863_s8  ;;  %v2389_v37 = vadd.f32 %v14448_v11, %v2353_v60  ;;  %v10854_v34 = vadd.f32 %v2450_v59, %v2390_v15  ;;  %v10856_v21 = vadd.f32 %v2468_v54, %v2408_v40  ;;  %v2437_v12 = vsel %vm307_vm7, %v14449_v61, 0.0  ;;  %v14453_v60 = vld [vmem:[#allocation100_spill] sm:$0xff] }
 0xd73   : > { %v4570_v48 = vsel %vm454_vm5, %v4569_v1, %v14445_v17  ;;  %v2407_v33 = vadd.f32 %v14450_v49, %v2371_v56  ;;  %v2463_v26 = vmul.f32 %v10761_v55, %v2435_v63  ;;  %v2391_v30 = vadd.f32 %v14451_v41, %v2355_v3  ;;  %v14460_v41 = vld [vmem:[#allocation53_spill] sm:$0xff] }
 0xd74   : > { %4589 = vrot.lane.b32.xlu0 %v4570_v48, %s5863_s8  ;;  %v4578_v6 = vpop.permute.xlu0 %4577  ;;  %v2452_v59 = vmul.f32 %v10749_v18, %v2442_v43  ;;  %v2470_v54 = vmul.f32 %v10761_v55, %v2442_v43  ;;  %v2409_v56 = vadd.f32 %v14454_v8, %v2373_v39  ;;  %v10874_v63 = vadd.f32 %v2445_v58, %v10787_v22  ;;  %v14456_v39 = vld [vmem:[#allocation198_spill] sm:$0xff]  ;;  %v14457_v43 = vld [vmem:[#allocation199_spill] sm:$0xff] }
 0xd75   : > { %v4579_v15 = vsel %vm454_vm5, %v4578_v6, %v14452_v25  ;;  %v2447_v1 = vmul.f32 %v10749_v18, %v2437_v12  ;;  %v2465_v3 = vmul.f32 %v10761_v55, %v2437_v12  ;;  %v2439_v46 = vsel %vm307_vm7, %v14455_v9, 0.0  ;;  %v14458_v12 = vld [vmem:[#allocation188_spill] sm:$0xff]  ;;  %v14459_v6 = vld [vmem:[#allocation339_spill] sm:$0xff] }
 0xd76   : > { %v4575_v7 = vpop.permute.xlu1 %4574  ;;  %4595 = vrot.lane.b32.xlu1 %v4579_v15, %s5863_s8  ;;  %v10882_v48 = vstv %s10831_s20  ;;  %v10885_v13 = vstv %s10833_s23  ;;  %v2560_v19 = vsel %vm306_vm6, %v14456_v39, 0.0  ;;  %v2562_v22 = vsel %vm306_vm6, %v14457_v43, 0.0  ;;  %v14461_v43 = vld [vmem:[#allocation200_spill] sm:$0xff]  ;;  %s11319_s20 = sld [smem:[#allocation2 + $0x62]]  ;;  %s11361_s23 = sld [smem:[#allocation2 + $0x13]] }
 0xd77   : > { %v4576_v40 = vsel %vm454_vm5, %v4575_v7, %v14453_v60  ;;  %v2471_v61 = vadd.f32 %v2463_v26, %v10790_v36  ;;  %v2441_v49 = vsel %vm307_vm7, %v14458_v12, 0.0  ;;  %v10904_v8 = vadd.f32 %v2470_v54, %v2410_v57 }
 0xd78   : > { %4593 = vrot.lane.b32.xlu0 %v4576_v40, %s5863_s8  ;;  %v10902_v40 = vadd.f32 %v2452_v59, %v10804_v10  ;;  %v2449_v9 = vmul.f32 %v10749_v18, %v2439_v46  ;;  %v2570_v36 = vmul.f32 %v10882_v48, %v2560_v19  ;;  %v2588_v26 = vmul.f32 %v10885_v13, %v2560_v19 }
 0xd79   : > { %v4788_v58 = vpop.permute.xlu0 %4787  ;;  %v2572_v39 = vmul.f32 %v10882_v48, %v2562_v22  ;;  %v10917_v10 = vadd.f32 %v2447_v1, %v2387_v62  ;;  %v10919_v57 = vadd.f32 %v2465_v3, %v2405_v38  ;;  %v2467_v59 = vmul.f32 %v10761_v55, %v2439_v46 }
 0xd7a   : > { %v4581_v11 = vpop.permute.xlu1 %4580  ;;  %v4789_v7 = vsel %vm454_vm5, %v4788_v58, %v14459_v6  ;;  %v2564_v58 = vsel %vm306_vm6, %v14461_v43, 0.0  ;;  %v2451_v54 = vmul.f32 %v10749_v18, %v2441_v49  ;;  %v2469_v19 = vmul.f32 %v10761_v55, %v2441_v49 }
 0xd7b   : > { %v4582_v15 = vsel %vm454_vm5, %v4581_v11, %v14460_v41  ;;  %4811 = vrot.lane.b32.xlu1 %v4789_v7, %s5863_s8  ;;  %v14462_v7 = vld [vmem:[#allocation201_spill] sm:$0xff]  ;;  %v2590_v38 = vmul.f32 %v10885_v13, %v2562_v22  ;;  %v2574_v1 = vmul.f32 %v10882_v48, %v2564_v58  ;;  %v2592_v18 = vmul.f32 %v10885_v13, %v2564_v58 }
 0xd7c   : > { %4597 = vrot.lane.b32.xlu0 %v4582_v15, %s5863_s8  ;;  %v2559_v15 = vsel %vm306_vm6, %v14462_v7, 0.0  ;;  %v10938_v55 = vadd.f32 %v2449_v9, %v2389_v37  ;;  %v2578_v3 = vadd.f32 %v2570_v36, %v10819_v27  ;;  %v2596_v46 = vadd.f32 %v2588_v26, %v10821_v31  ;;  %v14465_v37 = vld [vmem:[#allocation202_spill] sm:$0xff]  ;;  %v14466_v9 = vld [vmem:[#allocation340_spill] sm:$0xff] }
 0xd7d   : > { %v4794_v11 = vpop.permute.xlu0 %4793  ;;  %v2580_v49 = vadd.f32 %v2572_v39, %v10841_v52  ;;  %v10943_v22 = vadd.f32 %v2451_v54, %v2391_v30  ;;  %v2569_v58 = vmul.f32 %v10882_v48, %v2559_v15  ;;  %v10947_v4 = vadd.f32 %v2469_v19, %v2409_v56  ;;  %v14467_v52 = vld [vmem:[#allocation101_spill] sm:$0xff] }
 0xd7e   : > { %v4791_v12 = vpop.permute.xlu1 %4790  ;;  %v4795_v43 = vsel %vm454_vm5, %v4794_v11, %v14463_v20  ;;  %v2475_v11 = vadd.f32 %v2467_v59, %v2407_v33  ;;  %v2566_v27 = vsel %vm306_vm6, %v14465_v37, 0.0  ;;  %v2598_v30 = vadd.f32 %v2590_v38, %v10847_v45  ;;  %v14468_v56 = vld [vmem:[#allocation165_spill] sm:$0xff]  ;;  %v14469_v59 = vld [vmem:[#allocation422_spill] sm:$0xff]  ;;  %v14471_v38 = vld [vmem:[#allocation203_spill] sm:$0xff] }
 0xd7f   : > { %v4792_v62 = vsel %vm454_vm5, %v4791_v12, %v14464_v5  ;;  %4815 = vrot.lane.b32.xlu1 %v4795_v43, %s5863_s8  ;;  %v2587_v12 = vmul.f32 %v10885_v13, %v2559_v15  ;;  %v2582_v36 = vadd.f32 %v2574_v1, %v10854_v34  ;;  %v2600_v26 = vadd.f32 %v2592_v18, %v10856_v21  ;;  %v14470_v15 = vld [vmem:[#allocation166_spill] sm:$0xff] }
 0xd80   : > { %4813 = vrot.lane.b32.xlu0 %v4792_v62, %s5863_s8  ;;  %v2614_v39 = vadd.f32 %v14468_v56, %v2578_v3  ;;  %v2632_v54 = vadd.f32 %v14469_v59, %v2596_v46  ;;  %v10964_v19 = vstv %s10915_s7  ;;  %v2616_v62 = vadd.f32 %v14470_v15, %v2580_v49  ;;  %v14472_v3 = vld [vmem:[#allocation205_spill] sm:$0xff]  ;;  %v14473_v37 = vld [vmem:[#allocation274_spill] sm:$0xff]  ;;  %v14476_v56 = vld [vmem:[#allocation424_spill] sm:$0xff]  ;;  %s11363_s7 = sld [smem:[#allocation2 + $0x49]] }
 0xd81   : > { %v4800_v7 = vpop.permute.xlu0 %4799  ;;  %v2595_v45 = vadd.f32 %v2587_v12, %v2471_v61  ;;  %v2576_v34 = vmul.f32 %v10882_v48, %v2566_v27  ;;  %v2561_v21 = vsel %vm306_vm6, %v14471_v38, 0.0  ;;  %v2563_v46 = vsel %vm306_vm6, %v14472_v3, 0.0  ;;  %v14477_v38 = vld [vmem:[#allocation204_spill] sm:$0xff] }
 0xd82   : > { %v4797_v43 = vpop.permute.xlu1 %4796  ;;  %v4801_v31 = vsel %vm454_vm5, %v4800_v7, %v14466_v9  ;;  %v2577_v7 = vadd.f32 %v2569_v58, %v10874_v63  ;;  %v10981_v61 = vstv %s10934_s25  ;;  %v14474_v58 = vld [vmem:[#allocation423_spill] sm:$0xff]  ;;  %v2636_v59 = vadd.f32 %v14476_v56, %v2600_v26  ;;  %v14483_v9 = vld [vmem:[#allocation208_spill] sm:$0xff]  ;;  %s11377_s25 = sld [smem:[#allocation2 + $0x16]] }
 0xd83   : > { %v4798_v33 = vsel %vm454_vm5, %v4797_v43, %v14467_v52  ;;  %4819 = vrot.lane.b32.xlu1 %v4801_v31, %s5863_s8  ;;  %v2594_v43 = vmul.f32 %v10885_v13, %v2566_v27  ;;  %v2634_v12 = vadd.f32 %v14474_v58, %v2598_v30  ;;  %v14475_v31 = vld [vmem:[#allocation167_spill] sm:$0xff]  ;;  %v2571_v27 = vmul.f32 %v10882_v48, %v2561_v21 }
 0xd84   : > { %4817 = vrot.lane.b32.xlu0 %v4798_v33, %s5863_s8  ;;  %v2618_v33 = vadd.f32 %v14475_v31, %v2582_v36  ;;  %v2589_v15 = vmul.f32 %v10885_v13, %v2561_v21  ;;  %v2584_v36 = vadd.f32 %v2576_v34, %v10902_v40  ;;  %v2573_v26 = vmul.f32 %v10882_v48, %v2563_v46  ;;  %v14480_v31 = vld [vmem:[#allocation168_spill] sm:$0xff]  ;;  %v14485_v52 = vld [vmem:[#allocation99_spill] sm:$0xff] }
 0xd85   : > { %v4806_v1 = vpop.permute.xlu0 %4805  ;;  %v2591_v3 = vmul.f32 %v10885_v13, %v2563_v46  ;;  %v2602_v21 = vadd.f32 %v2594_v43, %v10904_v8  ;;  %v2613_v56 = vadd.f32 %v14480_v31, %v2577_v7  ;;  %v2579_v8 = vadd.f32 %v2571_v27, %v10917_v10 }
 0xd86   : > { %v4803_v18 = vpop.permute.xlu1 %4802  ;;  %v4807_v49 = vsel %vm454_vm5, %v4806_v1, %v10242_v29  ;;  %v2664_v1 = vsel %vm307_vm7, %v14477_v38, 0.0  ;;  %v14481_v38 = vld [vmem:[#allocation425_spill] sm:$0xff]  ;;  %v2597_v7 = vadd.f32 %v2589_v15, %v10919_v57  ;;  %v14488_v15 = vld [vmem:[#allocation210_spill] sm:$0xff] }
 0xd87   : > { %v4804_v63 = vsel %vm454_vm5, %v4803_v18, %v14473_v37  ;;  %4823 = vrot.lane.b32.xlu1 %v4807_v49, %s5863_s8  ;;  %v14478_v18 = vld [vmem:[#allocation207_spill] sm:$0xff]  ;;  %v14479_v49 = vld [vmem:[#allocation206_spill] sm:$0xff]  ;;  %v2631_v29 = vadd.f32 %v14481_v38, %v2595_v45  ;;  %v14482_v37 = vld [vmem:[#allocation257_spill] sm:$0xff]  ;;  %v2674_v40 = vmul.f32 %v10964_v19, %v2664_v1  ;;  %v2692_v45 = vmul.f32 %v10981_v61, %v2664_v1 }
 0xd88   : > { %4821 = vrot.lane.b32.xlu0 %v4804_v63, %s5863_s8  ;;  %v2565_v30 = vsel %vm306_vm6, %v14478_v18, 0.0  ;;  %v2666_v63 = vsel %vm307_vm7, %v14479_v49, 0.0  ;;  %v2668_v49 = vsel %vm307_vm7, %v14483_v9, 0.0  ;;  %v14487_v57 = vld [vmem:[#allocation209_spill] sm:$0xff]  ;;  %v2670_v1 = vsel %vm307_vm7, %v14488_v15, 0.0 }
 0xd89   : > { %v2575_v34 = vmul.f32 %v10882_v48, %v2565_v30  ;;  %v2593_v46 = vmul.f32 %v10885_v13, %v2565_v30  ;;  %v2676_v43 = vmul.f32 %v10964_v19, %v2666_v63  ;;  %v2581_v48 = vadd.f32 %v2573_v26, %v10938_v55  ;;  %v14489_v26 = vld [vmem:[#allocation426_spill] sm:$0xff] }
 0xd8a   : > { %v4809_v58 = vpop.permute.xlu1 %4808  ;;  %v2599_v13 = vadd.f32 %v2591_v3, %v2475_v11  ;;  %v2694_v9 = vmul.f32 %v10981_v61, %v2666_v63  ;;  %v2696_v10 = vmul.f32 %v10981_v61, %v2668_v49  ;;  %v2663_v27 = vsel %vm307_vm7, %v14487_v57, 0.0 }
 0xd8b   : > { %v4810_v18 = vsel %vm454_vm5, %v4809_v58, %v14482_v37  ;;  %4207 = vrot.lane.b32.xlu1 %v14485_v52, %s14484_s10  ;;  %v14486_v52 = vld [vmem:[#allocation169_spill] sm:$0xff]  ;;  %v2678_v58 = vmul.f32 %v10964_v19, %v2668_v49  ;;  %v2682_v31 = vadd.f32 %v2674_v40, %v2614_v39  ;;  %v2583_v55 = vadd.f32 %v2575_v34, %v10943_v22  ;;  %v14493_v37 = vld [vmem:[#allocation98_spill] sm:$0xff] }
 0xd8c   : > { %4825 = vrot.lane.b32.xlu0 %v4810_v18, %s5863_s8  ;;  %v2620_v30 = vadd.f32 %v14486_v52, %v2584_v36  ;;  %v2601_v11 = vadd.f32 %v2593_v46, %v10947_v4  ;;  %v2638_v3 = vadd.f32 %v14489_v26, %v2602_v21  ;;  %v14490_v36 = vld [vmem:[#allocation334_spill] sm:$0xff]  ;;  %v2700_v63 = vadd.f32 %v2692_v45, %v2632_v54  ;;  %v14492_v52 = vld [vmem:[#allocation427_spill] sm:$0xff]  ;;  %v14495_v46 = vld [vmem:[#allocation428_spill] sm:$0xff]  ;;  %s11074_s8 = sld [smem:[#allocation2 + $0x26]] }
 0xd8d   : > { %v2684_v38 = vadd.f32 %v2676_v43, %v2616_v62  ;;  %v14491_v18 = vld [vmem:[#allocation170_spill] sm:$0xff]  ;;  %v2633_v57 = vadd.f32 %v14492_v52, %v2597_v7  ;;  %v2702_v39 = vadd.f32 %v2694_v9, %v2634_v12  ;;  %v2673_v22 = vmul.f32 %v10964_v19, %v2663_v27  ;;  %v14494_v54 = vld [vmem:[#allocation171_spill] sm:$0xff]  ;;  %v14497_v43 = vld [vmem:[#allocation172_spill] sm:$0xff] }
 0xd8e   : > { %v2615_v49 = vadd.f32 %v14491_v18, %v2579_v8  ;;  %v2691_v4 = vmul.f32 %v10981_v61, %v2663_v27  ;;  %v2680_v21 = vmul.f32 %v10964_v19, %v2670_v1  ;;  %v2686_v40 = vadd.f32 %v2678_v58, %v2618_v33  ;;  %v14496_v45 = vld [vmem:[#allocation211_spill] sm:$0xff]  ;;  %v14498_v9 = vld [vmem:[#allocation429_spill] sm:$0xff]  ;;  %v14499_v27 = vld [vmem:[#allocation58_spill] sm:$0xff] }
 0xd8f   : > { %4211 = vrot.lane.b32.xlu1 %v14490_v36, %s14484_s10  ;;  %v2704_v34 = vadd.f32 %v2696_v10, %v2636_v59  ;;  %v2617_v62 = vadd.f32 %v14494_v54, %v2581_v48  ;;  %v2635_v8 = vadd.f32 %v14495_v46, %v2599_v13  ;;  %v2698_v7 = vmul.f32 %v10981_v61, %v2670_v1  ;;  %v14500_v26 = vld [vmem:[#allocation212_spill] sm:$0xff]  ;;  %v14501_v13 = vld [vmem:[#allocation214_spill] sm:$0xff]  ;;  %v14503_v36 = vld [vmem:[#allocation215_spill] sm:$0xff] }
 0xd90   : > { %4209 = vrot.lane.b32.xlu0 %v14493_v37, %s14484_s10  ;;  %v2665_v37 = vsel %vm307_vm7, %v14496_v45, 0.0  ;;  %v2619_v12 = vadd.f32 %v14497_v43, %v2583_v55  ;;  %v2637_v15 = vadd.f32 %v14498_v9, %v2601_v11  ;;  %v2667_v33 = vsel %vm307_vm7, %v14500_v26, 0.0  ;;  %v14502_v10 = vld [vmem:[#allocation254_spill] sm:$0xff]  ;;  %v14504_v46 = vld [vmem:[#allocation213_spill] sm:$0xff]  ;;  %v14505_v43 = vld [vmem:[#allocation216_spill] sm:$0xff] }
 0xd91   : > { %v11061_v59 = vstv %s11020_s9  ;;  %v11064_v48 = vstv %s11022_s6  ;;  %v2844_v58 = vsel %vm306_vm6, %v14501_v13, 0.0  ;;  %v2681_v1 = vadd.f32 %v2673_v22, %v2613_v56  ;;  %v14507_v13 = vld [vmem:[#allocation341_spill] sm:$0xff]  ;;  %s11384_s9 = sld [smem:[#allocation2 + $0x4c]]  ;;  %s11386_s6 = sld [smem:[#allocation2 + $0x19]] }
 0xd92   : > { %v2699_v55 = vadd.f32 %v2691_v4, %v2631_v29  ;;  %v2688_v11 = vadd.f32 %v2680_v21, %v2620_v30  ;;  %v2846_v18 = vsel %vm306_vm6, %v14503_v36, 0.0  ;;  %v2675_v52 = vmul.f32 %v10964_v19, %v2665_v37  ;;  %v14506_v4 = vld [vmem:[#allocation217_spill] sm:$0xff] }
 0xd93   : > { %4215 = vrot.lane.b32.xlu1 %v14499_v27, %s14484_s10  ;;  %v2693_v54 = vmul.f32 %v10981_v61, %v2665_v37  ;;  %v2669_v45 = vsel %vm307_vm7, %v14504_v46, 0.0  ;;  %v2848_v56 = vsel %vm306_vm6, %v14505_v43, 0.0  ;;  %v2677_v29 = vmul.f32 %v10964_v19, %v2667_v33  ;;  %v14508_v46 = vld [vmem:[#allocation218_spill] sm:$0xff] }
 0xd94   : > { %4213 = vrot.lane.b32.xlu0 %v14502_v10, %s14484_s10  ;;  %v2854_v30 = vmul.f32 %v11061_v59, %v2844_v58  ;;  %v2872_v22 = vmul.f32 %v11064_v48, %v2844_v58  ;;  %v2843_v21 = vsel %vm306_vm6, %v14506_v4, 0.0  ;;  %v2706_v37 = vadd.f32 %v2698_v7, %v2638_v3 }
 0xd95   : > { %v2695_v9 = vmul.f32 %v10981_v61, %v2667_v33  ;;  %v2856_v27 = vmul.f32 %v11061_v59, %v2846_v18  ;;  %v2874_v26 = vmul.f32 %v11064_v48, %v2846_v18  ;;  %v2679_v58 = vmul.f32 %v10964_v19, %v2669_v45 }
 0xd96   : > { %v2697_v10 = vmul.f32 %v10981_v61, %v2669_v45  ;;  %v2858_v36 = vmul.f32 %v11061_v59, %v2848_v56  ;;  %v2683_v3 = vadd.f32 %v2675_v52, %v2615_v49  ;;  %v2701_v7 = vadd.f32 %v2693_v54, %v2633_v57 }
 0xd97   : > { %4219 = vrot.lane.b32.xlu1 %v10356_v2, %s14484_s10  ;;  %v2850_v2 = vsel %vm306_vm6, %v14508_v46, 0.0  ;;  %v2876_v33 = vmul.f32 %v11064_v48, %v2848_v56  ;;  %v2853_v18 = vmul.f32 %v11061_v59, %v2843_v21  ;;  %v2685_v43 = vadd.f32 %v2677_v29, %v2617_v62 }
 0xd98   : > { %4217 = vrot.lane.b32.xlu0 %v14507_v13, %s14484_s10  ;;  %v2862_v4 = vadd.f32 %v2854_v30, %v2682_v31  ;;  %v2880_v13 = vadd.f32 %v2872_v22, %v2700_v63  ;;  %v2871_v19 = vmul.f32 %v11064_v48, %v2843_v21  ;;  %v2703_v20 = vadd.f32 %v2695_v9, %v2635_v8  ;;  %v14509_v63 = vld [vmem:[#allocation219_spill] sm:$0xff]  ;;  %v14511_v30 = vld [vmem:[#allocation432_spill] sm:$0xff] }
 0xd99   : > { %v2864_v61 = vadd.f32 %v2856_v27, %v2684_v38  ;;  %v2882_v45 = vadd.f32 %v2874_v26, %v2702_v39  ;;  %v2860_v5 = vmul.f32 %v11061_v59, %v2850_v2  ;;  %v2687_v49 = vadd.f32 %v2679_v58, %v2619_v12  ;;  %v14510_v39 = vld [vmem:[#allocation430_spill] sm:$0xff]  ;;  %v14512_v12 = vld [vmem:[#allocation221_spill] sm:$0xff] }
 0xd9a   : > { %v2705_v57 = vadd.f32 %v2697_v10, %v2637_v15  ;;  %v2866_v52 = vadd.f32 %v2858_v36, %v2686_v40  ;;  %v11112_v54 = vstv %s11074_s8  ;;  %v2884_v56 = vadd.f32 %v2876_v33, %v2704_v34  ;;  %v14513_v34 = vld [vmem:[#allocation431_spill] sm:$0xff]  ;;  %v14517_v36 = vld [vmem:[#allocation192_spill] sm:$0xff]  ;;  %s11408_s8 = sld [smem:[#allocation2 + $0x4f]] }
 0xd9b   : > { %v2861_v62 = vadd.f32 %v2853_v18, %v2681_v1  ;;  %v2878_v31 = vmul.f32 %v11064_v48, %v2850_v2  ;;  %v2845_v8 = vsel %vm306_vm6, %v14509_v63, 0.0  ;;  %v2879_v38 = vadd.f32 %v2871_v19, %v2699_v55  ;;  %v14514_v1 = vld [vmem:[#allocation433_spill] sm:$0xff]  ;;  %v14515_v55 = vld [vmem:[#allocation220_spill] sm:$0xff]  ;;  %v14516_v10 = vld [vmem:[#allocation223_spill] sm:$0xff] }
 0xd9c   : > { %4221 = vrot.lane.b32.xlu0 %v10352_v16, %s14484_s10  ;;  %v2898_v29 = vadd.f32 %v14510_v39, %v2862_v4  ;;  %v2916_v22 = vadd.f32 %v14511_v30, %v2880_v13  ;;  %v11121_v21 = vstv %s11090_s30  ;;  %v2868_v16 = vadd.f32 %v2860_v5, %v2688_v11  ;;  %v14518_v2 = vld [vmem:[#allocation434_spill] sm:$0xff]  ;;  %v14519_v18 = vld [vmem:[#allocation193_spill] sm:$0xff]  ;;  %v14521_v63 = vld [vmem:[#allocation435_spill] sm:$0xff]  ;;  %s11429_s30 = sld [smem:[#allocation2 + $0x12]] }
 0xd9d   : > { %v2847_v40 = vsel %vm306_vm6, %v14512_v12, 0.0  ;;  %v2900_v15 = vadd.f32 %v14513_v34, %v2864_v61  ;;  %v2918_v9 = vadd.f32 %v14514_v1, %v2882_v45  ;;  %v2855_v27 = vmul.f32 %v11061_v59, %v2845_v8  ;;  %v14520_v61 = vld [vmem:[#allocation222_spill] sm:$0xff] }
 0xd9e   : > { %v2873_v26 = vmul.f32 %v11064_v48, %v2845_v8  ;;  %v2948_v58 = vsel %vm307_vm7, %v14515_v55, 0.0  ;;  %v2849_v5 = vsel %vm306_vm6, %v14516_v10, 0.0  ;;  %v2886_v11 = vadd.f32 %v2878_v31, %v2706_v37  ;;  %v14522_v31 = vld [vmem:[#allocation224_spill] sm:$0xff]  ;;  %v14525_v55 = vld [vmem:[#allocation225_spill] sm:$0xff] }
 0xd9f   : > { %v2902_v46 = vadd.f32 %v14517_v36, %v2866_v52  ;;  %v2920_v33 = vadd.f32 %v14518_v2, %v2884_v56  ;;  %v2897_v4 = vadd.f32 %v14519_v18, %v2861_v62  ;;  %v2857_v13 = vmul.f32 %v11061_v59, %v2847_v40 }
 0xda0   : > { %v2875_v19 = vmul.f32 %v11064_v48, %v2847_v40  ;;  %v2950_v45 = vsel %vm307_vm7, %v14520_v61, 0.0  ;;  %v2915_v8 = vadd.f32 %v14521_v63, %v2879_v38  ;;  %v2958_v39 = vmul.f32 %v11112_v54, %v2948_v58  ;;  %v14524_v40 = vld [vmem:[#allocation194_spill] sm:$0xff] }
 0xda1   : > { %v2859_v37 = vmul.f32 %v11061_v59, %v2849_v5  ;;  %v2877_v52 = vmul.f32 %v11064_v48, %v2849_v5  ;;  %v2952_v56 = vsel %vm307_vm7, %v14522_v31, 0.0  ;;  %v2863_v62 = vadd.f32 %v2855_v27, %v2683_v3  ;;  %v14526_v48 = vld [vmem:[#allocation226_spill] sm:$0xff]  ;;  %v14527_v27 = vld [vmem:[#allocation436_spill] sm:$0xff] }
 0xda2   : > { %v11151_v30 = vadd.f32 %v2873_v26, %v2701_v7  ;;  %v2976_v12 = vmul.f32 %v11121_v21, %v2948_v58  ;;  %v2904_v34 = vadd.f32 %v14524_v40, %v2868_v16  ;;  %v2960_v1 = vmul.f32 %v11112_v54, %v2950_v45  ;;  %v14535_v40 = vld [vmem:[#allocation229_spill] sm:$0xff] }
 0xda3   : > { %v2978_v38 = vmul.f32 %v11121_v21, %v2950_v45  ;;  %v2947_v59 = vsel %vm307_vm7, %v14525_v55, 0.0  ;;  %v2954_v10 = vsel %vm307_vm7, %v14526_v48, 0.0  ;;  %v2865_v5 = vadd.f32 %v2857_v13, %v2685_v43  ;;  %v14528_v45 = vld [vmem:[#allocation195_spill] sm:$0xff] }
 0xda4   : > { %14523 = vst [vmem:[#allocation62_spill] sm:$0xff] %v11151_v30  ;;  %v2883_v3 = vadd.f32 %v2875_v19, %v2703_v20  ;;  %v2962_v7 = vmul.f32 %v11112_v54, %v2952_v56  ;;  %v2922_v26 = vadd.f32 %v14527_v27, %v2886_v11  ;;  %v2966_v16 = vadd.f32 %v2958_v39, %v2898_v29  ;;  %v14531_v39 = vld [vmem:[#allocation438_spill] sm:$0xff]  ;;  %v14538_v55 = vld [vmem:[#allocation227_spill] sm:$0xff]  ;;  %v14542_v27 = vld [vmem:[#allocation240_spill] sm:$0xff] }
 0xda5   : > { %v2867_v58 = vadd.f32 %v2859_v37, %v2687_v49  ;;  %v2885_v36 = vadd.f32 %v2877_v52, %v2705_v57  ;;  %v2980_v2 = vmul.f32 %v11121_v21, %v2952_v56  ;;  %v11170_v18 = vadd.f32 %v2976_v12, %v2916_v22  ;;  %v14530_v57 = vld [vmem:[#allocation196_spill] sm:$0xff]  ;;  %v14533_v56 = vld [vmem:[#allocation197_spill] sm:$0xff] }
 0xda6   : > { %v2957_v61 = vmul.f32 %v11112_v54, %v2947_v59  ;;  %v2975_v43 = vmul.f32 %v11121_v21, %v2947_v59  ;;  %v2964_v20 = vmul.f32 %v11112_v54, %v2954_v10  ;;  %v2968_v13 = vadd.f32 %v2960_v1, %v2900_v15  ;;  %v14532_v22 = vld [vmem:[#allocation228_spill] sm:$0xff]  ;;  %v14534_v15 = vld [vmem:[#allocation439_spill] sm:$0xff] }
 0xda7   : > { %v2986_v19 = vadd.f32 %v2978_v38, %v2918_v9  ;;  %v2982_v11 = vmul.f32 %v11121_v21, %v2954_v10  ;;  %v11177_v29 = vadd.f32 %v14528_v45, %v2863_v62  ;;  %v2970_v49 = vadd.f32 %v2962_v7, %v2902_v46 }
 0xda8   : > { %v2901_v63 = vadd.f32 %v14530_v57, %v2865_v5  ;;  %v2919_v37 = vadd.f32 %v14531_v39, %v2883_v3  ;;  %v2951_v52 = vsel %vm307_vm7, %v14532_v22, 0.0  ;;  %v2988_v31 = vadd.f32 %v2980_v2, %v2920_v33  ;;  %v14539_v5 = vld [vmem:[#allocation239_spill] sm:$0xff]  ;;  %v14547_v57 = vld [vmem:[#allocation245_spill] sm:$0xff] }
 0xda9   : > { %14529 = vst [vmem:[#allocation69_spill] sm:$0xff] %v11177_v29  ;;  %v2903_v12 = vadd.f32 %v14533_v56, %v2867_v58  ;;  %v2921_v9 = vadd.f32 %v14534_v15, %v2885_v36  ;;  %v2953_v62 = vsel %vm307_vm7, %v14535_v40, 0.0  ;;  %v11191_v46 = vadd.f32 %v2957_v61, %v2897_v4  ;;  %v14545_v61 = vld [vmem:[#allocation242_spill] sm:$0xff] }
 0xdaa   : > { %v11193_v1 = vadd.f32 %v2975_v43, %v2915_v8  ;;  %v2972_v38 = vadd.f32 %v2964_v20, %v2904_v34  ;;  %v2949_v33 = vsel %vm307_vm7, %v14538_v55, 0.0  ;;  %v2990_v59 = vadd.f32 %v2982_v11, %v2922_v26  ;;  %v14541_v34 = vld [vmem:[#allocation238_spill] sm:$0xff] }
 0xdab   : > { %14536 = vst [vmem:[#allocation70_spill] sm:$0xff] %v11191_v46  ;;  %v2961_v48 = vmul.f32 %v11112_v54, %v2951_v52  ;;  %v2979_v10 = vmul.f32 %v11121_v21, %v2951_v52  ;;  %v3074_v3 = vsel %vm306_vm6, %v14539_v5, 0.0  ;;  %v2963_v4 = vmul.f32 %v11112_v54, %v2953_v62  ;;  %v14618_v46 = vld [vmem:[#allocation285_spill] sm:$0xff] }
 0xdac   : > { %14537 = vst [vmem:[#allocation255_spill] sm:$0xff] %v11193_v1  ;;  %v11207_v8 = vstv %s11165_s11  ;;  %v3072_v7 = vsel %vm306_vm6, %v14541_v34, 0.0  ;;  %v3076_v26 = vsel %vm306_vm6, %v14542_v27, 0.0  ;;  %v11216_v58 = vmul.f32 %v11112_v54, %v2949_v33  ;;  %v14551_v27 = vld [vmem:[#allocation241_spill] sm:$0xff]  ;;  %v14576_v1 = vld [vmem:[#allocation448_spill] sm:$0xff]  ;;  %s11452_s11 = sld [smem:[#allocation2 + $0x48]] }
 0xdad   : > { %14540 = vst [vmem:[#allocation31_spill] sm:$0xff] %v11207_v8  ;;  %v2981_v36 = vmul.f32 %v11121_v21, %v2953_v62  ;;  %v11220_v2 = vstv %s11168_s29  ;;  %v3078_v43 = vsel %vm306_vm6, %v14545_v61, 0.0  ;;  %v11226_v20 = vmul.f32 %v11121_v21, %v2949_v33  ;;  %s11534_s29 = sld [smem:[#allocation2 + $0x14]] }
 0xdae   : > { %14543 = vst [vmem:[#allocation104_spill] sm:$0xff] %v11216_v58  ;;  %14544 = vst [vmem:[#allocation343_spill] sm:$0xff] %v11220_v2  ;;  %v3084_v11 = vmul.f32 %v11207_v8, %v3074_v3  ;;  %v3102_v45 = vmul.f32 %v11220_v2, %v3074_v3  ;;  %v3075_v54 = vsel %vm306_vm6, %v14547_v57, 0.0  ;;  %v2969_v39 = vadd.f32 %v2961_v48, %v2901_v63  ;;  %v14549_v3 = vld [vmem:[#allocation246_spill] sm:$0xff]  ;;  %v14558_v57 = vld [vmem:[#allocation441_spill] sm:$0xff] }
 0xdaf   : > { %14546 = vst [vmem:[#allocation344_spill] sm:$0xff] %v11226_v20  ;;  %v2987_v22 = vadd.f32 %v2979_v10, %v2919_v37  ;;  %v3082_v52 = vmul.f32 %v11207_v8, %v3072_v7  ;;  %v3086_v56 = vmul.f32 %v11207_v8, %v3076_v26  ;;  %v2971_v15 = vadd.f32 %v2963_v4, %v2903_v12 }
 0xdb0   : > { %v3104_v40 = vmul.f32 %v11220_v2, %v3076_v26  ;;  %v3088_v21 = vmul.f32 %v11207_v8, %v3078_v43  ;;  %v3106_v62 = vmul.f32 %v11220_v2, %v3078_v43  ;;  %v2989_v55 = vadd.f32 %v2981_v36, %v2921_v9 }
 0xdb1   : > { %v11239_v33 = vstv %s11189_s13  ;;  %v3085_v5 = vmul.f32 %v11207_v8, %v3075_v54  ;;  %v3103_v63 = vmul.f32 %v11220_v2, %v3075_v54  ;;  %v3100_v37 = vmul.f32 %v11220_v2, %v3072_v7  ;;  %v14554_v7 = vld [vmem:[#allocation247_spill] sm:$0xff]  ;;  %s11555_s13 = sld [smem:[#allocation2 + $0x4a]] }
 0xdb2   : > { %14548 = vst [vmem:[#allocation105_spill] sm:$0xff] %v11239_v33  ;;  %v3092_v48 = vadd.f32 %v3084_v11, %v2968_v13  ;;  %v3110_v10 = vadd.f32 %v3102_v45, %v2986_v19  ;;  %v3178_v12 = vsel %vm307_vm7, %v14549_v3, 0.0  ;;  %v11247_v4 = vadd.f32 %v3082_v52, %v2966_v16 }
 0xdb3   : > { %v3094_v34 = vadd.f32 %v3086_v56, %v2970_v49  ;;  %v11252_v9 = vsel %vm306_vm6, %v14551_v27, 0.0  ;;  %v11255_v26 = vstv %s11203_s26  ;;  %v3112_v36 = vadd.f32 %v3104_v40, %v2988_v31  ;;  %v14560_v40 = vld [vmem:[#allocation248_spill] sm:$0xff]  ;;  %s11673_s26 = sld [smem:[#allocation2 + $0x15]] }
 0xdb4   : > { %14550 = vst [vmem:[#allocation256_spill] sm:$0xff] %v11247_v4  ;;  %14552 = vst [vmem:[#allocation49_spill] sm:$0xff] %v11252_v9  ;;  %v3096_v61 = vadd.f32 %v3088_v21, %v2972_v38  ;;  %v3114_v43 = vadd.f32 %v3106_v62, %v2990_v59  ;;  %v3077_v13 = vsel %vm306_vm6, %v14554_v7, 0.0  ;;  %v3093_v16 = vadd.f32 %v3085_v5, %v2969_v39  ;;  %v14557_v38 = vld [vmem:[#allocation189_spill] sm:$0xff]  ;;  %v14562_v5 = vld [vmem:[#allocation20_spill] sm:$0xff] }
 0xdb5   : > { %14553 = vst [vmem:[#allocation73_spill] sm:$0xff] %v11255_v26  ;;  %v3111_v19 = vadd.f32 %v3103_v63, %v2987_v22  ;;  %v3188_v49 = vmul.f32 %v11239_v33, %v3178_v12  ;;  %v3206_v11 = vmul.f32 %v11255_v26, %v3178_v12  ;;  %v11267_v45 = vadd.f32 %v3100_v37, %v11170_v18  ;;  %v14559_v22 = vld [vmem:[#allocation190_spill] sm:$0xff]  ;;  %v14563_v37 = vld [vmem:[#allocation444_spill] sm:$0xff]  ;;  %v14565_v7 = vld [vmem:[#allocation19_spill] sm:$0xff] }
 0xdb6   : > { %v11271_v31 = vmul.f32 %v11207_v8, %v11252_v9  ;;  %v3128_v59 = vadd.f32 %v14557_v38, %v3092_v48  ;;  %v3146_v54 = vadd.f32 %v14558_v57, %v3110_v10  ;;  %v3087_v52 = vmul.f32 %v11207_v8, %v3077_v13  ;;  %v14561_v18 = vld [vmem:[#allocation442_spill] sm:$0xff]  ;;  %v14620_v9 = vld [vmem:[#allocation295_spill] sm:$0xff] }
 0xdb7   : > { %14555 = vst [vmem:[#allocation74_spill] sm:$0xff] %v11267_v45  ;;  %v3105_v39 = vmul.f32 %v11220_v2, %v3077_v13  ;;  %v3130_v56 = vadd.f32 %v14559_v22, %v3094_v34  ;;  %v3180_v21 = vsel %vm307_vm7, %v14560_v40, 0.0  ;;  %v3148_v62 = vadd.f32 %v14561_v18, %v3112_v36  ;;  %v14564_v48 = vld [vmem:[#allocation250_spill] sm:$0xff]  ;;  %v14566_v13 = vld [vmem:[#allocation447_spill] sm:$0xff]  ;;  %v14567_v22 = vld [vmem:[#allocation252_spill] sm:$0xff] }
 0xdb8   : > { %14556 = vst [vmem:[#allocation106_spill] sm:$0xff] %v11271_v31  ;;  %v3132_v63 = vadd.f32 %v14562_v5, %v3096_v61  ;;  %v3150_v3 = vadd.f32 %v14563_v37, %v3114_v43  ;;  %v3182_v10 = vsel %vm307_vm7, %v14564_v48, 0.0  ;;  %v3196_v12 = vadd.f32 %v3188_v49, %v3128_v59  ;;  %v14568_v43 = vld [vmem:[#allocation259_spill] sm:$0xff] }
 0xdb9   : > { %v3214_v27 = vadd.f32 %v3206_v11, %v3146_v54  ;;  %v3129_v34 = vadd.f32 %v14565_v7, %v3093_v16  ;;  %v3147_v38 = vadd.f32 %v14566_v13, %v3111_v19  ;;  %v3190_v57 = vmul.f32 %v11239_v33, %v3180_v21  ;;  %v14569_v11 = vld [vmem:[#allocation253_spill] sm:$0xff] }
 0xdba   : > { %v3208_v36 = vmul.f32 %v11255_v26, %v3180_v21  ;;  %v3179_v61 = vsel %vm307_vm7, %v14567_v22, 0.0  ;;  %v3302_v40 = vsel %vm306_vm6, %v14568_v43, 0.0  ;;  %v3095_v18 = vadd.f32 %v3087_v52, %v2971_v15  ;;  %v14572_v21 = vld [vmem:[#allocation261_spill] sm:$0xff]  ;;  %v11323_v43 = vpop.permute.xlu0 %4109 }
 0xdbb   : > { %v3113_v5 = vadd.f32 %v3105_v39, %v2989_v55  ;;  %v3192_v49 = vmul.f32 %v11239_v33, %v3182_v10  ;;  %v3181_v16 = vsel %vm307_vm7, %v14569_v11, 0.0  ;;  %v3210_v19 = vmul.f32 %v11255_v26, %v3182_v10  ;;  %v14573_v39 = vld [vmem:[#allocation263_spill] sm:$0xff]  ;;  %14574 = vst [vmem:[#allocation345_spill] sm:$0xff] %v11323_v43 }
 0xdbc   : > { %v11303_v59 = vstv %s11260_s22  ;;  %v11306_v54 = vstv %s11262_s12  ;;  %v3304_v37 = vsel %vm306_vm6, %v14572_v21, 0.0  ;;  %v3189_v15 = vmul.f32 %v11239_v33, %v3179_v61  ;;  %v14575_v11 = vld [vmem:[#allocation191_spill] sm:$0xff]  ;;  %s11675_s22 = sld [smem:[#allocation2 + $0x4b]]  ;;  %s11733_s12 = sld [smem:[#allocation2 + $0x17]] }
 0xdbd   : > { %14570 = vst [vmem:[#allocation107_spill] sm:$0xff] %v11303_v59  ;;  %14571 = vst [vmem:[#allocation38_spill] sm:$0xff] %v11306_v54  ;;  %v3312_v55 = vmul.f32 %v11303_v59, %v3302_v40  ;;  %v3330_v52 = vmul.f32 %v11306_v54, %v3302_v40  ;;  %v3306_v48 = vsel %vm306_vm6, %v14573_v39, 0.0  ;;  %v3198_v10 = vadd.f32 %v3190_v57, %v3130_v56 }
 0xdbe   : > { %v3216_v7 = vadd.f32 %v3208_v36, %v3148_v62  ;;  %v3207_v13 = vmul.f32 %v11255_v26, %v3179_v61  ;;  %v3191_v22 = vmul.f32 %v11239_v33, %v3181_v16  ;;  %v3131_v21 = vadd.f32 %v14575_v11, %v3095_v18  ;;  %v11331_v62 = vpop.permute.xlu1 %4111  ;;  %v14578_v18 = vld [vmem:[#allocation264_spill] sm:$0xff] }
 0xdbf   : > { %v3209_v45 = vmul.f32 %v11255_v26, %v3181_v16  ;;  %v3314_v40 = vmul.f32 %v11303_v59, %v3304_v37  ;;  %v3332_v4 = vmul.f32 %v11306_v54, %v3304_v37  ;;  %v3200_v20 = vadd.f32 %v3192_v49, %v3132_v63  ;;  %14577 = vst [vmem:[#allocation39_spill] sm:$0xff] %v11331_v62  ;;  %v14580_v37 = vld [vmem:[#allocation267_spill] sm:$0xff]  ;;  %v14630_v62 = vld [vmem:[#allocation298_spill] sm:$0xff] }
 0xdc0   : > { %v3218_v39 = vadd.f32 %v3210_v19, %v3150_v3  ;;  %v3149_v58 = vadd.f32 %v14576_v1, %v3113_v5  ;;  %v3316_v56 = vmul.f32 %v11303_v59, %v3306_v48  ;;  %v3197_v57 = vadd.f32 %v3189_v15, %v3129_v34  ;;  %v14579_v3 = vld [vmem:[#allocation266_spill] sm:$0xff] }
 0xdc1   : > { %v3320_v36 = vadd.f32 %v3312_v55, %v3196_v12  ;;  %v3338_v61 = vadd.f32 %v3330_v52, %v3214_v27  ;;  %v3303_v16 = vsel %vm306_vm6, %v14578_v18, 0.0  ;;  %v3215_v11 = vadd.f32 %v3207_v13, %v3147_v38  ;;  %v11348_v55 = vpop.permute.xlu0 %4113  ;;  %v14589_v18 = vld [vmem:[#allocation451_spill] sm:$0xff] }
 0xdc2   : > { %v3199_v26 = vadd.f32 %v3191_v22, %v3131_v21  ;;  %v3334_v63 = vmul.f32 %v11306_v54, %v3306_v48  ;;  %v3305_v1 = vsel %vm306_vm6, %v14579_v3, 0.0  ;;  %v3217_v5 = vadd.f32 %v3209_v45, %v3149_v58  ;;  %14582 = vst [vmem:[#allocation346_spill] sm:$0xff] %v11348_v55  ;;  %v14584_v48 = vld [vmem:[#allocation231_spill] sm:$0xff]  ;;  %v14585_v58 = vld [vmem:[#allocation450_spill] sm:$0xff]  ;;  %v14586_v22 = vld [vmem:[#allocation269_spill] sm:$0xff] }
 0xdc3   : > { %v3322_v49 = vadd.f32 %v3314_v40, %v3198_v10  ;;  %v3340_v19 = vadd.f32 %v3332_v4, %v3216_v7  ;;  %v3406_v12 = vsel %vm307_vm7, %v14580_v37, 0.0  ;;  %v3324_v27 = vadd.f32 %v3316_v56, %v3200_v20  ;;  %v11365_v40 = vpop.permute.xlu1 %4115  ;;  %v14591_v37 = vld [vmem:[#allocation234_spill] sm:$0xff]  ;;  %v14629_v55 = vld [vmem:[#allocation297_spill] sm:$0xff] }
 0xdc4   : > { %v11344_v34 = vstv %s11311_s14  ;;  %v3313_v15 = vmul.f32 %v11303_v59, %v3303_v16  ;;  %v3331_v38 = vmul.f32 %v11306_v54, %v3303_v16  ;;  %v11351_v52 = vstv %s11319_s20  ;;  %14587 = vst [vmem:[#allocation347_spill] sm:$0xff] %v11365_v40  ;;  %v14590_v16 = vld [vmem:[#allocation271_spill] sm:$0xff]  ;;  %s11757_s14 = sld [smem:[#allocation2 + $0x4d]]  ;;  %s11784_s20 = sld [smem:[#allocation2 + $0x18]] }
 0xdc5   : > { %14581 = vst [vmem:[#allocation108_spill] sm:$0xff] %v11344_v34  ;;  %14583 = vst [vmem:[#allocation41_spill] sm:$0xff] %v11351_v52  ;;  %v3356_v13 = vadd.f32 %v14584_v48, %v3320_v36  ;;  %v3374_v45 = vadd.f32 %v14585_v58, %v3338_v61  ;;  %v3315_v4 = vmul.f32 %v11303_v59, %v3305_v1  ;;  %v3408_v21 = vsel %vm307_vm7, %v14586_v22, 0.0  ;;  %v14588_v36 = vld [vmem:[#allocation232_spill] sm:$0xff]  ;;  %v14613_v59 = vld [vmem:[#allocation281_spill] sm:$0xff] }
 0xdc6   : > { %v3342_v10 = vadd.f32 %v3334_v63, %v3218_v39  ;;  %v3416_v7 = vmul.f32 %v11344_v34, %v3406_v12  ;;  %v3333_v20 = vmul.f32 %v11306_v54, %v3305_v1  ;;  %v3434_v56 = vmul.f32 %v11351_v52, %v3406_v12  ;;  %v14592_v58 = vld [vmem:[#allocation272_spill] sm:$0xff] }
 0xdc7   : > { %v3358_v61 = vadd.f32 %v14588_v36, %v3322_v49  ;;  %v3376_v39 = vadd.f32 %v14589_v18, %v3340_v19  ;;  %v3410_v63 = vsel %vm307_vm7, %v14590_v16, 0.0  ;;  %v3321_v3 = vadd.f32 %v3313_v15, %v3197_v57  ;;  %v14593_v19 = vld [vmem:[#allocation273_spill] sm:$0xff] }
 0xdc8   : > { %v3339_v1 = vadd.f32 %v3331_v38, %v3215_v11  ;;  %v3360_v48 = vadd.f32 %v14591_v37, %v3324_v27  ;;  %v3407_v22 = vsel %vm307_vm7, %v14592_v58, 0.0  ;;  %v3323_v54 = vadd.f32 %v3315_v4, %v3199_v26  ;;  %v14594_v27 = vld [vmem:[#allocation453_spill] sm:$0xff]  ;;  %v11392_v26 = vpop.permute.xlu0 %4117 }
 0xdc9   : > { %v3418_v12 = vmul.f32 %v11344_v34, %v3408_v21  ;;  %v3436_v49 = vmul.f32 %v11351_v52, %v3408_v21  ;;  %v3409_v36 = vsel %vm307_vm7, %v14593_v19, 0.0  ;;  %v11388_v57 = vadd.f32 %v3416_v7, %v3356_v13  ;;  %14595 = vst [vmem:[#allocation109_spill] sm:$0xff] %v11392_v26  ;;  %v14598_v19 = vld [vmem:[#allocation237_spill] sm:$0xff] }
 0xdca   : > { %v3341_v11 = vadd.f32 %v3333_v20, %v3217_v5  ;;  %v3378_v15 = vadd.f32 %v14594_v27, %v3342_v10  ;;  %v3420_v38 = vmul.f32 %v11344_v34, %v3410_v63  ;;  %v11394_v18 = vadd.f32 %v3434_v56, %v3374_v45  ;;  %v14596_v5 = vld [vmem:[#allocation236_spill] sm:$0xff] }
 0xdcb   : > { %v3438_v21 = vmul.f32 %v11351_v52, %v3410_v63  ;;  %v3417_v16 = vmul.f32 %v11344_v34, %v3407_v22  ;;  %v3357_v7 = vadd.f32 %v14596_v5, %v3321_v3  ;;  %v3435_v10 = vmul.f32 %v11351_v52, %v3407_v22  ;;  %v14597_v63 = vld [vmem:[#allocation455_spill] sm:$0xff]  ;;  %v14599_v22 = vld [vmem:[#allocation456_spill] sm:$0xff] }
 0xdcc   : > { %v4356_v4 = vpop.permute.xlu1 %4355  ;;  %v3419_v20 = vmul.f32 %v11344_v34, %v3409_v36  ;;  %v3437_v37 = vmul.f32 %v11351_v52, %v3409_v36  ;;  %v11410_v45 = vadd.f32 %v3418_v12, %v3358_v61  ;;  %v11412_v56 = vadd.f32 %v3436_v49, %v3376_v39  ;;  %v14610_v34 = vld [vmem:[#allocation279_spill] sm:$0xff] }
 0xdcd   : > { %v11400_v13 = vsel %vm454_vm5, %v4356_v4, %v9911_v51  ;;  %v3375_v58 = vadd.f32 %v14597_v63, %v3339_v1  ;;  %v3359_v3 = vadd.f32 %v14598_v19, %v3323_v54  ;;  %v11416_v27 = vadd.f32 %v3420_v38, %v3360_v48 }
 0xdce   : > { %4387 = vrot.lane.b32.xlu1 %v11400_v13, %s5864_s5  ;;  %v3377_v4 = vadd.f32 %v14599_v22, %v3341_v11  ;;  %v11420_v5 = vstv %s11361_s23  ;;  %v11423_v36 = vstv %s11363_s7  ;;  %v11425_v61 = vadd.f32 %v3438_v21, %v3378_v15  ;;  %s11793_s23 = sld [smem:[#allocation2 + $0x4e]]  ;;  %s11878_s7 = sld [smem:[#allocation2 + $0x1a]] }
 0xdcf   : > { %14600 = vst [vmem:[#allocation111_spill] sm:$0xff] %v11420_v5  ;;  %14601 = vst [vmem:[#allocation348_spill] sm:$0xff] %v11423_v36  ;;  %v11427_v39 = vadd.f32 %v3417_v16, %v3357_v7  ;;  %v11439_v48 = vadd.f32 %v3435_v10, %v3375_v58  ;;  %v11441_v12 = vadd.f32 %v3419_v20, %v3359_v3  ;;  %v11446_v11 = vstv %s11377_s25  ;;  %v14606_v16 = vld [vmem:[#allocation288_spill] sm:$0xff]  ;;  %v14607_v20 = vld [vmem:[#allocation287_spill] sm:$0xff]  ;;  %s11880_s25 = sld [smem:[#allocation2 + $0x50]] }
 0xdd0   : > { %v4358_v51 = vpop.permute.xlu0 %4357  ;;  %v4360_v52 = vpop.permute.xlu1 %4359  ;;  %v11443_v49 = vadd.f32 %v3437_v37, %v3377_v4  ;;  %14602 = vst [vmem:[#allocation349_spill] sm:$0xff] %v11446_v11  ;;  %v11463_v38 = vstv %s11384_s9  ;;  %v11466_v21 = vstv %s11386_s6  ;;  %v11470_v7 = vmul.f32 %v11420_v5, %v14606_v16  ;;  %v14608_v3 = vld [vmem:[#allocation290_spill] sm:$0xff]  ;;  %s12309_s9 = sld [smem:[#allocation2 + $0x2e]]  ;;  %s12311_s6 = sld [smem:[#allocation2 + $0x64]] }
 0xdd1   : > { %v11433_v54 = vsel %vm454_vm5, %v4358_v51, %v9950_v44  ;;  %v11437_v1 = vsel %vm454_vm5, %v4360_v52, %v9946_v42  ;;  %v14603_v51 = vld [vmem:[#allocation286_spill] sm:$0xff]  ;;  %14604 = vst [vmem:[#allocation110_spill] sm:$0xff] %v11463_v38  ;;  %14605 = vst [vmem:[#allocation113_spill] sm:$0xff] %v11466_v21  ;;  %v11474_v10 = vmul.f32 %v11423_v36, %v14606_v16  ;;  %v11553_v31 = vstv %s11429_s30  ;;  %s5423_s30 = sld [smem:[#allocation2 + $0x67]] }
 0xdd2   : > { %4389 = vrot.lane.b32.xlu0 %v11433_v54, %s5864_s5  ;;  %4391 = vrot.lane.b32.xlu1 %v11437_v1, %s5864_s5  ;;  %v11456_v52 = vmul.f32 %v11420_v5, %v14603_v51  ;;  %v11460_v15 = vmul.f32 %v11423_v36, %v14603_v51  ;;  %v11478_v37 = vmul.f32 %v11420_v5, %v14607_v20  ;;  %v3676_v26 = vsel %vm306_vm6, %v14620_v9, 0.0 }
 0xdd3   : > { %v11482_v63 = vmul.f32 %v11423_v36, %v14607_v20  ;;  %v11486_v22 = vmul.f32 %v11420_v5, %v14608_v3  ;;  %v11490_v4 = vmul.f32 %v11423_v36, %v14608_v3  ;;  %v14609_v20 = vld [vmem:[#allocation289_spill] sm:$0xff]  ;;  %v11510_v3 = vmul.f32 %v11446_v11, %v14610_v34  ;;  %14617 = vst [vmem:[#allocation112_spill] sm:$0xff] %v11553_v31 }
 0xdd4   : > { %v4364_v19 = vpop.permute.xlu1 %4363  ;;  %v11502_v42 = vmul.f32 %v11420_v5, %v14609_v20  ;;  %v11506_v44 = vmul.f32 %v11423_v36, %v14609_v20  ;;  %v11524_v20 = vmul.f32 %v11463_v38, %v14610_v34  ;;  %v11538_v33 = vmul.f32 %v11446_v11, %v14613_v59  ;;  %v14614_v34 = vld [vmem:[#allocation277_spill] sm:$0xff] }
 0xdd5   : > { %v4362_v58 = vpop.permute.xlu0 %4361  ;;  %v11498_v16 = vsel %vm454_vm5, %v4364_v19, %v14420_v14  ;;  %v14611_v19 = vld [vmem:[#allocation293_spill] sm:$0xff]  ;;  %v11546_v29 = vmul.f32 %v11446_v11, %v14614_v34  ;;  %v11550_v30 = vmul.f32 %v11463_v38, %v14614_v34  ;;  %v11559_v6 = vmul.f32 %v11446_v11, %v14618_v46 }
 0xdd6   : > { %v11494_v51 = vsel %vm454_vm5, %v4362_v58, %v14421_v28  ;;  %4395 = vrot.lane.b32.xlu1 %v11498_v16, %s5864_s5  ;;  %v11517_v58 = vstv %s11408_s8  ;;  %v3674_v14 = vsel %vm306_vm6, %v14611_v19, 0.0  ;;  %v14612_v28 = vld [vmem:[#allocation283_spill] sm:$0xff]  ;;  %v11542_v19 = vmul.f32 %v11463_v38, %v14613_v59  ;;  %s5422_s8 = sld [smem:[#allocation2 + $0x31]] }
 0xdd7   : > { %4393 = vrot.lane.b32.xlu0 %v11494_v51, %s5864_s5  ;;  %v11528_v36 = vmul.f32 %v11446_v11, %v14612_v28  ;;  %v11532_v5 = vmul.f32 %v11463_v38, %v14612_v28  ;;  %14615 = vst [vmem:[#allocation46_spill] sm:$0xff] %v11546_v29  ;;  %14616 = vst [vmem:[#allocation350_spill] sm:$0xff] %v11550_v30  ;;  %v3684_v34 = vmul.f32 %v11553_v31, %v3674_v14  ;;  %v14637_v29 = vld [vmem:[#allocation303_spill] sm:$0xff] }
 0xdd8   : > { %v4368_v8 = vpop.permute.xlu1 %4367  ;;  %14619 = vst [vmem:[#allocation27_spill] sm:$0xff] %v11559_v6  ;;  %v11575_v40 = vmul.f32 %v11463_v38, %v14618_v46  ;;  %v14627_v38 = vld [vmem:[#allocation312_spill] sm:$0xff]  ;;  %v3677_v25 = vsel %vm306_vm6, %v14630_v62, 0.0 }
 0xdd9   : > { %v4366_v28 = vpop.permute.xlu0 %4365  ;;  %v11567_v2 = vsel %vm454_vm5, %v4368_v8, %v14424_v47  ;;  %v11586_v47 = vstv %s11452_s11  ;;  %v11597_v11 = vmul.f32 %v11466_v21, %v14627_v38  ;;  %v3692_v62 = vadd.f32 %v3684_v34, %v11388_v57  ;;  %s12325_s11 = sld [smem:[#allocation2 + $0x34]] }
 0xdda   : > { %v11563_v59 = vsel %vm454_vm5, %v4366_v28, %v14425_v50  ;;  %14621 = vst [vmem:[#allocation377_spill] sm:$0xff] %v11575_v40  ;;  %4399 = vrot.lane.b32.xlu1 %v11567_v2, %s5864_s5  ;;  %v14622_v28 = vld [vmem:[#allocation309_spill] sm:$0xff]  ;;  %14624 = vst [vmem:[#allocation116_spill] sm:$0xff] %v11586_v47  ;;  %v14625_v50 = vld [vmem:[#allocation296_spill] sm:$0xff]  ;;  %v3702_v41 = vmul.f32 %v11586_v47, %v3674_v14  ;;  %v3704_v14 = vmul.f32 %v11586_v47, %v3676_v26 }
 0xddb   : > { %4397 = vrot.lane.b32.xlu0 %v11563_v59, %s5864_s5  ;;  %v11583_v8 = vmul.f32 %v11466_v21, %v14622_v28  ;;  %v3675_v9 = vsel %vm306_vm6, %v14625_v50, 0.0  ;;  %v11593_v46 = vmul.f32 %v11517_v58, %v14622_v28  ;;  %14628 = vst [vmem:[#allocation65_spill] sm:$0xff] %v11597_v11  ;;  %v11610_v28 = vmul.f32 %v11517_v58, %v14627_v38 }
 0xddc   : > { %v11606_v50 = vpop.permute.xlu1 %4583  ;;  %v3686_v11 = vmul.f32 %v11553_v31, %v3676_v26  ;;  %v3685_v40 = vmul.f32 %v11553_v31, %v3675_v9  ;;  %v3703_v38 = vmul.f32 %v11586_v47, %v3675_v9  ;;  %v3710_v34 = vadd.f32 %v3702_v41, %v11394_v18 }
 0xddd   : > { %14623 = vst [vmem:[#allocation115_spill] sm:$0xff] %v11583_v8  ;;  %14626 = vst [vmem:[#allocation114_spill] sm:$0xff] %v11593_v46  ;;  %v3678_v8 = vsel %vm306_vm6, %v14629_v55, 0.0  ;;  %v14632_v55 = vld [vmem:[#allocation311_spill] sm:$0xff]  ;;  %v3705_v9 = vmul.f32 %v11586_v47, %v3677_v25 }
 0xdde   : > { %v4370_v60 = vpop.permute.xlu0 %4369  ;;  %14631 = vst [vmem:[#allocation66_spill] sm:$0xff] %v11610_v28  ;;  %v11620_v43 = vmul.f32 %v11466_v21, %v14632_v55  ;;  %4491 = vrot.lane.b32.xlu1 %v11400_v13, %s14484_s10  ;;  %v3706_v26 = vmul.f32 %v11586_v47, %v3678_v8  ;;  %v11634_v57 = vmul.f32 %v11517_v58, %v14632_v55  ;;  %v14635_v13 = vld [vmem:[#allocation314_spill] sm:$0xff]  ;;  %v11652_v55 = vstv %s11555_s13  ;;  %s12416_s13 = sld [smem:[#allocation2 + $0x2f]] }
 0xddf   : > { %v11616_v46 = vsel %vm454_vm5, %v4370_v60, %v14433_v32  ;;  %v3688_v60 = vmul.f32 %v11553_v31, %v3678_v8  ;;  %v3687_v32 = vmul.f32 %v11553_v31, %v3677_v25  ;;  %v11647_v30 = vmul.f32 %v11466_v21, %v14635_v13 }
 0xde0   : > { %14633 = vst [vmem:[#allocation351_spill] sm:$0xff] %v11620_v43  ;;  %4401 = vrot.lane.b32.xlu0 %v11616_v46, %s5864_s5  ;;  %14634 = vst [vmem:[#allocation352_spill] sm:$0xff] %v11634_v57  ;;  %v11639_v43 = vstv %s11534_s29  ;;  %v11643_v6 = vpop.permute.xlu1 %4587  ;;  %v3694_v8 = vadd.f32 %v3686_v11, %v11410_v45  ;;  %v3712_v31 = vadd.f32 %v3704_v14, %v11412_v56  ;;  %v14636_v57 = vld [vmem:[#allocation301_spill] sm:$0xff]  ;;  %v3780_v21 = vsel %vm307_vm7, %v14637_v29, 0.0  ;;  %s12327_s29 = sld [smem:[#allocation2 + $0x6a]] }
 0xde1   : > { %v3778_v25 = vsel %vm307_vm7, %v14636_v57, 0.0  ;;  %v3693_v41 = vadd.f32 %v3685_v40, %v11427_v39  ;;  %v3711_v18 = vadd.f32 %v3703_v38, %v11439_v48  ;;  %v3728_v47 = vadd.f32 %v11456_v52, %v3692_v62  ;;  %v14638_v39 = vld [vmem:[#allocation304_spill] sm:$0xff]  ;;  %v14639_v38 = vld [vmem:[#allocation305_spill] sm:$0xff] }
 0xde2   : > { %v11641_v28 = vpop.permute.xlu0 %4585  ;;  %4495 = vrot.lane.b32.xlu1 %v11437_v1, %s14484_s10  ;;  %v3696_v45 = vadd.f32 %v3688_v60, %v11416_v27  ;;  %v3714_v56 = vadd.f32 %v3706_v26, %v11425_v61  ;;  %v3695_v40 = vadd.f32 %v3687_v32, %v11441_v12  ;;  %v3779_v48 = vsel %vm307_vm7, %v14638_v39, 0.0  ;;  %v14643_v39 = vld [vmem:[#allocation320_spill] sm:$0xff] }
 0xde3   : > { %v3713_v29 = vadd.f32 %v3705_v9, %v11443_v49  ;;  %v3788_v1 = vmul.f32 %v11639_v43, %v3778_v25  ;;  %v3806_v27 = vmul.f32 %v11652_v55, %v3778_v25  ;;  %v3730_v32 = vadd.f32 %v11470_v7, %v3694_v8  ;;  %v14641_v8 = vld [vmem:[#allocation317_spill] sm:$0xff] }
 0xde4   : > { %4493 = vrot.lane.b32.xlu0 %v11433_v54, %s14484_s10  ;;  %v3746_v54 = vadd.f32 %v11460_v15, %v3710_v34  ;;  %v11683_v61 = vpop.permute.xlu1 %4591  ;;  %v3748_v12 = vadd.f32 %v11474_v10, %v3712_v31  ;;  %v3790_v52 = vmul.f32 %v11639_v43, %v3780_v21  ;;  %v3808_v14 = vmul.f32 %v11652_v55, %v3780_v21  ;;  %v14640_v34 = vld [vmem:[#allocation306_spill] sm:$0xff] }
 0xde5   : > { %v3729_v49 = vadd.f32 %v11478_v37, %v3693_v41  ;;  %v3789_v15 = vmul.f32 %v11639_v43, %v3779_v48  ;;  %v3807_v62 = vmul.f32 %v11652_v55, %v3779_v48  ;;  %v3782_v60 = vsel %vm307_vm7, %v14639_v38, 0.0  ;;  %v14642_v41 = vld [vmem:[#allocation319_spill] sm:$0xff] }
 0xde6   : > { %v11681_v11 = vpop.permute.xlu0 %4589  ;;  %4499 = vrot.lane.b32.xlu1 %v11498_v16, %s14484_s10  ;;  %v3747_v31 = vadd.f32 %v11482_v63, %v3711_v18  ;;  %v3732_v21 = vadd.f32 %v11486_v22, %v3696_v45  ;;  %v3750_v7 = vadd.f32 %v11490_v4, %v3714_v56  ;;  %v3731_v10 = vadd.f32 %v11502_v42, %v3695_v40 }
 0xde7   : > { %v3796_v37 = vadd.f32 %v3788_v1, %v3728_v47  ;;  %v3814_v26 = vadd.f32 %v3806_v27, %v3746_v54  ;;  %v3749_v57 = vadd.f32 %v11506_v44, %v3713_v29  ;;  %v3798_v63 = vadd.f32 %v3790_v52, %v3730_v32  ;;  %v14644_v1 = vld [vmem:[#allocation321_spill] sm:$0xff] }
 0xde8   : > { %4497 = vrot.lane.b32.xlu0 %v11494_v51, %s14484_s10  ;;  %v3781_v51 = vsel %vm307_vm7, %v14640_v34, 0.0  ;;  %v11709_v16 = vpop.permute.xlu1 %4595  ;;  %v3816_v22 = vadd.f32 %v3808_v14, %v3748_v12  ;;  %v3792_v4 = vmul.f32 %v11639_v43, %v3782_v60  ;;  %v3902_v42 = vsel %vm306_vm6, %v14641_v8, 0.0  ;;  %v14645_v14 = vld [vmem:[#allocation322_spill] sm:$0xff] }
 0xde9   : > { %v3797_v47 = vadd.f32 %v3789_v15, %v3729_v49  ;;  %v3815_v25 = vadd.f32 %v3807_v62, %v3747_v31  ;;  %v3810_v44 = vmul.f32 %v11652_v55, %v3782_v60  ;;  %v3904_v18 = vsel %vm306_vm6, %v14642_v41, 0.0 }
 0xdea   : > { %v11707_v9 = vpop.permute.xlu0 %4593  ;;  %4503 = vrot.lane.b32.xlu1 %v11567_v2, %s14484_s10  ;;  %v3791_v45 = vmul.f32 %v11639_v43, %v3781_v51  ;;  %v11725_v56 = vstv %s11673_s26  ;;  %v11728_v40 = vstv %s11675_s22  ;;  %v3903_v48 = vsel %vm306_vm6, %v14643_v39, 0.0  ;;  %s12418_s26 = sld [smem:[#allocation2 + $0x65]]  ;;  %s12448_s22 = sld [smem:[#allocation2 + $0x30]] }
 0xdeb   : > { %v3809_v29 = vmul.f32 %v11652_v55, %v3781_v51  ;;  %v3912_v54 = vmul.f32 %v11725_v56, %v3902_v42  ;;  %v3906_v2 = vsel %vm306_vm6, %v14644_v1, 0.0  ;;  %v3800_v12 = vadd.f32 %v3792_v4, %v3732_v21 }
 0xdec   : > { %4501 = vrot.lane.b32.xlu0 %v11563_v59, %s14484_s10  ;;  %v3930_v59 = vmul.f32 %v11728_v40, %v3902_v42  ;;  %v3914_v52 = vmul.f32 %v11725_v56, %v3904_v18  ;;  %v3905_v49 = vsel %vm306_vm6, %v14645_v14, 0.0  ;;  %v11752_v15 = vsel %vm454_vm5, %v11606_v50, %v9814_v24 }
 0xded   : > { %v11743_v32 = vpop.permute.xlu1 %4811  ;;  %v3932_v62 = vmul.f32 %v11728_v40, %v3904_v18  ;;  %v3913_v38 = vmul.f32 %v11725_v56, %v3903_v48  ;;  %v3931_v60 = vmul.f32 %v11728_v40, %v3903_v48  ;;  %v3818_v31 = vadd.f32 %v3810_v44, %v3750_v7 }
 0xdee   : > { %v11741_v27 = vpop.permute.xlu0 %4597  ;;  %4615 = vrot.lane.b32.xlu1 %v11752_v15, %s5864_s5  ;;  %v3799_v21 = vadd.f32 %v3791_v45, %v3731_v10  ;;  %v3916_v34 = vmul.f32 %v11725_v56, %v3906_v2  ;;  %v3934_v50 = vmul.f32 %v11728_v40, %v3906_v2  ;;  %v3920_v51 = vadd.f32 %v3912_v54, %v3796_v37  ;;  %v14646_v45 = vld [vmem:[#allocation325_spill] sm:$0xff] }
 0xdef   : > { %v3938_v4 = vadd.f32 %v3930_v59, %v3814_v26  ;;  %v3915_v8 = vmul.f32 %v11725_v56, %v3905_v49  ;;  %v3933_v42 = vmul.f32 %v11728_v40, %v3905_v49  ;;  %v3922_v39 = vadd.f32 %v3914_v52, %v3798_v63 }
 0xdf0   : > { %4505 = vrot.lane.b32.xlu0 %v11616_v46, %s14484_s10  ;;  %v3817_v46 = vadd.f32 %v3809_v29, %v3749_v57  ;;  %v11774_v7 = vsel %vm454_vm5, %v11641_v28, %v14440_v53  ;;  %v11779_v10 = vsel %vm454_vm5, %v11643_v6, %v9871_v35  ;;  %v3940_v37 = vadd.f32 %v3932_v62, %v3816_v22 }
 0xdf1   : > { %v11769_v18 = vpop.permute.xlu1 %4815  ;;  %v3921_v26 = vadd.f32 %v3913_v38, %v3797_v47  ;;  %v3939_v44 = vadd.f32 %v3931_v60, %v3815_v25  ;;  %v4006_v48 = vsel %vm307_vm7, %v14646_v45, 0.0  ;;  %v3924_v28 = vadd.f32 %v3916_v34, %v3800_v12  ;;  %v14651_v60 = vld [vmem:[#allocation27_spill] sm:$0xff] }
 0xdf2   : > { %v11767_v41 = vpop.permute.xlu0 %4813  ;;  %4619 = vrot.lane.b32.xlu1 %v11779_v10, %s5864_s5  ;;  %v3942_v57 = vadd.f32 %v3934_v50, %v3818_v31  ;;  %v11791_v6 = vstv %s11733_s12  ;;  %v11797_v63 = vmul.f32 %v11517_v58, %v14635_v13  ;;  %v3923_v22 = vadd.f32 %v3915_v8, %v3799_v21  ;;  %v14652_v21 = vld [vmem:[#allocation377_spill] sm:$0xff]  ;;  %s12450_s12 = sld [smem:[#allocation2 + $0x66]] }
 0xdf3   : > { %v3941_v47 = vadd.f32 %v3933_v42, %v3817_v46  ;;  %v3956_v25 = vadd.f32 %v11510_v3, %v3920_v51  ;;  %v3974_v29 = vadd.f32 %v11524_v20, %v3938_v4  ;;  %v4016_v1 = vmul.f32 %v11791_v6, %v4006_v48  ;;  %v14653_v50 = vld [vmem:[#allocation345_spill] sm:$0xff] }
 0xdf4   : > { %4617 = vrot.lane.b32.xlu0 %v11774_v7, %s5864_s5  ;;  %v3958_v2 = vadd.f32 %v11528_v36, %v3922_v39  ;;  %v11810_v12 = vsel %vm454_vm5, %v11681_v11, %v14445_v17  ;;  %v11815_v13 = vsel %vm454_vm5, %v11683_v61, %v14444_v23  ;;  %v11818_v3 = vstv %s11757_s14  ;;  %v14647_v36 = vld [vmem:[#allocation327_spill] sm:$0xff]  ;;  %v14648_v61 = vld [vmem:[#allocation328_spill] sm:$0xff]  ;;  %v14654_v46 = vld [vmem:[#allocation329_spill] sm:$0xff]  ;;  %s12465_s14 = sld [smem:[#allocation2 + $0x32]] }
 0xdf5   : > { %v11803_v59 = vpop.permute.xlu1 %4819  ;;  %v3976_v20 = vadd.f32 %v11532_v5, %v3940_v37  ;;  %v3957_v52 = vadd.f32 %v11538_v33, %v3921_v26  ;;  %v3975_v14 = vadd.f32 %v11542_v19, %v3939_v44  ;;  %v4008_v11 = vsel %vm307_vm7, %v14647_v36, 0.0  ;;  %v14649_v5 = vld [vmem:[#allocation46_spill] sm:$0xff]  ;;  %v14655_v37 = vld [vmem:[#allocation100_spill] sm:$0xff] }
 0xdf6   : > { %v11801_v54 = vpop.permute.xlu0 %4817  ;;  %4623 = vrot.lane.b32.xlu1 %v11815_v13, %s5864_s5  ;;  %v4007_v49 = vsel %vm307_vm7, %v14648_v61, 0.0  ;;  %v3960_v62 = vadd.f32 %v14649_v5, %v3924_v28  ;;  %v14650_v33 = vld [vmem:[#allocation350_spill] sm:$0xff]  ;;  %v4034_v19 = vmul.f32 %v11818_v3, %v4006_v48  ;;  %v3959_v31 = vadd.f32 %v14651_v60, %v3923_v22  ;;  %v14656_v44 = vld [vmem:[#allocation336_spill] sm:$0xff]  ;;  %v14657_v22 = vld [vmem:[#allocation39_spill] sm:$0xff] }
 0xdf7   : > { %v3978_v38 = vadd.f32 %v14650_v33, %v3942_v57  ;;  %v3977_v34 = vadd.f32 %v14652_v21, %v3941_v47  ;;  %v4130_v51 = vsel %vm306_vm6, %v14653_v50, 0.0  ;;  %v4024_v42 = vadd.f32 %v4016_v1, %v3956_v25  ;;  %v14659_v50 = vld [vmem:[#allocation346_spill] sm:$0xff] }
 0xdf8   : > { %4621 = vrot.lane.b32.xlu0 %v11810_v12, %s5864_s5  ;;  %v4010_v39 = vsel %vm307_vm7, %v14654_v46, 0.0  ;;  %v11851_v26 = vsel %vm454_vm5, %v11707_v9, %v14655_v37  ;;  %v11856_v45 = vsel %vm454_vm5, %v11709_v16, %v14656_v44  ;;  %v4018_v48 = vmul.f32 %v11791_v6, %v4008_v11  ;;  %v14658_v16 = vld [vmem:[#allocation330_spill] sm:$0xff]  ;;  %v14660_v44 = vld [vmem:[#allocation53_spill] sm:$0xff]  ;;  %v14661_v37 = vld [vmem:[#allocation347_spill] sm:$0xff] }
 0xdf9   : > { %v11843_v8 = vpop.permute.xlu1 %4823  ;;  %v4017_v28 = vmul.f32 %v11791_v6, %v4007_v49  ;;  %v11861_v57 = vstv %s11784_s20  ;;  %v4131_v47 = vsel %vm306_vm6, %v14657_v22, 0.0  ;;  %v4035_v9 = vmul.f32 %v11818_v3, %v4007_v49  ;;  %s12467_s20 = sld [smem:[#allocation2 + $0x68]] }
 0xdfa   : > { %v11841_v4 = vpop.permute.xlu0 %4821  ;;  %4627 = vrot.lane.b32.xlu1 %v11856_v45, %s5864_s5  ;;  %v4009_v25 = vsel %vm307_vm7, %v14658_v16, 0.0  ;;  %v11875_v1 = vstv %s11793_s23  ;;  %v4140_v36 = vmul.f32 %v11861_v57, %v4130_v51  ;;  %v4042_v61 = vadd.f32 %v4034_v19, %v3974_v29  ;;  %s12485_s23 = sld [smem:[#allocation2 + $0x33]] }
 0xdfb   : > { %v4036_v5 = vmul.f32 %v11818_v3, %v4008_v11  ;;  %v4020_v33 = vmul.f32 %v11791_v6, %v4010_v39  ;;  %v4158_v60 = vmul.f32 %v11875_v1, %v4130_v51  ;;  %v4132_v46 = vsel %vm306_vm6, %v14659_v50, 0.0 }
 0xdfc   : > { %4625 = vrot.lane.b32.xlu0 %v11851_v26, %s5864_s5  ;;  %v4141_v22 = vmul.f32 %v11861_v57, %v4131_v47  ;;  %v4159_v16 = vmul.f32 %v11875_v1, %v4131_v47  ;;  %v11897_v29 = vsel %vm454_vm5, %v11741_v27, %v14660_v44  ;;  %v4026_v11 = vadd.f32 %v4018_v48, %v3958_v2 }
 0xdfd   : > { %v11887_v21 = vpop.permute.xlu1 %4207  ;;  %v4038_v19 = vmul.f32 %v11818_v3, %v4010_v39  ;;  %v4019_v51 = vmul.f32 %v11791_v6, %v4009_v25  ;;  %v4133_v23 = vsel %vm306_vm6, %v14661_v37, 0.0  ;;  %v4025_v47 = vadd.f32 %v4017_v28, %v3957_v52 }
 0xdfe   : > { %v11885_v49 = vpop.permute.xlu0 %4825  ;;  %4719 = vrot.lane.b32.xlu1 %v11752_v15, %s14484_s10  ;;  %v4043_v50 = vadd.f32 %v4035_v9, %v3975_v14  ;;  %v4037_v27 = vmul.f32 %v11818_v3, %v4009_v25  ;;  %v4148_v44 = vadd.f32 %v4140_v36, %v4024_v42  ;;  %v4044_v2 = vadd.f32 %v4036_v5, %v3976_v20  ;;  %v14662_v14 = vld [vmem:[#allocation243_spill] sm:$0xff] }
 0xdff   : > { %v4166_v48 = vadd.f32 %v4158_v60, %v4042_v61  ;;  %v4142_v39 = vmul.f32 %v11861_v57, %v4132_v46  ;;  %v4160_v17 = vmul.f32 %v11875_v1, %v4132_v46  ;;  %v4028_v35 = vadd.f32 %v4020_v33, %v3960_v62  ;;  %v14663_v61 = vld [vmem:[#allocation115_spill] sm:$0xff]  ;;  %v14664_v46 = vld [vmem:[#allocation109_spill] sm:$0xff] }
 0xe00   : > { %4629 = vrot.lane.b32.xlu0 %v11897_v29, %s5864_s5  ;;  %v4149_v53 = vadd.f32 %v4141_v22, %v4025_v47  ;;  %v4167_v24 = vadd.f32 %v4159_v16, %v4043_v50  ;;  %v4143_v15 = vmul.f32 %v11861_v57, %v4133_v23  ;;  %v11919_v20 = vsel %vm306_vm6, %v14662_v14, 0.0 }
 0xe01   : > { %v11911_v37 = vpop.permute.xlu1 %4211  ;;  %v4046_v42 = vadd.f32 %v4038_v19, %v3978_v38  ;;  %v4027_v28 = vadd.f32 %v4019_v51, %v3959_v31  ;;  %v4161_v9 = vmul.f32 %v11875_v1, %v4133_v23  ;;  %v4045_v62 = vadd.f32 %v4037_v27, %v3977_v34  ;;  %v14665_v23 = vld [vmem:[#allocation114_spill] sm:$0xff]  ;;  %v14666_v19 = vld [vmem:[#allocation65_spill] sm:$0xff] }
 0xe02   : > { %v11914_v52 = vpop.permute.xlu0 %4209  ;;  %4723 = vrot.lane.b32.xlu1 %v11779_v10, %s14484_s10  ;;  %v11927_v25 = vstv %s11878_s7  ;;  %v11930_v36 = vstv %s11880_s25  ;;  %v4184_v5 = vadd.f32 %v14663_v61, %v4148_v44  ;;  %v4150_v33 = vadd.f32 %v4142_v39, %v4026_v11  ;;  %v14667_v34 = vld [vmem:[#allocation66_spill] sm:$0xff]  ;;  %s12487_s7 = sld [smem:[#allocation2 + $0x69]]  ;;  %s12505_s25 = sld [smem:[#allocation2 + $0x35]] }
 0xe03   : > { %v4168_v60 = vadd.f32 %v4160_v17, %v4044_v2  ;;  %v4134_v38 = vsel %vm306_vm6, %v14664_v46, 0.0  ;;  %v4202_v31 = vadd.f32 %v14665_v23, %v4166_v48  ;;  %v4185_v10 = vadd.f32 %v14666_v19, %v4149_v53  ;;  %v14671_v19 = vld [vmem:[#allocation343_spill] sm:$0xff] }
 0xe04   : > { %4721 = vrot.lane.b32.xlu0 %v11774_v7, %s14484_s10  ;;  %v4151_v7 = vadd.f32 %v4143_v15, %v4027_v28  ;;  %v4203_v51 = vadd.f32 %v14667_v34, %v4167_v24  ;;  %v4169_v50 = vadd.f32 %v4161_v9, %v4045_v62  ;;  %v4144_v53 = vmul.f32 %v11861_v57, %v4134_v38  ;;  %v14668_v15 = vld [vmem:[#allocation351_spill] sm:$0xff]  ;;  %v14669_v28 = vld [vmem:[#allocation352_spill] sm:$0xff] }
 0xe05   : > { %v4216_v22 = vpop.permute.xlu1 %4215  ;;  %v4162_v24 = vmul.f32 %v11875_v1, %v4134_v38  ;;  %v4186_v14 = vadd.f32 %v14668_v15, %v4150_v33  ;;  %v4204_v9 = vadd.f32 %v14669_v28, %v4168_v60  ;;  %v14680_v15 = vld [vmem:[#allocation244_spill] sm:$0xff] }
 0xe06   : > { %v4214_v16 = vpop.permute.xlu0 %4213  ;;  %v4235_v47 = vsel %vm307_vm7, %v4216_v22, 0.0  ;;  %4727 = vrot.lane.b32.xlu1 %v11815_v13, %s14484_s10  ;;  %v4187_v46 = vadd.f32 %v11647_v30, %v4151_v7  ;;  %v4205_v22 = vadd.f32 %v11797_v63, %v4169_v50  ;;  %v3176_v28 = vsel %vm307_vm7, %v14680_v15, 0.0  ;;  %v14695_v15 = vld [vmem:[#allocation440_spill] sm:$0xff] }
 0xe07   : > { %v4234_v17 = vsel %vm307_vm7, %v4214_v16, 0.0  ;;  %v4245_v44 = vmul.f32 %v11927_v25, %v4235_v47  ;;  %v4263_v11 = vmul.f32 %v11930_v36, %v4235_v47  ;;  %v4170_v30 = vadd.f32 %v4162_v24, %v4046_v42  ;;  %v14670_v16 = vld [vmem:[#allocation49_spill] sm:$0xff] }
 0xe08   : > { %4725 = vrot.lane.b32.xlu0 %v11810_v12, %s14484_s10  ;;  %v4244_v27 = vmul.f32 %v11927_v25, %v4234_v17  ;;  %v4262_v2 = vmul.f32 %v11930_v36, %v4234_v17  ;;  %v14675_v47 = vld [vmem:[#allocation113_spill] sm:$0xff] }
 0xe09   : > { %v11953_v48 = vadd.f32 %v4245_v44, %v4185_v10  ;;  %v11955_v39 = vadd.f32 %v4263_v11, %v4203_v51  ;;  %v4220_v12 = vpop.permute.xlu1 %4219  ;;  %v3099_v10 = vmul.f32 %v14671_v19, %v14670_v16  ;;  %v14674_v51 = vld [vmem:[#allocation313_spill] sm:$0xff]  ;;  %v14677_v11 = vld [vmem:[#allocation70_spill] sm:$0xff] }
 0xe0a   : > { %v11959_v62 = vadd.f32 %v4244_v27, %v4184_v5  ;;  %v11961_v13 = vadd.f32 %v4262_v2, %v4202_v31  ;;  %v4218_v61 = vpop.permute.xlu0 %4217  ;;  %v4237_v38 = vsel %vm307_vm7, %v4220_v12, 0.0  ;;  %4731 = vrot.lane.b32.xlu1 %v11856_v45, %s14484_s10  ;;  %v4152_v5 = vadd.f32 %v4144_v53, %v4028_v35  ;;  %v14678_v53 = vld [vmem:[#allocation106_spill] sm:$0xff]  ;;  %v14679_v27 = vld [vmem:[#allocation31_spill] sm:$0xff] }
 0xe0b   : > { %v4236_v23 = vsel %vm307_vm7, %v4218_v61, 0.0  ;;  %v4247_v33 = vmul.f32 %v11927_v25, %v4237_v38  ;;  %v4265_v60 = vmul.f32 %v11930_v36, %v4237_v38  ;;  %v4180_v50 = vmul.f32 %v14675_v47, %v14674_v51  ;;  %v14682_v38 = vld [vmem:[#allocation437_spill] sm:$0xff]  ;;  %v14686_v16 = vld [vmem:[#allocation102_spill] sm:$0xff] }
 0xe0c   : > { %4729 = vrot.lane.b32.xlu0 %v11851_v26, %s14484_s10  ;;  %v4246_v31 = vmul.f32 %v11927_v25, %v4236_v23  ;;  %v4264_v7 = vmul.f32 %v11930_v36, %v4236_v23  ;;  %v14676_v26 = vld [vmem:[#allocation339_spill] sm:$0xff]  ;;  %v4198_v17 = vmul.f32 %v11517_v58, %v14674_v51  ;;  %v3089_v24 = vadd.f32 %v14678_v53, %v14677_v11  ;;  %v14692_v53 = vld [vmem:[#allocation17_spill] sm:$0xff] }
 0xe0d   : > { %v11979_v63 = vadd.f32 %v4247_v33, %v4187_v46  ;;  %v11981_v34 = vadd.f32 %v4265_v60, %v4205_v22  ;;  %v11988_v45 = vsel %vm454_vm5, %v11743_v32, %v14676_v26  ;;  %v3083_v2 = vmul.f32 %v14679_v27, %v11919_v20  ;;  %v14681_v46 = vld [vmem:[#allocation62_spill] sm:$0xff]  ;;  %v14683_v22 = vld [vmem:[#allocation69_spill] sm:$0xff]  ;;  %v14684_v33 = vld [vmem:[#allocation104_spill] sm:$0xff] }
 0xe0e   : > { %v11990_v35 = vadd.f32 %v4246_v31, %v4186_v14  ;;  %v11992_v42 = vadd.f32 %v4264_v7, %v4204_v9  ;;  %v4222_v44 = vpop.permute.xlu0 %4221  ;;  %4843 = vrot.lane.b32.xlu1 %v11988_v45, %s5864_s5  ;;  %v4188_v14 = vadd.f32 %v4180_v50, %v4152_v5  ;;  %v4206_v9 = vadd.f32 %v4198_v17, %v4170_v30  ;;  %v14685_v31 = vld [vmem:[#allocation255_spill] sm:$0xff]  ;;  %v14687_v30 = vld [vmem:[#allocation25_spill] sm:$0xff]  ;;  %v14710_v26 = vld [vmem:[#allocation274_spill] sm:$0xff] }
 0xe0f   : > { %14672 = vst [vmem:[#allocation118_spill] sm:$0xff] %v11979_v63  ;;  %14673 = vst [vmem:[#allocation119_spill] sm:$0xff] %v11981_v34  ;;  %v4238_v32 = vsel %vm307_vm7, %v4222_v44, 0.0  ;;  %v2917_v23 = vadd.f32 %v14682_v38, %v14681_v46  ;;  %v2967_v60 = vadd.f32 %v14684_v33, %v14683_v22  ;;  %v3107_v7 = vadd.f32 %v3099_v10, %v14685_v31  ;;  %v14690_v44 = vld [vmem:[#allocation344_spill] sm:$0xff]  ;;  %v14698_v38 = vld [vmem:[#allocation443_spill] sm:$0xff] }
 0xe10   : > { %4733 = vrot.lane.b32.xlu0 %v11897_v29, %s14484_s10  ;;  %v4248_v12 = vmul.f32 %v11927_v25, %v4238_v32  ;;  %v4266_v61 = vmul.f32 %v11930_v36, %v4238_v32  ;;  %v3101_v29 = vmul.f32 %v14671_v19, %v11919_v20  ;;  %v12021_v5 = vsel %vm454_vm5, %v11767_v41, %v14686_v16  ;;  %v14691_v10 = vld [vmem:[#allocation256_spill] sm:$0xff]  ;;  %v14693_v20 = vld [vmem:[#allocation105_spill] sm:$0xff]  ;;  %v14699_v22 = vld [vmem:[#allocation251_spill] sm:$0xff] }
 0xe11   : > { %v12026_v51 = vsel %vm454_vm5, %v11769_v18, %v14687_v30  ;;  %v2985_v11 = vadd.f32 %v14690_v44, %v2917_v23  ;;  %v3126_v27 = vadd.f32 %v14692_v53, %v14691_v10  ;;  %v3186_v19 = vmul.f32 %v14693_v20, %v3176_v28  ;;  %v14694_v18 = vld [vmem:[#allocation74_spill] sm:$0xff]  ;;  %v14702_v10 = vld [vmem:[#allocation260_spill] sm:$0xff]  ;;  %v14703_v53 = vld [vmem:[#allocation101_spill] sm:$0xff] }
 0xe12   : > { %v12028_v50 = vadd.f32 %v4248_v12, %v4188_v14  ;;  %v12030_v17 = vadd.f32 %v4266_v61, %v4206_v9  ;;  %4847 = vrot.lane.b32.xlu1 %v12026_v51, %s5864_s5  ;;  %v3091_v41 = vadd.f32 %v3083_v2, %v2967_v60  ;;  %v3144_v32 = vadd.f32 %v14695_v15, %v14694_v18  ;;  %v14696_v14 = vld [vmem:[#allocation42_spill] sm:$0xff]  ;;  %v14697_v12 = vld [vmem:[#allocation249_spill] sm:$0xff] }
 0xe13   : > { %v3125_v9 = vadd.f32 %v14696_v14, %v3089_v24  ;;  %v3175_v61 = vsel %vm307_vm7, %v14697_v12, 0.0  ;;  %v3109_v46 = vadd.f32 %v3101_v29, %v2985_v11  ;;  %v3143_v23 = vadd.f32 %v14698_v38, %v3107_v7  ;;  %v14700_v31 = vld [vmem:[#allocation258_spill] sm:$0xff]  ;;  %v14701_v60 = vld [vmem:[#allocation73_spill] sm:$0xff]  ;;  %v14704_v7 = vld [vmem:[#allocation340_spill] sm:$0xff] }
 0xe14   : > { %14688 = vst [vmem:[#allocation117_spill] sm:$0xff] %v12028_v50  ;;  %14689 = vst [vmem:[#allocation353_spill] sm:$0xff] %v12030_v17  ;;  %4845 = vrot.lane.b32.xlu0 %v12021_v5, %s5864_s5  ;;  %v3177_v33 = vsel %vm307_vm7, %v14699_v22, 0.0  ;;  %v3300_v2 = vsel %vm306_vm6, %v14700_v31, 0.0  ;;  %v3204_v44 = vmul.f32 %v14701_v60, %v3176_v28  ;;  %v3299_v24 = vsel %vm306_vm6, %v14702_v10, 0.0  ;;  %v14705_v28 = vld [vmem:[#allocation262_spill] sm:$0xff] }
 0xe15   : > { %v12060_v29 = vsel %vm454_vm5, %v11801_v54, %v14703_v53  ;;  %v12065_v11 = vsel %vm454_vm5, %v11803_v59, %v14704_v7  ;;  %v3194_v18 = vadd.f32 %v3186_v19, %v3126_v27  ;;  %v3185_v15 = vmul.f32 %v14693_v20, %v3175_v61  ;;  %v14706_v54 = vld [vmem:[#allocation18_spill] sm:$0xff]  ;;  %v14707_v19 = vld [vmem:[#allocation107_spill] sm:$0xff] }
 0xe16   : > { %v3203_v14 = vmul.f32 %v14701_v60, %v3175_v61  ;;  %v3301_v12 = vsel %vm306_vm6, %v14705_v28, 0.0  ;;  %4851 = vrot.lane.b32.xlu1 %v12065_v11, %s5864_s5  ;;  %v3127_v38 = vadd.f32 %v14706_v54, %v3091_v41  ;;  %v3187_v59 = vmul.f32 %v14693_v20, %v3177_v33  ;;  %v14708_v31 = vld [vmem:[#allocation446_spill] sm:$0xff]  ;;  %v14712_v54 = vld [vmem:[#allocation265_spill] sm:$0xff] }
 0xe17   : > { %v3205_v27 = vmul.f32 %v14701_v60, %v3177_v33  ;;  %v3310_v22 = vmul.f32 %v14707_v19, %v3300_v2  ;;  %v3145_v61 = vadd.f32 %v14708_v31, %v3109_v46  ;;  %v14709_v10 = vld [vmem:[#allocation38_spill] sm:$0xff]  ;;  %v3309_v28 = vmul.f32 %v14707_v19, %v3299_v24  ;;  %v14713_v31 = vld [vmem:[#allocation268_spill] sm:$0xff] }
 0xe18   : > { %4849 = vrot.lane.b32.xlu0 %v12060_v29, %s5864_s5  ;;  %v3328_v7 = vmul.f32 %v14709_v10, %v3300_v2  ;;  %v3327_v53 = vmul.f32 %v14709_v10, %v3299_v24  ;;  %v3311_v30 = vmul.f32 %v14707_v19, %v3301_v12  ;;  %v3329_v16 = vmul.f32 %v14709_v10, %v3301_v12  ;;  %v14711_v41 = vld [vmem:[#allocation26_spill] sm:$0xff] }
 0xe19   : > { %v12089_v20 = vsel %vm454_vm5, %v11841_v4, %v14710_v26  ;;  %v12094_v33 = vsel %vm454_vm5, %v11843_v8, %v14711_v41  ;;  %v3212_v46 = vadd.f32 %v3204_v44, %v3144_v32  ;;  %v3193_v2 = vadd.f32 %v3185_v15, %v3125_v9  ;;  %v14714_v44 = vld [vmem:[#allocation270_spill] sm:$0xff]  ;;  %v14716_v26 = vld [vmem:[#allocation257_spill] sm:$0xff] }
 0xe1a   : > { %v3211_v60 = vadd.f32 %v3203_v14, %v3143_v23  ;;  %v3404_v24 = vsel %vm307_vm7, %v14712_v54, 0.0  ;;  %4855 = vrot.lane.b32.xlu1 %v12094_v33, %s5864_s5  ;;  %v3195_v4 = vadd.f32 %v3187_v59, %v3127_v38  ;;  %v3213_v12 = vadd.f32 %v3205_v27, %v3145_v61  ;;  %v14715_v54 = vld [vmem:[#allocation108_spill] sm:$0xff] }
 0xe1b   : > { %v3318_v19 = vadd.f32 %v3310_v22, %v3194_v18  ;;  %v3403_v8 = vsel %vm307_vm7, %v14713_v31, 0.0  ;;  %v3336_v32 = vadd.f32 %v3328_v7, %v3212_v46  ;;  %v3317_v9 = vadd.f32 %v3309_v28, %v3193_v2  ;;  %v14717_v18 = vld [vmem:[#allocation41_spill] sm:$0xff] }
 0xe1c   : > { %4853 = vrot.lane.b32.xlu0 %v12089_v20, %s5864_s5  ;;  %v3335_v23 = vadd.f32 %v3327_v53, %v3211_v60  ;;  %v3405_v15 = vsel %vm307_vm7, %v14714_v44, 0.0  ;;  %v3319_v14 = vadd.f32 %v3311_v30, %v3195_v4  ;;  %v3337_v10 = vadd.f32 %v3329_v16, %v3213_v12  ;;  %v14718_v16 = vld [vmem:[#allocation230_spill] sm:$0xff]  ;;  %v14719_v53 = vld [vmem:[#allocation235_spill] sm:$0xff]  ;;  %v14720_v22 = vld [vmem:[#allocation445_spill] sm:$0xff] }
 0xe1d   : > { %v3414_v41 = vmul.f32 %v14715_v54, %v3404_v24  ;;  %v12113_v38 = vsel %vm454_vm5, %v11885_v49, %v14716_v26  ;;  %v3432_v59 = vmul.f32 %v14717_v18, %v3404_v24  ;;  %v3413_v27 = vmul.f32 %v14715_v54, %v3403_v8  ;;  %v14721_v46 = vld [vmem:[#allocation449_spill] sm:$0xff]  ;;  %v14723_v4 = vld [vmem:[#allocation452_spill] sm:$0xff] }
 0xe1e   : > { %v3431_v7 = vmul.f32 %v14717_v18, %v3403_v8  ;;  %4947 = vrot.lane.b32.xlu1 %v11988_v45, %s14484_s10  ;;  %v3354_v30 = vadd.f32 %v14718_v16, %v3318_v19  ;;  %v3365_v61 = vmul.f32 %v14720_v22, %v14719_v53  ;;  %v3415_v49 = vmul.f32 %v14715_v54, %v3405_v15  ;;  %v14722_v60 = vld [vmem:[#allocation233_spill] sm:$0xff]  ;;  %v14724_v8 = vld [vmem:[#allocation454_spill] sm:$0xff]  ;;  %v14725_v45 = vld [vmem:[#allocation291_spill] sm:$0xff] }
 0xe1f   : > { %v3433_v28 = vmul.f32 %v14717_v18, %v3405_v15  ;;  %v3372_v2 = vadd.f32 %v14721_v46, %v3336_v32  ;;  %v3353_v24 = vadd.f32 %v14722_v60, %v3317_v9  ;;  %v3371_v12 = vadd.f32 %v14723_v4, %v3335_v23  ;;  %v14726_v23 = vld [vmem:[#allocation292_spill] sm:$0xff] }
 0xe20   : > { %4857 = vrot.lane.b32.xlu0 %v12113_v38, %s5864_s5  ;;  %v3422_v31 = vadd.f32 %v3414_v41, %v3354_v30  ;;  %v3355_v44 = vadd.f32 %v14724_v8, %v3319_v14  ;;  %v3373_v26 = vadd.f32 %v3365_v61, %v3337_v10  ;;  %v3672_v19 = vsel %vm306_vm6, %v14725_v45, 0.0  ;;  %v14727_v15 = vld [vmem:[#allocation280_spill] sm:$0xff]  ;;  %v14728_v14 = vld [vmem:[#allocation111_spill] sm:$0xff]  ;;  %v14733_v61 = vld [vmem:[#allocation282_spill] sm:$0xff]  ;;  %s12263_s5 = sld [smem:[#allocation2 + $0x2d]] }
 0xe21   : > { %v3440_v16 = vadd.f32 %v3432_v59, %v3372_v2  ;;  %v3421_v53 = vadd.f32 %v3413_v27, %v3353_v24  ;;  %v3439_v22 = vadd.f32 %v3431_v7, %v3371_v12  ;;  %v3671_v41 = vsel %vm306_vm6, %v14726_v23, 0.0  ;;  %v14729_v54 = vld [vmem:[#allocation112_spill] sm:$0xff]  ;;  %v14731_v7 = vld [vmem:[#allocation294_spill] sm:$0xff]  ;;  %v14736_v12 = vld [vmem:[#allocation349_spill] sm:$0xff] }
 0xe22   : > { %4951 = vrot.lane.b32.xlu1 %v12026_v51, %s14484_s10  ;;  %v3423_v32 = vadd.f32 %v3415_v49, %v3355_v44  ;;  %v3441_v9 = vadd.f32 %v3433_v28, %v3373_v26  ;;  %v3718_v10 = vmul.f32 %v14728_v14, %v14727_v15  ;;  %v3682_v18 = vmul.f32 %v14729_v54, %v3672_v19  ;;  %v14730_v59 = vld [vmem:[#allocation116_spill] sm:$0xff]  ;;  %v14737_v45 = vld [vmem:[#allocation110_spill] sm:$0xff]  ;;  %v14738_v23 = vld [vmem:[#allocation275_spill] sm:$0xff] }
 0xe23   : > { %v3700_v27 = vmul.f32 %v14730_v59, %v3672_v19  ;;  %v14732_v30 = vld [vmem:[#allocation348_spill] sm:$0xff]  ;;  %v3717_v26 = vmul.f32 %v14728_v14, %v14733_v61  ;;  %v3681_v60 = vmul.f32 %v14729_v54, %v3671_v41  ;;  %v3699_v24 = vmul.f32 %v14730_v59, %v3671_v41 }
 0xe24   : > { %4949 = vrot.lane.b32.xlu0 %v12021_v5, %s14484_s10  ;;  %v3673_v5 = vsel %vm306_vm6, %v14731_v7, 0.0  ;;  %v3736_v51 = vmul.f32 %v14732_v30, %v14727_v15  ;;  %v3735_v49 = vmul.f32 %v14732_v30, %v14733_v61  ;;  %v14734_v28 = vld [vmem:[#allocation284_spill] sm:$0xff]  ;;  %v3945_v15 = vmul.f32 %v14736_v12, %v14738_v23  ;;  %v14740_v61 = vld [vmem:[#allocation299_spill] sm:$0xff] }
 0xe25   : > { %v3719_v46 = vmul.f32 %v14728_v14, %v14734_v28  ;;  %v3737_v2 = vmul.f32 %v14732_v30, %v14734_v28  ;;  %v14735_v4 = vld [vmem:[#allocation276_spill] sm:$0xff]  ;;  %v3683_v44 = vmul.f32 %v14729_v54, %v3673_v5  ;;  %v12177_v41 = vmul.f32 %v14737_v45, %v14738_v23  ;;  %v14739_v30 = vld [vmem:[#allocation278_spill] sm:$0xff] }
 0xe26   : > { %v12162_v8 = vmul.f32 %v14736_v12, %v14735_v4  ;;  %4955 = vrot.lane.b32.xlu1 %v12065_v11, %s14484_s10  ;;  %v12171_v19 = vmul.f32 %v14737_v45, %v14735_v4  ;;  %v3690_v14 = vadd.f32 %v3682_v18, %v3422_v31  ;;  %v3708_v7 = vadd.f32 %v3700_v27, %v3440_v16  ;;  %v14741_v4 = vld [vmem:[#allocation300_spill] sm:$0xff] }
 0xe27   : > { %v12185_v11 = vmul.f32 %v14737_v45, %v14739_v30  ;;  %v3701_v54 = vmul.f32 %v14730_v59, %v3673_v5  ;;  %v3776_v28 = vsel %vm307_vm7, %v14740_v61, 0.0  ;;  %v3775_v23 = vsel %vm307_vm7, %v14741_v4, 0.0  ;;  %v14742_v31 = vld [vmem:[#allocation308_spill] sm:$0xff]  ;;  %v14743_v5 = vld [vmem:[#allocation302_spill] sm:$0xff] }
 0xe28   : > { %4953 = vrot.lane.b32.xlu0 %v12060_v29, %s14484_s10  ;;  %v12181_v29 = vmul.f32 %v14736_v12, %v14739_v30  ;;  %v12196_v16 = vmul.f32 %v14675_v47, %v14742_v31  ;;  %v3689_v18 = vadd.f32 %v3681_v60, %v3421_v53  ;;  %v3707_v27 = vadd.f32 %v3699_v24, %v3439_v22  ;;  %v14744_v30 = vld [vmem:[#allocation315_spill] sm:$0xff]  ;;  %v14745_v22 = vld [vmem:[#allocation316_spill] sm:$0xff] }
 0xe29   : > { %v12200_v12 = vmul.f32 %v11517_v58, %v14742_v31  ;;  %v3691_v59 = vadd.f32 %v3683_v44, %v3423_v32  ;;  %v3777_v45 = vsel %vm307_vm7, %v14743_v5, 0.0  ;;  %v3900_v53 = vsel %vm306_vm6, %v14744_v30, 0.0  ;;  %v14746_v31 = vld [vmem:[#allocation318_spill] sm:$0xff] }
 0xe2a   : > { %4959 = vrot.lane.b32.xlu1 %v12094_v33, %s14484_s10  ;;  %v3899_v60 = vsel %vm306_vm6, %v14745_v22, 0.0  ;;  %v3726_v24 = vadd.f32 %v3718_v10, %v3690_v14  ;;  %v3744_v61 = vadd.f32 %v3736_v51, %v3708_v7  ;;  %v3785_v4 = vmul.f32 %v11639_v43, %v3775_v23 }
 0xe2b   : > { %v3709_v33 = vadd.f32 %v3701_v54, %v3441_v9  ;;  %v3804_v32 = vmul.f32 %v11652_v55, %v3776_v28  ;;  %v3803_v44 = vmul.f32 %v11652_v55, %v3775_v23  ;;  %v3901_v5 = vsel %vm306_vm6, %v14746_v31, 0.0 }
 0xe2c   : > { %4957 = vrot.lane.b32.xlu0 %v12089_v20, %s14484_s10  ;;  %v3786_v20 = vmul.f32 %v11639_v43, %v3776_v28  ;;  %v3725_v30 = vadd.f32 %v3717_v26, %v3689_v18  ;;  %v3787_v17 = vmul.f32 %v11639_v43, %v3777_v45  ;;  %v3910_v22 = vmul.f32 %v11725_v56, %v3900_v53 }
 0xe2d   : > { %v3909_v10 = vmul.f32 %v11725_v56, %v3899_v60  ;;  %v3743_v51 = vadd.f32 %v3735_v49, %v3707_v27  ;;  %v3727_v9 = vadd.f32 %v3719_v46, %v3691_v59  ;;  %v3805_v14 = vmul.f32 %v11652_v55, %v3777_v45  ;;  %v14747_v49 = vld [vmem:[#allocation324_spill] sm:$0xff]  ;;  %v14748_v59 = vld [vmem:[#allocation326_spill] sm:$0xff] }
 0xe2e   : > { %v3927_v7 = vmul.f32 %v11728_v40, %v3899_v60  ;;  %v3794_v54 = vadd.f32 %v3786_v20, %v3726_v24  ;;  %v3793_v28 = vadd.f32 %v3785_v4, %v3725_v30  ;;  %v3928_v23 = vmul.f32 %v11728_v40, %v3900_v53  ;;  %v14749_v53 = vld [vmem:[#allocation307_spill] sm:$0xff] }
 0xe2f   : > { %v3911_v26 = vmul.f32 %v11725_v56, %v3901_v5  ;;  %v3812_v43 = vadd.f32 %v3804_v32, %v3744_v61  ;;  %v3811_v18 = vadd.f32 %v3803_v44, %v3743_v51  ;;  %v3745_v31 = vadd.f32 %v3737_v2, %v3709_v33  ;;  %v14751_v20 = vld [vmem:[#allocation323_spill] sm:$0xff]  ;;  %v14752_v32 = vld [vmem:[#allocation342_spill] sm:$0xff] }
 0xe30   : > { %4961 = vrot.lane.b32.xlu0 %v12113_v38, %s14484_s10  ;;  %v3929_v50 = vmul.f32 %v11728_v40, %v3901_v5  ;;  %v3795_v34 = vadd.f32 %v3787_v17, %v3727_v9  ;;  %v3918_v63 = vadd.f32 %v3910_v22, %v3794_v54  ;;  %v3917_v38 = vadd.f32 %v3909_v10, %v3793_v28  ;;  %v14750_v40 = vld [vmem:[#allocation28_spill] sm:$0xff]  ;;  %v14753_v51 = vld [vmem:[#allocation103_spill] sm:$0xff]  ;;  %s12265_s10 = sld [smem:[#allocation2 + $0x63]] }
 0xe31   : > { %v4003_v55 = vsel %vm307_vm7, %v14747_v49, 0.0  ;;  %v3813_v46 = vadd.f32 %v3805_v14, %v3745_v31  ;;  %v3935_v27 = vadd.f32 %v3927_v7, %v3811_v18  ;;  %v4005_v45 = vsel %vm307_vm7, %v14748_v59, 0.0 }
 0xe32   : > { %v12240_v56 = vmul.f32 %v14675_v47, %v14749_v53  ;;  %v3936_v2 = vadd.f32 %v3928_v23, %v3812_v43  ;;  %v3919_v60 = vadd.f32 %v3911_v26, %v3795_v34  ;;  %v4127_v17 = vsel %vm306_vm6, %v14750_v40, 0.0 }
 0xe33   : > { %v4192_v24 = vmul.f32 %v11517_v58, %v14749_v53  ;;  %v3937_v61 = vadd.f32 %v3929_v50, %v3813_v46  ;;  %v4004_v4 = vsel %vm307_vm7, %v14751_v20, 0.0  ;;  %v4013_v33 = vmul.f32 %v11791_v6, %v4003_v55  ;;  %v14754_v46 = vld [vmem:[#allocation310_spill] sm:$0xff] }
 0xe34   : > { %v4129_v44 = vsel %vm306_vm6, %v14752_v32, 0.0  ;;  %v3954_v34 = vadd.f32 %v12162_v8, %v3918_v63  ;;  %v3953_v5 = vadd.f32 %v3945_v15, %v3917_v38  ;;  %v4031_v30 = vmul.f32 %v11818_v3, %v4003_v55 }
 0xe35   : > { %v4015_v22 = vmul.f32 %v11791_v6, %v4005_v45  ;;  %v3971_v10 = vadd.f32 %v12177_v41, %v3935_v27  ;;  %v4033_v50 = vmul.f32 %v11818_v3, %v4005_v45  ;;  %v4128_v9 = vsel %vm306_vm6, %v14753_v51, 0.0 }
 0xe36   : > { %v4137_v14 = vmul.f32 %v11861_v57, %v4127_v17  ;;  %v4014_v63 = vmul.f32 %v11791_v6, %v4004_v4  ;;  %v3955_v8 = vadd.f32 %v12181_v29, %v3919_v60  ;;  %v4155_v15 = vmul.f32 %v11875_v1, %v4127_v17 }
 0xe37   : > { %v4139_v41 = vmul.f32 %v11861_v57, %v4129_v44  ;;  %v4032_v7 = vmul.f32 %v11818_v3, %v4004_v4  ;;  %v4021_v54 = vadd.f32 %v4013_v33, %v3953_v5  ;;  %v3973_v28 = vadd.f32 %v12185_v11, %v3937_v61 }
 0xe38   : > { %v4157_v23 = vmul.f32 %v11875_v1, %v4129_v44  ;;  %v3972_v26 = vadd.f32 %v12171_v19, %v3936_v2  ;;  %v4039_v43 = vadd.f32 %v4031_v30, %v3971_v10  ;;  %v4023_v18 = vadd.f32 %v4015_v22, %v3955_v8 }
 0xe39   : > { %v4138_v31 = vmul.f32 %v11861_v57, %v4128_v9  ;;  %v4041_v6 = vadd.f32 %v4033_v50, %v3973_v28  ;;  %v4156_v29 = vmul.f32 %v11875_v1, %v4128_v9  ;;  %v4145_v38 = vadd.f32 %v4137_v14, %v4021_v54 }
 0xe3a   : > { %v4231_v3 = vsel %vm307_vm7, %v11887_v21, 0.0  ;;  %v4022_v49 = vadd.f32 %v4014_v63, %v3954_v34  ;;  %v4163_v11 = vadd.f32 %v4155_v15, %v4039_v43  ;;  %v4147_v55 = vadd.f32 %v4139_v41, %v4023_v18 }
 0xe3b   : > { %v4175_v19 = vmul.f32 %v14675_v47, %v14754_v46  ;;  %v4040_v27 = vadd.f32 %v4032_v7, %v3972_v26  ;;  %v4165_v59 = vadd.f32 %v4157_v23, %v4041_v6  ;;  %v4193_v57 = vmul.f32 %v11517_v58, %v14754_v46 }
 0xe3c   : > { %v4233_v1 = vsel %vm307_vm7, %v11911_v37, 0.0  ;;  %v4146_v45 = vadd.f32 %v4138_v31, %v4022_v49  ;;  %v4241_v53 = vmul.f32 %v11927_v25, %v4231_v3  ;;  %v4259_v21 = vmul.f32 %v11930_v36, %v4231_v3 }
 0xe3d   : > { %v4232_v2 = vsel %vm307_vm7, %v11914_v52, 0.0  ;;  %v4164_v60 = vadd.f32 %v4156_v29, %v4040_v27  ;;  %v4181_v47 = vadd.f32 %v12196_v16, %v4145_v38  ;;  %v12294_v40 = vstv %s12263_s5  ;;  %s12507_s5 = sld [smem:[#allocation2 + $0x6b]] }
 0xe3e   : > { %v12297_v17 = vstv %s12265_s10  ;;  %v4199_v58 = vadd.f32 %v12200_v12, %v4163_v11  ;;  %v4183_v61 = vadd.f32 %v4175_v19, %v4147_v55  ;;  %v4243_v37 = vmul.f32 %v11927_v25, %v4233_v1  ;;  %s12527_s10 = sld [smem:[#allocation2 + $0x6c]] }
 0xe3f   : > { %v4261_v20 = vmul.f32 %v11930_v36, %v4233_v1  ;;  %v4242_v33 = vmul.f32 %v11927_v25, %v4232_v2  ;;  %v4260_v32 = vmul.f32 %v11930_v36, %v4232_v2  ;;  %v4201_v52 = vadd.f32 %v4193_v57, %v4165_v59 }
 0xe40   : > { %v4388_v4 = vpop.permute.xlu1 %4387  ;;  %v4249_v44 = vadd.f32 %v4241_v53, %v4181_v47  ;;  %v4267_v34 = vadd.f32 %v4259_v21, %v4199_v58  ;;  %v4182_v30 = vadd.f32 %v12240_v56, %v4146_v45  ;;  %v4200_v22 = vadd.f32 %v4192_v24, %v4164_v60  ;;  %v14755_v60 = vld [vmem:[#allocation335_spill] sm:$0xff] }
 0xe41   : > { %v4411_v16 = vsel %vm306_vm6, %v4388_v4, 0.0  ;;  %v4251_v25 = vadd.f32 %v4243_v37, %v4183_v61  ;;  %v4269_v10 = vadd.f32 %v4261_v20, %v4201_v52  ;;  %v4456_v11 = vstv %s12309_s9  ;;  %v14757_v52 = vld [vmem:[#allocation119_spill] sm:$0xff]  ;;  %s12529_s9 = sld [smem:[#allocation2 + $0x6d]] }
 0xe42   : > { %v4421_v5 = vmul.f32 %v12294_v40, %v4411_v16  ;;  %v4439_v12 = vmul.f32 %v12297_v17, %v4411_v16  ;;  %v4250_v14 = vadd.f32 %v4242_v33, %v4182_v30  ;;  %v4268_v63 = vadd.f32 %v4260_v32, %v4200_v22  ;;  %v14756_v33 = vld [vmem:[#allocation118_spill] sm:$0xff] }
 0xe43   : > { %v4474_v55 = vstv %s12311_s6  ;;  %v12363_v53 = vstv %s5422_s8  ;;  %v12365_v21 = vstv %s5423_s30  ;;  %v12372_v47 = vmul.f32 %v4456_v11, %v14755_v60  ;;  %s5291_s6 = sshll.u32 %s6077_s0, 7  ;;  %s5292_s30 = sshll.u32 %s6077_s0, 6 }
 0xe44   : > { %v12313_v36 = vadd.f32 %v4421_v5, %v4249_v44  ;;  %v12315_v50 = vadd.f32 %v4439_v12, %v4267_v34  ;;  %v4390_v51 = vpop.permute.xlu0 %4389  ;;  %v4392_v9 = vpop.permute.xlu1 %4391  ;;  %v12375_v58 = vmul.f32 %v4474_v55, %v14755_v60  ;;  %v12378_v61 = vstv %s12325_s11  ;;  %v14758_v12 = vld [vmem:[#allocation337_spill] sm:$0xff]  ;;  %s12873_s8 = scalar_lea.vmem [#allocation9], %s5291_s6  ;;  %s5450_s11 = sshll.u32 %s5916_s19, 11 }
 0xe45   : > { %v4412_v8 = vsel %vm306_vm6, %v4390_v51, 0.0  ;;  %v4413_v56 = vsel %vm306_vm6, %v4392_v9, 0.0  ;;  %v12381_v37 = vstv %s12327_s29  ;;  %v12400_v30 = vmul.f32 %v4456_v11, %v14758_v12  ;;  %v14760_v9 = vld [vmem:[#allocation338_spill] sm:$0xff]  ;;  %s5127_s29 = sshll.u32 %s12873_s8, 4  ;;  %s12958_s29 = int_to_ptr.vmem [resolvable:$true] %s5127_s29 }
 0xe46   : > { %v4422_v24 = vmul.f32 %v12294_v40, %v4412_v8  ;;  %v4440_v15 = vmul.f32 %v12297_v17, %v4412_v8  ;;  %v4423_v41 = vmul.f32 %v12294_v40, %v4413_v56  ;;  %v4441_v7 = vmul.f32 %v12297_v17, %v4413_v56  ;;  %v14761_v8 = vld [vmem:[#allocation60_spill] sm:$0xff] }
 0xe47   : > { %v12424_v56 = vmul.f32 %v4456_v11, %v14761_v8 }
 0xe48   : > { %v12329_v54 = vadd.f32 %v4422_v24, %v4250_v14  ;;  %v12331_v28 = vadd.f32 %v4440_v15, %v4268_v63  ;;  %v12333_v23 = vadd.f32 %v4423_v41, %v4251_v25  ;;  %v12335_v26 = vadd.f32 %v4441_v7, %v4269_v10  ;;  %v4396_v18 = vpop.permute.xlu1 %4395  ;;  %v14763_v15 = vld [vmem:[#allocation117_spill] sm:$0xff] }
 0xe49   : > { %v4394_v43 = vpop.permute.xlu0 %4393  ;;  %v4415_v6 = vsel %vm306_vm6, %v4396_v18, 0.0  ;;  %v12414_v14 = vmul.f32 %v4456_v11, %v14760_v9  ;;  %v12421_v63 = vmul.f32 %v4474_v55, %v14760_v9  ;;  %v14764_v7 = vld [vmem:[#allocation353_spill] sm:$0xff]  ;;  %v14773_v9 = vld [vmem:[#allocation100_spill] sm:$0xff] }
 0xe4a   : > { %v4414_v31 = vsel %vm306_vm6, %v4394_v43, 0.0  ;;  %v4425_v3 = vmul.f32 %v12294_v40, %v4415_v6  ;;  %v4443_v49 = vmul.f32 %v12297_v17, %v4415_v6 }
 0xe4b   : > { %v4424_v29 = vmul.f32 %v12294_v40, %v4414_v31  ;;  %v4442_v38 = vmul.f32 %v12297_v17, %v4414_v31 }
 0xe4c   : > { %v12354_v27 = vadd.f32 %v4425_v3, %v11953_v48  ;;  %v12357_v59 = vadd.f32 %v4443_v49, %v11955_v39  ;;  %v4400_v1 = vpop.permute.xlu1 %4399  ;;  %v14766_v49 = vld [vmem:[#allocation45_spill] sm:$0xff] }
 0xe4d   : > { %v12348_v46 = vadd.f32 %v4424_v29, %v11959_v62  ;;  %v12351_v19 = vadd.f32 %v4442_v38, %v11961_v13  ;;  %v4398_v57 = vpop.permute.xlu0 %4397  ;;  %v4417_v62 = vsel %vm306_vm6, %v4400_v1, 0.0  ;;  %v14765_v29 = vld [vmem:[#allocation23_spill] sm:$0xff]  ;;  %v12459_v1 = vmul.f32 %v4474_v55, %v14766_v49 }
 0xe4e   : > { %v4416_v45 = vsel %vm306_vm6, %v4398_v57, 0.0  ;;  %v4427_v2 = vmul.f32 %v12294_v40, %v4417_v62  ;;  %v4445_v39 = vmul.f32 %v12297_v17, %v4417_v62  ;;  %v12446_v38 = vmul.f32 %v4456_v11, %v14765_v29 }
 0xe4f   : > { %v4426_v13 = vmul.f32 %v12294_v40, %v4416_v45  ;;  %v4444_v48 = vmul.f32 %v12297_v17, %v4416_v45  ;;  %v12453_v3 = vmul.f32 %v4474_v55, %v14765_v29  ;;  %v12456_v57 = vmul.f32 %v4456_v11, %v14766_v49  ;;  %v14767_v45 = vld [vmem:[#allocation97_spill] sm:$0xff] }
 0xe50   : > { %v12390_v32 = vadd.f32 %v4427_v2, %v14756_v33  ;;  %v12393_v16 = vadd.f32 %v4445_v39, %v14757_v52  ;;  %v12395_v34 = vpop.permute.xlu1 %4491  ;;  %v12463_v62 = vmul.f32 %v12363_v53, %v14767_v45  ;;  %v14770_v33 = vld [vmem:[#allocation55_spill] sm:$0xff]  ;;  %v14779_v49 = vld [vmem:[#allocation53_spill] sm:$0xff] }
 0xe51   : > { %v12384_v20 = vadd.f32 %v4426_v13, %v11990_v35  ;;  %v12387_v4 = vadd.f32 %v4444_v48, %v11992_v42  ;;  %v12403_v35 = vmul.f32 %v4474_v55, %v14758_v12  ;;  %v14759_v42 = vld [vmem:[#allocation21_spill] sm:$0xff]  ;;  %v12471_v13 = vmul.f32 %v12365_v21, %v14767_v45  ;;  %v14768_v48 = vld [vmem:[#allocation332_spill] sm:$0xff] }
 0xe52   : > { %v4402_v44 = vpop.permute.xlu0 %4401  ;;  %v12406_v22 = vmul.f32 %v4456_v11, %v14759_v42  ;;  %v12411_v51 = vmul.f32 %v4474_v55, %v14759_v42  ;;  %v12475_v2 = vmul.f32 %v12363_v53, %v14768_v48  ;;  %v12495_v52 = vmul.f32 %v12363_v53, %v14770_v33 }
 0xe53   : > { %v4418_v5 = vsel %vm306_vm6, %v4402_v44, 0.0  ;;  %v12499_v44 = vmul.f32 %v12365_v21, %v14770_v33  ;;  %v12537_v45 = vmul.f32 %v12363_v53, %v14779_v49 }
 0xe54   : > { %v4428_v25 = vmul.f32 %v12294_v40, %v4418_v5  ;;  %v4446_v10 = vmul.f32 %v12297_v17, %v4418_v5  ;;  %v12427_v40 = vmul.f32 %v4474_v55, %v14761_v8  ;;  %v14762_v17 = vld [vmem:[#allocation24_spill] sm:$0xff]  ;;  %v12440_v31 = vpop.permute.xlu1 %4495  ;;  %v14771_v5 = vld [vmem:[#allocation59_spill] sm:$0xff]  ;;  %v12517_v8 = vmul.f32 %v12363_v53, %v14773_v9 }
 0xe55   : > { %v12430_v24 = vmul.f32 %v4456_v11, %v14762_v17  ;;  %v12443_v6 = vmul.f32 %v4474_v55, %v14762_v17  ;;  %v12479_v11 = vmul.f32 %v12365_v21, %v14768_v48  ;;  %v14769_v55 = vld [vmem:[#allocation333_spill] sm:$0xff]  ;;  %v12503_v12 = vmul.f32 %v12363_v53, %v14771_v5  ;;  %14780 = vst [vmem:[#allocation144_spill] sm:$0xff] %v12537_v45 }
 0xe56   : > { %v12433_v41 = vadd.f32 %v4428_v25, %v14763_v15  ;;  %v12436_v43 = vadd.f32 %v4446_v10, %v14764_v7  ;;  %v12438_v18 = vpop.permute.xlu0 %4493  ;;  %v12483_v39 = vmul.f32 %v12363_v53, %v14769_v55  ;;  %v12491_v60 = vmul.f32 %v12365_v21, %v14769_v55  ;;  %14774 = vst [vmem:[#allocation120_spill] sm:$0xff] %v12517_v8  ;;  %v14776_v15 = vld [vmem:[#allocation336_spill] sm:$0xff]  ;;  %v14782_v55 = vld [vmem:[#allocation339_spill] sm:$0xff]  ;;  %v14788_v45 = vld [vmem:[#allocation25_spill] sm:$0xff] }
 0xe57   : > { %v12513_v10 = vmul.f32 %v12365_v21, %v14771_v5  ;;  %v12521_v17 = vmul.f32 %v12365_v21, %v14773_v9  ;;  %v12525_v7 = vmul.f32 %v12363_v53, %v14776_v15  ;;  %v12533_v29 = vmul.f32 %v12365_v21, %v14776_v15  ;;  %v14785_v9 = vld [vmem:[#allocation102_spill] sm:$0xff] }
 0xe58   : > { %v12509_v25 = vpop.permute.xlu1 %4499  ;;  %v12541_v48 = vmul.f32 %v12365_v21, %v14779_v49  ;;  %v12545_v33 = vmul.f32 %v12378_v61, %v14782_v55  ;;  %v12549_v5 = vmul.f32 %v12381_v37, %v14782_v55  ;;  %v12553_v15 = vmul.f32 %v12378_v61, %v14785_v9  ;;  %v14791_v55 = vld [vmem:[#allocation101_spill] sm:$0xff] }
 0xe59   : > { %14772 = vst [vmem:[#allocation354_spill] sm:$0xff] %v12513_v10  ;;  %14775 = vst [vmem:[#allocation355_spill] sm:$0xff] %v12521_v17  ;;  %v12557_v53 = vmul.f32 %v12381_v37, %v14785_v9  ;;  %v12561_v21 = vmul.f32 %v12378_v61, %v14788_v45  ;;  %v12565_v49 = vmul.f32 %v12381_v37, %v14788_v45  ;;  %v12640_v17 = vstv %s12507_s5 }
 0xe5a   : > { %v4498_v42 = vpop.permute.xlu0 %4497  ;;  %14777 = vst [vmem:[#allocation357_spill] sm:$0xff] %v12525_v7  ;;  %14778 = vst [vmem:[#allocation358_spill] sm:$0xff] %v12533_v29  ;;  %v12573_v9 = vmul.f32 %v12381_v37, %v14791_v55  ;;  %v12619_v29 = vstv %s12450_s12  ;;  %v12622_v7 = vstv %s12465_s14  ;;  %v12643_v8 = vstv %s12527_s10  ;;  %s12956_s12 = scalar_lea.hbm %s13063_s3, %s5450_s11  ;;  %s5109_s14 = scalar_lea.sflag [#allocation4], %s6077_s0 }
 0xe5b   : > { %14781 = vst [vmem:[#allocation121_spill] sm:$0xff] %v12541_v48  ;;  %14783 = vst [vmem:[#allocation356_spill] sm:$0xff] %v12545_v33  ;;  %v12598_v48 = vstv %s12416_s13  ;;  %v12646_v10 = vstv %s12529_s9  ;;  %s12948_s13 = scalar_lea.vmem [#allocation10], %s5292_s30 }
 0xe5c   : > { %14784 = vst [vmem:[#allocation146_spill] sm:$0xff] %v12549_v5  ;;  %14786 = vst [vmem:[#allocation67_spill] sm:$0xff] %v12553_v15  ;;  %v12569_v5 = vmul.f32 %v12378_v61, %v14791_v55  ;;  %v12579_v33 = vpop.permute.xlu1 %4503 }
 0xe5d   : > { %14787 = vst [vmem:[#allocation68_spill] sm:$0xff] %v12557_v53  ;;  %14789 = vst [vmem:[#allocation359_spill] sm:$0xff] %v12561_v21  ;;  %v14794_v53 = vld [vmem:[#allocation340_spill] sm:$0xff] }
 0xe5e   : > { %14790 = vst [vmem:[#allocation122_spill] sm:$0xff] %v12565_v49  ;;  %14792 = vst [vmem:[#allocation387_spill] sm:$0xff] %v12569_v5  ;;  %v12577_v15 = vmul.f32 %v12378_v61, %v14794_v53  ;;  %v4502_v21 = vpop.permute.xlu0 %4501  ;;  %v12583_v45 = vmul.f32 %v12381_v37, %v14794_v53  ;;  %v14797_v5 = vld [vmem:[#allocation274_spill] sm:$0xff] }
 0xe5f   : > { %14793 = vst [vmem:[#allocation388_spill] sm:$0xff] %v12573_v9  ;;  %v12587_v49 = vmul.f32 %v12378_v61, %v14797_v5  ;;  %v12591_v55 = vmul.f32 %v12381_v37, %v14797_v5  ;;  %v14800_v9 = vld [vmem:[#allocation26_spill] sm:$0xff]  ;;  %14806 = vst [vmem:[#allocation61_spill] sm:$0xff] %v12622_v7  ;;  %v4465_v7 = vadd.f32 %v12372_v47, %v12313_v36  ;;  %v4517_v36 = vsel %vm307_vm7, %v12440_v31, 0.0 }
 0xe60   : > { %14795 = vst [vmem:[#allocation123_spill] sm:$0xff] %v12577_v15  ;;  %14796 = vst [vmem:[#allocation360_spill] sm:$0xff] %v12583_v45  ;;  %v12595_v15 = vmul.f32 %v12378_v61, %v14800_v9  ;;  %v12602_v53 = vmul.f32 %v12381_v37, %v14800_v9  ;;  %v14803_v45 = vld [vmem:[#allocation257_spill] sm:$0xff]  ;;  %v4515_v9 = vsel %vm307_vm7, %v12395_v34, 0.0  ;;  %v4483_v34 = vadd.f32 %v12375_v58, %v12315_v50 }
 0xe61   : > { %14798 = vst [vmem:[#allocation71_spill] sm:$0xff] %v12587_v49  ;;  %14799 = vst [vmem:[#allocation361_spill] sm:$0xff] %v12591_v55  ;;  %v12606_v49 = vmul.f32 %v12378_v61, %v14803_v45  ;;  %v12610_v5 = vmul.f32 %v12381_v37, %v14803_v45  ;;  %v12613_v55 = vstv %s12418_s26  ;;  %v12631_v61 = vstv %s12485_s23  ;;  %v4616_v45 = vpop.permute.xlu1 %4615  ;;  %s5866_s23 = smov [#allocation9]  }
 0xe62   : > { %14801 = vst [vmem:[#allocation29_spill] sm:$0xff] %v12595_v15  ;;  %14802 = vst [vmem:[#allocation72_spill] sm:$0xff] %v12602_v53  ;;  %v12616_v15 = vstv %s12448_s22  ;;  %v12628_v53 = vstv %s12467_s20  ;;  %v4506_v37 = vpop.permute.xlu0 %4505  ;;  %v4485_v50 = vadd.f32 %v12411_v51, %v12335_v26  ;;  %v4486_v47 = vadd.f32 %v12421_v63, %v12351_v19  ;;  %s5750_s20 = scalar_lea.vmem %s12958_s29, 2048 }
 0xe63   : > { %14804 = vst [vmem:[#allocation124_spill] sm:$0xff] %v12606_v49  ;;  %14805 = vst [vmem:[#allocation51_spill] sm:$0xff] %v12610_v5  ;;  %v12634_v49 = vstv %s12487_s7  ;;  %v12637_v5 = vstv %s12505_s25  ;;  %v4469_v58 = vadd.f32 %v12424_v56, %v12354_v27  ;;  %v4527_v51 = vmul.f32 %v12598_v48, %v4517_v36  ;;  %p5751_p13 = scmp.ne.s32.totalorder %s12958_s29, %s5750_s20  ;;  %s5754_s7 = sshll.u32 %s5866_s23, 4  ;;  %s5755_s7 = int_to_ptr.vmem [resolvable:$false] %s5754_s7 }
 0xe64   : > { %14807 = vst [vmem:[#allocation363_spill] sm:$0xff] %v12631_v61  ;;  %14808 = vst [vmem:[#allocation81_spill] sm:$0xff] %v12634_v49  ;;  %v4466_v61 = vadd.f32 %v12400_v30, %v12329_v54  ;;  %v4516_v49 = vsel %vm307_vm7, %v12438_v18, 0.0  ;;  %v4468_v54 = vadd.f32 %v12414_v14, %v12348_v46  ;;  %v4518_v30 = vsel %vm307_vm7, %v4498_v42, 0.0  ;;  %s5756_s25 = scalar_lea.vmem %s5755_s7, 4096  ;;  %p5757_p9 = scmp.lt.s32.totalorder %s12958_s29, %s5755_s7 }
 0xe65   : > { %14809 = vst [vmem:[#allocation362_spill] sm:$0xff] %v12637_v5  ;;  %14810 = vst [vmem:[#allocation83_spill] sm:$0xff] %v12643_v8  ;;  %v4525_v5 = vmul.f32 %v12598_v48, %v4515_v9  ;;  %v4484_v8 = vadd.f32 %v12403_v35, %v12331_v28  ;;  %v4543_v28 = vmul.f32 %v12613_v55, %v4515_v9  ;;  %v4519_v63 = vsel %vm307_vm7, %v12509_v25, 0.0  ;;  %p5752_p0 = pnand %p5751_p13, %p14841_p5  ;;  %p5758_p10 = scmp.lt.s32.totalorder %s5756_s25, %s5750_s20 }
 0xe66   : > { %14811 = vst [vmem:[#allocation139_spill] sm:$0xff] %v12646_v10  ;;  %v4467_v10 = vadd.f32 %v12406_v22, %v12333_v23  ;;  %v4526_v23 = vmul.f32 %v12598_v48, %v4516_v49  ;;  %v4487_v35 = vadd.f32 %v12427_v40, %v12357_v59  ;;  %v4618_v26 = vpop.permute.xlu0 %4617  ;;  %v4620_v22 = vpop.permute.xlu1 %4619  ;;  %v4544_v46 = vmul.f32 %v12613_v55, %v4516_v49 }
 0xe67   : > { %v4470_v19 = vadd.f32 %v12430_v24, %v12384_v20  ;;  %v4488_v27 = vadd.f32 %v12443_v6, %v12387_v4  ;;  %v4533_v14 = vadd.f32 %v4525_v5, %v4465_v7  ;;  %v4471_v59 = vadd.f32 %v12446_v38, %v12390_v32  ;;  %p5753_p8 = pneg %p5752_p0  ;;  %p5759_p6 = por %p5758_p10, %p5757_p9 }
 0xe68   : > { %v4489_v56 = vadd.f32 %v12453_v3, %v12393_v16  ;;  %v4545_v40 = vmul.f32 %v12613_v55, %v4517_v36  ;;  %v4528_v18 = vmul.f32 %v12598_v48, %v4518_v30  ;;  %v4546_v20 = vmul.f32 %v12613_v55, %v4518_v30 }
 0xe69   : > { %v4520_v4 = vsel %vm307_vm7, %v4502_v21, 0.0  ;;  %v4551_v24 = vadd.f32 %v4543_v28, %v4483_v34  ;;  %v4534_v31 = vadd.f32 %v4526_v23, %v4466_v61  ;;  %v4472_v6 = vadd.f32 %v12456_v57, %v12433_v41  ;;  %p5760_p11 = pnand %p5759_p6, %p5753_p8 }
 0xe6a   : > { %v4490_v32 = vadd.f32 %v12459_v1, %v12436_v43  ;;  %v4622_v38 = vpop.permute.xlu0 %4621  ;;  %v4624_v42 = vpop.permute.xlu1 %4623  ;;  %v4552_v16 = vadd.f32 %v4544_v46, %v4484_v8  ;;  %v4535_v3 = vadd.f32 %v4527_v51, %v4467_v10  ;;  %v4529_v25 = vmul.f32 %v12598_v48, %v4519_v63 }
 0xe6b   : > { %v4639_v7 = vsel %vm306_vm6, %v4616_v45, 0.0  ;;  %v4547_v49 = vmul.f32 %v12613_v55, %v4519_v63  ;;  %v4530_v21 = vmul.f32 %v12598_v48, %v4520_v4  ;;  %v4521_v41 = vsel %vm307_vm7, %v12579_v33, 0.0 }
 0xe6c   : > { %v4522_v43 = vsel %vm307_vm7, %v4506_v37, 0.0  ;;  %v4553_v57 = vadd.f32 %v4545_v40, %v4485_v50  ;;  %v4536_v1 = vadd.f32 %v4528_v18, %v4468_v54  ;;  %v4554_v8 = vadd.f32 %v4546_v20, %v4486_v47 }
 0xe6d   : > { %v4640_v10 = vsel %vm306_vm6, %v4618_v26, 0.0  ;;  %v4548_v5 = vmul.f32 %v12613_v55, %v4520_v4  ;;  %v4649_v9 = vmul.f32 %v12616_v15, %v4639_v7  ;;  %v4667_v61 = vmul.f32 %v12619_v29, %v4639_v7 }
 0xe6e   : > { %v4641_v45 = vsel %vm306_vm6, %v4620_v22, 0.0  ;;  %v4626_v34 = vpop.permute.xlu0 %4625  ;;  %v4628_v33 = vpop.permute.xlu1 %4627  ;;  %v4537_v36 = vadd.f32 %v4529_v25, %v4469_v58  ;;  %v4531_v37 = vmul.f32 %v12598_v48, %v4521_v41  ;;  %v4549_v50 = vmul.f32 %v12613_v55, %v4521_v41 }
 0xe6f   : > { %v4532_v54 = vmul.f32 %v12598_v48, %v4522_v43  ;;  %v4555_v47 = vadd.f32 %v4547_v49, %v4487_v35  ;;  %v4538_v28 = vadd.f32 %v4530_v21, %v4470_v19  ;;  %v4650_v23 = vmul.f32 %v12616_v15, %v4640_v10 }
 0xe70   : > { %v4642_v30 = vsel %vm306_vm6, %v4622_v38, 0.0  ;;  %v4668_v26 = vmul.f32 %v12619_v29, %v4640_v10  ;;  %v4651_v22 = vmul.f32 %v12616_v15, %v4641_v45  ;;  %v4669_v46 = vmul.f32 %v12619_v29, %v4641_v45 }
 0xe71   : > { %v4643_v58 = vsel %vm306_vm6, %v4624_v42, 0.0  ;;  %v4556_v51 = vadd.f32 %v4548_v5, %v4488_v27  ;;  %v4550_v63 = vmul.f32 %v12613_v55, %v4522_v43  ;;  %v4657_v48 = vadd.f32 %v4649_v9, %v4533_v14 }
 0xe72   : > { %v4675_v35 = vadd.f32 %v4667_v61, %v4551_v24  ;;  %v4630_v19 = vpop.permute.xlu0 %4629  ;;  %v4720_v40 = vpop.permute.xlu1 %4719  ;;  %v4539_v18 = vadd.f32 %v4531_v37, %v4471_v59  ;;  %v4557_v20 = vadd.f32 %v4549_v50, %v4489_v56  ;;  %v4540_v4 = vadd.f32 %v4532_v54, %v4472_v6 }
 0xe73   : > { %v4652_v38 = vmul.f32 %v12616_v15, %v4642_v30  ;;  %v4670_v25 = vmul.f32 %v12619_v29, %v4642_v30  ;;  %v4653_v7 = vmul.f32 %v12616_v15, %v4643_v58  ;;  %v4644_v49 = vsel %vm306_vm6, %v4626_v34, 0.0 }
 0xe74   : > { %v4645_v27 = vsel %vm306_vm6, %v4628_v33, 0.0  ;;  %v4658_v55 = vadd.f32 %v4650_v23, %v4534_v31  ;;  %v4676_v14 = vadd.f32 %v4668_v26, %v4552_v16  ;;  %v4659_v24 = vadd.f32 %v4651_v22, %v4535_v3 }
 0xe75   : > { %v4677_v42 = vadd.f32 %v4669_v46, %v4553_v57  ;;  %v4558_v21 = vadd.f32 %v4550_v63, %v4490_v32  ;;  %v4671_v59 = vmul.f32 %v12619_v29, %v4643_v58  ;;  %v4693_v56 = vadd.f32 %v12463_v62, %v4657_v48  ;;  %v14814_v48 = vld [vmem:[#allocation120_spill] sm:$0xff] }
 0xe76   : > { %v4711_v6 = vadd.f32 %v12471_v13, %v4675_v35  ;;  %v4722_v41 = vpop.permute.xlu0 %4721  ;;  %v4724_v43 = vpop.permute.xlu1 %4723  ;;  %v4654_v10 = vmul.f32 %v12616_v15, %v4644_v49  ;;  %v4672_v5 = vmul.f32 %v12619_v29, %v4644_v49  ;;  %v4655_v9 = vmul.f32 %v12616_v15, %v4645_v27 }
 0xe77   : > { %v4646_v31 = vsel %vm306_vm6, %v4630_v19, 0.0  ;;  %v4660_v16 = vadd.f32 %v4652_v38, %v4536_v1  ;;  %v4678_v3 = vadd.f32 %v4670_v25, %v4554_v8  ;;  %v4661_v32 = vadd.f32 %v4653_v7, %v4537_v36  ;;  %v14815_v19 = vld [vmem:[#allocation355_spill] sm:$0xff] }
 0xe78   : > { %v4673_v57 = vmul.f32 %v12619_v29, %v4645_v27  ;;  %v4694_v62 = vadd.f32 %v12475_v2, %v4658_v55  ;;  %v4712_v13 = vadd.f32 %v12479_v11, %v4676_v14  ;;  %v4695_v61 = vadd.f32 %v12483_v39, %v4659_v24  ;;  %v14817_v14 = vld [vmem:[#allocation358_spill] sm:$0xff] }
 0xe79   : > { %v4713_v45 = vadd.f32 %v12491_v60, %v4677_v42  ;;  %v4679_v34 = vadd.f32 %v4671_v59, %v4555_v47  ;;  %v4656_v33 = vmul.f32 %v12616_v15, %v4646_v31  ;;  %v4674_v37 = vmul.f32 %v12619_v29, %v4646_v31  ;;  %v14812_v47 = vld [vmem:[#allocation61_spill] sm:$0xff] }
 0xe7a   : > { %v4743_v1 = vsel %vm307_vm7, %v4720_v40, 0.0  ;;  %v4726_v8 = vpop.permute.xlu0 %4725  ;;  %v4728_v36 = vpop.permute.xlu1 %4727  ;;  %v4662_v50 = vadd.f32 %v4654_v10, %v4538_v28  ;;  %v4680_v54 = vadd.f32 %v4672_v5, %v4556_v51  ;;  %v4663_v23 = vadd.f32 %v4655_v9, %v4539_v18  ;;  %v14813_v51 = vld [vmem:[#allocation354_spill] sm:$0xff]  ;;  %v14816_v18 = vld [vmem:[#allocation357_spill] sm:$0xff] }
 0xe7b   : > { %v4744_v2 = vsel %vm307_vm7, %v4722_v41, 0.0  ;;  %v4681_v11 = vadd.f32 %v4673_v57, %v4557_v20  ;;  %v4696_v39 = vadd.f32 %v12495_v52, %v4660_v16  ;;  %v4714_v60 = vadd.f32 %v12499_v44, %v4678_v3  ;;  %v14818_v41 = vld [vmem:[#allocation144_spill] sm:$0xff]  ;;  %v14819_v10 = vld [vmem:[#allocation121_spill] sm:$0xff] }
 0xe7c   : > { %v4697_v15 = vadd.f32 %v12503_v12, %v4661_v32  ;;  %v4753_v29 = vmul.f32 %v14812_v47, %v4743_v1  ;;  %v4771_v30 = vmul.f32 %v12628_v53, %v4743_v1  ;;  %v4745_v26 = vsel %vm307_vm7, %v4724_v43, 0.0 }
 0xe7d   : > { %v4746_v28 = vsel %vm307_vm7, %v4726_v8, 0.0  ;;  %v4664_v22 = vadd.f32 %v4656_v33, %v4540_v4  ;;  %v4682_v46 = vadd.f32 %v4674_v37, %v4558_v21  ;;  %v4754_v58 = vmul.f32 %v14812_v47, %v4744_v2 }
 0xe7e   : > { %v4715_v52 = vadd.f32 %v14813_v51, %v4679_v34  ;;  %v4730_v63 = vpop.permute.xlu0 %4729  ;;  %v4732_v44 = vpop.permute.xlu1 %4731  ;;  %v4772_v12 = vmul.f32 %v12628_v53, %v4744_v2  ;;  %v4698_v35 = vadd.f32 %v14814_v48, %v4662_v50  ;;  %v4716_v40 = vadd.f32 %v14815_v19, %v4680_v54  ;;  %v14820_v50 = vld [vmem:[#allocation363_spill] sm:$0xff] }
 0xe7f   : > { %v4699_v20 = vadd.f32 %v14816_v18, %v4663_v23  ;;  %v4755_v38 = vmul.f32 %v14812_v47, %v4745_v26  ;;  %v4773_v25 = vmul.f32 %v12628_v53, %v4745_v26  ;;  %v4756_v4 = vmul.f32 %v14812_v47, %v4746_v28  ;;  %v14821_v23 = vld [vmem:[#allocation81_spill] sm:$0xff] }
 0xe80   : > { %v4747_v7 = vsel %vm307_vm7, %v4728_v36, 0.0  ;;  %v4761_v49 = vadd.f32 %v4753_v29, %v4693_v56  ;;  %v4779_v27 = vadd.f32 %v4771_v30, %v4711_v6  ;;  %v4774_v55 = vmul.f32 %v12628_v53, %v4746_v28 }
 0xe81   : > { %v4717_v24 = vadd.f32 %v14817_v14, %v4681_v11  ;;  %v4762_v42 = vadd.f32 %v4754_v58, %v4694_v62  ;;  %v4748_v21 = vsel %vm307_vm7, %v4730_v63, 0.0  ;;  %v4700_v43 = vadd.f32 %v14818_v41, %v4664_v22 }
 0xe82   : > { %v4734_v59 = vpop.permute.xlu0 %4733  ;;  %v4718_v5 = vadd.f32 %v14819_v10, %v4682_v46  ;;  %v4844_v9 = vpop.permute.xlu1 %4843  ;;  %v4757_v31 = vmul.f32 %v14812_v47, %v4747_v7  ;;  %v4775_v16 = vmul.f32 %v12628_v53, %v4747_v7  ;;  %v4749_v56 = vsel %vm307_vm7, %v4732_v44, 0.0 }
 0xe83   : > { %v4867_v6 = vsel %vm306_vm6, %v4844_v9, 0.0  ;;  %v4780_v3 = vadd.f32 %v4772_v12, %v4712_v13  ;;  %v4763_v32 = vadd.f32 %v4755_v38, %v4695_v61  ;;  %v4781_v57 = vadd.f32 %v4773_v25, %v4713_v45 }
 0xe84   : > { %v4764_v62 = vadd.f32 %v4756_v4, %v4696_v39  ;;  %v4782_v34 = vadd.f32 %v4774_v55, %v4714_v60  ;;  %v4758_v33 = vmul.f32 %v14812_v47, %v4748_v21  ;;  %v4776_v37 = vmul.f32 %v12628_v53, %v4748_v21 }
 0xe85   : > { %v4750_v1 = vsel %vm307_vm7, %v4734_v59, 0.0  ;;  %v4759_v8 = vmul.f32 %v14812_v47, %v4749_v56  ;;  %v4777_v36 = vmul.f32 %v12628_v53, %v4749_v56  ;;  %v4877_v54 = vmul.f32 %v14820_v50, %v4867_v6  ;;  %v14823_v59 = vld [vmem:[#allocation146_spill] sm:$0xff] }
 0xe86   : > { %v4895_v2 = vmul.f32 %v14821_v23, %v4867_v6  ;;  %v4846_v13 = vpop.permute.xlu0 %4845  ;;  %v4848_v61 = vpop.permute.xlu1 %4847  ;;  %v4765_v45 = vadd.f32 %v4757_v31, %v4697_v15  ;;  %v4783_v11 = vadd.f32 %v4775_v16, %v4715_v52  ;;  %v4760_v29 = vmul.f32 %v14812_v47, %v4750_v1  ;;  %v14825_v31 = vld [vmem:[#allocation68_spill] sm:$0xff] }
 0xe87   : > { %v4868_v39 = vsel %vm306_vm6, %v4846_v13, 0.0  ;;  %v4869_v60 = vsel %vm306_vm6, %v4848_v61, 0.0  ;;  %v4778_v30 = vmul.f32 %v12628_v53, %v4750_v1  ;;  %v4766_v22 = vadd.f32 %v4758_v33, %v4698_v35  ;;  %v14828_v13 = vld [vmem:[#allocation387_spill] sm:$0xff] }
 0xe88   : > { %v4878_v26 = vmul.f32 %v14820_v50, %v4868_v39  ;;  %v4896_v28 = vmul.f32 %v14821_v23, %v4868_v39  ;;  %v4784_v46 = vadd.f32 %v4776_v37, %v4716_v40  ;;  %v4879_v58 = vmul.f32 %v14820_v50, %v4869_v60  ;;  %v14827_v37 = vld [vmem:[#allocation122_spill] sm:$0xff]  ;;  %v14829_v39 = vld [vmem:[#allocation388_spill] sm:$0xff] }
 0xe89   : > { %v4897_v15 = vmul.f32 %v14821_v23, %v4869_v60  ;;  %v4767_v51 = vadd.f32 %v4759_v8, %v4699_v20  ;;  %v4785_v52 = vadd.f32 %v4777_v36, %v4717_v24  ;;  %v4885_v63 = vadd.f32 %v4877_v54, %v4761_v49 }
 0xe8a   : > { %v4903_v44 = vadd.f32 %v4895_v2, %v4779_v27  ;;  %v4850_v12 = vpop.permute.xlu0 %4849  ;;  %v4852_v48 = vpop.permute.xlu1 %4851  ;;  %v4886_v19 = vadd.f32 %v4878_v26, %v4762_v42  ;;  %v4904_v47 = vadd.f32 %v4896_v28, %v4780_v3  ;;  %v4768_v35 = vadd.f32 %v4760_v29, %v4700_v43  ;;  %v14822_v42 = vld [vmem:[#allocation356_spill] sm:$0xff] }
 0xe8b   : > { %v4870_v53 = vsel %vm306_vm6, %v4850_v12, 0.0  ;;  %v4871_v18 = vsel %vm306_vm6, %v4852_v48, 0.0  ;;  %v4786_v40 = vadd.f32 %v4778_v30, %v4718_v5  ;;  %v4887_v20 = vadd.f32 %v4879_v58, %v4763_v32  ;;  %v14824_v5 = vld [vmem:[#allocation67_spill] sm:$0xff]  ;;  %v14834_v48 = vld [vmem:[#allocation361_spill] sm:$0xff] }
 0xe8c   : > { %v4880_v38 = vmul.f32 %v14820_v50, %v4870_v53  ;;  %v4898_v25 = vmul.f32 %v14821_v23, %v4870_v53  ;;  %v4905_v4 = vadd.f32 %v4897_v15, %v4781_v57  ;;  %v4881_v7 = vmul.f32 %v14820_v50, %v4871_v18  ;;  %v14831_v15 = vld [vmem:[#allocation123_spill] sm:$0xff] }
 0xe8d   : > { %v4899_v49 = vmul.f32 %v14821_v23, %v4871_v18  ;;  %v4921_v21 = vadd.f32 %v14822_v42, %v4885_v63  ;;  %v4939_v41 = vadd.f32 %v14823_v59, %v4903_v44  ;;  %v4922_v9 = vadd.f32 %v14824_v5, %v4886_v19  ;;  %v14832_v44 = vld [vmem:[#allocation360_spill] sm:$0xff] }
 0xe8e   : > { %v4888_v27 = vadd.f32 %v4880_v38, %v4764_v62  ;;  %v4906_v55 = vadd.f32 %v4898_v25, %v4782_v34  ;;  %v4854_v14 = vpop.permute.xlu0 %4853  ;;  %v4856_v24 = vpop.permute.xlu1 %4855  ;;  %v4940_v16 = vadd.f32 %v14825_v31, %v4904_v47  ;;  %v4889_v57 = vadd.f32 %v4881_v7, %v4765_v45  ;;  %v14826_v34 = vld [vmem:[#allocation359_spill] sm:$0xff] }
 0xe8f   : > { %v4872_v43 = vsel %vm306_vm6, %v4854_v14, 0.0  ;;  %v4873_v10 = vsel %vm306_vm6, %v4856_v24, 0.0  ;;  %v4907_v62 = vadd.f32 %v4899_v49, %v4783_v11  ;;  %v4923_v33 = vadd.f32 %v14826_v34, %v4887_v20  ;;  %v14836_v49 = vld [vmem:[#allocation72_spill] sm:$0xff] }
 0xe90   : > { %v4882_v56 = vmul.f32 %v14820_v50, %v4872_v43  ;;  %v4900_v6 = vmul.f32 %v14821_v23, %v4872_v43  ;;  %v4883_v3 = vmul.f32 %v14820_v50, %v4873_v10  ;;  %v4901_v32 = vmul.f32 %v14821_v23, %v4873_v10  ;;  %v14840_v10 = vld [vmem:[#allocation51_spill] sm:$0xff] }
 0xe91   : > { %v4941_v1 = vadd.f32 %v14827_v37, %v4905_v4  ;;  %v4924_v61 = vadd.f32 %v14828_v13, %v4888_v27  ;;  %v12830_v60 = vadd.f32 %v14829_v39, %v4906_v55  ;;  %v4925_v63 = vadd.f32 %v14831_v15, %v4889_v57  ;;  %v14835_v4 = vld [vmem:[#allocation29_spill] sm:$0xff]  ;;  %v14837_v55 = vld [vmem:[#allocation83_spill] sm:$0xff] }
 0xe92   : > { %v4890_v8 = vadd.f32 %v4882_v56, %v4766_v22  ;;  %v4908_v36 = vadd.f32 %v4900_v6, %v4784_v46  ;;  %v4858_v54 = vpop.permute.xlu0 %4857  ;;  %v4948_v2 = vpop.permute.xlu1 %4947  ;;  %v4891_v29 = vadd.f32 %v4883_v3, %v4767_v51  ;;  %v4909_v30 = vadd.f32 %v4901_v32, %v4785_v52  ;;  %v14830_v22 = vld [vmem:[#allocation362_spill] sm:$0xff]  ;;  %v14833_v52 = vld [vmem:[#allocation71_spill] sm:$0xff] }
 0xe93   : > { %v4874_v45 = vsel %vm306_vm6, %v4858_v54, 0.0  ;;  %v4971_v11 = vsel %vm307_vm7, %v4948_v2, 0.0  ;;  %v12843_v51 = vadd.f32 %v14832_v44, %v4907_v62 }
 0xe94   : > { %v4884_v26 = vmul.f32 %v14820_v50, %v4874_v45  ;;  %v4902_v28 = vmul.f32 %v14821_v23, %v4874_v45  ;;  %v4981_v46 = vmul.f32 %v14830_v22, %v4971_v11  ;;  %v4999_v58 = vmul.f32 %v12640_v17, %v4971_v11 }
 0xe95   : > { %v12846_v12 = vadd.f32 %v14833_v52, %v4890_v8  ;;  %v12849_v19 = vadd.f32 %v14834_v48, %v4908_v36  ;;  %v12856_v7 = vadd.f32 %v14835_v4, %v4891_v29  ;;  %v12859_v27 = vadd.f32 %v14836_v49, %v4909_v30 }
 0xe96   : > { %v4892_v47 = vadd.f32 %v4884_v26, %v4768_v35  ;;  %v4910_v50 = vadd.f32 %v4902_v28, %v4786_v40  ;;  %v4989_v53 = vadd.f32 %v4981_v46, %v4921_v21  ;;  %v5007_v23 = vadd.f32 %v4999_v58, %v4939_v41  ;;  %v4950_v18 = vpop.permute.xlu0 %4949  ;;  %v4952_v38 = vpop.permute.xlu1 %4951  ;;  %v14838_v35 = vld [vmem:[#allocation139_spill] sm:$0xff]  ;;  %v14839_v41 = vld [vmem:[#allocation124_spill] sm:$0xff] }
 0xe97   : > { %v4972_v25 = vsel %vm307_vm7, %v4950_v18, 0.0  ;;  %v4973_v20 = vsel %vm307_vm7, %v4952_v38, 0.0 }
 0xe98   : > { %v5017_v14 = vadd.f32 %v14837_v55, %v4989_v53  ;;  %v5027_v40 = vadd.f32 %v14838_v35, %v5007_v23  ;;  %v4982_v24 = vmul.f32 %v14830_v22, %v4972_v25  ;;  %v5000_v42 = vmul.f32 %v12640_v17, %v4972_v25 }
 0xe99   : > { %v4983_v21 = vmul.f32 %v14830_v22, %v4973_v20  ;;  %v5001_v59 = vmul.f32 %v12640_v17, %v4973_v20  ;;  %v12868_v43 = vadd.f32 %v14839_v41, %v4892_v47  ;;  %v12871_v5 = vadd.f32 %v14840_v10, %v4910_v50 }
 0xe9a   : > { %5035 = vst.msk [vmem:[%s12873_s8] sm:$0xff] %vm340_vm0, %v5017_v14  ;;  %5434 = vst.msk [vmem:[%s12873_s8 + $0x40] sm:$0xff] %vm340_vm0, %v5027_v40  ;;  %v5052_v31 = vmul.f32 %v5017_v14, %v5017_v14  ;;  %v5060_v56 = vmul.f32 %v5027_v40, %v5027_v40  ;;  %v4990_v6 = vadd.f32 %v4982_v24, %v4922_v9  ;;  %v4954_v32 = vpop.permute.xlu0 %4953  ;;  %v4956_v57 = vpop.permute.xlu1 %4955 }
 0xe9b   : > { %v5008_v3 = vadd.f32 %v5000_v42, %v4940_v16  ;;  %v4991_v62 = vadd.f32 %v4983_v21, %v4923_v33  ;;  %v5009_v34 = vadd.f32 %v5001_v59, %v4941_v1  ;;  %v4974_v37 = vsel %vm307_vm7, %v4954_v32, 0.0 }
 0xe9c   : > { %v4975_v8 = vsel %vm307_vm7, %v4956_v57, 0.0  ;;  %v5068_v36 = vadd.f32 %v5060_v56, %v5052_v31  ;;  %v5018_v54 = vadd.f32 %v14837_v55, %v4990_v6  ;;  %v4984_v16 = vmul.f32 %v14830_v22, %v4974_v37 }
 0xe9d   : > { %v5028_v9 = vadd.f32 %v14838_v35, %v5008_v3  ;;  %v5019_v2 = vadd.f32 %v14837_v55, %v4991_v62  ;;  %v5029_v33 = vadd.f32 %v14838_v35, %v5009_v34  ;;  %v5002_v1 = vmul.f32 %v12640_v17, %v4974_v37 }
 0xe9e   : > { %v4985_v13 = vmul.f32 %v14830_v22, %v4975_v8  ;;  %v5076_v39 = vsub.f32 0.0, %v5068_v36  ;;  %5036 = vst.msk [vmem:[%s12873_s8 + $0x8] sm:$0xff] %vm340_vm0, %v5018_v54  ;;  %v5053_v29 = vmul.f32 %v5018_v54, %v5018_v54  ;;  %v4992_v45 = vadd.f32 %v4984_v16, %v4924_v61  ;;  %v4958_v11 = vpop.permute.xlu0 %4957  ;;  %v4960_v23 = vpop.permute.xlu1 %4959 }
 0xe9f   : > { %5435 = vst.msk [vmem:[%s12873_s8 + $0x48] sm:$0xff] %vm340_vm0, %v5028_v9  ;;  %v5061_v30 = vmul.f32 %v5028_v9, %v5028_v9  ;;  %5037 = vst.msk [vmem:[%s12873_s8 + $0x10] sm:$0xff] %vm340_vm0, %v5019_v2  ;;  %v5054_v26 = vmul.f32 %v5019_v2, %v5019_v2  ;;  %v5062_v28 = vmul.f32 %v5029_v33, %v5029_v33  ;;  %v4976_v53 = vsel %vm307_vm7, %v4958_v11, 0.0 }
 0xea0   : > { %5436 = vst.msk [vmem:[%s12873_s8 + $0x50] sm:$0xff] %vm340_vm0, %v5029_v33  ;;  %v5010_v46 = vadd.f32 %v5002_v1, %v12830_v60  ;;  %v4993_v58 = vadd.f32 %v4985_v13, %v4925_v63  ;;  %v5084_v15 = vmul.f32 1.442695, %v5076_v39  ;;  %v5020_v52 = vadd.f32 %v14837_v55, %v4992_v45 }
 0xea1   : > { %v5069_v44 = vadd.f32 %v5061_v30, %v5053_v29  ;;  %v5003_v48 = vmul.f32 %v12640_v17, %v4975_v8  ;;  %v5070_v61 = vadd.f32 %v5062_v28, %v5054_v26  ;;  %v4986_v4 = vmul.f32 %v14830_v22, %v4976_v53 }
 0xea2   : > { %v5030_v47 = vadd.f32 %v14838_v35, %v5010_v46  ;;  %v5021_v50 = vadd.f32 %v14837_v55, %v4993_v58  ;;  %5661 = vpow2.f32 %v5084_v15  ;;  %5038 = vst.msk [vmem:[%s12873_s8 + $0x18] sm:$0xff] %vm340_vm0, %v5020_v52  ;;  %v5055_v63 = vmul.f32 %v5020_v52, %v5020_v52  ;;  %v4962_v41 = vpop.permute.xlu0 %4961 }
 0xea3   : > { %v5077_v60 = vsub.f32 0.0, %v5069_v44  ;;  %v5011_v18 = vadd.f32 %v5003_v48, %v12843_v51  ;;  %v5078_v38 = vsub.f32 0.0, %v5070_v61  ;;  %v5004_v40 = vmul.f32 %v12640_v17, %v4976_v53 }
 0xea4   : > { %5437 = vst.msk [vmem:[%s12873_s8 + $0x58] sm:$0xff] %vm340_vm0, %v5030_v47  ;;  %v5063_v25 = vmul.f32 %v5030_v47, %v5030_v47  ;;  %5039 = vst.msk [vmem:[%s12873_s8 + $0x20] sm:$0xff] %vm340_vm0, %v5021_v50  ;;  %v5056_v20 = vmul.f32 %v5021_v50, %v5021_v50  ;;  %v4977_v24 = vsel %vm307_vm7, %v4960_v23, 0.0  ;;  %v4994_v21 = vadd.f32 %v4986_v4, %v12846_v12 }
 0xea5   : > { %v5086_v49 = vmul.f32 1.442695, %v5077_v60  ;;  %v5031_v14 = vadd.f32 %v14838_v35, %v5011_v18  ;;  %v5088_v51 = vmul.f32 1.442695, %v5078_v38  ;;  %v4987_v59 = vmul.f32 %v14830_v22, %v4977_v24 }
 0xea6   : > { %v5071_v42 = vadd.f32 %v5063_v25, %v5055_v63  ;;  %v5012_v31 = vadd.f32 %v5004_v40, %v12849_v19  ;;  %v5005_v56 = vmul.f32 %v12640_v17, %v4977_v24  ;;  %v5022_v3 = vadd.f32 %v14837_v55, %v4994_v21 }
 0xea7   : > { %5663 = vpow2.f32 %v5086_v49  ;;  %5438 = vst.msk [vmem:[%s12873_s8 + $0x60] sm:$0xff] %vm340_vm0, %v5031_v14  ;;  %v5064_v10 = vmul.f32 %v5031_v14, %v5031_v14  ;;  %v4995_v12 = vadd.f32 %v4987_v59, %v12856_v7  ;;  %v4978_v19 = vsel %vm307_vm7, %v4962_v41, 0.0 }
 0xea8   : > { %5665 = vpow2.f32 %v5088_v51  ;;  %v5079_v6 = vsub.f32 0.0, %v5071_v42  ;;  %v5032_v57 = vadd.f32 %v14838_v35, %v5012_v31  ;;  %v5013_v62 = vadd.f32 %v5005_v56, %v12859_v27  ;;  %5040 = vst.msk [vmem:[%s12873_s8 + $0x28] sm:$0xff] %vm340_vm0, %v5022_v3 }
 0xea9   : > { %v5072_v32 = vadd.f32 %v5064_v10, %v5056_v20  ;;  %v5057_v37 = vmul.f32 %v5022_v3, %v5022_v3  ;;  %v5023_v8 = vadd.f32 %v14837_v55, %v4995_v12  ;;  %v4988_v36 = vmul.f32 %v14830_v22, %v4978_v19 }
 0xeaa   : > { %v5090_v34 = vmul.f32 1.442695, %v5079_v6  ;;  %5439 = vst.msk [vmem:[%s12873_s8 + $0x68] sm:$0xff] %vm340_vm0, %v5032_v57  ;;  %v5065_v54 = vmul.f32 %v5032_v57, %v5032_v57  ;;  %v5033_v9 = vadd.f32 %v14838_v35, %v5013_v62  ;;  %v5006_v27 = vmul.f32 %v12640_v17, %v4978_v19 }
 0xeab   : > { %v5080_v7 = vsub.f32 0.0, %v5072_v32  ;;  %5041 = vst.msk [vmem:[%s12873_s8 + $0x30] sm:$0xff] %vm340_vm0, %v5023_v8  ;;  %v5058_v0 = vmul.f32 %v5023_v8, %v5023_v8  ;;  %v4996_v16 = vadd.f32 %v4988_v36, %v12868_v43 }
 0xeac   : > { %5667 = vpow2.f32 %v5090_v34  ;;  %v5662_v2 = vpop.eup %5661  ;;  %v5073_v33 = vadd.f32 %v5065_v54, %v5057_v37  ;;  %5440 = vst.msk [vmem:[%s12873_s8 + $0x70] sm:$0xff] %vm340_vm0, %v5033_v9  ;;  %v5066_v1 = vmul.f32 %v5033_v9, %v5033_v9  ;;  %v5014_v13 = vadd.f32 %v5006_v27, %v12871_v5 }
 0xead   : > { %v5092_v22 = vmul.f32 1.442695, %v5080_v7  ;;  %5100 = vst.msk [vmem:[%s12948_s13] sm:$0xff] %vm340_vm0, %v5662_v2  ;;  %v5024_v17 = vadd.f32 %v14837_v55, %v4996_v16 }
 0xeae   : > { %v5081_v43 = vsub.f32 0.0, %v5073_v33  ;;  %v5074_v5 = vadd.f32 %v5066_v1, %v5058_v0  ;;  %v5034_v39 = vadd.f32 %v14838_v35, %v5014_v13 }
 0xeaf   : > { %5669 = vpow2.f32 %v5092_v22  ;;  %5042 = vst.msk [vmem:[%s12873_s8 + $0x38] sm:$0xff] %vm340_vm0, %v5024_v17  ;;  %v5059_v29 = vmul.f32 %v5024_v17, %v5024_v17 }
 0xeb0   : > { %v5094_v30 = vmul.f32 1.442695, %v5081_v43  ;;  %v5082_v45 = vsub.f32 0.0, %v5074_v5  ;;  %5441 = vst.msk [vmem:[%s12873_s8 + $0x78] sm:$0xff] %vm340_vm0, %v5034_v39  ;;  %v5067_v11 = vmul.f32 %v5034_v39, %v5034_v39 }
 0xeb1   : > { %v5664_v55 = vpop.eup %5663 }
 0xeb2   : > { %v5666_v26 = vpop.eup %5665  ;;  %5101 = vst.msk [vmem:[%s12948_s13 + $0x8] sm:$0xff] %vm340_vm0, %v5664_v55 }
 0xeb3   : > { %5763 = shalt.err (!%p5760_p11)
}
 0xeb4   : > { %s5764_s5 = scalar_lea.hbm %s12956_s12, 2048  ;;  %s5768_s6 = scalar_lea.hbm %s13063_s3, 4096 }
 0xeb5   : > { %p5765_p7 = scmp.ne.s32.totalorder %s12956_s12, %s5764_s5  ;;  %p5769_p1 = scmp.lt.u32.totalorder %s12956_s12, %s13063_s3 }
 0xeb6   : > { %p5770_p12 = scmp.lt.u32.totalorder %s5768_s6, %s5764_s5  ;;  %p5772_p13 = scmp.lt.u32.totalorder %s5764_s5, %s12956_s12 }
 0xeb7   : > { %p5766_p2 = pnand %p5765_p7, %p14841_p5 }
 0xeb8   : > { %p5771_p3 = por %p5770_p12, %p5769_p1 }
 0xeb9   : > { %p5767_p4 = pneg %p5766_p2 }
 0xeba   : > { %p5773_p0 = por %p5772_p13, %p5771_p3 }
 0xebc   : > { %p5774_p8 = pnand %p5773_p0, %p5767_p4 }
 0xebe   : > { %5777 = shalt.err (!%p5774_p8)
}
 0xebf   : > { %s5867_s11 = smov 128   ;;  %s5868_s26 = smov 8   ;;  %5102 = vst.msk [vmem:[%s12948_s13 + $0x10] sm:$0xff] %vm340_vm0, %v5666_v26  ;;  %5671 = vpow2.f32 %v5094_v30  ;;  %v5096_v35 = vmul.f32 1.442695, %v5082_v45  ;;  %v5075_v28 = vadd.f32 %v5067_v11, %v5059_v29  ;;  %v5668_v58 = vpop.eup %5667 }
 0xec0   : > { %5595 = dma.vmem_to_hbm [thread:$0]  (%p14841_p5), %s12958_s29, 2048, %s12956_s12, %s5109_s14, %s5867_s11, %s5867_s11, %s5868_s26   ;;  %v5670_v44 = vpop.eup %5669 }
 0xec1   : > { %5673 = vpow2.f32 %v5096_v35  ;;  %v5083_v46 = vsub.f32 0.0, %v5075_v28  ;;  %5103 = vst.msk [vmem:[%s12948_s13 + $0x18] sm:$0xff] %vm340_vm0, %v5668_v58  ;;  %5104 = vst.msk [vmem:[%s12948_s13 + $0x20] sm:$0xff] %vm340_vm0, %v5670_v44  ;;  %s5451_s29 = sshll.u32 %s5916_s19, 10  ;;  %s5143_s22 = sshll.u32 %s12948_s13, 4  ;;  %s13011_s22 = int_to_ptr.vmem [resolvable:$true] %s5143_s22 }
 0xec2   : > { %s13009_s20 = scalar_lea.hbm %s13064_s4, %s5451_s29  ;;  %s5114_s23 = scalar_lea.sflag [#allocation11], %s6077_s0 }
 0xec3   : > { %v5098_v15 = vmul.f32 1.442695, %v5083_v46  ;;  %s5778_s7 = scalar_lea.vmem %s13011_s22, 1024  ;;  %s5869_s19 = smov [#allocation10]  }
 0xec4   : > { %p5779_p9 = scmp.ne.s32.totalorder %s13011_s22, %s5778_s7  ;;  %s5782_s25 = sshll.u32 %s5869_s19, 4  ;;  %s5783_s25 = int_to_ptr.vmem [resolvable:$false] %s5782_s25 }
 0xec5   : > { %5675 = vpow2.f32 %v5098_v15  ;;  %s5784_s5 = scalar_lea.vmem %s5783_s25, 2048  ;;  %p5785_p11 = scmp.lt.s32.totalorder %s13011_s22, %s5783_s25 }
 0xec6   : > { %p5780_p10 = pnand %p5779_p9, %p14841_p5  ;;  %p5786_p7 = scmp.lt.s32.totalorder %s5784_s5, %s5778_s7 }
 0xec8   : > { %p5781_p6 = pneg %p5780_p10  ;;  %p5787_p2 = por %p5786_p7, %p5785_p11 }
 0xec9   : > { %v5672_v52 = vpop.eup %5671 }
 0xeca   : > { %5105 = vst.msk [vmem:[%s12948_s13 + $0x28] sm:$0xff] %vm340_vm0, %v5672_v52  ;;  %p5788_p4 = pnand %p5787_p2, %p5781_p6 }
 0xecb   : > { %v5674_v48 = vpop.eup %5673 }
 0xecc   : > { %5106 = vst.msk [vmem:[%s12948_s13 + $0x30] sm:$0xff] %vm340_vm0, %v5674_v48 }
 0xecf   : > { %v5676_v61 = vpop.eup %5675 }
 0xed0   : > { %5107 = vst.msk [vmem:[%s12948_s13 + $0x38] sm:$0xff] %vm340_vm0, %v5676_v61 }
 0xed1   : > { %5791 = shalt.err (!%p5788_p4)
}
 0xed2   : > { %s5792_s13 = scalar_lea.hbm %s13009_s20, 1024  ;;  %s5796_s6 = scalar_lea.hbm %s13064_s4, 2048 }
 0xed3   : > { %p5793_p1 = scmp.ne.s32.totalorder %s13009_s20, %s5792_s13  ;;  %p5797_p13 = scmp.lt.u32.totalorder %s13009_s20, %s13064_s4 }
 0xed4   : > { %p5798_p0 = scmp.lt.u32.totalorder %s5796_s6, %s5792_s13  ;;  %p5800_p9 = scmp.lt.u32.totalorder %s5792_s13, %s13009_s20 }
 0xed5   : > { %p5794_p12 = pnand %p5793_p1, %p14841_p5 }
 0xed6   : > { %p5799_p8 = por %p5798_p0, %p5797_p13 }
 0xed7   : > { %p5795_p3 = pneg %p5794_p12 }
 0xed8   : > { %p5801_p10 = por %p5800_p9, %p5799_p8 }
 0xeda   : > { %p5802_p6 = pnand %p5801_p10, %p5795_p3 }
 0xedc   : > { %5805 = shalt.err (!%p5802_p6)
}
 0xedd   : > { %5596 = dma.vmem_to_hbm [thread:$0]  (%p14841_p5), %s13011_s22, 1024, %s13009_s20, %s5114_s23, %s5867_s11, %s5867_s11, %s5868_s26  }
 0xede PF: > { %s5158_s29 = sand.u32 1, %s5844_s15   ;;  %p14842_p11 = scmp.ne.s32.totalorder %s13424_s28, 0 }
 0xedf   : > { %p14843_p7 = scmp.ge.s32.totalorder %s5856_s18, 2  ;;  %s5159_s12 = scalar_lea.sflag [#allocation4], %s5158_s29 }
 0xee1   : > { %p5611_p2 = pnand %p14843_p7, %p14842_p11 }
 0xee3   : > { %5835 = dma.done.wait (!%p5611_p2), %s5159_s12, 2048  }
 0xee4   : > { %5837 = vsyncadd (!%p5611_p2), %s5159_s12, 4294965248  ;;  %s5168_s27 = scalar_lea.sflag [#allocation11], %s5158_s29 }
 0xee5   : > { %5839 = dma.done.wait (!%p5611_p2), %s5168_s27, 1024  }
 0xee6   : > { %5841 = vsyncadd (!%p5611_p2), %s5168_s27, 4294966272  ;;  %p25_p5 = scmp.ge.s32.totalorder %s5920_s21, 4   ;;  %s14844_s15 = smov %s5848_s16 }
 0xee7   : > { %s14845_s16 = smov %s5852_s17  ;;  %s14846_s17 = smov %s5932_s24 }
 0xee8   : > { %s14847_s18 = smov %s5920_s21  ;;  %27 = sbr.rel (!%p25_p5) target bundleno = 12 (0xc), region = 117 }
 0xeef   :  { %5173 = vsyncpa [#allocation3], 1 }
 0xef0   :  { %5175 = vsyncpa [#allocation3 + $0x1], 1 }
 0xef1   :  { %5176 = vsyncpa [#allocation8], 1 }
 0xef2   :  { %5178 = vsyncpa [#allocation8 + $0x1], 1 }
 0xef3   :  { %5179 = vsyncpa [#allocation4], 1 }
 0xef4   :  { %5181 = vsyncpa [#allocation4 + $0x1], 1 }
 0xef5   :  { %5182 = vsyncpa [#allocation11], 1 }
 0xef6   :  { %5184 = vsyncpa [#allocation11 + $0x1], 1 }
 0xef7   :  { %5185 = vsyncpa [#allocation5], 1 }
 0xef8   :  { %5187 = vsyncpa [#allocation5 + $0x1], 1 }

</bundles_post_ra>
